<compile_context>
chip_gen: v5e
topology: v5e:2x2
jax: 0.10.0
libtpu: 0.0.40
codegen_flags: <defaults>
</compile_context>

<pallas_src>
import math
from functools import partial

import jax
import jax.numpy as jnp
from jax import lax
from jax.experimental import pallas as pl
from jax.experimental.pallas import tpu as pltpu


# ----------------------------- in-kernel math helpers -----------------------------

def _leaky(x, slope):
    return jnp.where(x >= 0, x, slope * x)


def _sigmoid(x):
    return 1.0 / (1.0 + jnp.exp(-x))


def _atan(x):
    # Cephes single-precision arctan (range-reduced polynomial); only ops with
    # guaranteed Mosaic lowering (abs/where/mul/add/div).
    sgn = jnp.where(x < 0, jnp.float32(-1.0), jnp.float32(1.0))
    ax = jnp.abs(x)
    t3p8 = jnp.float32(2.414213562373095)   # tan(3*pi/8)
    tp8 = jnp.float32(0.4142135623730951)   # tan(pi/8)
    big = ax > t3p8
    mid = jnp.logical_and(ax > tp8, jnp.logical_not(big))
    safe = jnp.where(ax > 0, ax, jnp.float32(1.0))
    xr = jnp.where(big, -1.0 / safe,
                   jnp.where(mid, (ax - 1.0) / (ax + 1.0), ax))
    y0 = jnp.where(big, jnp.float32(math.pi / 2),
                   jnp.where(mid, jnp.float32(math.pi / 4), jnp.float32(0.0)))
    z = xr * xr
    p = ((((8.05374449538e-2 * z - 1.38776856032e-1) * z
           + 1.99777106478e-1) * z - 3.33329491539e-1) * z) * xr + xr
    return sgn * (y0 + p)


def _conv3x3(pairs, bias, W, mask_l, mask_r):
    """Direct 3x3 same-conv on lane-flattened, H-padded images held in registers.

    pairs:  list of (x, w_ref); x is (Cin_i, P) f32 with zero pad rows,
            w_ref is a (9, Cout, Cin_i) VMEM ref (tap-major weights).
    bias:   (Cout, 1) f32 array.
    Returns (Cout, P) f32 (pad rows are NOT re-zeroed here).
    """
    x0, w0 = pairs[0]
    P = x0.shape[-1]
    cout = w0.shape[1]
    acc = jnp.zeros((cout, P), jnp.float32) + bias
    for dy in range(3):
        for dx in range(3):
            s = (dy - 1) * W + (dx - 1)      # flattened spatial offset of this tap
            k = dy * 3 + dx
            for x, w_ref in pairs:
                xt = x if s == 0 else pltpu.roll(x, (-s) % P, axis=1)
                if dx == 0:                  # tap reads column x-1: invalid at col 0
                    xt = xt * mask_l
                elif dx == 2:                # tap reads column x+1: invalid at col W-1
                    xt = xt * mask_r
                acc = acc + jnp.dot(w_ref[k], xt,
                                    preferred_element_type=jnp.float32)
    return acc


# ----------------------------- the fused Pallas kernel -----------------------------

def _couple_kernel(W, hw, half, split1, clamp, rev,
                   x_ref, c_ref, m_ref,
                   w_pre, b_pre, w_id, b_id, w_c1, b_c1, g_ref, bt_ref,
                   w_c2, b_c2, w_att, b_att,
                   s1_w1x, s1_w1c, s1_b1, s1_w2, s1_b2,
                   s2_w1x, s2_w1c, s2_b1, s2_w2, s2_b2,
                   y_ref):
    """Entire CoupleLayer forward for one image: (x, c) -> y."""
    m = m_ref[...]
    mask_l, mask_r, valid = m[0:1], m[1:2], m[2:3]
    conv = partial(_conv3x3, W=W, mask_l=mask_l, mask_r=mask_r)
    inv_hw = jnp.float32(1.0 / hw)

    # ---------------- conditioning branch: c -> c_att ----------------
    c = c_ref[0]                                                       # (4, P)

    # shadowpre: Conv2d(4 -> C2, 3x3) + LeakyReLU(0.2)
    cs = _leaky(conv([(c, w_pre)], b_pre[...]), 0.2) * valid

    # UNetConvBlock: identity (1x1), conv_1 + HIN + LeakyReLU(0.1),
    #                conv_2 + LeakyReLU(0.1) + identity residual.
    idn = jnp.dot(w_id[...], cs, preferred_element_type=jnp.float32) + b_id[...]
    o1 = conv([(cs, w_c1)], b_c1[...]) * valid
    # Half-instance-norm: per-channel stats over the H*W real pixels (pad rows are
    # zero and excluded by dividing by hw, not P).
    mu = jnp.sum(o1, axis=1, keepdims=True) * inv_hw
    var = jnp.sum(o1 * o1, axis=1, keepdims=True) * inv_hw - mu * mu
    xn = (o1 - mu) * lax.rsqrt(var + 1e-5) * g_ref[...] + bt_ref[...]
    ch = lax.broadcasted_iota(jnp.int32, o1.shape, 0)
    o1 = _leaky(jnp.where(ch < half, xn, o1), 0.1) * valid
    proc = (_leaky(conv([(o1, w_c2)], b_c2[...]), 0.1) + idn) * valid

    # Attention: 3x3 conv + sigmoid  ->  c_att (lives in VMEM/registers only)
    c_att = _sigmoid(conv([(proc, w_att)], b_att[...])) * valid

    # ---------------- subnets + affine coupling ----------------
    def subnet(xin, w1x, w1c, b1, w2, b2):
        # conv([xin, c_att]) via split-weight accumulation, LeakyReLU(0.1), conv.
        h = _leaky(conv([(xin, w1x), (c_att, w1c)], b1[...]), 0.1) * valid
        return conv([(h, w2)], b2[...])

    def log_e(s):
        return jnp.float32(clamp * 0.636) * _atan(s * jnp.float32(1.0 / clamp))

    x = x_ref[0]
    split2 = x.shape[0] - split1
    x1, x2 = x[:split1], x[split1:]

    if not rev:
        r2 = subnet(x2, s2_w1x, s2_w1c, s2_b1, s2_w2, s2_b2)
        s2v, t2 = r2[:split1], r2[split1:]
        y1 = (jnp.exp(log_e(s2v)) * x1 + t2) * valid
        r1 = subnet(y1, s1_w1x, s1_w1c, s1_b1, s1_w2, s1_b2)
        s1v, t1 = r1[:split2], r1[split2:]
        y2 = (jnp.exp(log_e(s1v)) * x2 + t1) * valid
    else:
        r1 = subnet(x1, s1_w1x, s1_w1c, s1_b1, s1_w2, s1_b2)
        s1v, t1 = r1[:split2], r1[split2:]
        y2 = ((x2 - t1) * jnp.exp(-log_e(s1v))) * valid     # division-free rev
        r2 = subnet(y2, s2_w1x, s2_w1c, s2_b1, s2_w2, s2_b2)
        s2v, t2 = r2[:split1], r2[split1:]
        y1 = ((x1 - t2) * jnp.exp(-log_e(s2v))) * valid

    y_ref[0, :split1, :] = y1
    y_ref[0, split1:, :] = y2


# ----------------------------- Pallas wrapper -----------------------------

def _wmat3(w_hwio):
    # (3, 3, Cin, Cout) -> (9, Cout, Cin), tap index = dy*3 + dx
    kh, kw, cin, cout = w_hwio.shape
    return jnp.transpose(w_hwio, (0, 1, 3, 2)).reshape(kh * kw, cout, cin)


def _bcol(b):
    return b.reshape(-1, 1).astype(jnp.float32)


def _bcast_spec(shape):
    nd = len(shape)
    return pl.BlockSpec(shape, lambda b: (0,) * nd)


def _batch_spec(shape):
    return pl.BlockSpec(shape, lambda b: (b, 0, 0))


def _couple_call(params, x_int, c_int, masks, W, hw, channels, clamp, rev):
    B, C, P = x_int.shape
    cc = c_int.shape[1]
    split1 = channels // 2
    split2 = channels - split1
    ch2 = channels // 2
    half = ch2 // 2

    g = jnp.concatenate([params["hin_g"].astype(jnp.float32),
                         jnp.ones((ch2 - half,), jnp.float32)]).reshape(ch2, 1)
    bt = jnp.concatenate([params["hin_b"].astype(jnp.float32),
                          jnp.zeros((ch2 - half,), jnp.float32)]).reshape(ch2, 1)

    s1w1, s2w1 = params["s1"]["w1"], params["s2"]["w1"]
    args = [
        x_int, c_int, masks,
        # conditioning branch weights
        _wmat3(params["pre_w"]), _bcol(params["pre_b"]),
        jnp.transpose(params["id_w"][0, 0], (1, 0)), _bcol(params["id_b"]),
        _wmat3(params["c1_w"]), _bcol(params["c1_b"]),
        g, bt,
        _wmat3(params["c2_w"]), _bcol(params["c2_b"]),
        _wmat3(params["att_w"]), _bcol(params["att_b"]),
        # subnet s1 (input = [y1/x1 (split1), c_att (ch2)])
        _wmat3(s1w1[:, :, :split1, :]), _wmat3(s1w1[:, :, split1:, :]),
        _bcol(params["s1"]["b1"]), _wmat3(params["s1"]["w2"]), _bcol(params["s1"]["b2"]),
        # subnet s2 (input = [x2/y2 (split2), c_att (ch2)])
        _wmat3(s2w1[:, :, :split2, :]), _wmat3(s2w1[:, :, split2:, :]),
        _bcol(params["s2"]["b1"]), _wmat3(params["s2"]["w2"]), _bcol(params["s2"]["b2"]),
    ]
    in_specs = ([_batch_spec((1, C, P)), _batch_spec((1, cc, P))]
                + [_bcast_spec(a.shape) for a in args[2:]])

    return pl.pallas_call(
        partial(_couple_kernel, W, hw, half, split1, float(clamp), bool(rev)),
        out_shape=jax.ShapeDtypeStruct((B, C, P), jnp.float32),
        grid=(B,),
        in_specs=in_specs,
        out_specs=_batch_spec((1, C, P)),
        compiler_params=pltpu.CompilerParams(dimension_semantics=("parallel",)),
    )(*args)


# ----------------------------- layout glue (plain JAX) -----------------------------

def _padded_rows(H, W):
    # Smallest Hp >= H+2 with Hp*W % 128 == 0 -> lane-dense, 128-aligned blocks.
    m = 128 // math.gcd(W, 128)
    return ((H + 2 + m - 1) // m) * m


def _to_internal(a_nchw, Hp):
    B, C, H, W = a_nchw.shape
    ap = jnp.pad(a_nchw.astype(jnp.float32),
                 ((0, 0), (0, 0), (1, Hp - H - 1), (0, 0)))
    return ap.reshape(B, C, Hp * W)


def _from_internal(a_int, H, W):
    B, C, P = a_int.shape
    return a_int.reshape(B, C, P // W, W)[:, :, 1:H + 1, :]


def _make_masks(H, W, Hp):
    P = Hp * W
    pos = jnp.arange(P, dtype=jnp.int32)
    col = pos % W
    mask_l = (col != 0).astype(jnp.float32)          # for taps reading column x-1
    mask_r = (col != W - 1).astype(jnp.float32)      # for taps reading column x+1
    valid = jnp.logical_and(pos >= W, pos < (H + 1) * W).astype(jnp.float32)
    return jnp.stack([mask_l, mask_r, valid], axis=0)   # (3, P)


# ----------------------------- parameters -----------------------------

def _conv_params(key, kh, kw, cin, cout):
    kw_, kb = jax.random.split(key)
    scale = 1.0 / math.sqrt(kh * kw * cin)
    w = jax.random.normal(kw_, (kh, kw, cin, cout), jnp.float32) * scale
    b = jax.random.normal(kb, (cout,), jnp.float32) * 0.01
    return w, b


def _subnet_params(key, cin, cout):
    k1, k2 = jax.random.split(key)
    w1, b1 = _conv_params(k1, 3, 3, cin, cin)
    w2, b2 = _conv_params(k2, 3, 3, cin, cout)
    return {"w1": w1, "b1": b1, "w2": w2, "b2": b2}


def init_couple_layer(key, channels, condition_length):
    split1 = channels // 2
    split2 = channels - split1
    ch2 = channels // 2
    assert condition_length == ch2, "condition_length must equal channels//2 (c_star width)"
    keys = jax.random.split(key, 7)
    p = {}
    p["pre_w"], p["pre_b"] = _conv_params(keys[0], 3, 3, 4, ch2)      # shadowpre
    p["id_w"], p["id_b"] = _conv_params(keys[1], 1, 1, ch2, ch2)      # UNetConvBlock.identity
    p["c1_w"], p["c1_b"] = _conv_params(keys[2], 3, 3, ch2, ch2)      # conv_1
    p["c2_w"], p["c2_b"] = _conv_params(keys[3], 3, 3, ch2, ch2)      # conv_2
    p["hin_g"] = jnp.ones((ch2 // 2,), jnp.float32)                   # InstanceNorm2d affine
    p["hin_b"] = jnp.zeros((ch2 // 2,), jnp.float32)
    p["att_w"], p["att_b"] = _conv_params(keys[4], 3, 3, ch2, ch2)    # Attention conv
    p["s1"] = _subnet_params(keys[5], split1 + condition_length, split2 * 2)
    p["s2"] = _subnet_params(keys[6], split2 + condition_length, split1 * 2)
    return p


# ----------------------------- forward -----------------------------

def couple_layer_forward(params, x_nchw, c_nchw, *, channels, clamp=5.0, rev=False):
    B, _, H, W = x_nchw.shape
    Hp = _padded_rows(H, W)
    x_int = _to_internal(x_nchw, Hp)       # (B, C, Hp*W), NCHW-like, lane-dense
    c_int = _to_internal(c_nchw, Hp)
    masks = _make_masks(H, W, Hp)

    # The entire forward (shadowpre + ShadowProcess + both subnets + coupling)
    # runs as a single fused kernel; only x, c are read and only y is written.
    y_int = _couple_call(params, x_int, c_int, masks, W, H * W, channels, clamp, rev)
    return _from_internal(y_int, H, W)     # NCHW out


# ----------------------------- demo -----------------------------

if __name__ == "__main__":
    channels = 8
    condition_length = channels // 2   # must equal c_star channel width
    B, H, W = 2, 16, 16
    clamp = 5.0

    key = jax.random.PRNGKey(0)
    kx, kc, kp = jax.random.split(key, 3)
    x = jax.random.normal(kx, (B, channels, H, W), jnp.float32)   # NCHW, like PyTorch
    c = jax.random.normal(kc, (B, 4, H, W), jnp.float32)          # 4-channel condition

    params = init_couple_layer(kp, channels, condition_length)

    fwd = jax.jit(partial(couple_layer_forward, channels=channels, clamp=clamp, rev=False))
    out = fwd(params, x, c)
    jax.block_until_ready(out)
    assert out.shape == (B, channels, H, W)
    assert out.dtype == jnp.float32
    print("KERNEL_OK")
</pallas_src>

<mosaic_0001>
module attributes {stable_mosaic.version = 11 : i64} {
  func.func @_couple_kernel(%arg0: i32, %arg1: memref<1x8x384xf32, #tpu.memory_space<vmem>>, %arg2: memref<1x4x384xf32, #tpu.memory_space<vmem>>, %arg3: memref<3x384xf32, #tpu.memory_space<vmem>>, %arg4: memref<9x4x4xf32, #tpu.memory_space<vmem>>, %arg5: memref<4x1xf32, #tpu.memory_space<vmem>>, %arg6: memref<4x4xf32, #tpu.memory_space<vmem>>, %arg7: memref<4x1xf32, #tpu.memory_space<vmem>>, %arg8: memref<9x4x4xf32, #tpu.memory_space<vmem>>, %arg9: memref<4x1xf32, #tpu.memory_space<vmem>>, %arg10: memref<4x1xf32, #tpu.memory_space<vmem>>, %arg11: memref<4x1xf32, #tpu.memory_space<vmem>>, %arg12: memref<9x4x4xf32, #tpu.memory_space<vmem>>, %arg13: memref<4x1xf32, #tpu.memory_space<vmem>>, %arg14: memref<9x4x4xf32, #tpu.memory_space<vmem>>, %arg15: memref<4x1xf32, #tpu.memory_space<vmem>>, %arg16: memref<9x8x4xf32, #tpu.memory_space<vmem>>, %arg17: memref<9x8x4xf32, #tpu.memory_space<vmem>>, %arg18: memref<8x1xf32, #tpu.memory_space<vmem>>, %arg19: memref<9x8x8xf32, #tpu.memory_space<vmem>>, %arg20: memref<8x1xf32, #tpu.memory_space<vmem>>, %arg21: memref<9x8x4xf32, #tpu.memory_space<vmem>>, %arg22: memref<9x8x4xf32, #tpu.memory_space<vmem>>, %arg23: memref<8x1xf32, #tpu.memory_space<vmem>>, %arg24: memref<9x8x8xf32, #tpu.memory_space<vmem>>, %arg25: memref<8x1xf32, #tpu.memory_space<vmem>>, %arg26: memref<1x8x384xf32, #tpu.memory_space<vmem>>) attributes {dimension_semantics = [#tpu.dimension_semantics<parallel>], iteration_bounds = array<i64: 2>, scalar_prefetch = 0 : i64, scratch_operands = 0 : i64, tpu.core_type = #tpu.core_type<tc>, window_params = [{transform_indices = @transform_0, window_bounds = array<i64: 1, 8, 384>}, {transform_indices = @transform_1, window_bounds = array<i64: 1, 4, 384>}, {pipeline_mode = #tpu.pipeline_mode<synchronous>, transform_indices = @transform_2, window_bounds = array<i64: 3, 384>}, {pipeline_mode = #tpu.pipeline_mode<synchronous>, transform_indices = @transform_3, window_bounds = array<i64: 9, 4, 4>}, {pipeline_mode = #tpu.pipeline_mode<synchronous>, transform_indices = @transform_4, window_bounds = array<i64: 4, 1>}, {pipeline_mode = #tpu.pipeline_mode<synchronous>, transform_indices = @transform_5, window_bounds = array<i64: 4, 4>}, {pipeline_mode = #tpu.pipeline_mode<synchronous>, transform_indices = @transform_6, window_bounds = array<i64: 4, 1>}, {pipeline_mode = #tpu.pipeline_mode<synchronous>, transform_indices = @transform_7, window_bounds = array<i64: 9, 4, 4>}, {pipeline_mode = #tpu.pipeline_mode<synchronous>, transform_indices = @transform_8, window_bounds = array<i64: 4, 1>}, {pipeline_mode = #tpu.pipeline_mode<synchronous>, transform_indices = @transform_9, window_bounds = array<i64: 4, 1>}, {pipeline_mode = #tpu.pipeline_mode<synchronous>, transform_indices = @transform_10, window_bounds = array<i64: 4, 1>}, {pipeline_mode = #tpu.pipeline_mode<synchronous>, transform_indices = @transform_11, window_bounds = array<i64: 9, 4, 4>}, {pipeline_mode = #tpu.pipeline_mode<synchronous>, transform_indices = @transform_12, window_bounds = array<i64: 4, 1>}, {pipeline_mode = #tpu.pipeline_mode<synchronous>, transform_indices = @transform_13, window_bounds = array<i64: 9, 4, 4>}, {pipeline_mode = #tpu.pipeline_mode<synchronous>, transform_indices = @transform_14, window_bounds = array<i64: 4, 1>}, {pipeline_mode = #tpu.pipeline_mode<synchronous>, transform_indices = @transform_15, window_bounds = array<i64: 9, 8, 4>}, {pipeline_mode = #tpu.pipeline_mode<synchronous>, transform_indices = @transform_16, window_bounds = array<i64: 9, 8, 4>}, {pipeline_mode = #tpu.pipeline_mode<synchronous>, transform_indices = @transform_17, window_bounds = array<i64: 8, 1>}, {pipeline_mode = #tpu.pipeline_mode<synchronous>, transform_indices = @transform_18, window_bounds = array<i64: 9, 8, 8>}, {pipeline_mode = #tpu.pipeline_mode<synchronous>, transform_indices = @transform_19, window_bounds = array<i64: 8, 1>}, {pipeline_mode = #tpu.pipeline_mode<synchronous>, transform_indices = @transform_20, window_bounds = array<i64: 9, 8, 4>}, {pipeline_mode = #tpu.pipeline_mode<synchronous>, transform_indices = @transform_21, window_bounds = array<i64: 9, 8, 4>}, {pipeline_mode = #tpu.pipeline_mode<synchronous>, transform_indices = @transform_22, window_bounds = array<i64: 8, 1>}, {pipeline_mode = #tpu.pipeline_mode<synchronous>, transform_indices = @transform_23, window_bounds = array<i64: 9, 8, 8>}, {pipeline_mode = #tpu.pipeline_mode<synchronous>, transform_indices = @transform_24, window_bounds = array<i64: 8, 1>}, {transform_indices = @transform_25, window_bounds = array<i64: 1, 8, 384>}]} {
    %c0 = arith.constant 0 : index
    %c0_0 = arith.constant 0 : index
    %0 = vector.load %arg3[%c0, %c0_0] : memref<3x384xf32, #tpu.memory_space<vmem>>, vector<3x384xf32>
    %1 = vector.extract_strided_slice %0 {offsets = [0, 0], sizes = [1, 384], strides = [1, 1]} : vector<3x384xf32> to vector<1x384xf32>
    %2 = vector.extract_strided_slice %0 {offsets = [1, 0], sizes = [1, 384], strides = [1, 1]} : vector<3x384xf32> to vector<1x384xf32>
    %3 = vector.extract_strided_slice %0 {offsets = [2, 0], sizes = [1, 384], strides = [1, 1]} : vector<3x384xf32> to vector<1x384xf32>
    %c0_1 = arith.constant 0 : index
    %c0_2 = arith.constant 0 : index
    %c0_3 = arith.constant 0 : index
    %4 = vector.load %arg2[%c0_1, %c0_2, %c0_3] : memref<1x4x384xf32, #tpu.memory_space<vmem>>, vector<1x4x384xf32>
    %5 = vector.shape_cast %4 : vector<1x4x384xf32> to vector<4x384xf32>
    %c0_4 = arith.constant 0 : index
    %c0_5 = arith.constant 0 : index
    %6 = vector.load %arg5[%c0_4, %c0_5] : memref<4x1xf32, #tpu.memory_space<vmem>>, vector<4x1xf32>
    %cst = arith.constant 0.000000e+00 : f32
    %7 = vector.broadcast %cst : f32 to vector<4x384xf32>
    %8 = vector.broadcast %6 : vector<4x1xf32> to vector<4x384xf32>
    %9 = arith.addf %7, %8 : vector<4x384xf32>
    %c17_i32 = arith.constant 17 : i32
    %10 = tpu.dynamic_rotate %5 by %c17_i32 dim 1 : vector<4x384xf32>, i32 -> vector<4x384xf32>
    %11 = vector.broadcast %1 : vector<1x384xf32> to vector<4x384xf32>
    %12 = arith.mulf %10, %11 : vector<4x384xf32>
    %c0_6 = arith.constant 0 : index
    %c0_7 = arith.constant 0 : index
    %c0_8 = arith.constant 0 : index
    %13 = vector.load %arg4[%c0_6, %c0_7, %c0_8] : memref<9x4x4xf32, #tpu.memory_space<vmem>>, vector<1x4x4xf32>
    %14 = vector.shape_cast %13 : vector<1x4x4xf32> to vector<4x4xf32>
    %cst_9 = arith.constant dense<0.000000e+00> : vector<4x384xf32>
    %15 = tpu.matmul %14, %12, %cst_9 {dimension_numbers = #tpu.dot_dimension_numbers<[1], [0], [0], [1], [0, 0, 1, 1], [], []>} : vector<4x4xf32>, vector<4x384xf32>, vector<4x384xf32> -> vector<4x384xf32>
    %16 = arith.addf %9, %15 : vector<4x384xf32>
    %c16_i32 = arith.constant 16 : i32
    %17 = tpu.dynamic_rotate %5 by %c16_i32 dim 1 : vector<4x384xf32>, i32 -> vector<4x384xf32>
    %c1 = arith.constant 1 : index
    %c0_10 = arith.constant 0 : index
    %c0_11 = arith.constant 0 : index
    %18 = vector.load %arg4[%c1, %c0_10, %c0_11] : memref<9x4x4xf32, #tpu.memory_space<vmem>>, vector<1x4x4xf32>
    %19 = vector.shape_cast %18 : vector<1x4x4xf32> to vector<4x4xf32>
    %cst_12 = arith.constant dense<0.000000e+00> : vector<4x384xf32>
    %20 = tpu.matmul %19, %17, %cst_12 {dimension_numbers = #tpu.dot_dimension_numbers<[1], [0], [0], [1], [0, 0, 1, 1], [], []>} : vector<4x4xf32>, vector<4x384xf32>, vector<4x384xf32> -> vector<4x384xf32>
    %21 = arith.addf %16, %20 : vector<4x384xf32>
    %c15_i32 = arith.constant 15 : i32
    %22 = tpu.dynamic_rotate %5 by %c15_i32 dim 1 : vector<4x384xf32>, i32 -> vector<4x384xf32>
    %23 = vector.broadcast %2 : vector<1x384xf32> to vector<4x384xf32>
    %24 = arith.mulf %22, %23 : vector<4x384xf32>
    %c2 = arith.constant 2 : index
    %c0_13 = arith.constant 0 : index
    %c0_14 = arith.constant 0 : index
    %25 = vector.load %arg4[%c2, %c0_13, %c0_14] : memref<9x4x4xf32, #tpu.memory_space<vmem>>, vector<1x4x4xf32>
    %26 = vector.shape_cast %25 : vector<1x4x4xf32> to vector<4x4xf32>
    %cst_15 = arith.constant dense<0.000000e+00> : vector<4x384xf32>
    %27 = tpu.matmul %26, %24, %cst_15 {dimension_numbers = #tpu.dot_dimension_numbers<[1], [0], [0], [1], [0, 0, 1, 1], [], []>} : vector<4x4xf32>, vector<4x384xf32>, vector<4x384xf32> -> vector<4x384xf32>
    %28 = arith.addf %21, %27 : vector<4x384xf32>
    %c1_i32 = arith.constant 1 : i32
    %29 = tpu.dynamic_rotate %5 by %c1_i32 dim 1 : vector<4x384xf32>, i32 -> vector<4x384xf32>
    %30 = vector.broadcast %1 : vector<1x384xf32> to vector<4x384xf32>
    %31 = arith.mulf %29, %30 : vector<4x384xf32>
    %c3 = arith.constant 3 : index
    %c0_16 = arith.constant 0 : index
    %c0_17 = arith.constant 0 : index
    %32 = vector.load %arg4[%c3, %c0_16, %c0_17] : memref<9x4x4xf32, #tpu.memory_space<vmem>>, vector<1x4x4xf32>
    %33 = vector.shape_cast %32 : vector<1x4x4xf32> to vector<4x4xf32>
    %cst_18 = arith.constant dense<0.000000e+00> : vector<4x384xf32>
    %34 = tpu.matmul %33, %31, %cst_18 {dimension_numbers = #tpu.dot_dimension_numbers<[1], [0], [0], [1], [0, 0, 1, 1], [], []>} : vector<4x4xf32>, vector<4x384xf32>, vector<4x384xf32> -> vector<4x384xf32>
    %35 = arith.addf %28, %34 : vector<4x384xf32>
    %c4 = arith.constant 4 : index
    %c0_19 = arith.constant 0 : index
    %c0_20 = arith.constant 0 : index
    %36 = vector.load %arg4[%c4, %c0_19, %c0_20] : memref<9x4x4xf32, #tpu.memory_space<vmem>>, vector<1x4x4xf32>
    %37 = vector.shape_cast %36 : vector<1x4x4xf32> to vector<4x4xf32>
    %cst_21 = arith.constant dense<0.000000e+00> : vector<4x384xf32>
    %38 = tpu.matmul %37, %5, %cst_21 {dimension_numbers = #tpu.dot_dimension_numbers<[1], [0], [0], [1], [0, 0, 1, 1], [], []>} : vector<4x4xf32>, vector<4x384xf32>, vector<4x384xf32> -> vector<4x384xf32>
    %39 = arith.addf %35, %38 : vector<4x384xf32>
    %c383_i32 = arith.constant 383 : i32
    %40 = tpu.dynamic_rotate %5 by %c383_i32 dim 1 : vector<4x384xf32>, i32 -> vector<4x384xf32>
    %41 = vector.broadcast %2 : vector<1x384xf32> to vector<4x384xf32>
    %42 = arith.mulf %40, %41 : vector<4x384xf32>
    %c5 = arith.constant 5 : index
    %c0_22 = arith.constant 0 : index
    %c0_23 = arith.constant 0 : index
    %43 = vector.load %arg4[%c5, %c0_22, %c0_23] : memref<9x4x4xf32, #tpu.memory_space<vmem>>, vector<1x4x4xf32>
    %44 = vector.shape_cast %43 : vector<1x4x4xf32> to vector<4x4xf32>
    %cst_24 = arith.constant dense<0.000000e+00> : vector<4x384xf32>
    %45 = tpu.matmul %44, %42, %cst_24 {dimension_numbers = #tpu.dot_dimension_numbers<[1], [0], [0], [1], [0, 0, 1, 1], [], []>} : vector<4x4xf32>, vector<4x384xf32>, vector<4x384xf32> -> vector<4x384xf32>
    %46 = arith.addf %39, %45 : vector<4x384xf32>
    %c369_i32 = arith.constant 369 : i32
    %47 = tpu.dynamic_rotate %5 by %c369_i32 dim 1 : vector<4x384xf32>, i32 -> vector<4x384xf32>
    %48 = vector.broadcast %1 : vector<1x384xf32> to vector<4x384xf32>
    %49 = arith.mulf %47, %48 : vector<4x384xf32>
    %c6 = arith.constant 6 : index
    %c0_25 = arith.constant 0 : index
    %c0_26 = arith.constant 0 : index
    %50 = vector.load %arg4[%c6, %c0_25, %c0_26] : memref<9x4x4xf32, #tpu.memory_space<vmem>>, vector<1x4x4xf32>
    %51 = vector.shape_cast %50 : vector<1x4x4xf32> to vector<4x4xf32>
    %cst_27 = arith.constant dense<0.000000e+00> : vector<4x384xf32>
    %52 = tpu.matmul %51, %49, %cst_27 {dimension_numbers = #tpu.dot_dimension_numbers<[1], [0], [0], [1], [0, 0, 1, 1], [], []>} : vector<4x4xf32>, vector<4x384xf32>, vector<4x384xf32> -> vector<4x384xf32>
    %53 = arith.addf %46, %52 : vector<4x384xf32>
    %c368_i32 = arith.constant 368 : i32
    %54 = tpu.dynamic_rotate %5 by %c368_i32 dim 1 : vector<4x384xf32>, i32 -> vector<4x384xf32>
    %c7 = arith.constant 7 : index
    %c0_28 = arith.constant 0 : index
    %c0_29 = arith.constant 0 : index
    %55 = vector.load %arg4[%c7, %c0_28, %c0_29] : memref<9x4x4xf32, #tpu.memory_space<vmem>>, vector<1x4x4xf32>
    %56 = vector.shape_cast %55 : vector<1x4x4xf32> to vector<4x4xf32>
    %cst_30 = arith.constant dense<0.000000e+00> : vector<4x384xf32>
    %57 = tpu.matmul %56, %54, %cst_30 {dimension_numbers = #tpu.dot_dimension_numbers<[1], [0], [0], [1], [0, 0, 1, 1], [], []>} : vector<4x4xf32>, vector<4x384xf32>, vector<4x384xf32> -> vector<4x384xf32>
    %58 = arith.addf %53, %57 : vector<4x384xf32>
    %c367_i32 = arith.constant 367 : i32
    %59 = tpu.dynamic_rotate %5 by %c367_i32 dim 1 : vector<4x384xf32>, i32 -> vector<4x384xf32>
    %60 = vector.broadcast %2 : vector<1x384xf32> to vector<4x384xf32>
    %61 = arith.mulf %59, %60 : vector<4x384xf32>
    %c8 = arith.constant 8 : index
    %c0_31 = arith.constant 0 : index
    %c0_32 = arith.constant 0 : index
    %62 = vector.load %arg4[%c8, %c0_31, %c0_32] : memref<9x4x4xf32, #tpu.memory_space<vmem>>, vector<1x4x4xf32>
    %63 = vector.shape_cast %62 : vector<1x4x4xf32> to vector<4x4xf32>
    %cst_33 = arith.constant dense<0.000000e+00> : vector<4x384xf32>
    %64 = tpu.matmul %63, %61, %cst_33 {dimension_numbers = #tpu.dot_dimension_numbers<[1], [0], [0], [1], [0, 0, 1, 1], [], []>} : vector<4x4xf32>, vector<4x384xf32>, vector<4x384xf32> -> vector<4x384xf32>
    %65 = arith.addf %58, %64 : vector<4x384xf32>
    %cst_34 = arith.constant 0.000000e+00 : f32
    %66 = vector.broadcast %cst_34 : f32 to vector<4x384xf32>
    %67 = arith.cmpf oge, %65, %66 : vector<4x384xf32>
    %cst_35 = arith.constant 2.000000e-01 : f32
    %68 = vector.broadcast %cst_35 : f32 to vector<4x384xf32>
    %69 = arith.mulf %68, %65 : vector<4x384xf32>
    %70 = arith.select %67, %65, %69 : vector<4x384xi1>, vector<4x384xf32>
    %71 = vector.broadcast %3 : vector<1x384xf32> to vector<4x384xf32>
    %72 = arith.mulf %70, %71 : vector<4x384xf32>
    %c0_36 = arith.constant 0 : index
    %c0_37 = arith.constant 0 : index
    %73 = vector.load %arg6[%c0_36, %c0_37] : memref<4x4xf32, #tpu.memory_space<vmem>>, vector<4x4xf32>
    %cst_38 = arith.constant dense<0.000000e+00> : vector<4x384xf32>
    %74 = tpu.matmul %73, %72, %cst_38 {dimension_numbers = #tpu.dot_dimension_numbers<[1], [0], [0], [1], [0, 0, 1, 1], [], []>} : vector<4x4xf32>, vector<4x384xf32>, vector<4x384xf32> -> vector<4x384xf32>
    %c0_39 = arith.constant 0 : index
    %c0_40 = arith.constant 0 : index
    %75 = vector.load %arg7[%c0_39, %c0_40] : memref<4x1xf32, #tpu.memory_space<vmem>>, vector<4x1xf32>
    %76 = vector.broadcast %75 : vector<4x1xf32> to vector<4x384xf32>
    %77 = arith.addf %74, %76 : vector<4x384xf32>
    %c0_41 = arith.constant 0 : index
    %c0_42 = arith.constant 0 : index
    %78 = vector.load %arg9[%c0_41, %c0_42] : memref<4x1xf32, #tpu.memory_space<vmem>>, vector<4x1xf32>
    %cst_43 = arith.constant 0.000000e+00 : f32
    %79 = vector.broadcast %cst_43 : f32 to vector<4x384xf32>
    %80 = vector.broadcast %78 : vector<4x1xf32> to vector<4x384xf32>
    %81 = arith.addf %79, %80 : vector<4x384xf32>
    %c17_i32_44 = arith.constant 17 : i32
    %82 = tpu.dynamic_rotate %72 by %c17_i32_44 dim 1 : vector<4x384xf32>, i32 -> vector<4x384xf32>
    %83 = vector.broadcast %1 : vector<1x384xf32> to vector<4x384xf32>
    %84 = arith.mulf %82, %83 : vector<4x384xf32>
    %c0_45 = arith.constant 0 : index
    %c0_46 = arith.constant 0 : index
    %c0_47 = arith.constant 0 : index
    %85 = vector.load %arg8[%c0_45, %c0_46, %c0_47] : memref<9x4x4xf32, #tpu.memory_space<vmem>>, vector<1x4x4xf32>
    %86 = vector.shape_cast %85 : vector<1x4x4xf32> to vector<4x4xf32>
    %cst_48 = arith.constant dense<0.000000e+00> : vector<4x384xf32>
    %87 = tpu.matmul %86, %84, %cst_48 {dimension_numbers = #tpu.dot_dimension_numbers<[1], [0], [0], [1], [0, 0, 1, 1], [], []>} : vector<4x4xf32>, vector<4x384xf32>, vector<4x384xf32> -> vector<4x384xf32>
    %88 = arith.addf %81, %87 : vector<4x384xf32>
    %c16_i32_49 = arith.constant 16 : i32
    %89 = tpu.dynamic_rotate %72 by %c16_i32_49 dim 1 : vector<4x384xf32>, i32 -> vector<4x384xf32>
    %c1_50 = arith.constant 1 : index
    %c0_51 = arith.constant 0 : index
    %c0_52 = arith.constant 0 : index
    %90 = vector.load %arg8[%c1_50, %c0_51, %c0_52] : memref<9x4x4xf32, #tpu.memory_space<vmem>>, vector<1x4x4xf32>
    %91 = vector.shape_cast %90 : vector<1x4x4xf32> to vector<4x4xf32>
    %cst_53 = arith.constant dense<0.000000e+00> : vector<4x384xf32>
    %92 = tpu.matmul %91, %89, %cst_53 {dimension_numbers = #tpu.dot_dimension_numbers<[1], [0], [0], [1], [0, 0, 1, 1], [], []>} : vector<4x4xf32>, vector<4x384xf32>, vector<4x384xf32> -> vector<4x384xf32>
    %93 = arith.addf %88, %92 : vector<4x384xf32>
    %c15_i32_54 = arith.constant 15 : i32
    %94 = tpu.dynamic_rotate %72 by %c15_i32_54 dim 1 : vector<4x384xf32>, i32 -> vector<4x384xf32>
    %95 = vector.broadcast %2 : vector<1x384xf32> to vector<4x384xf32>
    %96 = arith.mulf %94, %95 : vector<4x384xf32>
    %c2_55 = arith.constant 2 : index
    %c0_56 = arith.constant 0 : index
    %c0_57 = arith.constant 0 : index
    %97 = vector.load %arg8[%c2_55, %c0_56, %c0_57] : memref<9x4x4xf32, #tpu.memory_space<vmem>>, vector<1x4x4xf32>
    %98 = vector.shape_cast %97 : vector<1x4x4xf32> to vector<4x4xf32>
    %cst_58 = arith.constant dense<0.000000e+00> : vector<4x384xf32>
    %99 = tpu.matmul %98, %96, %cst_58 {dimension_numbers = #tpu.dot_dimension_numbers<[1], [0], [0], [1], [0, 0, 1, 1], [], []>} : vector<4x4xf32>, vector<4x384xf32>, vector<4x384xf32> -> vector<4x384xf32>
    %100 = arith.addf %93, %99 : vector<4x384xf32>
    %c1_i32_59 = arith.constant 1 : i32
    %101 = tpu.dynamic_rotate %72 by %c1_i32_59 dim 1 : vector<4x384xf32>, i32 -> vector<4x384xf32>
    %102 = vector.broadcast %1 : vector<1x384xf32> to vector<4x384xf32>
    %103 = arith.mulf %101, %102 : vector<4x384xf32>
    %c3_60 = arith.constant 3 : index
    %c0_61 = arith.constant 0 : index
    %c0_62 = arith.constant 0 : index
    %104 = vector.load %arg8[%c3_60, %c0_61, %c0_62] : memref<9x4x4xf32, #tpu.memory_space<vmem>>, vector<1x4x4xf32>
    %105 = vector.shape_cast %104 : vector<1x4x4xf32> to vector<4x4xf32>
    %cst_63 = arith.constant dense<0.000000e+00> : vector<4x384xf32>
    %106 = tpu.matmul %105, %103, %cst_63 {dimension_numbers = #tpu.dot_dimension_numbers<[1], [0], [0], [1], [0, 0, 1, 1], [], []>} : vector<4x4xf32>, vector<4x384xf32>, vector<4x384xf32> -> vector<4x384xf32>
    %107 = arith.addf %100, %106 : vector<4x384xf32>
    %c4_64 = arith.constant 4 : index
    %c0_65 = arith.constant 0 : index
    %c0_66 = arith.constant 0 : index
    %108 = vector.load %arg8[%c4_64, %c0_65, %c0_66] : memref<9x4x4xf32, #tpu.memory_space<vmem>>, vector<1x4x4xf32>
    %109 = vector.shape_cast %108 : vector<1x4x4xf32> to vector<4x4xf32>
    %cst_67 = arith.constant dense<0.000000e+00> : vector<4x384xf32>
    %110 = tpu.matmul %109, %72, %cst_67 {dimension_numbers = #tpu.dot_dimension_numbers<[1], [0], [0], [1], [0, 0, 1, 1], [], []>} : vector<4x4xf32>, vector<4x384xf32>, vector<4x384xf32> -> vector<4x384xf32>
    %111 = arith.addf %107, %110 : vector<4x384xf32>
    %c383_i32_68 = arith.constant 383 : i32
    %112 = tpu.dynamic_rotate %72 by %c383_i32_68 dim 1 : vector<4x384xf32>, i32 -> vector<4x384xf32>
    %113 = vector.broadcast %2 : vector<1x384xf32> to vector<4x384xf32>
    %114 = arith.mulf %112, %113 : vector<4x384xf32>
    %c5_69 = arith.constant 5 : index
    %c0_70 = arith.constant 0 : index
    %c0_71 = arith.constant 0 : index
    %115 = vector.load %arg8[%c5_69, %c0_70, %c0_71] : memref<9x4x4xf32, #tpu.memory_space<vmem>>, vector<1x4x4xf32>
    %116 = vector.shape_cast %115 : vector<1x4x4xf32> to vector<4x4xf32>
    %cst_72 = arith.constant dense<0.000000e+00> : vector<4x384xf32>
    %117 = tpu.matmul %116, %114, %cst_72 {dimension_numbers = #tpu.dot_dimension_numbers<[1], [0], [0], [1], [0, 0, 1, 1], [], []>} : vector<4x4xf32>, vector<4x384xf32>, vector<4x384xf32> -> vector<4x384xf32>
    %118 = arith.addf %111, %117 : vector<4x384xf32>
    %c369_i32_73 = arith.constant 369 : i32
    %119 = tpu.dynamic_rotate %72 by %c369_i32_73 dim 1 : vector<4x384xf32>, i32 -> vector<4x384xf32>
    %120 = vector.broadcast %1 : vector<1x384xf32> to vector<4x384xf32>
    %121 = arith.mulf %119, %120 : vector<4x384xf32>
    %c6_74 = arith.constant 6 : index
    %c0_75 = arith.constant 0 : index
    %c0_76 = arith.constant 0 : index
    %122 = vector.load %arg8[%c6_74, %c0_75, %c0_76] : memref<9x4x4xf32, #tpu.memory_space<vmem>>, vector<1x4x4xf32>
    %123 = vector.shape_cast %122 : vector<1x4x4xf32> to vector<4x4xf32>
    %cst_77 = arith.constant dense<0.000000e+00> : vector<4x384xf32>
    %124 = tpu.matmul %123, %121, %cst_77 {dimension_numbers = #tpu.dot_dimension_numbers<[1], [0], [0], [1], [0, 0, 1, 1], [], []>} : vector<4x4xf32>, vector<4x384xf32>, vector<4x384xf32> -> vector<4x384xf32>
    %125 = arith.addf %118, %124 : vector<4x384xf32>
    %c368_i32_78 = arith.constant 368 : i32
    %126 = tpu.dynamic_rotate %72 by %c368_i32_78 dim 1 : vector<4x384xf32>, i32 -> vector<4x384xf32>
    %c7_79 = arith.constant 7 : index
    %c0_80 = arith.constant 0 : index
    %c0_81 = arith.constant 0 : index
    %127 = vector.load %arg8[%c7_79, %c0_80, %c0_81] : memref<9x4x4xf32, #tpu.memory_space<vmem>>, vector<1x4x4xf32>
    %128 = vector.shape_cast %127 : vector<1x4x4xf32> to vector<4x4xf32>
    %cst_82 = arith.constant dense<0.000000e+00> : vector<4x384xf32>
    %129 = tpu.matmul %128, %126, %cst_82 {dimension_numbers = #tpu.dot_dimension_numbers<[1], [0], [0], [1], [0, 0, 1, 1], [], []>} : vector<4x4xf32>, vector<4x384xf32>, vector<4x384xf32> -> vector<4x384xf32>
    %130 = arith.addf %125, %129 : vector<4x384xf32>
    %c367_i32_83 = arith.constant 367 : i32
    %131 = tpu.dynamic_rotate %72 by %c367_i32_83 dim 1 : vector<4x384xf32>, i32 -> vector<4x384xf32>
    %132 = vector.broadcast %2 : vector<1x384xf32> to vector<4x384xf32>
    %133 = arith.mulf %131, %132 : vector<4x384xf32>
    %c8_84 = arith.constant 8 : index
    %c0_85 = arith.constant 0 : index
    %c0_86 = arith.constant 0 : index
    %134 = vector.load %arg8[%c8_84, %c0_85, %c0_86] : memref<9x4x4xf32, #tpu.memory_space<vmem>>, vector<1x4x4xf32>
    %135 = vector.shape_cast %134 : vector<1x4x4xf32> to vector<4x4xf32>
    %cst_87 = arith.constant dense<0.000000e+00> : vector<4x384xf32>
    %136 = tpu.matmul %135, %133, %cst_87 {dimension_numbers = #tpu.dot_dimension_numbers<[1], [0], [0], [1], [0, 0, 1, 1], [], []>} : vector<4x4xf32>, vector<4x384xf32>, vector<4x384xf32> -> vector<4x384xf32>
    %137 = arith.addf %130, %136 : vector<4x384xf32>
    %138 = vector.broadcast %3 : vector<1x384xf32> to vector<4x384xf32>
    %139 = arith.mulf %137, %138 : vector<4x384xf32>
    %cst_88 = arith.constant dense<0.000000e+00> : vector<4xf32>
    %140 = vector.multi_reduction <add>, %139, %cst_88 [1] : vector<4x384xf32> to vector<4xf32>
    %141 = vector.shape_cast %140 : vector<4xf32> to vector<4x1xf32>
    %cst_89 = arith.constant 3.906250e-03 : f32
    %142 = vector.broadcast %cst_89 : f32 to vector<4x1xf32>
    %143 = arith.mulf %141, %142 : vector<4x1xf32>
    %144 = arith.mulf %139, %139 : vector<4x384xf32>
    %cst_90 = arith.constant dense<0.000000e+00> : vector<4xf32>
    %145 = vector.multi_reduction <add>, %144, %cst_90 [1] : vector<4x384xf32> to vector<4xf32>
    %146 = vector.shape_cast %145 : vector<4xf32> to vector<4x1xf32>
    %cst_91 = arith.constant 3.906250e-03 : f32
    %147 = vector.broadcast %cst_91 : f32 to vector<4x1xf32>
    %148 = arith.mulf %146, %147 : vector<4x1xf32>
    %149 = arith.mulf %143, %143 : vector<4x1xf32>
    %150 = arith.subf %148, %149 : vector<4x1xf32>
    %151 = vector.broadcast %143 : vector<4x1xf32> to vector<4x384xf32>
    %152 = arith.subf %139, %151 : vector<4x384xf32>
    %cst_92 = arith.constant 9.99999974E-6 : f32
    %153 = vector.broadcast %cst_92 : f32 to vector<4x1xf32>
    %154 = arith.addf %150, %153 : vector<4x1xf32>
    %155 = math.rsqrt %154 : vector<4x1xf32>
    %156 = vector.broadcast %155 : vector<4x1xf32> to vector<4x384xf32>
    %157 = arith.mulf %152, %156 : vector<4x384xf32>
    %c0_93 = arith.constant 0 : index
    %c0_94 = arith.constant 0 : index
    %158 = vector.load %arg10[%c0_93, %c0_94] : memref<4x1xf32, #tpu.memory_space<vmem>>, vector<4x1xf32>
    %159 = vector.broadcast %158 : vector<4x1xf32> to vector<4x384xf32>
    %160 = arith.mulf %157, %159 : vector<4x384xf32>
    %c0_95 = arith.constant 0 : index
    %c0_96 = arith.constant 0 : index
    %161 = vector.load %arg11[%c0_95, %c0_96] : memref<4x1xf32, #tpu.memory_space<vmem>>, vector<4x1xf32>
    %162 = vector.broadcast %161 : vector<4x1xf32> to vector<4x384xf32>
    %163 = arith.addf %160, %162 : vector<4x384xf32>
    %164 = tpu.iota {dimensions = array<i32: 0>} : vector<4x384xi32>
    %c2_i32 = arith.constant 2 : i32
    %165 = vector.broadcast %c2_i32 : i32 to vector<4x384xi32>
    %166 = arith.cmpi slt, %164, %165 : vector<4x384xi32>
    %167 = arith.select %166, %163, %139 : vector<4x384xi1>, vector<4x384xf32>
    %cst_97 = arith.constant 0.000000e+00 : f32
    %168 = vector.broadcast %cst_97 : f32 to vector<4x384xf32>
    %169 = arith.cmpf oge, %167, %168 : vector<4x384xf32>
    %cst_98 = arith.constant 1.000000e-01 : f32
    %170 = vector.broadcast %cst_98 : f32 to vector<4x384xf32>
    %171 = arith.mulf %170, %167 : vector<4x384xf32>
    %172 = arith.select %169, %167, %171 : vector<4x384xi1>, vector<4x384xf32>
    %173 = vector.broadcast %3 : vector<1x384xf32> to vector<4x384xf32>
    %174 = arith.mulf %172, %173 : vector<4x384xf32>
    %c0_99 = arith.constant 0 : index
    %c0_100 = arith.constant 0 : index
    %175 = vector.load %arg13[%c0_99, %c0_100] : memref<4x1xf32, #tpu.memory_space<vmem>>, vector<4x1xf32>
    %cst_101 = arith.constant 0.000000e+00 : f32
    %176 = vector.broadcast %cst_101 : f32 to vector<4x384xf32>
    %177 = vector.broadcast %175 : vector<4x1xf32> to vector<4x384xf32>
    %178 = arith.addf %176, %177 : vector<4x384xf32>
    %c17_i32_102 = arith.constant 17 : i32
    %179 = tpu.dynamic_rotate %174 by %c17_i32_102 dim 1 : vector<4x384xf32>, i32 -> vector<4x384xf32>
    %180 = vector.broadcast %1 : vector<1x384xf32> to vector<4x384xf32>
    %181 = arith.mulf %179, %180 : vector<4x384xf32>
    %c0_103 = arith.constant 0 : index
    %c0_104 = arith.constant 0 : index
    %c0_105 = arith.constant 0 : index
    %182 = vector.load %arg12[%c0_103, %c0_104, %c0_105] : memref<9x4x4xf32, #tpu.memory_space<vmem>>, vector<1x4x4xf32>
    %183 = vector.shape_cast %182 : vector<1x4x4xf32> to vector<4x4xf32>
    %cst_106 = arith.constant dense<0.000000e+00> : vector<4x384xf32>
    %184 = tpu.matmul %183, %181, %cst_106 {dimension_numbers = #tpu.dot_dimension_numbers<[1], [0], [0], [1], [0, 0, 1, 1], [], []>} : vector<4x4xf32>, vector<4x384xf32>, vector<4x384xf32> -> vector<4x384xf32>
    %185 = arith.addf %178, %184 : vector<4x384xf32>
    %c16_i32_107 = arith.constant 16 : i32
    %186 = tpu.dynamic_rotate %174 by %c16_i32_107 dim 1 : vector<4x384xf32>, i32 -> vector<4x384xf32>
    %c1_108 = arith.constant 1 : index
    %c0_109 = arith.constant 0 : index
    %c0_110 = arith.constant 0 : index
    %187 = vector.load %arg12[%c1_108, %c0_109, %c0_110] : memref<9x4x4xf32, #tpu.memory_space<vmem>>, vector<1x4x4xf32>
    %188 = vector.shape_cast %187 : vector<1x4x4xf32> to vector<4x4xf32>
    %cst_111 = arith.constant dense<0.000000e+00> : vector<4x384xf32>
    %189 = tpu.matmul %188, %186, %cst_111 {dimension_numbers = #tpu.dot_dimension_numbers<[1], [0], [0], [1], [0, 0, 1, 1], [], []>} : vector<4x4xf32>, vector<4x384xf32>, vector<4x384xf32> -> vector<4x384xf32>
    %190 = arith.addf %185, %189 : vector<4x384xf32>
    %c15_i32_112 = arith.constant 15 : i32
    %191 = tpu.dynamic_rotate %174 by %c15_i32_112 dim 1 : vector<4x384xf32>, i32 -> vector<4x384xf32>
    %192 = vector.broadcast %2 : vector<1x384xf32> to vector<4x384xf32>
    %193 = arith.mulf %191, %192 : vector<4x384xf32>
    %c2_113 = arith.constant 2 : index
    %c0_114 = arith.constant 0 : index
    %c0_115 = arith.constant 0 : index
    %194 = vector.load %arg12[%c2_113, %c0_114, %c0_115] : memref<9x4x4xf32, #tpu.memory_space<vmem>>, vector<1x4x4xf32>
    %195 = vector.shape_cast %194 : vector<1x4x4xf32> to vector<4x4xf32>
    %cst_116 = arith.constant dense<0.000000e+00> : vector<4x384xf32>
    %196 = tpu.matmul %195, %193, %cst_116 {dimension_numbers = #tpu.dot_dimension_numbers<[1], [0], [0], [1], [0, 0, 1, 1], [], []>} : vector<4x4xf32>, vector<4x384xf32>, vector<4x384xf32> -> vector<4x384xf32>
    %197 = arith.addf %190, %196 : vector<4x384xf32>
    %c1_i32_117 = arith.constant 1 : i32
    %198 = tpu.dynamic_rotate %174 by %c1_i32_117 dim 1 : vector<4x384xf32>, i32 -> vector<4x384xf32>
    %199 = vector.broadcast %1 : vector<1x384xf32> to vector<4x384xf32>
    %200 = arith.mulf %198, %199 : vector<4x384xf32>
    %c3_118 = arith.constant 3 : index
    %c0_119 = arith.constant 0 : index
    %c0_120 = arith.constant 0 : index
    %201 = vector.load %arg12[%c3_118, %c0_119, %c0_120] : memref<9x4x4xf32, #tpu.memory_space<vmem>>, vector<1x4x4xf32>
    %202 = vector.shape_cast %201 : vector<1x4x4xf32> to vector<4x4xf32>
    %cst_121 = arith.constant dense<0.000000e+00> : vector<4x384xf32>
    %203 = tpu.matmul %202, %200, %cst_121 {dimension_numbers = #tpu.dot_dimension_numbers<[1], [0], [0], [1], [0, 0, 1, 1], [], []>} : vector<4x4xf32>, vector<4x384xf32>, vector<4x384xf32> -> vector<4x384xf32>
    %204 = arith.addf %197, %203 : vector<4x384xf32>
    %c4_122 = arith.constant 4 : index
    %c0_123 = arith.constant 0 : index
    %c0_124 = arith.constant 0 : index
    %205 = vector.load %arg12[%c4_122, %c0_123, %c0_124] : memref<9x4x4xf32, #tpu.memory_space<vmem>>, vector<1x4x4xf32>
    %206 = vector.shape_cast %205 : vector<1x4x4xf32> to vector<4x4xf32>
    %cst_125 = arith.constant dense<0.000000e+00> : vector<4x384xf32>
    %207 = tpu.matmul %206, %174, %cst_125 {dimension_numbers = #tpu.dot_dimension_numbers<[1], [0], [0], [1], [0, 0, 1, 1], [], []>} : vector<4x4xf32>, vector<4x384xf32>, vector<4x384xf32> -> vector<4x384xf32>
    %208 = arith.addf %204, %207 : vector<4x384xf32>
    %c383_i32_126 = arith.constant 383 : i32
    %209 = tpu.dynamic_rotate %174 by %c383_i32_126 dim 1 : vector<4x384xf32>, i32 -> vector<4x384xf32>
    %210 = vector.broadcast %2 : vector<1x384xf32> to vector<4x384xf32>
    %211 = arith.mulf %209, %210 : vector<4x384xf32>
    %c5_127 = arith.constant 5 : index
    %c0_128 = arith.constant 0 : index
    %c0_129 = arith.constant 0 : index
    %212 = vector.load %arg12[%c5_127, %c0_128, %c0_129] : memref<9x4x4xf32, #tpu.memory_space<vmem>>, vector<1x4x4xf32>
    %213 = vector.shape_cast %212 : vector<1x4x4xf32> to vector<4x4xf32>
    %cst_130 = arith.constant dense<0.000000e+00> : vector<4x384xf32>
    %214 = tpu.matmul %213, %211, %cst_130 {dimension_numbers = #tpu.dot_dimension_numbers<[1], [0], [0], [1], [0, 0, 1, 1], [], []>} : vector<4x4xf32>, vector<4x384xf32>, vector<4x384xf32> -> vector<4x384xf32>
    %215 = arith.addf %208, %214 : vector<4x384xf32>
    %c369_i32_131 = arith.constant 369 : i32
    %216 = tpu.dynamic_rotate %174 by %c369_i32_131 dim 1 : vector<4x384xf32>, i32 -> vector<4x384xf32>
    %217 = vector.broadcast %1 : vector<1x384xf32> to vector<4x384xf32>
    %218 = arith.mulf %216, %217 : vector<4x384xf32>
    %c6_132 = arith.constant 6 : index
    %c0_133 = arith.constant 0 : index
    %c0_134 = arith.constant 0 : index
    %219 = vector.load %arg12[%c6_132, %c0_133, %c0_134] : memref<9x4x4xf32, #tpu.memory_space<vmem>>, vector<1x4x4xf32>
    %220 = vector.shape_cast %219 : vector<1x4x4xf32> to vector<4x4xf32>
    %cst_135 = arith.constant dense<0.000000e+00> : vector<4x384xf32>
    %221 = tpu.matmul %220, %218, %cst_135 {dimension_numbers = #tpu.dot_dimension_numbers<[1], [0], [0], [1], [0, 0, 1, 1], [], []>} : vector<4x4xf32>, vector<4x384xf32>, vector<4x384xf32> -> vector<4x384xf32>
    %222 = arith.addf %215, %221 : vector<4x384xf32>
    %c368_i32_136 = arith.constant 368 : i32
    %223 = tpu.dynamic_rotate %174 by %c368_i32_136 dim 1 : vector<4x384xf32>, i32 -> vector<4x384xf32>
    %c7_137 = arith.constant 7 : index
    %c0_138 = arith.constant 0 : index
    %c0_139 = arith.constant 0 : index
    %224 = vector.load %arg12[%c7_137, %c0_138, %c0_139] : memref<9x4x4xf32, #tpu.memory_space<vmem>>, vector<1x4x4xf32>
    %225 = vector.shape_cast %224 : vector<1x4x4xf32> to vector<4x4xf32>
    %cst_140 = arith.constant dense<0.000000e+00> : vector<4x384xf32>
    %226 = tpu.matmul %225, %223, %cst_140 {dimension_numbers = #tpu.dot_dimension_numbers<[1], [0], [0], [1], [0, 0, 1, 1], [], []>} : vector<4x4xf32>, vector<4x384xf32>, vector<4x384xf32> -> vector<4x384xf32>
    %227 = arith.addf %222, %226 : vector<4x384xf32>
    %c367_i32_141 = arith.constant 367 : i32
    %228 = tpu.dynamic_rotate %174 by %c367_i32_141 dim 1 : vector<4x384xf32>, i32 -> vector<4x384xf32>
    %229 = vector.broadcast %2 : vector<1x384xf32> to vector<4x384xf32>
    %230 = arith.mulf %228, %229 : vector<4x384xf32>
    %c8_142 = arith.constant 8 : index
    %c0_143 = arith.constant 0 : index
    %c0_144 = arith.constant 0 : index
    %231 = vector.load %arg12[%c8_142, %c0_143, %c0_144] : memref<9x4x4xf32, #tpu.memory_space<vmem>>, vector<1x4x4xf32>
    %232 = vector.shape_cast %231 : vector<1x4x4xf32> to vector<4x4xf32>
    %cst_145 = arith.constant dense<0.000000e+00> : vector<4x384xf32>
    %233 = tpu.matmul %232, %230, %cst_145 {dimension_numbers = #tpu.dot_dimension_numbers<[1], [0], [0], [1], [0, 0, 1, 1], [], []>} : vector<4x4xf32>, vector<4x384xf32>, vector<4x384xf32> -> vector<4x384xf32>
    %234 = arith.addf %227, %233 : vector<4x384xf32>
    %cst_146 = arith.constant 0.000000e+00 : f32
    %235 = vector.broadcast %cst_146 : f32 to vector<4x384xf32>
    %236 = arith.cmpf oge, %234, %235 : vector<4x384xf32>
    %cst_147 = arith.constant 1.000000e-01 : f32
    %237 = vector.broadcast %cst_147 : f32 to vector<4x384xf32>
    %238 = arith.mulf %237, %234 : vector<4x384xf32>
    %239 = arith.select %236, %234, %238 : vector<4x384xi1>, vector<4x384xf32>
    %240 = arith.addf %239, %77 : vector<4x384xf32>
    %241 = vector.broadcast %3 : vector<1x384xf32> to vector<4x384xf32>
    %242 = arith.mulf %240, %241 : vector<4x384xf32>
    %c0_148 = arith.constant 0 : index
    %c0_149 = arith.constant 0 : index
    %243 = vector.load %arg15[%c0_148, %c0_149] : memref<4x1xf32, #tpu.memory_space<vmem>>, vector<4x1xf32>
    %cst_150 = arith.constant 0.000000e+00 : f32
    %244 = vector.broadcast %cst_150 : f32 to vector<4x384xf32>
    %245 = vector.broadcast %243 : vector<4x1xf32> to vector<4x384xf32>
    %246 = arith.addf %244, %245 : vector<4x384xf32>
    %c17_i32_151 = arith.constant 17 : i32
    %247 = tpu.dynamic_rotate %242 by %c17_i32_151 dim 1 : vector<4x384xf32>, i32 -> vector<4x384xf32>
    %248 = vector.broadcast %1 : vector<1x384xf32> to vector<4x384xf32>
    %249 = arith.mulf %247, %248 : vector<4x384xf32>
    %c0_152 = arith.constant 0 : index
    %c0_153 = arith.constant 0 : index
    %c0_154 = arith.constant 0 : index
    %250 = vector.load %arg14[%c0_152, %c0_153, %c0_154] : memref<9x4x4xf32, #tpu.memory_space<vmem>>, vector<1x4x4xf32>
    %251 = vector.shape_cast %250 : vector<1x4x4xf32> to vector<4x4xf32>
    %cst_155 = arith.constant dense<0.000000e+00> : vector<4x384xf32>
    %252 = tpu.matmul %251, %249, %cst_155 {dimension_numbers = #tpu.dot_dimension_numbers<[1], [0], [0], [1], [0, 0, 1, 1], [], []>} : vector<4x4xf32>, vector<4x384xf32>, vector<4x384xf32> -> vector<4x384xf32>
    %253 = arith.addf %246, %252 : vector<4x384xf32>
    %c16_i32_156 = arith.constant 16 : i32
    %254 = tpu.dynamic_rotate %242 by %c16_i32_156 dim 1 : vector<4x384xf32>, i32 -> vector<4x384xf32>
    %c1_157 = arith.constant 1 : index
    %c0_158 = arith.constant 0 : index
    %c0_159 = arith.constant 0 : index
    %255 = vector.load %arg14[%c1_157, %c0_158, %c0_159] : memref<9x4x4xf32, #tpu.memory_space<vmem>>, vector<1x4x4xf32>
    %256 = vector.shape_cast %255 : vector<1x4x4xf32> to vector<4x4xf32>
    %cst_160 = arith.constant dense<0.000000e+00> : vector<4x384xf32>
    %257 = tpu.matmul %256, %254, %cst_160 {dimension_numbers = #tpu.dot_dimension_numbers<[1], [0], [0], [1], [0, 0, 1, 1], [], []>} : vector<4x4xf32>, vector<4x384xf32>, vector<4x384xf32> -> vector<4x384xf32>
    %258 = arith.addf %253, %257 : vector<4x384xf32>
    %c15_i32_161 = arith.constant 15 : i32
    %259 = tpu.dynamic_rotate %242 by %c15_i32_161 dim 1 : vector<4x384xf32>, i32 -> vector<4x384xf32>
    %260 = vector.broadcast %2 : vector<1x384xf32> to vector<4x384xf32>
    %261 = arith.mulf %259, %260 : vector<4x384xf32>
    %c2_162 = arith.constant 2 : index
    %c0_163 = arith.constant 0 : index
    %c0_164 = arith.constant 0 : index
    %262 = vector.load %arg14[%c2_162, %c0_163, %c0_164] : memref<9x4x4xf32, #tpu.memory_space<vmem>>, vector<1x4x4xf32>
    %263 = vector.shape_cast %262 : vector<1x4x4xf32> to vector<4x4xf32>
    %cst_165 = arith.constant dense<0.000000e+00> : vector<4x384xf32>
    %264 = tpu.matmul %263, %261, %cst_165 {dimension_numbers = #tpu.dot_dimension_numbers<[1], [0], [0], [1], [0, 0, 1, 1], [], []>} : vector<4x4xf32>, vector<4x384xf32>, vector<4x384xf32> -> vector<4x384xf32>
    %265 = arith.addf %258, %264 : vector<4x384xf32>
    %c1_i32_166 = arith.constant 1 : i32
    %266 = tpu.dynamic_rotate %242 by %c1_i32_166 dim 1 : vector<4x384xf32>, i32 -> vector<4x384xf32>
    %267 = vector.broadcast %1 : vector<1x384xf32> to vector<4x384xf32>
    %268 = arith.mulf %266, %267 : vector<4x384xf32>
    %c3_167 = arith.constant 3 : index
    %c0_168 = arith.constant 0 : index
    %c0_169 = arith.constant 0 : index
    %269 = vector.load %arg14[%c3_167, %c0_168, %c0_169] : memref<9x4x4xf32, #tpu.memory_space<vmem>>, vector<1x4x4xf32>
    %270 = vector.shape_cast %269 : vector<1x4x4xf32> to vector<4x4xf32>
    %cst_170 = arith.constant dense<0.000000e+00> : vector<4x384xf32>
    %271 = tpu.matmul %270, %268, %cst_170 {dimension_numbers = #tpu.dot_dimension_numbers<[1], [0], [0], [1], [0, 0, 1, 1], [], []>} : vector<4x4xf32>, vector<4x384xf32>, vector<4x384xf32> -> vector<4x384xf32>
    %272 = arith.addf %265, %271 : vector<4x384xf32>
    %c4_171 = arith.constant 4 : index
    %c0_172 = arith.constant 0 : index
    %c0_173 = arith.constant 0 : index
    %273 = vector.load %arg14[%c4_171, %c0_172, %c0_173] : memref<9x4x4xf32, #tpu.memory_space<vmem>>, vector<1x4x4xf32>
    %274 = vector.shape_cast %273 : vector<1x4x4xf32> to vector<4x4xf32>
    %cst_174 = arith.constant dense<0.000000e+00> : vector<4x384xf32>
    %275 = tpu.matmul %274, %242, %cst_174 {dimension_numbers = #tpu.dot_dimension_numbers<[1], [0], [0], [1], [0, 0, 1, 1], [], []>} : vector<4x4xf32>, vector<4x384xf32>, vector<4x384xf32> -> vector<4x384xf32>
    %276 = arith.addf %272, %275 : vector<4x384xf32>
    %c383_i32_175 = arith.constant 383 : i32
    %277 = tpu.dynamic_rotate %242 by %c383_i32_175 dim 1 : vector<4x384xf32>, i32 -> vector<4x384xf32>
    %278 = vector.broadcast %2 : vector<1x384xf32> to vector<4x384xf32>
    %279 = arith.mulf %277, %278 : vector<4x384xf32>
    %c5_176 = arith.constant 5 : index
    %c0_177 = arith.constant 0 : index
    %c0_178 = arith.constant 0 : index
    %280 = vector.load %arg14[%c5_176, %c0_177, %c0_178] : memref<9x4x4xf32, #tpu.memory_space<vmem>>, vector<1x4x4xf32>
    %281 = vector.shape_cast %280 : vector<1x4x4xf32> to vector<4x4xf32>
    %cst_179 = arith.constant dense<0.000000e+00> : vector<4x384xf32>
    %282 = tpu.matmul %281, %279, %cst_179 {dimension_numbers = #tpu.dot_dimension_numbers<[1], [0], [0], [1], [0, 0, 1, 1], [], []>} : vector<4x4xf32>, vector<4x384xf32>, vector<4x384xf32> -> vector<4x384xf32>
    %283 = arith.addf %276, %282 : vector<4x384xf32>
    %c369_i32_180 = arith.constant 369 : i32
    %284 = tpu.dynamic_rotate %242 by %c369_i32_180 dim 1 : vector<4x384xf32>, i32 -> vector<4x384xf32>
    %285 = vector.broadcast %1 : vector<1x384xf32> to vector<4x384xf32>
    %286 = arith.mulf %284, %285 : vector<4x384xf32>
    %c6_181 = arith.constant 6 : index
    %c0_182 = arith.constant 0 : index
    %c0_183 = arith.constant 0 : index
    %287 = vector.load %arg14[%c6_181, %c0_182, %c0_183] : memref<9x4x4xf32, #tpu.memory_space<vmem>>, vector<1x4x4xf32>
    %288 = vector.shape_cast %287 : vector<1x4x4xf32> to vector<4x4xf32>
    %cst_184 = arith.constant dense<0.000000e+00> : vector<4x384xf32>
    %289 = tpu.matmul %288, %286, %cst_184 {dimension_numbers = #tpu.dot_dimension_numbers<[1], [0], [0], [1], [0, 0, 1, 1], [], []>} : vector<4x4xf32>, vector<4x384xf32>, vector<4x384xf32> -> vector<4x384xf32>
    %290 = arith.addf %283, %289 : vector<4x384xf32>
    %c368_i32_185 = arith.constant 368 : i32
    %291 = tpu.dynamic_rotate %242 by %c368_i32_185 dim 1 : vector<4x384xf32>, i32 -> vector<4x384xf32>
    %c7_186 = arith.constant 7 : index
    %c0_187 = arith.constant 0 : index
    %c0_188 = arith.constant 0 : index
    %292 = vector.load %arg14[%c7_186, %c0_187, %c0_188] : memref<9x4x4xf32, #tpu.memory_space<vmem>>, vector<1x4x4xf32>
    %293 = vector.shape_cast %292 : vector<1x4x4xf32> to vector<4x4xf32>
    %cst_189 = arith.constant dense<0.000000e+00> : vector<4x384xf32>
    %294 = tpu.matmul %293, %291, %cst_189 {dimension_numbers = #tpu.dot_dimension_numbers<[1], [0], [0], [1], [0, 0, 1, 1], [], []>} : vector<4x4xf32>, vector<4x384xf32>, vector<4x384xf32> -> vector<4x384xf32>
    %295 = arith.addf %290, %294 : vector<4x384xf32>
    %c367_i32_190 = arith.constant 367 : i32
    %296 = tpu.dynamic_rotate %242 by %c367_i32_190 dim 1 : vector<4x384xf32>, i32 -> vector<4x384xf32>
    %297 = vector.broadcast %2 : vector<1x384xf32> to vector<4x384xf32>
    %298 = arith.mulf %296, %297 : vector<4x384xf32>
    %c8_191 = arith.constant 8 : index
    %c0_192 = arith.constant 0 : index
    %c0_193 = arith.constant 0 : index
    %299 = vector.load %arg14[%c8_191, %c0_192, %c0_193] : memref<9x4x4xf32, #tpu.memory_space<vmem>>, vector<1x4x4xf32>
    %300 = vector.shape_cast %299 : vector<1x4x4xf32> to vector<4x4xf32>
    %cst_194 = arith.constant dense<0.000000e+00> : vector<4x384xf32>
    %301 = tpu.matmul %300, %298, %cst_194 {dimension_numbers = #tpu.dot_dimension_numbers<[1], [0], [0], [1], [0, 0, 1, 1], [], []>} : vector<4x4xf32>, vector<4x384xf32>, vector<4x384xf32> -> vector<4x384xf32>
    %302 = arith.addf %295, %301 : vector<4x384xf32>
    %cst_195 = arith.constant 0.000000e+00 : f32
    %303 = vector.broadcast %cst_195 : f32 to vector<4x384xf32>
    %304 = arith.subf %303, %302 : vector<4x384xf32>
    %305 = math.exp %304 : vector<4x384xf32>
    %cst_196 = arith.constant 1.000000e+00 : f32
    %306 = vector.broadcast %cst_196 : f32 to vector<4x384xf32>
    %307 = arith.addf %306, %305 : vector<4x384xf32>
    %cst_197 = arith.constant 1.000000e+00 : f32
    %308 = vector.broadcast %cst_197 : f32 to vector<4x384xf32>
    %309 = arith.divf %308, %307 : vector<4x384xf32>
    %310 = vector.broadcast %3 : vector<1x384xf32> to vector<4x384xf32>
    %311 = arith.mulf %309, %310 : vector<4x384xf32>
    %c0_198 = arith.constant 0 : index
    %c0_199 = arith.constant 0 : index
    %c0_200 = arith.constant 0 : index
    %312 = vector.load %arg1[%c0_198, %c0_199, %c0_200] : memref<1x8x384xf32, #tpu.memory_space<vmem>>, vector<1x8x384xf32>
    %313 = vector.shape_cast %312 : vector<1x8x384xf32> to vector<8x384xf32>
    %314 = vector.extract_strided_slice %313 {offsets = [0, 0], sizes = [4, 384], strides = [1, 1]} : vector<8x384xf32> to vector<4x384xf32>
    %315 = vector.extract_strided_slice %313 {offsets = [4, 0], sizes = [4, 384], strides = [1, 1]} : vector<8x384xf32> to vector<4x384xf32>
    %c0_201 = arith.constant 0 : index
    %c0_202 = arith.constant 0 : index
    %316 = vector.load %arg23[%c0_201, %c0_202] : memref<8x1xf32, #tpu.memory_space<vmem>>, vector<8x1xf32>
    %cst_203 = arith.constant 0.000000e+00 : f32
    %317 = vector.broadcast %cst_203 : f32 to vector<8x384xf32>
    %318 = vector.broadcast %316 : vector<8x1xf32> to vector<8x384xf32>
    %319 = arith.addf %317, %318 : vector<8x384xf32>
    %c17_i32_204 = arith.constant 17 : i32
    %320 = tpu.dynamic_rotate %315 by %c17_i32_204 dim 1 : vector<4x384xf32>, i32 -> vector<4x384xf32>
    %321 = vector.broadcast %1 : vector<1x384xf32> to vector<4x384xf32>
    %322 = arith.mulf %320, %321 : vector<4x384xf32>
    %c0_205 = arith.constant 0 : index
    %c0_206 = arith.constant 0 : index
    %c0_207 = arith.constant 0 : index
    %323 = vector.load %arg21[%c0_205, %c0_206, %c0_207] : memref<9x8x4xf32, #tpu.memory_space<vmem>>, vector<1x8x4xf32>
    %324 = vector.shape_cast %323 : vector<1x8x4xf32> to vector<8x4xf32>
    %cst_208 = arith.constant dense<0.000000e+00> : vector<8x384xf32>
    %325 = tpu.matmul %324, %322, %cst_208 {dimension_numbers = #tpu.dot_dimension_numbers<[1], [0], [0], [1], [0, 0, 1, 1], [], []>} : vector<8x4xf32>, vector<4x384xf32>, vector<8x384xf32> -> vector<8x384xf32>
    %326 = arith.addf %319, %325 : vector<8x384xf32>
    %c17_i32_209 = arith.constant 17 : i32
    %327 = tpu.dynamic_rotate %311 by %c17_i32_209 dim 1 : vector<4x384xf32>, i32 -> vector<4x384xf32>
    %328 = vector.broadcast %1 : vector<1x384xf32> to vector<4x384xf32>
    %329 = arith.mulf %327, %328 : vector<4x384xf32>
    %c0_210 = arith.constant 0 : index
    %c0_211 = arith.constant 0 : index
    %c0_212 = arith.constant 0 : index
    %330 = vector.load %arg22[%c0_210, %c0_211, %c0_212] : memref<9x8x4xf32, #tpu.memory_space<vmem>>, vector<1x8x4xf32>
    %331 = vector.shape_cast %330 : vector<1x8x4xf32> to vector<8x4xf32>
    %cst_213 = arith.constant dense<0.000000e+00> : vector<8x384xf32>
    %332 = tpu.matmul %331, %329, %cst_213 {dimension_numbers = #tpu.dot_dimension_numbers<[1], [0], [0], [1], [0, 0, 1, 1], [], []>} : vector<8x4xf32>, vector<4x384xf32>, vector<8x384xf32> -> vector<8x384xf32>
    %333 = arith.addf %326, %332 : vector<8x384xf32>
    %c16_i32_214 = arith.constant 16 : i32
    %334 = tpu.dynamic_rotate %315 by %c16_i32_214 dim 1 : vector<4x384xf32>, i32 -> vector<4x384xf32>
    %c1_215 = arith.constant 1 : index
    %c0_216 = arith.constant 0 : index
    %c0_217 = arith.constant 0 : index
    %335 = vector.load %arg21[%c1_215, %c0_216, %c0_217] : memref<9x8x4xf32, #tpu.memory_space<vmem>>, vector<1x8x4xf32>
    %336 = vector.shape_cast %335 : vector<1x8x4xf32> to vector<8x4xf32>
    %cst_218 = arith.constant dense<0.000000e+00> : vector<8x384xf32>
    %337 = tpu.matmul %336, %334, %cst_218 {dimension_numbers = #tpu.dot_dimension_numbers<[1], [0], [0], [1], [0, 0, 1, 1], [], []>} : vector<8x4xf32>, vector<4x384xf32>, vector<8x384xf32> -> vector<8x384xf32>
    %338 = arith.addf %333, %337 : vector<8x384xf32>
    %c16_i32_219 = arith.constant 16 : i32
    %339 = tpu.dynamic_rotate %311 by %c16_i32_219 dim 1 : vector<4x384xf32>, i32 -> vector<4x384xf32>
    %c1_220 = arith.constant 1 : index
    %c0_221 = arith.constant 0 : index
    %c0_222 = arith.constant 0 : index
    %340 = vector.load %arg22[%c1_220, %c0_221, %c0_222] : memref<9x8x4xf32, #tpu.memory_space<vmem>>, vector<1x8x4xf32>
    %341 = vector.shape_cast %340 : vector<1x8x4xf32> to vector<8x4xf32>
    %cst_223 = arith.constant dense<0.000000e+00> : vector<8x384xf32>
    %342 = tpu.matmul %341, %339, %cst_223 {dimension_numbers = #tpu.dot_dimension_numbers<[1], [0], [0], [1], [0, 0, 1, 1], [], []>} : vector<8x4xf32>, vector<4x384xf32>, vector<8x384xf32> -> vector<8x384xf32>
    %343 = arith.addf %338, %342 : vector<8x384xf32>
    %c15_i32_224 = arith.constant 15 : i32
    %344 = tpu.dynamic_rotate %315 by %c15_i32_224 dim 1 : vector<4x384xf32>, i32 -> vector<4x384xf32>
    %345 = vector.broadcast %2 : vector<1x384xf32> to vector<4x384xf32>
    %346 = arith.mulf %344, %345 : vector<4x384xf32>
    %c2_225 = arith.constant 2 : index
    %c0_226 = arith.constant 0 : index
    %c0_227 = arith.constant 0 : index
    %347 = vector.load %arg21[%c2_225, %c0_226, %c0_227] : memref<9x8x4xf32, #tpu.memory_space<vmem>>, vector<1x8x4xf32>
    %348 = vector.shape_cast %347 : vector<1x8x4xf32> to vector<8x4xf32>
    %cst_228 = arith.constant dense<0.000000e+00> : vector<8x384xf32>
    %349 = tpu.matmul %348, %346, %cst_228 {dimension_numbers = #tpu.dot_dimension_numbers<[1], [0], [0], [1], [0, 0, 1, 1], [], []>} : vector<8x4xf32>, vector<4x384xf32>, vector<8x384xf32> -> vector<8x384xf32>
    %350 = arith.addf %343, %349 : vector<8x384xf32>
    %c15_i32_229 = arith.constant 15 : i32
    %351 = tpu.dynamic_rotate %311 by %c15_i32_229 dim 1 : vector<4x384xf32>, i32 -> vector<4x384xf32>
    %352 = vector.broadcast %2 : vector<1x384xf32> to vector<4x384xf32>
    %353 = arith.mulf %351, %352 : vector<4x384xf32>
    %c2_230 = arith.constant 2 : index
    %c0_231 = arith.constant 0 : index
    %c0_232 = arith.constant 0 : index
    %354 = vector.load %arg22[%c2_230, %c0_231, %c0_232] : memref<9x8x4xf32, #tpu.memory_space<vmem>>, vector<1x8x4xf32>
    %355 = vector.shape_cast %354 : vector<1x8x4xf32> to vector<8x4xf32>
    %cst_233 = arith.constant dense<0.000000e+00> : vector<8x384xf32>
    %356 = tpu.matmul %355, %353, %cst_233 {dimension_numbers = #tpu.dot_dimension_numbers<[1], [0], [0], [1], [0, 0, 1, 1], [], []>} : vector<8x4xf32>, vector<4x384xf32>, vector<8x384xf32> -> vector<8x384xf32>
    %357 = arith.addf %350, %356 : vector<8x384xf32>
    %c1_i32_234 = arith.constant 1 : i32
    %358 = tpu.dynamic_rotate %315 by %c1_i32_234 dim 1 : vector<4x384xf32>, i32 -> vector<4x384xf32>
    %359 = vector.broadcast %1 : vector<1x384xf32> to vector<4x384xf32>
    %360 = arith.mulf %358, %359 : vector<4x384xf32>
    %c3_235 = arith.constant 3 : index
    %c0_236 = arith.constant 0 : index
    %c0_237 = arith.constant 0 : index
    %361 = vector.load %arg21[%c3_235, %c0_236, %c0_237] : memref<9x8x4xf32, #tpu.memory_space<vmem>>, vector<1x8x4xf32>
    %362 = vector.shape_cast %361 : vector<1x8x4xf32> to vector<8x4xf32>
    %cst_238 = arith.constant dense<0.000000e+00> : vector<8x384xf32>
    %363 = tpu.matmul %362, %360, %cst_238 {dimension_numbers = #tpu.dot_dimension_numbers<[1], [0], [0], [1], [0, 0, 1, 1], [], []>} : vector<8x4xf32>, vector<4x384xf32>, vector<8x384xf32> -> vector<8x384xf32>
    %364 = arith.addf %357, %363 : vector<8x384xf32>
    %c1_i32_239 = arith.constant 1 : i32
    %365 = tpu.dynamic_rotate %311 by %c1_i32_239 dim 1 : vector<4x384xf32>, i32 -> vector<4x384xf32>
    %366 = vector.broadcast %1 : vector<1x384xf32> to vector<4x384xf32>
    %367 = arith.mulf %365, %366 : vector<4x384xf32>
    %c3_240 = arith.constant 3 : index
    %c0_241 = arith.constant 0 : index
    %c0_242 = arith.constant 0 : index
    %368 = vector.load %arg22[%c3_240, %c0_241, %c0_242] : memref<9x8x4xf32, #tpu.memory_space<vmem>>, vector<1x8x4xf32>
    %369 = vector.shape_cast %368 : vector<1x8x4xf32> to vector<8x4xf32>
    %cst_243 = arith.constant dense<0.000000e+00> : vector<8x384xf32>
    %370 = tpu.matmul %369, %367, %cst_243 {dimension_numbers = #tpu.dot_dimension_numbers<[1], [0], [0], [1], [0, 0, 1, 1], [], []>} : vector<8x4xf32>, vector<4x384xf32>, vector<8x384xf32> -> vector<8x384xf32>
    %371 = arith.addf %364, %370 : vector<8x384xf32>
    %c4_244 = arith.constant 4 : index
    %c0_245 = arith.constant 0 : index
    %c0_246 = arith.constant 0 : index
    %372 = vector.load %arg21[%c4_244, %c0_245, %c0_246] : memref<9x8x4xf32, #tpu.memory_space<vmem>>, vector<1x8x4xf32>
    %373 = vector.shape_cast %372 : vector<1x8x4xf32> to vector<8x4xf32>
    %cst_247 = arith.constant dense<0.000000e+00> : vector<8x384xf32>
    %374 = tpu.matmul %373, %315, %cst_247 {dimension_numbers = #tpu.dot_dimension_numbers<[1], [0], [0], [1], [0, 0, 1, 1], [], []>} : vector<8x4xf32>, vector<4x384xf32>, vector<8x384xf32> -> vector<8x384xf32>
    %375 = arith.addf %371, %374 : vector<8x384xf32>
    %c4_248 = arith.constant 4 : index
    %c0_249 = arith.constant 0 : index
    %c0_250 = arith.constant 0 : index
    %376 = vector.load %arg22[%c4_248, %c0_249, %c0_250] : memref<9x8x4xf32, #tpu.memory_space<vmem>>, vector<1x8x4xf32>
    %377 = vector.shape_cast %376 : vector<1x8x4xf32> to vector<8x4xf32>
    %cst_251 = arith.constant dense<0.000000e+00> : vector<8x384xf32>
    %378 = tpu.matmul %377, %311, %cst_251 {dimension_numbers = #tpu.dot_dimension_numbers<[1], [0], [0], [1], [0, 0, 1, 1], [], []>} : vector<8x4xf32>, vector<4x384xf32>, vector<8x384xf32> -> vector<8x384xf32>
    %379 = arith.addf %375, %378 : vector<8x384xf32>
    %c383_i32_252 = arith.constant 383 : i32
    %380 = tpu.dynamic_rotate %315 by %c383_i32_252 dim 1 : vector<4x384xf32>, i32 -> vector<4x384xf32>
    %381 = vector.broadcast %2 : vector<1x384xf32> to vector<4x384xf32>
    %382 = arith.mulf %380, %381 : vector<4x384xf32>
    %c5_253 = arith.constant 5 : index
    %c0_254 = arith.constant 0 : index
    %c0_255 = arith.constant 0 : index
    %383 = vector.load %arg21[%c5_253, %c0_254, %c0_255] : memref<9x8x4xf32, #tpu.memory_space<vmem>>, vector<1x8x4xf32>
    %384 = vector.shape_cast %383 : vector<1x8x4xf32> to vector<8x4xf32>
    %cst_256 = arith.constant dense<0.000000e+00> : vector<8x384xf32>
    %385 = tpu.matmul %384, %382, %cst_256 {dimension_numbers = #tpu.dot_dimension_numbers<[1], [0], [0], [1], [0, 0, 1, 1], [], []>} : vector<8x4xf32>, vector<4x384xf32>, vector<8x384xf32> -> vector<8x384xf32>
    %386 = arith.addf %379, %385 : vector<8x384xf32>
    %c383_i32_257 = arith.constant 383 : i32
    %387 = tpu.dynamic_rotate %311 by %c383_i32_257 dim 1 : vector<4x384xf32>, i32 -> vector<4x384xf32>
    %388 = vector.broadcast %2 : vector<1x384xf32> to vector<4x384xf32>
    %389 = arith.mulf %387, %388 : vector<4x384xf32>
    %c5_258 = arith.constant 5 : index
    %c0_259 = arith.constant 0 : index
    %c0_260 = arith.constant 0 : index
    %390 = vector.load %arg22[%c5_258, %c0_259, %c0_260] : memref<9x8x4xf32, #tpu.memory_space<vmem>>, vector<1x8x4xf32>
    %391 = vector.shape_cast %390 : vector<1x8x4xf32> to vector<8x4xf32>
    %cst_261 = arith.constant dense<0.000000e+00> : vector<8x384xf32>
    %392 = tpu.matmul %391, %389, %cst_261 {dimension_numbers = #tpu.dot_dimension_numbers<[1], [0], [0], [1], [0, 0, 1, 1], [], []>} : vector<8x4xf32>, vector<4x384xf32>, vector<8x384xf32> -> vector<8x384xf32>
    %393 = arith.addf %386, %392 : vector<8x384xf32>
    %c369_i32_262 = arith.constant 369 : i32
    %394 = tpu.dynamic_rotate %315 by %c369_i32_262 dim 1 : vector<4x384xf32>, i32 -> vector<4x384xf32>
    %395 = vector.broadcast %1 : vector<1x384xf32> to vector<4x384xf32>
    %396 = arith.mulf %394, %395 : vector<4x384xf32>
    %c6_263 = arith.constant 6 : index
    %c0_264 = arith.constant 0 : index
    %c0_265 = arith.constant 0 : index
    %397 = vector.load %arg21[%c6_263, %c0_264, %c0_265] : memref<9x8x4xf32, #tpu.memory_space<vmem>>, vector<1x8x4xf32>
    %398 = vector.shape_cast %397 : vector<1x8x4xf32> to vector<8x4xf32>
    %cst_266 = arith.constant dense<0.000000e+00> : vector<8x384xf32>
    %399 = tpu.matmul %398, %396, %cst_266 {dimension_numbers = #tpu.dot_dimension_numbers<[1], [0], [0], [1], [0, 0, 1, 1], [], []>} : vector<8x4xf32>, vector<4x384xf32>, vector<8x384xf32> -> vector<8x384xf32>
    %400 = arith.addf %393, %399 : vector<8x384xf32>
    %c369_i32_267 = arith.constant 369 : i32
    %401 = tpu.dynamic_rotate %311 by %c369_i32_267 dim 1 : vector<4x384xf32>, i32 -> vector<4x384xf32>
    %402 = vector.broadcast %1 : vector<1x384xf32> to vector<4x384xf32>
    %403 = arith.mulf %401, %402 : vector<4x384xf32>
    %c6_268 = arith.constant 6 : index
    %c0_269 = arith.constant 0 : index
    %c0_270 = arith.constant 0 : index
    %404 = vector.load %arg22[%c6_268, %c0_269, %c0_270] : memref<9x8x4xf32, #tpu.memory_space<vmem>>, vector<1x8x4xf32>
    %405 = vector.shape_cast %404 : vector<1x8x4xf32> to vector<8x4xf32>
    %cst_271 = arith.constant dense<0.000000e+00> : vector<8x384xf32>
    %406 = tpu.matmul %405, %403, %cst_271 {dimension_numbers = #tpu.dot_dimension_numbers<[1], [0], [0], [1], [0, 0, 1, 1], [], []>} : vector<8x4xf32>, vector<4x384xf32>, vector<8x384xf32> -> vector<8x384xf32>
    %407 = arith.addf %400, %406 : vector<8x384xf32>
    %c368_i32_272 = arith.constant 368 : i32
    %408 = tpu.dynamic_rotate %315 by %c368_i32_272 dim 1 : vector<4x384xf32>, i32 -> vector<4x384xf32>
    %c7_273 = arith.constant 7 : index
    %c0_274 = arith.constant 0 : index
    %c0_275 = arith.constant 0 : index
    %409 = vector.load %arg21[%c7_273, %c0_274, %c0_275] : memref<9x8x4xf32, #tpu.memory_space<vmem>>, vector<1x8x4xf32>
    %410 = vector.shape_cast %409 : vector<1x8x4xf32> to vector<8x4xf32>
    %cst_276 = arith.constant dense<0.000000e+00> : vector<8x384xf32>
    %411 = tpu.matmul %410, %408, %cst_276 {dimension_numbers = #tpu.dot_dimension_numbers<[1], [0], [0], [1], [0, 0, 1, 1], [], []>} : vector<8x4xf32>, vector<4x384xf32>, vector<8x384xf32> -> vector<8x384xf32>
    %412 = arith.addf %407, %411 : vector<8x384xf32>
    %c368_i32_277 = arith.constant 368 : i32
    %413 = tpu.dynamic_rotate %311 by %c368_i32_277 dim 1 : vector<4x384xf32>, i32 -> vector<4x384xf32>
    %c7_278 = arith.constant 7 : index
    %c0_279 = arith.constant 0 : index
    %c0_280 = arith.constant 0 : index
    %414 = vector.load %arg22[%c7_278, %c0_279, %c0_280] : memref<9x8x4xf32, #tpu.memory_space<vmem>>, vector<1x8x4xf32>
    %415 = vector.shape_cast %414 : vector<1x8x4xf32> to vector<8x4xf32>
    %cst_281 = arith.constant dense<0.000000e+00> : vector<8x384xf32>
    %416 = tpu.matmul %415, %413, %cst_281 {dimension_numbers = #tpu.dot_dimension_numbers<[1], [0], [0], [1], [0, 0, 1, 1], [], []>} : vector<8x4xf32>, vector<4x384xf32>, vector<8x384xf32> -> vector<8x384xf32>
    %417 = arith.addf %412, %416 : vector<8x384xf32>
    %c367_i32_282 = arith.constant 367 : i32
    %418 = tpu.dynamic_rotate %315 by %c367_i32_282 dim 1 : vector<4x384xf32>, i32 -> vector<4x384xf32>
    %419 = vector.broadcast %2 : vector<1x384xf32> to vector<4x384xf32>
    %420 = arith.mulf %418, %419 : vector<4x384xf32>
    %c8_283 = arith.constant 8 : index
    %c0_284 = arith.constant 0 : index
    %c0_285 = arith.constant 0 : index
    %421 = vector.load %arg21[%c8_283, %c0_284, %c0_285] : memref<9x8x4xf32, #tpu.memory_space<vmem>>, vector<1x8x4xf32>
    %422 = vector.shape_cast %421 : vector<1x8x4xf32> to vector<8x4xf32>
    %cst_286 = arith.constant dense<0.000000e+00> : vector<8x384xf32>
    %423 = tpu.matmul %422, %420, %cst_286 {dimension_numbers = #tpu.dot_dimension_numbers<[1], [0], [0], [1], [0, 0, 1, 1], [], []>} : vector<8x4xf32>, vector<4x384xf32>, vector<8x384xf32> -> vector<8x384xf32>
    %424 = arith.addf %417, %423 : vector<8x384xf32>
    %c367_i32_287 = arith.constant 367 : i32
    %425 = tpu.dynamic_rotate %311 by %c367_i32_287 dim 1 : vector<4x384xf32>, i32 -> vector<4x384xf32>
    %426 = vector.broadcast %2 : vector<1x384xf32> to vector<4x384xf32>
    %427 = arith.mulf %425, %426 : vector<4x384xf32>
    %c8_288 = arith.constant 8 : index
    %c0_289 = arith.constant 0 : index
    %c0_290 = arith.constant 0 : index
    %428 = vector.load %arg22[%c8_288, %c0_289, %c0_290] : memref<9x8x4xf32, #tpu.memory_space<vmem>>, vector<1x8x4xf32>
    %429 = vector.shape_cast %428 : vector<1x8x4xf32> to vector<8x4xf32>
    %cst_291 = arith.constant dense<0.000000e+00> : vector<8x384xf32>
    %430 = tpu.matmul %429, %427, %cst_291 {dimension_numbers = #tpu.dot_dimension_numbers<[1], [0], [0], [1], [0, 0, 1, 1], [], []>} : vector<8x4xf32>, vector<4x384xf32>, vector<8x384xf32> -> vector<8x384xf32>
    %431 = arith.addf %424, %430 : vector<8x384xf32>
    %cst_292 = arith.constant 0.000000e+00 : f32
    %432 = vector.broadcast %cst_292 : f32 to vector<8x384xf32>
    %433 = arith.cmpf oge, %431, %432 : vector<8x384xf32>
    %cst_293 = arith.constant 1.000000e-01 : f32
    %434 = vector.broadcast %cst_293 : f32 to vector<8x384xf32>
    %435 = arith.mulf %434, %431 : vector<8x384xf32>
    %436 = arith.select %433, %431, %435 : vector<8x384xi1>, vector<8x384xf32>
    %437 = vector.broadcast %3 : vector<1x384xf32> to vector<8x384xf32>
    %438 = arith.mulf %436, %437 : vector<8x384xf32>
    %c0_294 = arith.constant 0 : index
    %c0_295 = arith.constant 0 : index
    %439 = vector.load %arg25[%c0_294, %c0_295] : memref<8x1xf32, #tpu.memory_space<vmem>>, vector<8x1xf32>
    %cst_296 = arith.constant 0.000000e+00 : f32
    %440 = vector.broadcast %cst_296 : f32 to vector<8x384xf32>
    %441 = vector.broadcast %439 : vector<8x1xf32> to vector<8x384xf32>
    %442 = arith.addf %440, %441 : vector<8x384xf32>
    %c17_i32_297 = arith.constant 17 : i32
    %443 = tpu.dynamic_rotate %438 by %c17_i32_297 dim 1 : vector<8x384xf32>, i32 -> vector<8x384xf32>
    %444 = vector.broadcast %1 : vector<1x384xf32> to vector<8x384xf32>
    %445 = arith.mulf %443, %444 : vector<8x384xf32>
    %c0_298 = arith.constant 0 : index
    %c0_299 = arith.constant 0 : index
    %c0_300 = arith.constant 0 : index
    %446 = vector.load %arg24[%c0_298, %c0_299, %c0_300] : memref<9x8x8xf32, #tpu.memory_space<vmem>>, vector<1x8x8xf32>
    %447 = vector.shape_cast %446 : vector<1x8x8xf32> to vector<8x8xf32>
    %cst_301 = arith.constant dense<0.000000e+00> : vector<8x384xf32>
    %448 = tpu.matmul %447, %445, %cst_301 {dimension_numbers = #tpu.dot_dimension_numbers<[1], [0], [0], [1], [0, 0, 1, 1], [], []>} : vector<8x8xf32>, vector<8x384xf32>, vector<8x384xf32> -> vector<8x384xf32>
    %449 = arith.addf %442, %448 : vector<8x384xf32>
    %c16_i32_302 = arith.constant 16 : i32
    %450 = tpu.dynamic_rotate %438 by %c16_i32_302 dim 1 : vector<8x384xf32>, i32 -> vector<8x384xf32>
    %c1_303 = arith.constant 1 : index
    %c0_304 = arith.constant 0 : index
    %c0_305 = arith.constant 0 : index
    %451 = vector.load %arg24[%c1_303, %c0_304, %c0_305] : memref<9x8x8xf32, #tpu.memory_space<vmem>>, vector<1x8x8xf32>
    %452 = vector.shape_cast %451 : vector<1x8x8xf32> to vector<8x8xf32>
    %cst_306 = arith.constant dense<0.000000e+00> : vector<8x384xf32>
    %453 = tpu.matmul %452, %450, %cst_306 {dimension_numbers = #tpu.dot_dimension_numbers<[1], [0], [0], [1], [0, 0, 1, 1], [], []>} : vector<8x8xf32>, vector<8x384xf32>, vector<8x384xf32> -> vector<8x384xf32>
    %454 = arith.addf %449, %453 : vector<8x384xf32>
    %c15_i32_307 = arith.constant 15 : i32
    %455 = tpu.dynamic_rotate %438 by %c15_i32_307 dim 1 : vector<8x384xf32>, i32 -> vector<8x384xf32>
    %456 = vector.broadcast %2 : vector<1x384xf32> to vector<8x384xf32>
    %457 = arith.mulf %455, %456 : vector<8x384xf32>
    %c2_308 = arith.constant 2 : index
    %c0_309 = arith.constant 0 : index
    %c0_310 = arith.constant 0 : index
    %458 = vector.load %arg24[%c2_308, %c0_309, %c0_310] : memref<9x8x8xf32, #tpu.memory_space<vmem>>, vector<1x8x8xf32>
    %459 = vector.shape_cast %458 : vector<1x8x8xf32> to vector<8x8xf32>
    %cst_311 = arith.constant dense<0.000000e+00> : vector<8x384xf32>
    %460 = tpu.matmul %459, %457, %cst_311 {dimension_numbers = #tpu.dot_dimension_numbers<[1], [0], [0], [1], [0, 0, 1, 1], [], []>} : vector<8x8xf32>, vector<8x384xf32>, vector<8x384xf32> -> vector<8x384xf32>
    %461 = arith.addf %454, %460 : vector<8x384xf32>
    %c1_i32_312 = arith.constant 1 : i32
    %462 = tpu.dynamic_rotate %438 by %c1_i32_312 dim 1 : vector<8x384xf32>, i32 -> vector<8x384xf32>
    %463 = vector.broadcast %1 : vector<1x384xf32> to vector<8x384xf32>
    %464 = arith.mulf %462, %463 : vector<8x384xf32>
    %c3_313 = arith.constant 3 : index
    %c0_314 = arith.constant 0 : index
    %c0_315 = arith.constant 0 : index
    %465 = vector.load %arg24[%c3_313, %c0_314, %c0_315] : memref<9x8x8xf32, #tpu.memory_space<vmem>>, vector<1x8x8xf32>
    %466 = vector.shape_cast %465 : vector<1x8x8xf32> to vector<8x8xf32>
    %cst_316 = arith.constant dense<0.000000e+00> : vector<8x384xf32>
    %467 = tpu.matmul %466, %464, %cst_316 {dimension_numbers = #tpu.dot_dimension_numbers<[1], [0], [0], [1], [0, 0, 1, 1], [], []>} : vector<8x8xf32>, vector<8x384xf32>, vector<8x384xf32> -> vector<8x384xf32>
    %468 = arith.addf %461, %467 : vector<8x384xf32>
    %c4_317 = arith.constant 4 : index
    %c0_318 = arith.constant 0 : index
    %c0_319 = arith.constant 0 : index
    %469 = vector.load %arg24[%c4_317, %c0_318, %c0_319] : memref<9x8x8xf32, #tpu.memory_space<vmem>>, vector<1x8x8xf32>
    %470 = vector.shape_cast %469 : vector<1x8x8xf32> to vector<8x8xf32>
    %cst_320 = arith.constant dense<0.000000e+00> : vector<8x384xf32>
    %471 = tpu.matmul %470, %438, %cst_320 {dimension_numbers = #tpu.dot_dimension_numbers<[1], [0], [0], [1], [0, 0, 1, 1], [], []>} : vector<8x8xf32>, vector<8x384xf32>, vector<8x384xf32> -> vector<8x384xf32>
    %472 = arith.addf %468, %471 : vector<8x384xf32>
    %c383_i32_321 = arith.constant 383 : i32
    %473 = tpu.dynamic_rotate %438 by %c383_i32_321 dim 1 : vector<8x384xf32>, i32 -> vector<8x384xf32>
    %474 = vector.broadcast %2 : vector<1x384xf32> to vector<8x384xf32>
    %475 = arith.mulf %473, %474 : vector<8x384xf32>
    %c5_322 = arith.constant 5 : index
    %c0_323 = arith.constant 0 : index
    %c0_324 = arith.constant 0 : index
    %476 = vector.load %arg24[%c5_322, %c0_323, %c0_324] : memref<9x8x8xf32, #tpu.memory_space<vmem>>, vector<1x8x8xf32>
    %477 = vector.shape_cast %476 : vector<1x8x8xf32> to vector<8x8xf32>
    %cst_325 = arith.constant dense<0.000000e+00> : vector<8x384xf32>
    %478 = tpu.matmul %477, %475, %cst_325 {dimension_numbers = #tpu.dot_dimension_numbers<[1], [0], [0], [1], [0, 0, 1, 1], [], []>} : vector<8x8xf32>, vector<8x384xf32>, vector<8x384xf32> -> vector<8x384xf32>
    %479 = arith.addf %472, %478 : vector<8x384xf32>
    %c369_i32_326 = arith.constant 369 : i32
    %480 = tpu.dynamic_rotate %438 by %c369_i32_326 dim 1 : vector<8x384xf32>, i32 -> vector<8x384xf32>
    %481 = vector.broadcast %1 : vector<1x384xf32> to vector<8x384xf32>
    %482 = arith.mulf %480, %481 : vector<8x384xf32>
    %c6_327 = arith.constant 6 : index
    %c0_328 = arith.constant 0 : index
    %c0_329 = arith.constant 0 : index
    %483 = vector.load %arg24[%c6_327, %c0_328, %c0_329] : memref<9x8x8xf32, #tpu.memory_space<vmem>>, vector<1x8x8xf32>
    %484 = vector.shape_cast %483 : vector<1x8x8xf32> to vector<8x8xf32>
    %cst_330 = arith.constant dense<0.000000e+00> : vector<8x384xf32>
    %485 = tpu.matmul %484, %482, %cst_330 {dimension_numbers = #tpu.dot_dimension_numbers<[1], [0], [0], [1], [0, 0, 1, 1], [], []>} : vector<8x8xf32>, vector<8x384xf32>, vector<8x384xf32> -> vector<8x384xf32>
    %486 = arith.addf %479, %485 : vector<8x384xf32>
    %c368_i32_331 = arith.constant 368 : i32
    %487 = tpu.dynamic_rotate %438 by %c368_i32_331 dim 1 : vector<8x384xf32>, i32 -> vector<8x384xf32>
    %c7_332 = arith.constant 7 : index
    %c0_333 = arith.constant 0 : index
    %c0_334 = arith.constant 0 : index
    %488 = vector.load %arg24[%c7_332, %c0_333, %c0_334] : memref<9x8x8xf32, #tpu.memory_space<vmem>>, vector<1x8x8xf32>
    %489 = vector.shape_cast %488 : vector<1x8x8xf32> to vector<8x8xf32>
    %cst_335 = arith.constant dense<0.000000e+00> : vector<8x384xf32>
    %490 = tpu.matmul %489, %487, %cst_335 {dimension_numbers = #tpu.dot_dimension_numbers<[1], [0], [0], [1], [0, 0, 1, 1], [], []>} : vector<8x8xf32>, vector<8x384xf32>, vector<8x384xf32> -> vector<8x384xf32>
    %491 = arith.addf %486, %490 : vector<8x384xf32>
    %c367_i32_336 = arith.constant 367 : i32
    %492 = tpu.dynamic_rotate %438 by %c367_i32_336 dim 1 : vector<8x384xf32>, i32 -> vector<8x384xf32>
    %493 = vector.broadcast %2 : vector<1x384xf32> to vector<8x384xf32>
    %494 = arith.mulf %492, %493 : vector<8x384xf32>
    %c8_337 = arith.constant 8 : index
    %c0_338 = arith.constant 0 : index
    %c0_339 = arith.constant 0 : index
    %495 = vector.load %arg24[%c8_337, %c0_338, %c0_339] : memref<9x8x8xf32, #tpu.memory_space<vmem>>, vector<1x8x8xf32>
    %496 = vector.shape_cast %495 : vector<1x8x8xf32> to vector<8x8xf32>
    %cst_340 = arith.constant dense<0.000000e+00> : vector<8x384xf32>
    %497 = tpu.matmul %496, %494, %cst_340 {dimension_numbers = #tpu.dot_dimension_numbers<[1], [0], [0], [1], [0, 0, 1, 1], [], []>} : vector<8x8xf32>, vector<8x384xf32>, vector<8x384xf32> -> vector<8x384xf32>
    %498 = arith.addf %491, %497 : vector<8x384xf32>
    %499 = vector.extract_strided_slice %498 {offsets = [0, 0], sizes = [4, 384], strides = [1, 1]} : vector<8x384xf32> to vector<4x384xf32>
    %500 = vector.extract_strided_slice %498 {offsets = [4, 0], sizes = [4, 384], strides = [1, 1]} : vector<8x384xf32> to vector<4x384xf32>
    %cst_341 = arith.constant 2.000000e-01 : f32
    %501 = vector.broadcast %cst_341 : f32 to vector<4x384xf32>
    %502 = arith.mulf %499, %501 : vector<4x384xf32>
    %cst_342 = arith.constant 0.000000e+00 : f32
    %503 = vector.broadcast %cst_342 : f32 to vector<4x384xf32>
    %504 = arith.cmpf olt, %502, %503 : vector<4x384xf32>
    %cst_343 = arith.constant -1.000000e+00 : f32
    %cst_344 = arith.constant 1.000000e+00 : f32
    %505 = vector.broadcast %cst_343 : f32 to vector<4x384xf32>
    %506 = vector.broadcast %cst_344 : f32 to vector<4x384xf32>
    %507 = arith.select %504, %505, %506 : vector<4x384xi1>, vector<4x384xf32>
    %508 = math.absf %502 : vector<4x384xf32>
    %cst_345 = arith.constant 2.41421366 : f32
    %509 = vector.broadcast %cst_345 : f32 to vector<4x384xf32>
    %510 = arith.cmpf ogt, %508, %509 : vector<4x384xf32>
    %cst_346 = arith.constant 0.414213568 : f32
    %511 = vector.broadcast %cst_346 : f32 to vector<4x384xf32>
    %512 = arith.cmpf ogt, %508, %511 : vector<4x384xf32>
    %cst_347 = arith.constant dense<true> : vector<4x384xi1>
    %513 = arith.xori %510, %cst_347 : vector<4x384xi1>
    %514 = arith.andi %512, %513 : vector<4x384xi1>
    %cst_348 = arith.constant 0.000000e+00 : f32
    %515 = vector.broadcast %cst_348 : f32 to vector<4x384xf32>
    %516 = arith.cmpf ogt, %508, %515 : vector<4x384xf32>
    %cst_349 = arith.constant 1.000000e+00 : f32
    %517 = vector.broadcast %cst_349 : f32 to vector<4x384xf32>
    %518 = arith.select %516, %508, %517 : vector<4x384xi1>, vector<4x384xf32>
    %cst_350 = arith.constant -1.000000e+00 : f32
    %519 = vector.broadcast %cst_350 : f32 to vector<4x384xf32>
    %520 = arith.divf %519, %518 : vector<4x384xf32>
    %cst_351 = arith.constant 1.000000e+00 : f32
    %521 = vector.broadcast %cst_351 : f32 to vector<4x384xf32>
    %522 = arith.subf %508, %521 : vector<4x384xf32>
    %cst_352 = arith.constant 1.000000e+00 : f32
    %523 = vector.broadcast %cst_352 : f32 to vector<4x384xf32>
    %524 = arith.addf %508, %523 : vector<4x384xf32>
    %525 = arith.divf %522, %524 : vector<4x384xf32>
    %526 = arith.select %514, %525, %508 : vector<4x384xi1>, vector<4x384xf32>
    %527 = arith.select %510, %520, %526 : vector<4x384xi1>, vector<4x384xf32>
    %cst_353 = arith.constant 0.785398185 : f32
    %cst_354 = arith.constant 0.000000e+00 : f32
    %528 = vector.broadcast %cst_353 : f32 to vector<4x384xf32>
    %529 = vector.broadcast %cst_354 : f32 to vector<4x384xf32>
    %530 = arith.select %514, %528, %529 : vector<4x384xi1>, vector<4x384xf32>
    %cst_355 = arith.constant 1.57079637 : f32
    %531 = vector.broadcast %cst_355 : f32 to vector<4x384xf32>
    %532 = arith.select %510, %531, %530 : vector<4x384xi1>, vector<4x384xf32>
    %533 = arith.mulf %527, %527 : vector<4x384xf32>
    %cst_356 = arith.constant 0.0805374458 : f32
    %534 = vector.broadcast %cst_356 : f32 to vector<4x384xf32>
    %535 = arith.mulf %534, %533 : vector<4x384xf32>
    %cst_357 = arith.constant 0.138776854 : f32
    %536 = vector.broadcast %cst_357 : f32 to vector<4x384xf32>
    %537 = arith.subf %535, %536 : vector<4x384xf32>
    %538 = arith.mulf %537, %533 : vector<4x384xf32>
    %cst_358 = arith.constant 0.199777111 : f32
    %539 = vector.broadcast %cst_358 : f32 to vector<4x384xf32>
    %540 = arith.addf %538, %539 : vector<4x384xf32>
    %541 = arith.mulf %540, %533 : vector<4x384xf32>
    %cst_359 = arith.constant 0.333329499 : f32
    %542 = vector.broadcast %cst_359 : f32 to vector<4x384xf32>
    %543 = arith.subf %541, %542 : vector<4x384xf32>
    %544 = arith.mulf %543, %533 : vector<4x384xf32>
    %545 = arith.mulf %544, %527 : vector<4x384xf32>
    %546 = arith.addf %545, %527 : vector<4x384xf32>
    %547 = arith.addf %532, %546 : vector<4x384xf32>
    %548 = arith.mulf %507, %547 : vector<4x384xf32>
    %cst_360 = arith.constant 3.180000e+00 : f32
    %549 = vector.broadcast %cst_360 : f32 to vector<4x384xf32>
    %550 = arith.mulf %549, %548 : vector<4x384xf32>
    %551 = math.exp %550 : vector<4x384xf32>
    %552 = arith.mulf %551, %314 : vector<4x384xf32>
    %553 = arith.addf %552, %500 : vector<4x384xf32>
    %554 = vector.broadcast %3 : vector<1x384xf32> to vector<4x384xf32>
    %555 = arith.mulf %553, %554 : vector<4x384xf32>
    %c0_361 = arith.constant 0 : index
    %c0_362 = arith.constant 0 : index
    %556 = vector.load %arg18[%c0_361, %c0_362] : memref<8x1xf32, #tpu.memory_space<vmem>>, vector<8x1xf32>
    %cst_363 = arith.constant 0.000000e+00 : f32
    %557 = vector.broadcast %cst_363 : f32 to vector<8x384xf32>
    %558 = vector.broadcast %556 : vector<8x1xf32> to vector<8x384xf32>
    %559 = arith.addf %557, %558 : vector<8x384xf32>
    %c17_i32_364 = arith.constant 17 : i32
    %560 = tpu.dynamic_rotate %555 by %c17_i32_364 dim 1 : vector<4x384xf32>, i32 -> vector<4x384xf32>
    %561 = vector.broadcast %1 : vector<1x384xf32> to vector<4x384xf32>
    %562 = arith.mulf %560, %561 : vector<4x384xf32>
    %c0_365 = arith.constant 0 : index
    %c0_366 = arith.constant 0 : index
    %c0_367 = arith.constant 0 : index
    %563 = vector.load %arg16[%c0_365, %c0_366, %c0_367] : memref<9x8x4xf32, #tpu.memory_space<vmem>>, vector<1x8x4xf32>
    %564 = vector.shape_cast %563 : vector<1x8x4xf32> to vector<8x4xf32>
    %cst_368 = arith.constant dense<0.000000e+00> : vector<8x384xf32>
    %565 = tpu.matmul %564, %562, %cst_368 {dimension_numbers = #tpu.dot_dimension_numbers<[1], [0], [0], [1], [0, 0, 1, 1], [], []>} : vector<8x4xf32>, vector<4x384xf32>, vector<8x384xf32> -> vector<8x384xf32>
    %566 = arith.addf %559, %565 : vector<8x384xf32>
    %c17_i32_369 = arith.constant 17 : i32
    %567 = tpu.dynamic_rotate %311 by %c17_i32_369 dim 1 : vector<4x384xf32>, i32 -> vector<4x384xf32>
    %568 = vector.broadcast %1 : vector<1x384xf32> to vector<4x384xf32>
    %569 = arith.mulf %567, %568 : vector<4x384xf32>
    %c0_370 = arith.constant 0 : index
    %c0_371 = arith.constant 0 : index
    %c0_372 = arith.constant 0 : index
    %570 = vector.load %arg17[%c0_370, %c0_371, %c0_372] : memref<9x8x4xf32, #tpu.memory_space<vmem>>, vector<1x8x4xf32>
    %571 = vector.shape_cast %570 : vector<1x8x4xf32> to vector<8x4xf32>
    %cst_373 = arith.constant dense<0.000000e+00> : vector<8x384xf32>
    %572 = tpu.matmul %571, %569, %cst_373 {dimension_numbers = #tpu.dot_dimension_numbers<[1], [0], [0], [1], [0, 0, 1, 1], [], []>} : vector<8x4xf32>, vector<4x384xf32>, vector<8x384xf32> -> vector<8x384xf32>
    %573 = arith.addf %566, %572 : vector<8x384xf32>
    %c16_i32_374 = arith.constant 16 : i32
    %574 = tpu.dynamic_rotate %555 by %c16_i32_374 dim 1 : vector<4x384xf32>, i32 -> vector<4x384xf32>
    %c1_375 = arith.constant 1 : index
    %c0_376 = arith.constant 0 : index
    %c0_377 = arith.constant 0 : index
    %575 = vector.load %arg16[%c1_375, %c0_376, %c0_377] : memref<9x8x4xf32, #tpu.memory_space<vmem>>, vector<1x8x4xf32>
    %576 = vector.shape_cast %575 : vector<1x8x4xf32> to vector<8x4xf32>
    %cst_378 = arith.constant dense<0.000000e+00> : vector<8x384xf32>
    %577 = tpu.matmul %576, %574, %cst_378 {dimension_numbers = #tpu.dot_dimension_numbers<[1], [0], [0], [1], [0, 0, 1, 1], [], []>} : vector<8x4xf32>, vector<4x384xf32>, vector<8x384xf32> -> vector<8x384xf32>
    %578 = arith.addf %573, %577 : vector<8x384xf32>
    %c16_i32_379 = arith.constant 16 : i32
    %579 = tpu.dynamic_rotate %311 by %c16_i32_379 dim 1 : vector<4x384xf32>, i32 -> vector<4x384xf32>
    %c1_380 = arith.constant 1 : index
    %c0_381 = arith.constant 0 : index
    %c0_382 = arith.constant 0 : index
    %580 = vector.load %arg17[%c1_380, %c0_381, %c0_382] : memref<9x8x4xf32, #tpu.memory_space<vmem>>, vector<1x8x4xf32>
    %581 = vector.shape_cast %580 : vector<1x8x4xf32> to vector<8x4xf32>
    %cst_383 = arith.constant dense<0.000000e+00> : vector<8x384xf32>
    %582 = tpu.matmul %581, %579, %cst_383 {dimension_numbers = #tpu.dot_dimension_numbers<[1], [0], [0], [1], [0, 0, 1, 1], [], []>} : vector<8x4xf32>, vector<4x384xf32>, vector<8x384xf32> -> vector<8x384xf32>
    %583 = arith.addf %578, %582 : vector<8x384xf32>
    %c15_i32_384 = arith.constant 15 : i32
    %584 = tpu.dynamic_rotate %555 by %c15_i32_384 dim 1 : vector<4x384xf32>, i32 -> vector<4x384xf32>
    %585 = vector.broadcast %2 : vector<1x384xf32> to vector<4x384xf32>
    %586 = arith.mulf %584, %585 : vector<4x384xf32>
    %c2_385 = arith.constant 2 : index
    %c0_386 = arith.constant 0 : index
    %c0_387 = arith.constant 0 : index
    %587 = vector.load %arg16[%c2_385, %c0_386, %c0_387] : memref<9x8x4xf32, #tpu.memory_space<vmem>>, vector<1x8x4xf32>
    %588 = vector.shape_cast %587 : vector<1x8x4xf32> to vector<8x4xf32>
    %cst_388 = arith.constant dense<0.000000e+00> : vector<8x384xf32>
    %589 = tpu.matmul %588, %586, %cst_388 {dimension_numbers = #tpu.dot_dimension_numbers<[1], [0], [0], [1], [0, 0, 1, 1], [], []>} : vector<8x4xf32>, vector<4x384xf32>, vector<8x384xf32> -> vector<8x384xf32>
    %590 = arith.addf %583, %589 : vector<8x384xf32>
    %c15_i32_389 = arith.constant 15 : i32
    %591 = tpu.dynamic_rotate %311 by %c15_i32_389 dim 1 : vector<4x384xf32>, i32 -> vector<4x384xf32>
    %592 = vector.broadcast %2 : vector<1x384xf32> to vector<4x384xf32>
    %593 = arith.mulf %591, %592 : vector<4x384xf32>
    %c2_390 = arith.constant 2 : index
    %c0_391 = arith.constant 0 : index
    %c0_392 = arith.constant 0 : index
    %594 = vector.load %arg17[%c2_390, %c0_391, %c0_392] : memref<9x8x4xf32, #tpu.memory_space<vmem>>, vector<1x8x4xf32>
    %595 = vector.shape_cast %594 : vector<1x8x4xf32> to vector<8x4xf32>
    %cst_393 = arith.constant dense<0.000000e+00> : vector<8x384xf32>
    %596 = tpu.matmul %595, %593, %cst_393 {dimension_numbers = #tpu.dot_dimension_numbers<[1], [0], [0], [1], [0, 0, 1, 1], [], []>} : vector<8x4xf32>, vector<4x384xf32>, vector<8x384xf32> -> vector<8x384xf32>
    %597 = arith.addf %590, %596 : vector<8x384xf32>
    %c1_i32_394 = arith.constant 1 : i32
    %598 = tpu.dynamic_rotate %555 by %c1_i32_394 dim 1 : vector<4x384xf32>, i32 -> vector<4x384xf32>
    %599 = vector.broadcast %1 : vector<1x384xf32> to vector<4x384xf32>
    %600 = arith.mulf %598, %599 : vector<4x384xf32>
    %c3_395 = arith.constant 3 : index
    %c0_396 = arith.constant 0 : index
    %c0_397 = arith.constant 0 : index
    %601 = vector.load %arg16[%c3_395, %c0_396, %c0_397] : memref<9x8x4xf32, #tpu.memory_space<vmem>>, vector<1x8x4xf32>
    %602 = vector.shape_cast %601 : vector<1x8x4xf32> to vector<8x4xf32>
    %cst_398 = arith.constant dense<0.000000e+00> : vector<8x384xf32>
    %603 = tpu.matmul %602, %600, %cst_398 {dimension_numbers = #tpu.dot_dimension_numbers<[1], [0], [0], [1], [0, 0, 1, 1], [], []>} : vector<8x4xf32>, vector<4x384xf32>, vector<8x384xf32> -> vector<8x384xf32>
    %604 = arith.addf %597, %603 : vector<8x384xf32>
    %c1_i32_399 = arith.constant 1 : i32
    %605 = tpu.dynamic_rotate %311 by %c1_i32_399 dim 1 : vector<4x384xf32>, i32 -> vector<4x384xf32>
    %606 = vector.broadcast %1 : vector<1x384xf32> to vector<4x384xf32>
    %607 = arith.mulf %605, %606 : vector<4x384xf32>
    %c3_400 = arith.constant 3 : index
    %c0_401 = arith.constant 0 : index
    %c0_402 = arith.constant 0 : index
    %608 = vector.load %arg17[%c3_400, %c0_401, %c0_402] : memref<9x8x4xf32, #tpu.memory_space<vmem>>, vector<1x8x4xf32>
    %609 = vector.shape_cast %608 : vector<1x8x4xf32> to vector<8x4xf32>
    %cst_403 = arith.constant dense<0.000000e+00> : vector<8x384xf32>
    %610 = tpu.matmul %609, %607, %cst_403 {dimension_numbers = #tpu.dot_dimension_numbers<[1], [0], [0], [1], [0, 0, 1, 1], [], []>} : vector<8x4xf32>, vector<4x384xf32>, vector<8x384xf32> -> vector<8x384xf32>
    %611 = arith.addf %604, %610 : vector<8x384xf32>
    %c4_404 = arith.constant 4 : index
    %c0_405 = arith.constant 0 : index
    %c0_406 = arith.constant 0 : index
    %612 = vector.load %arg16[%c4_404, %c0_405, %c0_406] : memref<9x8x4xf32, #tpu.memory_space<vmem>>, vector<1x8x4xf32>
    %613 = vector.shape_cast %612 : vector<1x8x4xf32> to vector<8x4xf32>
    %cst_407 = arith.constant dense<0.000000e+00> : vector<8x384xf32>
    %614 = tpu.matmul %613, %555, %cst_407 {dimension_numbers = #tpu.dot_dimension_numbers<[1], [0], [0], [1], [0, 0, 1, 1], [], []>} : vector<8x4xf32>, vector<4x384xf32>, vector<8x384xf32> -> vector<8x384xf32>
    %615 = arith.addf %611, %614 : vector<8x384xf32>
    %c4_408 = arith.constant 4 : index
    %c0_409 = arith.constant 0 : index
    %c0_410 = arith.constant 0 : index
    %616 = vector.load %arg17[%c4_408, %c0_409, %c0_410] : memref<9x8x4xf32, #tpu.memory_space<vmem>>, vector<1x8x4xf32>
    %617 = vector.shape_cast %616 : vector<1x8x4xf32> to vector<8x4xf32>
    %cst_411 = arith.constant dense<0.000000e+00> : vector<8x384xf32>
    %618 = tpu.matmul %617, %311, %cst_411 {dimension_numbers = #tpu.dot_dimension_numbers<[1], [0], [0], [1], [0, 0, 1, 1], [], []>} : vector<8x4xf32>, vector<4x384xf32>, vector<8x384xf32> -> vector<8x384xf32>
    %619 = arith.addf %615, %618 : vector<8x384xf32>
    %c383_i32_412 = arith.constant 383 : i32
    %620 = tpu.dynamic_rotate %555 by %c383_i32_412 dim 1 : vector<4x384xf32>, i32 -> vector<4x384xf32>
    %621 = vector.broadcast %2 : vector<1x384xf32> to vector<4x384xf32>
    %622 = arith.mulf %620, %621 : vector<4x384xf32>
    %c5_413 = arith.constant 5 : index
    %c0_414 = arith.constant 0 : index
    %c0_415 = arith.constant 0 : index
    %623 = vector.load %arg16[%c5_413, %c0_414, %c0_415] : memref<9x8x4xf32, #tpu.memory_space<vmem>>, vector<1x8x4xf32>
    %624 = vector.shape_cast %623 : vector<1x8x4xf32> to vector<8x4xf32>
    %cst_416 = arith.constant dense<0.000000e+00> : vector<8x384xf32>
    %625 = tpu.matmul %624, %622, %cst_416 {dimension_numbers = #tpu.dot_dimension_numbers<[1], [0], [0], [1], [0, 0, 1, 1], [], []>} : vector<8x4xf32>, vector<4x384xf32>, vector<8x384xf32> -> vector<8x384xf32>
    %626 = arith.addf %619, %625 : vector<8x384xf32>
    %c383_i32_417 = arith.constant 383 : i32
    %627 = tpu.dynamic_rotate %311 by %c383_i32_417 dim 1 : vector<4x384xf32>, i32 -> vector<4x384xf32>
    %628 = vector.broadcast %2 : vector<1x384xf32> to vector<4x384xf32>
    %629 = arith.mulf %627, %628 : vector<4x384xf32>
    %c5_418 = arith.constant 5 : index
    %c0_419 = arith.constant 0 : index
    %c0_420 = arith.constant 0 : index
    %630 = vector.load %arg17[%c5_418, %c0_419, %c0_420] : memref<9x8x4xf32, #tpu.memory_space<vmem>>, vector<1x8x4xf32>
    %631 = vector.shape_cast %630 : vector<1x8x4xf32> to vector<8x4xf32>
    %cst_421 = arith.constant dense<0.000000e+00> : vector<8x384xf32>
    %632 = tpu.matmul %631, %629, %cst_421 {dimension_numbers = #tpu.dot_dimension_numbers<[1], [0], [0], [1], [0, 0, 1, 1], [], []>} : vector<8x4xf32>, vector<4x384xf32>, vector<8x384xf32> -> vector<8x384xf32>
    %633 = arith.addf %626, %632 : vector<8x384xf32>
    %c369_i32_422 = arith.constant 369 : i32
    %634 = tpu.dynamic_rotate %555 by %c369_i32_422 dim 1 : vector<4x384xf32>, i32 -> vector<4x384xf32>
    %635 = vector.broadcast %1 : vector<1x384xf32> to vector<4x384xf32>
    %636 = arith.mulf %634, %635 : vector<4x384xf32>
    %c6_423 = arith.constant 6 : index
    %c0_424 = arith.constant 0 : index
    %c0_425 = arith.constant 0 : index
    %637 = vector.load %arg16[%c6_423, %c0_424, %c0_425] : memref<9x8x4xf32, #tpu.memory_space<vmem>>, vector<1x8x4xf32>
    %638 = vector.shape_cast %637 : vector<1x8x4xf32> to vector<8x4xf32>
    %cst_426 = arith.constant dense<0.000000e+00> : vector<8x384xf32>
    %639 = tpu.matmul %638, %636, %cst_426 {dimension_numbers = #tpu.dot_dimension_numbers<[1], [0], [0], [1], [0, 0, 1, 1], [], []>} : vector<8x4xf32>, vector<4x384xf32>, vector<8x384xf32> -> vector<8x384xf32>
    %640 = arith.addf %633, %639 : vector<8x384xf32>
    %c369_i32_427 = arith.constant 369 : i32
    %641 = tpu.dynamic_rotate %311 by %c369_i32_427 dim 1 : vector<4x384xf32>, i32 -> vector<4x384xf32>
    %642 = vector.broadcast %1 : vector<1x384xf32> to vector<4x384xf32>
    %643 = arith.mulf %641, %642 : vector<4x384xf32>
    %c6_428 = arith.constant 6 : index
    %c0_429 = arith.constant 0 : index
    %c0_430 = arith.constant 0 : index
    %644 = vector.load %arg17[%c6_428, %c0_429, %c0_430] : memref<9x8x4xf32, #tpu.memory_space<vmem>>, vector<1x8x4xf32>
    %645 = vector.shape_cast %644 : vector<1x8x4xf32> to vector<8x4xf32>
    %cst_431 = arith.constant dense<0.000000e+00> : vector<8x384xf32>
    %646 = tpu.matmul %645, %643, %cst_431 {dimension_numbers = #tpu.dot_dimension_numbers<[1], [0], [0], [1], [0, 0, 1, 1], [], []>} : vector<8x4xf32>, vector<4x384xf32>, vector<8x384xf32> -> vector<8x384xf32>
    %647 = arith.addf %640, %646 : vector<8x384xf32>
    %c368_i32_432 = arith.constant 368 : i32
    %648 = tpu.dynamic_rotate %555 by %c368_i32_432 dim 1 : vector<4x384xf32>, i32 -> vector<4x384xf32>
    %c7_433 = arith.constant 7 : index
    %c0_434 = arith.constant 0 : index
    %c0_435 = arith.constant 0 : index
    %649 = vector.load %arg16[%c7_433, %c0_434, %c0_435] : memref<9x8x4xf32, #tpu.memory_space<vmem>>, vector<1x8x4xf32>
    %650 = vector.shape_cast %649 : vector<1x8x4xf32> to vector<8x4xf32>
    %cst_436 = arith.constant dense<0.000000e+00> : vector<8x384xf32>
    %651 = tpu.matmul %650, %648, %cst_436 {dimension_numbers = #tpu.dot_dimension_numbers<[1], [0], [0], [1], [0, 0, 1, 1], [], []>} : vector<8x4xf32>, vector<4x384xf32>, vector<8x384xf32> -> vector<8x384xf32>
    %652 = arith.addf %647, %651 : vector<8x384xf32>
    %c368_i32_437 = arith.constant 368 : i32
    %653 = tpu.dynamic_rotate %311 by %c368_i32_437 dim 1 : vector<4x384xf32>, i32 -> vector<4x384xf32>
    %c7_438 = arith.constant 7 : index
    %c0_439 = arith.constant 0 : index
    %c0_440 = arith.constant 0 : index
    %654 = vector.load %arg17[%c7_438, %c0_439, %c0_440] : memref<9x8x4xf32, #tpu.memory_space<vmem>>, vector<1x8x4xf32>
    %655 = vector.shape_cast %654 : vector<1x8x4xf32> to vector<8x4xf32>
    %cst_441 = arith.constant dense<0.000000e+00> : vector<8x384xf32>
    %656 = tpu.matmul %655, %653, %cst_441 {dimension_numbers = #tpu.dot_dimension_numbers<[1], [0], [0], [1], [0, 0, 1, 1], [], []>} : vector<8x4xf32>, vector<4x384xf32>, vector<8x384xf32> -> vector<8x384xf32>
    %657 = arith.addf %652, %656 : vector<8x384xf32>
    %c367_i32_442 = arith.constant 367 : i32
    %658 = tpu.dynamic_rotate %555 by %c367_i32_442 dim 1 : vector<4x384xf32>, i32 -> vector<4x384xf32>
    %659 = vector.broadcast %2 : vector<1x384xf32> to vector<4x384xf32>
    %660 = arith.mulf %658, %659 : vector<4x384xf32>
    %c8_443 = arith.constant 8 : index
    %c0_444 = arith.constant 0 : index
    %c0_445 = arith.constant 0 : index
    %661 = vector.load %arg16[%c8_443, %c0_444, %c0_445] : memref<9x8x4xf32, #tpu.memory_space<vmem>>, vector<1x8x4xf32>
    %662 = vector.shape_cast %661 : vector<1x8x4xf32> to vector<8x4xf32>
    %cst_446 = arith.constant dense<0.000000e+00> : vector<8x384xf32>
    %663 = tpu.matmul %662, %660, %cst_446 {dimension_numbers = #tpu.dot_dimension_numbers<[1], [0], [0], [1], [0, 0, 1, 1], [], []>} : vector<8x4xf32>, vector<4x384xf32>, vector<8x384xf32> -> vector<8x384xf32>
    %664 = arith.addf %657, %663 : vector<8x384xf32>
    %c367_i32_447 = arith.constant 367 : i32
    %665 = tpu.dynamic_rotate %311 by %c367_i32_447 dim 1 : vector<4x384xf32>, i32 -> vector<4x384xf32>
    %666 = vector.broadcast %2 : vector<1x384xf32> to vector<4x384xf32>
    %667 = arith.mulf %665, %666 : vector<4x384xf32>
    %c8_448 = arith.constant 8 : index
    %c0_449 = arith.constant 0 : index
    %c0_450 = arith.constant 0 : index
    %668 = vector.load %arg17[%c8_448, %c0_449, %c0_450] : memref<9x8x4xf32, #tpu.memory_space<vmem>>, vector<1x8x4xf32>
    %669 = vector.shape_cast %668 : vector<1x8x4xf32> to vector<8x4xf32>
    %cst_451 = arith.constant dense<0.000000e+00> : vector<8x384xf32>
    %670 = tpu.matmul %669, %667, %cst_451 {dimension_numbers = #tpu.dot_dimension_numbers<[1], [0], [0], [1], [0, 0, 1, 1], [], []>} : vector<8x4xf32>, vector<4x384xf32>, vector<8x384xf32> -> vector<8x384xf32>
    %671 = arith.addf %664, %670 : vector<8x384xf32>
    %cst_452 = arith.constant 0.000000e+00 : f32
    %672 = vector.broadcast %cst_452 : f32 to vector<8x384xf32>
    %673 = arith.cmpf oge, %671, %672 : vector<8x384xf32>
    %cst_453 = arith.constant 1.000000e-01 : f32
    %674 = vector.broadcast %cst_453 : f32 to vector<8x384xf32>
    %675 = arith.mulf %674, %671 : vector<8x384xf32>
    %676 = arith.select %673, %671, %675 : vector<8x384xi1>, vector<8x384xf32>
    %677 = vector.broadcast %3 : vector<1x384xf32> to vector<8x384xf32>
    %678 = arith.mulf %676, %677 : vector<8x384xf32>
    %c0_454 = arith.constant 0 : index
    %c0_455 = arith.constant 0 : index
    %679 = vector.load %arg20[%c0_454, %c0_455] : memref<8x1xf32, #tpu.memory_space<vmem>>, vector<8x1xf32>
    %cst_456 = arith.constant 0.000000e+00 : f32
    %680 = vector.broadcast %cst_456 : f32 to vector<8x384xf32>
    %681 = vector.broadcast %679 : vector<8x1xf32> to vector<8x384xf32>
    %682 = arith.addf %680, %681 : vector<8x384xf32>
    %c17_i32_457 = arith.constant 17 : i32
    %683 = tpu.dynamic_rotate %678 by %c17_i32_457 dim 1 : vector<8x384xf32>, i32 -> vector<8x384xf32>
    %684 = vector.broadcast %1 : vector<1x384xf32> to vector<8x384xf32>
    %685 = arith.mulf %683, %684 : vector<8x384xf32>
    %c0_458 = arith.constant 0 : index
    %c0_459 = arith.constant 0 : index
    %c0_460 = arith.constant 0 : index
    %686 = vector.load %arg19[%c0_458, %c0_459, %c0_460] : memref<9x8x8xf32, #tpu.memory_space<vmem>>, vector<1x8x8xf32>
    %687 = vector.shape_cast %686 : vector<1x8x8xf32> to vector<8x8xf32>
    %cst_461 = arith.constant dense<0.000000e+00> : vector<8x384xf32>
    %688 = tpu.matmul %687, %685, %cst_461 {dimension_numbers = #tpu.dot_dimension_numbers<[1], [0], [0], [1], [0, 0, 1, 1], [], []>} : vector<8x8xf32>, vector<8x384xf32>, vector<8x384xf32> -> vector<8x384xf32>
    %689 = arith.addf %682, %688 : vector<8x384xf32>
    %c16_i32_462 = arith.constant 16 : i32
    %690 = tpu.dynamic_rotate %678 by %c16_i32_462 dim 1 : vector<8x384xf32>, i32 -> vector<8x384xf32>
    %c1_463 = arith.constant 1 : index
    %c0_464 = arith.constant 0 : index
    %c0_465 = arith.constant 0 : index
    %691 = vector.load %arg19[%c1_463, %c0_464, %c0_465] : memref<9x8x8xf32, #tpu.memory_space<vmem>>, vector<1x8x8xf32>
    %692 = vector.shape_cast %691 : vector<1x8x8xf32> to vector<8x8xf32>
    %cst_466 = arith.constant dense<0.000000e+00> : vector<8x384xf32>
    %693 = tpu.matmul %692, %690, %cst_466 {dimension_numbers = #tpu.dot_dimension_numbers<[1], [0], [0], [1], [0, 0, 1, 1], [], []>} : vector<8x8xf32>, vector<8x384xf32>, vector<8x384xf32> -> vector<8x384xf32>
    %694 = arith.addf %689, %693 : vector<8x384xf32>
    %c15_i32_467 = arith.constant 15 : i32
    %695 = tpu.dynamic_rotate %678 by %c15_i32_467 dim 1 : vector<8x384xf32>, i32 -> vector<8x384xf32>
    %696 = vector.broadcast %2 : vector<1x384xf32> to vector<8x384xf32>
    %697 = arith.mulf %695, %696 : vector<8x384xf32>
    %c2_468 = arith.constant 2 : index
    %c0_469 = arith.constant 0 : index
    %c0_470 = arith.constant 0 : index
    %698 = vector.load %arg19[%c2_468, %c0_469, %c0_470] : memref<9x8x8xf32, #tpu.memory_space<vmem>>, vector<1x8x8xf32>
    %699 = vector.shape_cast %698 : vector<1x8x8xf32> to vector<8x8xf32>
    %cst_471 = arith.constant dense<0.000000e+00> : vector<8x384xf32>
    %700 = tpu.matmul %699, %697, %cst_471 {dimension_numbers = #tpu.dot_dimension_numbers<[1], [0], [0], [1], [0, 0, 1, 1], [], []>} : vector<8x8xf32>, vector<8x384xf32>, vector<8x384xf32> -> vector<8x384xf32>
    %701 = arith.addf %694, %700 : vector<8x384xf32>
    %c1_i32_472 = arith.constant 1 : i32
    %702 = tpu.dynamic_rotate %678 by %c1_i32_472 dim 1 : vector<8x384xf32>, i32 -> vector<8x384xf32>
    %703 = vector.broadcast %1 : vector<1x384xf32> to vector<8x384xf32>
    %704 = arith.mulf %702, %703 : vector<8x384xf32>
    %c3_473 = arith.constant 3 : index
    %c0_474 = arith.constant 0 : index
    %c0_475 = arith.constant 0 : index
    %705 = vector.load %arg19[%c3_473, %c0_474, %c0_475] : memref<9x8x8xf32, #tpu.memory_space<vmem>>, vector<1x8x8xf32>
    %706 = vector.shape_cast %705 : vector<1x8x8xf32> to vector<8x8xf32>
    %cst_476 = arith.constant dense<0.000000e+00> : vector<8x384xf32>
    %707 = tpu.matmul %706, %704, %cst_476 {dimension_numbers = #tpu.dot_dimension_numbers<[1], [0], [0], [1], [0, 0, 1, 1], [], []>} : vector<8x8xf32>, vector<8x384xf32>, vector<8x384xf32> -> vector<8x384xf32>
    %708 = arith.addf %701, %707 : vector<8x384xf32>
    %c4_477 = arith.constant 4 : index
    %c0_478 = arith.constant 0 : index
    %c0_479 = arith.constant 0 : index
    %709 = vector.load %arg19[%c4_477, %c0_478, %c0_479] : memref<9x8x8xf32, #tpu.memory_space<vmem>>, vector<1x8x8xf32>
    %710 = vector.shape_cast %709 : vector<1x8x8xf32> to vector<8x8xf32>
    %cst_480 = arith.constant dense<0.000000e+00> : vector<8x384xf32>
    %711 = tpu.matmul %710, %678, %cst_480 {dimension_numbers = #tpu.dot_dimension_numbers<[1], [0], [0], [1], [0, 0, 1, 1], [], []>} : vector<8x8xf32>, vector<8x384xf32>, vector<8x384xf32> -> vector<8x384xf32>
    %712 = arith.addf %708, %711 : vector<8x384xf32>
    %c383_i32_481 = arith.constant 383 : i32
    %713 = tpu.dynamic_rotate %678 by %c383_i32_481 dim 1 : vector<8x384xf32>, i32 -> vector<8x384xf32>
    %714 = vector.broadcast %2 : vector<1x384xf32> to vector<8x384xf32>
    %715 = arith.mulf %713, %714 : vector<8x384xf32>
    %c5_482 = arith.constant 5 : index
    %c0_483 = arith.constant 0 : index
    %c0_484 = arith.constant 0 : index
    %716 = vector.load %arg19[%c5_482, %c0_483, %c0_484] : memref<9x8x8xf32, #tpu.memory_space<vmem>>, vector<1x8x8xf32>
    %717 = vector.shape_cast %716 : vector<1x8x8xf32> to vector<8x8xf32>
    %cst_485 = arith.constant dense<0.000000e+00> : vector<8x384xf32>
    %718 = tpu.matmul %717, %715, %cst_485 {dimension_numbers = #tpu.dot_dimension_numbers<[1], [0], [0], [1], [0, 0, 1, 1], [], []>} : vector<8x8xf32>, vector<8x384xf32>, vector<8x384xf32> -> vector<8x384xf32>
    %719 = arith.addf %712, %718 : vector<8x384xf32>
    %c369_i32_486 = arith.constant 369 : i32
    %720 = tpu.dynamic_rotate %678 by %c369_i32_486 dim 1 : vector<8x384xf32>, i32 -> vector<8x384xf32>
    %721 = vector.broadcast %1 : vector<1x384xf32> to vector<8x384xf32>
    %722 = arith.mulf %720, %721 : vector<8x384xf32>
    %c6_487 = arith.constant 6 : index
    %c0_488 = arith.constant 0 : index
    %c0_489 = arith.constant 0 : index
    %723 = vector.load %arg19[%c6_487, %c0_488, %c0_489] : memref<9x8x8xf32, #tpu.memory_space<vmem>>, vector<1x8x8xf32>
    %724 = vector.shape_cast %723 : vector<1x8x8xf32> to vector<8x8xf32>
    %cst_490 = arith.constant dense<0.000000e+00> : vector<8x384xf32>
    %725 = tpu.matmul %724, %722, %cst_490 {dimension_numbers = #tpu.dot_dimension_numbers<[1], [0], [0], [1], [0, 0, 1, 1], [], []>} : vector<8x8xf32>, vector<8x384xf32>, vector<8x384xf32> -> vector<8x384xf32>
    %726 = arith.addf %719, %725 : vector<8x384xf32>
    %c368_i32_491 = arith.constant 368 : i32
    %727 = tpu.dynamic_rotate %678 by %c368_i32_491 dim 1 : vector<8x384xf32>, i32 -> vector<8x384xf32>
    %c7_492 = arith.constant 7 : index
    %c0_493 = arith.constant 0 : index
    %c0_494 = arith.constant 0 : index
    %728 = vector.load %arg19[%c7_492, %c0_493, %c0_494] : memref<9x8x8xf32, #tpu.memory_space<vmem>>, vector<1x8x8xf32>
    %729 = vector.shape_cast %728 : vector<1x8x8xf32> to vector<8x8xf32>
    %cst_495 = arith.constant dense<0.000000e+00> : vector<8x384xf32>
    %730 = tpu.matmul %729, %727, %cst_495 {dimension_numbers = #tpu.dot_dimension_numbers<[1], [0], [0], [1], [0, 0, 1, 1], [], []>} : vector<8x8xf32>, vector<8x384xf32>, vector<8x384xf32> -> vector<8x384xf32>
    %731 = arith.addf %726, %730 : vector<8x384xf32>
    %c367_i32_496 = arith.constant 367 : i32
    %732 = tpu.dynamic_rotate %678 by %c367_i32_496 dim 1 : vector<8x384xf32>, i32 -> vector<8x384xf32>
    %733 = vector.broadcast %2 : vector<1x384xf32> to vector<8x384xf32>
    %734 = arith.mulf %732, %733 : vector<8x384xf32>
    %c8_497 = arith.constant 8 : index
    %c0_498 = arith.constant 0 : index
    %c0_499 = arith.constant 0 : index
    %735 = vector.load %arg19[%c8_497, %c0_498, %c0_499] : memref<9x8x8xf32, #tpu.memory_space<vmem>>, vector<1x8x8xf32>
    %736 = vector.shape_cast %735 : vector<1x8x8xf32> to vector<8x8xf32>
    %cst_500 = arith.constant dense<0.000000e+00> : vector<8x384xf32>
    %737 = tpu.matmul %736, %734, %cst_500 {dimension_numbers = #tpu.dot_dimension_numbers<[1], [0], [0], [1], [0, 0, 1, 1], [], []>} : vector<8x8xf32>, vector<8x384xf32>, vector<8x384xf32> -> vector<8x384xf32>
    %738 = arith.addf %731, %737 : vector<8x384xf32>
    %739 = vector.extract_strided_slice %738 {offsets = [0, 0], sizes = [4, 384], strides = [1, 1]} : vector<8x384xf32> to vector<4x384xf32>
    %740 = vector.extract_strided_slice %738 {offsets = [4, 0], sizes = [4, 384], strides = [1, 1]} : vector<8x384xf32> to vector<4x384xf32>
    %cst_501 = arith.constant 2.000000e-01 : f32
    %741 = vector.broadcast %cst_501 : f32 to vector<4x384xf32>
    %742 = arith.mulf %739, %741 : vector<4x384xf32>
    %cst_502 = arith.constant 0.000000e+00 : f32
    %743 = vector.broadcast %cst_502 : f32 to vector<4x384xf32>
    %744 = arith.cmpf olt, %742, %743 : vector<4x384xf32>
    %cst_503 = arith.constant -1.000000e+00 : f32
    %cst_504 = arith.constant 1.000000e+00 : f32
    %745 = vector.broadcast %cst_503 : f32 to vector<4x384xf32>
    %746 = vector.broadcast %cst_504 : f32 to vector<4x384xf32>
    %747 = arith.select %744, %745, %746 : vector<4x384xi1>, vector<4x384xf32>
    %748 = math.absf %742 : vector<4x384xf32>
    %cst_505 = arith.constant 2.41421366 : f32
    %749 = vector.broadcast %cst_505 : f32 to vector<4x384xf32>
    %750 = arith.cmpf ogt, %748, %749 : vector<4x384xf32>
    %cst_506 = arith.constant 0.414213568 : f32
    %751 = vector.broadcast %cst_506 : f32 to vector<4x384xf32>
    %752 = arith.cmpf ogt, %748, %751 : vector<4x384xf32>
    %cst_507 = arith.constant dense<true> : vector<4x384xi1>
    %753 = arith.xori %750, %cst_507 : vector<4x384xi1>
    %754 = arith.andi %752, %753 : vector<4x384xi1>
    %cst_508 = arith.constant 0.000000e+00 : f32
    %755 = vector.broadcast %cst_508 : f32 to vector<4x384xf32>
    %756 = arith.cmpf ogt, %748, %755 : vector<4x384xf32>
    %cst_509 = arith.constant 1.000000e+00 : f32
    %757 = vector.broadcast %cst_509 : f32 to vector<4x384xf32>
    %758 = arith.select %756, %748, %757 : vector<4x384xi1>, vector<4x384xf32>
    %cst_510 = arith.constant -1.000000e+00 : f32
    %759 = vector.broadcast %cst_510 : f32 to vector<4x384xf32>
    %760 = arith.divf %759, %758 : vector<4x384xf32>
    %cst_511 = arith.constant 1.000000e+00 : f32
    %761 = vector.broadcast %cst_511 : f32 to vector<4x384xf32>
    %762 = arith.subf %748, %761 : vector<4x384xf32>
    %cst_512 = arith.constant 1.000000e+00 : f32
    %763 = vector.broadcast %cst_512 : f32 to vector<4x384xf32>
    %764 = arith.addf %748, %763 : vector<4x384xf32>
    %765 = arith.divf %762, %764 : vector<4x384xf32>
    %766 = arith.select %754, %765, %748 : vector<4x384xi1>, vector<4x384xf32>
    %767 = arith.select %750, %760, %766 : vector<4x384xi1>, vector<4x384xf32>
    %cst_513 = arith.constant 0.785398185 : f32
    %cst_514 = arith.constant 0.000000e+00 : f32
    %768 = vector.broadcast %cst_513 : f32 to vector<4x384xf32>
    %769 = vector.broadcast %cst_514 : f32 to vector<4x384xf32>
    %770 = arith.select %754, %768, %769 : vector<4x384xi1>, vector<4x384xf32>
    %cst_515 = arith.constant 1.57079637 : f32
    %771 = vector.broadcast %cst_515 : f32 to vector<4x384xf32>
    %772 = arith.select %750, %771, %770 : vector<4x384xi1>, vector<4x384xf32>
    %773 = arith.mulf %767, %767 : vector<4x384xf32>
    %cst_516 = arith.constant 0.0805374458 : f32
    %774 = vector.broadcast %cst_516 : f32 to vector<4x384xf32>
    %775 = arith.mulf %774, %773 : vector<4x384xf32>
    %cst_517 = arith.constant 0.138776854 : f32
    %776 = vector.broadcast %cst_517 : f32 to vector<4x384xf32>
    %777 = arith.subf %775, %776 : vector<4x384xf32>
    %778 = arith.mulf %777, %773 : vector<4x384xf32>
    %cst_518 = arith.constant 0.199777111 : f32
    %779 = vector.broadcast %cst_518 : f32 to vector<4x384xf32>
    %780 = arith.addf %778, %779 : vector<4x384xf32>
    %781 = arith.mulf %780, %773 : vector<4x384xf32>
    %cst_519 = arith.constant 0.333329499 : f32
    %782 = vector.broadcast %cst_519 : f32 to vector<4x384xf32>
    %783 = arith.subf %781, %782 : vector<4x384xf32>
    %784 = arith.mulf %783, %773 : vector<4x384xf32>
    %785 = arith.mulf %784, %767 : vector<4x384xf32>
    %786 = arith.addf %785, %767 : vector<4x384xf32>
    %787 = arith.addf %772, %786 : vector<4x384xf32>
    %788 = arith.mulf %747, %787 : vector<4x384xf32>
    %cst_520 = arith.constant 3.180000e+00 : f32
    %789 = vector.broadcast %cst_520 : f32 to vector<4x384xf32>
    %790 = arith.mulf %789, %788 : vector<4x384xf32>
    %791 = math.exp %790 : vector<4x384xf32>
    %792 = arith.mulf %791, %315 : vector<4x384xf32>
    %793 = arith.addf %792, %740 : vector<4x384xf32>
    %794 = vector.broadcast %3 : vector<1x384xf32> to vector<4x384xf32>
    %795 = arith.mulf %793, %794 : vector<4x384xf32>
    %c0_521 = arith.constant 0 : index
    %c0_522 = arith.constant 0 : index
    %c0_523 = arith.constant 0 : index
    %796 = vector.load %arg26[%c0_521, %c0_522, %c0_523] : memref<1x8x384xf32, #tpu.memory_space<vmem>>, vector<1x4x384xf32>
    %797 = vector.shape_cast %796 : vector<1x4x384xf32> to vector<4x384xf32>
    %798 = vector.shape_cast %555 : vector<4x384xf32> to vector<1x4x384xf32>
    tpu.vector_store %arg26[%c0_521, %c0_522, %c0_523], %798 {strides = array<i32>} : memref<1x8x384xf32, #tpu.memory_space<vmem>>, vector<1x4x384xf32>,
    %c0_524 = arith.constant 0 : index
    %c4_525 = arith.constant 4 : index
    %c0_526 = arith.constant 0 : index
    %799 = vector.load %arg26[%c0_524, %c4_525, %c0_526] : memref<1x8x384xf32, #tpu.memory_space<vmem>>, vector<1x4x384xf32>
    %800 = vector.shape_cast %799 : vector<1x4x384xf32> to vector<4x384xf32>
    %801 = vector.shape_cast %795 : vector<4x384xf32> to vector<1x4x384xf32>
    tpu.vector_store %arg26[%c0_524, %c4_525, %c0_526], %801 {strides = array<i32>} : memref<1x8x384xf32, #tpu.memory_space<vmem>>, vector<1x4x384xf32>,
    return
  }
  func.func @transform_0(%arg0: i32) -> (i32, i32, i32) {
    %c0_i32 = arith.constant 0 : i32
    %c0_i32_0 = arith.constant 0 : i32
    %c0_i32_1 = arith.constant 0 : i32
    return %arg0, %c0_i32, %c0_i32_0 : i32, i32, i32
  }
  func.func @transform_1(%arg0: i32) -> (i32, i32, i32) {
    %c0_i32 = arith.constant 0 : i32
    %c0_i32_0 = arith.constant 0 : i32
    %c0_i32_1 = arith.constant 0 : i32
    return %arg0, %c0_i32, %c0_i32_0 : i32, i32, i32
  }
  func.func @transform_2(%arg0: i32) -> (i32, i32) {
    %c0_i32 = arith.constant 0 : i32
    %c0_i32_0 = arith.constant 0 : i32
    %c0_i32_1 = arith.constant 0 : i32
    return %c0_i32, %c0_i32_0 : i32, i32
  }
  func.func @transform_3(%arg0: i32) -> (i32, i32, i32) {
    %c0_i32 = arith.constant 0 : i32
    %c0_i32_0 = arith.constant 0 : i32
    %c0_i32_1 = arith.constant 0 : i32
    %c0_i32_2 = arith.constant 0 : i32
    return %c0_i32, %c0_i32_0, %c0_i32_1 : i32, i32, i32
  }
  func.func @transform_4(%arg0: i32) -> (i32, i32) {
    %c0_i32 = arith.constant 0 : i32
    %c0_i32_0 = arith.constant 0 : i32
    %c0_i32_1 = arith.constant 0 : i32
    return %c0_i32, %c0_i32_0 : i32, i32
  }
  func.func @transform_5(%arg0: i32) -> (i32, i32) {
    %c0_i32 = arith.constant 0 : i32
    %c0_i32_0 = arith.constant 0 : i32
    %c0_i32_1 = arith.constant 0 : i32
    return %c0_i32, %c0_i32_0 : i32, i32
  }
  func.func @transform_6(%arg0: i32) -> (i32, i32) {
    %c0_i32 = arith.constant 0 : i32
    %c0_i32_0 = arith.constant 0 : i32
    %c0_i32_1 = arith.constant 0 : i32
    return %c0_i32, %c0_i32_0 : i32, i32
  }
  func.func @transform_7(%arg0: i32) -> (i32, i32, i32) {
    %c0_i32 = arith.constant 0 : i32
    %c0_i32_0 = arith.constant 0 : i32
    %c0_i32_1 = arith.constant 0 : i32
    %c0_i32_2 = arith.constant 0 : i32
    return %c0_i32, %c0_i32_0, %c0_i32_1 : i32, i32, i32
  }
  func.func @transform_8(%arg0: i32) -> (i32, i32) {
    %c0_i32 = arith.constant 0 : i32
    %c0_i32_0 = arith.constant 0 : i32
    %c0_i32_1 = arith.constant 0 : i32
    return %c0_i32, %c0_i32_0 : i32, i32
  }
  func.func @transform_9(%arg0: i32) -> (i32, i32) {
    %c0_i32 = arith.constant 0 : i32
    %c0_i32_0 = arith.constant 0 : i32
    %c0_i32_1 = arith.constant 0 : i32
    return %c0_i32, %c0_i32_0 : i32, i32
  }
  func.func @transform_10(%arg0: i32) -> (i32, i32) {
    %c0_i32 = arith.constant 0 : i32
    %c0_i32_0 = arith.constant 0 : i32
    %c0_i32_1 = arith.constant 0 : i32
    return %c0_i32, %c0_i32_0 : i32, i32
  }
  func.func @transform_11(%arg0: i32) -> (i32, i32, i32) {
    %c0_i32 = arith.constant 0 : i32
    %c0_i32_0 = arith.constant 0 : i32
    %c0_i32_1 = arith.constant 0 : i32
    %c0_i32_2 = arith.constant 0 : i32
    return %c0_i32, %c0_i32_0, %c0_i32_1 : i32, i32, i32
  }
  func.func @transform_12(%arg0: i32) -> (i32, i32) {
    %c0_i32 = arith.constant 0 : i32
    %c0_i32_0 = arith.constant 0 : i32
    %c0_i32_1 = arith.constant 0 : i32
    return %c0_i32, %c0_i32_0 : i32, i32
  }
  func.func @transform_13(%arg0: i32) -> (i32, i32, i32) {
    %c0_i32 = arith.constant 0 : i32
    %c0_i32_0 = arith.constant 0 : i32
    %c0_i32_1 = arith.constant 0 : i32
    %c0_i32_2 = arith.constant 0 : i32
    return %c0_i32, %c0_i32_0, %c0_i32_1 : i32, i32, i32
  }
  func.func @transform_14(%arg0: i32) -> (i32, i32) {
    %c0_i32 = arith.constant 0 : i32
    %c0_i32_0 = arith.constant 0 : i32
    %c0_i32_1 = arith.constant 0 : i32
    return %c0_i32, %c0_i32_0 : i32, i32
  }
  func.func @transform_15(%arg0: i32) -> (i32, i32, i32) {
    %c0_i32 = arith.constant 0 : i32
    %c0_i32_0 = arith.constant 0 : i32
    %c0_i32_1 = arith.constant 0 : i32
    %c0_i32_2 = arith.constant 0 : i32
    return %c0_i32, %c0_i32_0, %c0_i32_1 : i32, i32, i32
  }
  func.func @transform_16(%arg0: i32) -> (i32, i32, i32) {
    %c0_i32 = arith.constant 0 : i32
    %c0_i32_0 = arith.constant 0 : i32
    %c0_i32_1 = arith.constant 0 : i32
    %c0_i32_2 = arith.constant 0 : i32
    return %c0_i32, %c0_i32_0, %c0_i32_1 : i32, i32, i32
  }
  func.func @transform_17(%arg0: i32) -> (i32, i32) {
    %c0_i32 = arith.constant 0 : i32
    %c0_i32_0 = arith.constant 0 : i32
    %c0_i32_1 = arith.constant 0 : i32
    return %c0_i32, %c0_i32_0 : i32, i32
  }
  func.func @transform_18(%arg0: i32) -> (i32, i32, i32) {
    %c0_i32 = arith.constant 0 : i32
    %c0_i32_0 = arith.constant 0 : i32
    %c0_i32_1 = arith.constant 0 : i32
    %c0_i32_2 = arith.constant 0 : i32
    return %c0_i32, %c0_i32_0, %c0_i32_1 : i32, i32, i32
  }
  func.func @transform_19(%arg0: i32) -> (i32, i32) {
    %c0_i32 = arith.constant 0 : i32
    %c0_i32_0 = arith.constant 0 : i32
    %c0_i32_1 = arith.constant 0 : i32
    return %c0_i32, %c0_i32_0 : i32, i32
  }
  func.func @transform_20(%arg0: i32) -> (i32, i32, i32) {
    %c0_i32 = arith.constant 0 : i32
    %c0_i32_0 = arith.constant 0 : i32
    %c0_i32_1 = arith.constant 0 : i32
    %c0_i32_2 = arith.constant 0 : i32
    return %c0_i32, %c0_i32_0, %c0_i32_1 : i32, i32, i32
  }
  func.func @transform_21(%arg0: i32) -> (i32, i32, i32) {
    %c0_i32 = arith.constant 0 : i32
    %c0_i32_0 = arith.constant 0 : i32
    %c0_i32_1 = arith.constant 0 : i32
    %c0_i32_2 = arith.constant 0 : i32
    return %c0_i32, %c0_i32_0, %c0_i32_1 : i32, i32, i32
  }
  func.func @transform_22(%arg0: i32) -> (i32, i32) {
    %c0_i32 = arith.constant 0 : i32
    %c0_i32_0 = arith.constant 0 : i32
    %c0_i32_1 = arith.constant 0 : i32
    return %c0_i32, %c0_i32_0 : i32, i32
  }
  func.func @transform_23(%arg0: i32) -> (i32, i32, i32) {
    %c0_i32 = arith.constant 0 : i32
    %c0_i32_0 = arith.constant 0 : i32
    %c0_i32_1 = arith.constant 0 : i32
    %c0_i32_2 = arith.constant 0 : i32
    return %c0_i32, %c0_i32_0, %c0_i32_1 : i32, i32, i32
  }
  func.func @transform_24(%arg0: i32) -> (i32, i32) {
    %c0_i32 = arith.constant 0 : i32
    %c0_i32_0 = arith.constant 0 : i32
    %c0_i32_1 = arith.constant 0 : i32
    return %c0_i32, %c0_i32_0 : i32, i32
  }
  func.func @transform_25(%arg0: i32) -> (i32, i32, i32) {
    %c0_i32 = arith.constant 0 : i32
    %c0_i32_0 = arith.constant 0 : i32
    %c0_i32_1 = arith.constant 0 : i32
    return %arg0, %c0_i32, %c0_i32_0 : i32, i32, i32
  }
}

</mosaic_0001>

<bundles_post_ra>
// kernel: couple_layer_forward.1
= control target key start
LH: loop header
LB: loop body
LE: loop exit
PB: predicated region body
PF: predicated region fallthrough
CT: control target
= control target key end

     0   :  { %s10050_s29 = smov 0   ;;  %s12515_s0 = inlined_call_operand.vmem [shape: f32[2,8,384], index: 0, kind: input, shape index: {}]   ;;  %s12516_s1 = inlined_call_operand.vmem [shape: f32[2,4,384], index: 1, kind: input, shape index: {}]   ;;  %s12517_s2 = inlined_call_operand.vmem [shape: f32[3,384], index: 2, kind: input, shape index: {}]   ;;  %s12518_s3 = inlined_call_operand.vmem [shape: f32[9,4,4], index: 3, kind: input, shape index: {}]   ;;  %s12519_s4 = inlined_call_operand.vmem [shape: f32[4,1], index: 4, kind: input, shape index: {}]   ;;  %s12520_s5 = inlined_call_operand.vmem [shape: f32[4,4], index: 5, kind: input, shape index: {}]   ;;  %s12521_s6 = inlined_call_operand.vmem [shape: f32[4,1], index: 6, kind: input, shape index: {}]   ;;  %s12522_s7 = inlined_call_operand.vmem [shape: f32[9,4,4], index: 7, kind: input, shape index: {}]   ;;  %s12523_s8 = inlined_call_operand.vmem [shape: f32[4,1], index: 8, kind: input, shape index: {}]   ;;  %s12524_s9 = inlined_call_operand.vmem [shape: f32[4,1], index: 9, kind: input, shape index: {}]   ;;  %s12525_s10 = inlined_call_operand.vmem [shape: f32[4,1], index: 10, kind: input, shape index: {}]   ;;  %s12526_s11 = inlined_call_operand.vmem [shape: f32[9,4,4], index: 11, kind: input, shape index: {}]   ;;  %s12527_s12 = inlined_call_operand.vmem [shape: f32[4,1], index: 12, kind: input, shape index: {}]   ;;  %s12528_s13 = inlined_call_operand.vmem [shape: f32[9,4,4], index: 13, kind: input, shape index: {}]   ;;  %s12529_s14 = inlined_call_operand.vmem [shape: f32[4,1], index: 14, kind: input, shape index: {}]   ;;  %s12530_s15 = inlined_call_operand.vmem [shape: f32[9,8,4], index: 15, kind: input, shape index: {}]   ;;  %s12531_s16 = inlined_call_operand.vmem [shape: f32[9,8,4], index: 16, kind: input, shape index: {}]   ;;  %s12532_s17 = inlined_call_operand.vmem [shape: f32[8,1], index: 17, kind: input, shape index: {}]   ;;  %s12533_s18 = inlined_call_operand.vmem [shape: f32[9,8,8], index: 18, kind: input, shape index: {}]   ;;  %s12534_s19 = inlined_call_operand.vmem [shape: f32[8,1], index: 19, kind: input, shape index: {}]   ;;  %s12535_s20 = inlined_call_operand.vmem [shape: f32[9,8,4], index: 20, kind: input, shape index: {}]   ;;  %s12536_s21 = inlined_call_operand.vmem [shape: f32[9,8,4], index: 21, kind: input, shape index: {}]   ;;  %s12537_s22 = inlined_call_operand.vmem [shape: f32[8,1], index: 22, kind: input, shape index: {}]   ;;  %s12538_s23 = inlined_call_operand.vmem [shape: f32[9,8,8], index: 23, kind: input, shape index: {}]   ;;  %s12539_s24 = inlined_call_operand.vmem [shape: f32[8,1], index: 24, kind: input, shape index: {}]   ;;  %s12540_s25 = inlined_call_operand.vmem [shape: f32[2,8,384], index: 25, kind: output, shape index: {}]  }
   0x1   :  { %12598 = sst [smem:[#allocation30_spill]] %s12515_s0 }
   0x2   :  { %12599 = sst [smem:[#allocation31_spill]] %s12516_s1 }
   0x3   :  { %12600 = sst [smem:[#allocation32_spill]] %s12517_s2 }
   0x4   :  { %12601 = sst [smem:[#allocation33_spill]] %s12518_s3 }
   0x5   :  { %12602 = sst [smem:[#allocation34_spill]] %s12519_s4 }
   0x6   :  { %12603 = sst [smem:[#allocation35_spill]] %s12520_s5 }
   0x7   :  { %12604 = sst [smem:[#allocation36_spill]] %s12521_s6 }
   0x8   :  { %12605 = sst [smem:[#allocation37_spill]] %s12522_s7 }
   0x9   :  { %12606 = sst [smem:[#allocation38_spill]] %s12523_s8 }
   0xa   :  { %12607 = sst [smem:[#allocation39_spill]] %s12524_s9 }
   0xb   :  { %12608 = sst [smem:[#allocation40_spill]] %s12525_s10 }
   0xc   :  { %12609 = sst [smem:[#allocation41_spill]] %s12526_s11 }
   0xd   :  { %12610 = sst [smem:[#allocation42_spill]] %s12527_s12 }
   0xe   :  { %12611 = sst [smem:[#allocation43_spill]] %s12529_s14 }
   0xf LB: > { %s9202_s2 = sadd.s32 4294967295, %s9906_s29   ;;  %p9206_p0 = scmp.ge.s32.totalorder %s9906_s29, 1  ;;  %s9906_s29 = sphi %s10050_s29, %s35_s29  }
  0x10   : > { %p697_p1 = scmp.lt.s32.totalorder %s9906_s29, 3 }
  0x12   : > { %p698_p2 = pnand %p9206_p0, %p697_p1 }
  0x14   : > { %701 = sbr.rel (%p698_p2) target bundleno = 2978 (0xba2), region = 120 }
  0x19   : > { %p770_p3 = scmp.lt.s32.totalorder %s9202_s2, 1  ;;  %s12612_s3 = sld [smem:[#allocation31_spill]]  ;;  %v813_v30 = vlaneseq  ;;  %v9916_v40 = vmov 0   ;;  %vm12597_vm2 = vcmask 1043456   ;;  %vm834_vm3 = vcmask 31744  }
  0x1a   : > { %s12558_s1 = smov 17   ;;  %s12554_s8 = smov 16   ;;  %9824 = vset.pattern.permute.xlu0 %v9916_v40  ;;  %9825 = vset.pattern.permute.xlu2 %v9916_v40 }
  0x1b   : > { %s12847_s2 = smov (!%p770_p3, %s9202_s2), 1  ;;  %s12556_s27 = smov 15   ;;  %v10122_v33 = vand.u32 127, %v813_v30  ;;  %9826 = vset.pattern.permute.xlu1 %v9916_v40 }
  0x1c   : > { %s9803_s6 = smul.u32 12, %s12847_s2  ;;  %s12552_s4 = smov 1  }
  0x1d   : > { %s12550_s28 = smov 127   ;;  %s12548_s9 = smov 113   ;;  %vm815_vm0 = vcmp.lt.s32.totalorder %v10122_v33, 17  ;;  %vm12596_vm1 = vcmp.lt.s32.totalorder %v10122_v33, 16  ;;  %vm12595_vm4 = vcmp.lt.s32.totalorder %v10122_v33, 15  ;;  %vm12594_vm5 = vcmp.lt.s32.totalorder %v10122_v33, 1 }
  0x1e   : > { %s12546_s5 = smov 112   ;;  %s12544_s0 = smov 111   ;;  %vm12593_vm6 = vcmp.lt.s32.totalorder %v10122_v33, 127  ;;  %vm12592_vm7 = vcmp.lt.s32.totalorder %v10122_v33, 113  ;;  %vm12562_vm8 = vcmp.lt.s32.totalorder %v10122_v33, 112  ;;  %vm12561_vm9 = vcmp.lt.s32.totalorder %v10122_v33, 111 }
  0x1f   : > { %s779_s26 = scalar_lea.vmem %s12612_s3, %s9803_s6  ;;  %s12613_s7 = sld [smem:[#allocation32_spill]] }
  0x20   : > { %v10064_v0 = vld [vmem:[%s779_s26] sm:$0xff]  ;;  %v10066_v1 = vld [vmem:[%s779_s26 + $0x8] sm:$0xf]  ;;  %s12615_s26 = sld [smem:[#allocation33_spill]]  ;;  %s12616_s6 = smov 111  }
  0x21   : > { %798 = vst [vmem:[#allocation1] ss:$2 sm:$0xff] %v10064_v0  ;;  %s12617_s3 = sld [smem:[#allocation35_spill]] }
  0x22   : > { %800 = vst [vmem:[#allocation1 + $0x10] ss:$2 sm:$0xff] %v10066_v1  ;;  %s12618_s30 = sld [smem:[#allocation37_spill]] }
  0x23   : > { %s12621_s10 = sld [smem:[#allocation40_spill]] }
  0x24   : > { %s12628_s12 = sld [smem:[#allocation42_spill]] }
  0x25   : > { %v10119_v31 = vld [vmem:[%s12613_s7] sm:$0x77]  ;;  %v10132_v36 = vld [vmem:[%s12613_s7 + $0x8] sm:$0x7]  ;;  %s12629_s11 = sld [smem:[#allocation41_spill]] }
  0x26   : > { %v822_v34 = vperm.slane %v10119_v31, 4  ;;  %v821_v45 = vperm.slane %v10119_v31, 0  ;;  %v823_v46 = vperm.slane %v10132_v36, 0  ;;  %v833_v47 = vld [vmem:[%s12615_s26] sm:$0xf]  ;;  %v1027_v58 = vperm.slane %v10119_v31, 5 }
  0x27   : > { %v9216_v52 = vld [vmem:[%s12615_s26 + $0x4] sm:$0xf]  ;;  %v1028_v59 = vperm.slane %v10132_v36, 1  ;;  %v1026_v61 = vperm.slane %v10119_v31, 1  ;;  %s12632_s14 = sld [smem:[#allocation43_spill]] }
  0x28   : > { %v802_v2 = vld.sshfl [vmem:[#allocation1 + $0x8] sm:$0xff pattern:$0x75316420]  ;;  %v801_v3 = vld.sshfl [vmem:[#allocation1] sm:$0xff pattern:$0x75316420] }
  0x29   : > { %809 = vrot.lane.b32.xlu0 %v802_v2, %s12558_s1  ;;  %807 = vrot.lane.b32.xlu1 %v801_v3, %s12558_s1  ;;  %911 = vst [vmem:[#allocation1] ss:$2 sm:$0xff] %v10064_v0  ;;  %v803_v4 = vld.sshfl [vmem:[#allocation1 + $0x10] sm:$0xff pattern:$0x75316420]  ;;  %v10126_v35 = vperm.slane %v822_v34, 0 }
  0x2a   : > { %913 = vst [vmem:[#allocation1 + $0x10] ss:$2 sm:$0xff] %v10066_v1  ;;  %v10149_v48 = vperm.slane %v821_v45, 0  ;;  %v10151_v49 = vperm.slane %v823_v46, 0  ;;  %v10178_v62 = vperm.slane %v1027_v58, 1  ;;  %v10181_v63 = vperm.slane %v1028_v59, 1 }
  0x30   : > { %v914_v5 = vld.sshfl [vmem:[#allocation1] sm:$0xff pattern:$0x75316420]  ;;  %v915_v6 = vld.sshfl [vmem:[#allocation1 + $0x8] sm:$0xff pattern:$0x75316420] }
  0x31   : > { %811 = vrot.lane.b32.xlu0 %v803_v4, %s12558_s1  ;;  %920 = vrot.lane.b32.xlu1 %v914_v5, %s12554_s8  ;;  %1007 = vst [vmem:[#allocation1] ss:$2 sm:$0xff] %v10064_v0  ;;  %v916_v7 = vld.sshfl [vmem:[#allocation1 + $0x10] sm:$0xff pattern:$0x75316420] }
  0x32   : > { %924 = vrot.lane.b32.xlu2 %v916_v7, %s12554_s8  ;;  %1009 = vst [vmem:[#allocation1 + $0x10] ss:$2 sm:$0xff] %v10066_v1 }
  0x38   : > { %v1011_v8 = vld.sshfl [vmem:[#allocation1 + $0x8] sm:$0xff pattern:$0x75316420]  ;;  %v1010_v9 = vld.sshfl [vmem:[#allocation1] sm:$0xff pattern:$0x75316420] }
  0x39   : > { %v1012_v10 = vld.sshfl [vmem:[#allocation1 + $0x10] sm:$0xff pattern:$0x75316420]  ;;  %1018 = vrot.lane.b32.xlu1 %v1011_v8, %s12556_s27  ;;  %1115 = vst [vmem:[#allocation1] ss:$2 sm:$0xff] %v10064_v0 }
  0x3a   : > { %1117 = vst [vmem:[#allocation1 + $0x10] ss:$2 sm:$0xff] %v10066_v1  ;;  %1020 = vrot.lane.b32.xlu0 %v1012_v10, %s12556_s27  ;;  %1016 = vrot.lane.b32.xlu2 %v1010_v9, %s12556_s27  ;;  %v9223_v9 = vld [vmem:[%s12615_s26 + $0x8] sm:$0xf] }
  0x40   : > { %v1119_v11 = vld.sshfl [vmem:[#allocation1 + $0x8] sm:$0xff pattern:$0x75316420]  ;;  %v1118_v12 = vld.sshfl [vmem:[#allocation1] sm:$0xff pattern:$0x75316420] }
  0x41   : > { %1126 = vrot.lane.b32.xlu1 %v1119_v11, %s12552_s4  ;;  %1216 = vst [vmem:[#allocation1] ss:$2 sm:$0xff] %v10064_v0  ;;  %v1120_v13 = vld.sshfl [vmem:[#allocation1 + $0x10] sm:$0xff pattern:$0x75316420] }
  0x42   : > { %1124 = vrot.lane.b32.xlu0 %v1118_v12, %s12552_s4  ;;  %922 = vrot.lane.b32.xlu2 %v915_v6, %s12554_s8  ;;  %1218 = vst [vmem:[#allocation1 + $0x10] ss:$2 sm:$0xff] %v10066_v1 }
  0x48   : > { %v10089_v14 = vld.sshfl [vmem:[#allocation1] sm:$0xff pattern:$0x75316420]  ;;  %v10091_v15 = vld.sshfl [vmem:[#allocation1 + $0x8] sm:$0xff pattern:$0x75316420] }
  0x49   : > { %1294 = vst [vmem:[#allocation1] ss:$2 sm:$0xff] %v10064_v0  ;;  %v10094_v16 = vld.sshfl [vmem:[#allocation1 + $0x10] sm:$0xff pattern:$0x75316420] }
  0x4a   : > { %1296 = vst [vmem:[#allocation1 + $0x10] ss:$2 sm:$0xff] %v10066_v1  ;;  %1128 = vrot.lane.b32.xlu2 %v1120_v13, %s12552_s4 }
  0x50   : > { %v1298_v17 = vld.sshfl [vmem:[#allocation1 + $0x8] sm:$0xff pattern:$0x75316420]  ;;  %v1297_v18 = vld.sshfl [vmem:[#allocation1] sm:$0xff pattern:$0x75316420] }
  0x51   : > { %1305 = vrot.lane.b32.xlu1 %v1298_v17, %s12550_s28  ;;  %1303 = vrot.lane.b32.xlu0 %v1297_v18, %s12550_s28  ;;  %1393 = vst [vmem:[#allocation1] ss:$2 sm:$0xff] %v10064_v0  ;;  %v1299_v19 = vld.sshfl [vmem:[#allocation1 + $0x10] sm:$0xff pattern:$0x75316420] }
  0x52   : > { %1395 = vst [vmem:[#allocation1 + $0x10] ss:$2 sm:$0xff] %v10066_v1 }
  0x58   : > { %v1397_v20 = vld.sshfl [vmem:[#allocation1 + $0x8] sm:$0xff pattern:$0x75316420]  ;;  %v1396_v21 = vld.sshfl [vmem:[#allocation1] sm:$0xff pattern:$0x75316420] }
  0x59   : > { %v1398_v22 = vld.sshfl [vmem:[#allocation1 + $0x10] sm:$0xff pattern:$0x75316420]  ;;  %1307 = vrot.lane.b32.xlu1 %v1299_v19, %s12550_s28  ;;  %1404 = vrot.lane.b32.xlu0 %v1397_v20, %s12548_s9  ;;  %1492 = vst [vmem:[#allocation1] ss:$2 sm:$0xff] %v10064_v0 }
  0x5a   : > { %1494 = vst [vmem:[#allocation1 + $0x10] ss:$2 sm:$0xff] %v10066_v1  ;;  %1402 = vrot.lane.b32.xlu2 %v1396_v21, %s12548_s9 }
  0x60   : > { %v1496_v23 = vld.sshfl [vmem:[#allocation1 + $0x8] sm:$0xff pattern:$0x75316420]  ;;  %v1495_v24 = vld.sshfl [vmem:[#allocation1] sm:$0xff pattern:$0x75316420] }
  0x61   : > { %v1497_v25 = vld.sshfl [vmem:[#allocation1 + $0x10] sm:$0xff pattern:$0x75316420]  ;;  %1503 = vrot.lane.b32.xlu0 %v1496_v23, %s12546_s5  ;;  %1588 = vst [vmem:[#allocation1] ss:$2 sm:$0xff] %v10064_v0  ;;  %v10183_v0 = vperm.slane %v1026_v61, 1 }
  0x62   : > { %1590 = vst [vmem:[#allocation1 + $0x10] ss:$2 sm:$0xff] %v10066_v1  ;;  %1505 = vrot.lane.b32.xlu1 %v1497_v25, %s12546_s5  ;;  %1406 = vrot.lane.b32.xlu2 %v1398_v22, %s12548_s9  ;;  %v9237_v23 = vld [vmem:[%s12615_s26 + $0x10] sm:$0xf] }
  0x68   : > { %v1591_v26 = vld.sshfl [vmem:[#allocation1] sm:$0xff pattern:$0x75316420]  ;;  %v1592_v28 = vld.sshfl [vmem:[#allocation1 + $0x8] sm:$0xff pattern:$0x75316420] }
  0x69   : > { %v1593_v27 = vld.sshfl [vmem:[#allocation1 + $0x10] sm:$0xff pattern:$0x75316420]  ;;  %1597 = vrot.lane.b32.xlu0 %v1591_v26, %s12544_s0 }
  0x6a   : > { %1601 = vrot.lane.b32.xlu1 %v1593_v27, %s12544_s0  ;;  %1501 = vrot.lane.b32.xlu2 %v1495_v24, %s12546_s5  ;;  %v9244_v26 = vld [vmem:[%s12615_s26 + $0x14] sm:$0xf] }
  0x72   : > { %1599 = vrot.lane.b32.xlu2 %v1592_v28, %s12544_s0  ;;  %s12614_s0 = sld [smem:[#allocation34_spill]] }
  0x78   : > { %v789_v37 = vld [vmem:[%s12614_s0] sm:$0xf]  ;;  %s12624_s0 = smov 127  }
  0x79   : > { %792 = vperm.xlu0 %9824, %v789_v37  }
  0x8c   : > { %v925_v29 = vpop.permute.xlu2 %924 }
  0x94   : > { %v1017_v32 = vpop.permute.xlu2 %1016 }
  0x9b   : > { %v810_v38 = vpop.permute.xlu0 %809  ;;  %v808_v39 = vpop.permute.xlu1 %807 }
  0x9c   : > { %v923_v41 = vpop.permute.xlu2 %922  ;;  %v817_v42 = vsel %vm815_vm0, %v808_v39, %v810_v38 }
  0x9d   : > { %v831_v43 = vmul.f32 %v10126_v35, %v817_v42  ;;  %v927_v44 = vsel %vm12596_vm1, %v923_v41, %v925_v29 }
  0x9f   : > { %9212 = vmatpush.msk.msra.mxu1 %vm12597_vm2, %v831_v43 }
  0xa0   : > { %9213 = vmatmul.msk.f32.vlgmr.msra.gmra.mxu1 %vm834_vm3, %v833_v47 }
  0xa1   : > { %9221 = vmatpush.msk.msrb.mxu1 %vm12597_vm2, %v927_v44  ;;  %v9251_v44 = vld [vmem:[%s12615_s26 + $0x18] sm:$0xf] }
  0xa3   : > { %v812_v50 = vpop.permute.xlu0 %811  ;;  %v921_v51 = vpop.permute.xlu1 %920 }
  0xa4   : > { %v929_v53 = vsel %vm12596_vm1, %v925_v29, %v921_v51  ;;  %v818_v54 = vsel %vm815_vm0, %v812_v50, %v808_v39  ;;  %v816_v55 = vsel %vm815_vm0, %v810_v38, %v812_v50  ;;  %v928_v60 = vsel %vm12596_vm1, %v921_v51, %v923_v41  ;;  %v1129_v10 = vpop.permute.xlu2 %1128 }
  0xa5   : > { %9217 = vmatpush.msk.msra.mxu3 %vm12597_vm2, %v929_v53  ;;  %v830_v56 = vmul.f32 %v10149_v48, %v818_v54  ;;  %v832_v57 = vmul.f32 %v10151_v49, %v816_v55  ;;  %v9258_v54 = vld [vmem:[%s12615_s26 + $0x1c] sm:$0xf] }
  0xa6   : > { %9218 = vmatmul.msk.f32.vlgmr.msra.gmra.mxu3 %vm834_vm3, %v9216_v52 }
  0xa7   : > { %9210 = vmatpush.msk.msra.mxu0 %vm12597_vm2, %v830_v56  ;;  %9214 = vmatpush.msk.msra.mxu2 %vm12597_vm2, %v832_v57 }
  0xa8   : > { %9211 = vmatmul.msk.f32.vlgmr.msra.gmra.mxu0 %vm834_vm3, %v833_v47  ;;  %9215 = vmatmul.msk.f32.vlgmr.msra.gmra.mxu2 %vm834_vm3, %v833_v47 }
  0xa9   : > { %9219 = vmatpush.msk.msrb.mxu0 %vm12597_vm2, %v928_v60  ;;  %9222 = vmatmul.msk.f32.vlgmr.msrb.gmra.mxu1 %vm834_vm3, %v9216_v52 }
  0xab   : > { %v1019_v1 = vpop.permute.xlu1 %1018 }
  0xac   : > { %v1021_v2 = vpop.permute.xlu0 %1020  ;;  %v1024_v3 = vsel %vm12595_vm4, %v1017_v32, %v1019_v1 }
  0xad   : > { %v1025_v4 = vsel %vm12595_vm4, %v1021_v2, %v1017_v32  ;;  %v1023_v5 = vsel %vm12595_vm4, %v1019_v1, %v1021_v2  ;;  %v1036_v6 = vmul.f32 %v10178_v62, %v1024_v3  ;;  %v9265_v3 = vld [vmem:[%s12615_s26 + $0x20] sm:$0xf] }
  0xae   : > { %v1037_v7 = vmul.f32 %v10181_v63, %v1023_v5  ;;  %v1035_v8 = vmul.f32 %v10183_v0, %v1025_v4 }
  0xaf   : > { %9226 = vmatpush.msk.msrb.mxu3 %vm12597_vm2, %v1036_v6 }
  0xb0   : > { %9224 = vmatpush.msk.msrb.mxu2 %vm12597_vm2, %v1035_v8  ;;  %9220 = vmatmul.msk.f32.vlgmr.msrb.gmra.mxu0 %vm834_vm3, %v9216_v52 }
  0xb1   : > { %9225 = vmatmul.msk.f32.vlgmr.msrb.gmra.mxu2 %vm834_vm3, %v9223_v9  ;;  %9227 = vmatmul.msk.f32.vlgmr.msrb.gmra.mxu3 %vm834_vm3, %v9223_v9 }
  0xb2   : > { %9228 = vmatpush.msk.msra.mxu0 %vm12597_vm2, %v1037_v7 }
  0xb3   : > { %v1127_v11 = vpop.permute.xlu1 %1126 }
  0xb4   : > { %9238 = vmatpush.msk.msrb.mxu0 %vm12597_vm2, %v10089_v14  ;;  %v1131_v12 = vsel %vm12594_vm5, %v1127_v11, %v1129_v10  ;;  %v1125_v13 = vpop.permute.xlu0 %1124  ;;  %v9230_v14 = vld [vmem:[%s12615_s26 + $0xc] sm:$0xf]  ;;  %v1403_v22 = vpop.permute.xlu2 %1402 }
  0xb5   : > { %v1136_v17 = vmul.f32 %v1131_v12, %v10151_v49  ;;  %v1132_v18 = vsel %vm12594_vm5, %v1125_v13, %v1127_v11  ;;  %v1133_v19 = vsel %vm12594_vm5, %v1129_v10, %v1125_v13 }
  0xb6   : > { %v1134_v20 = vmul.f32 %v1133_v19, %v10149_v48  ;;  %v1135_v21 = vmul.f32 %v1132_v18, %v10126_v35 }
  0xb7   : > { %9235 = vmatpush.msk.msra.mxu3 %vm12597_vm2, %v1136_v17 }
  0xb8   : > { %9231 = vmatpush.msk.msra.mxu1 %vm12597_vm2, %v1134_v20  ;;  %9233 = vmatpush.msk.msra.mxu2 %vm12597_vm2, %v1135_v21 }
  0xb9   : > { %9229 = vmatmul.msk.f32.vlgmr.msra.gmra.mxu0 %vm834_vm3, %v9223_v9  ;;  %9232 = vmatmul.msk.f32.vlgmr.msra.gmra.mxu1 %vm834_vm3, %v9230_v14 }
  0xba   : > { %9234 = vmatmul.msk.f32.vlgmr.msra.gmra.mxu2 %vm834_vm3, %v9230_v14  ;;  %9236 = vmatmul.msk.f32.vlgmr.msra.gmra.mxu3 %vm834_vm3, %v9230_v14 }
  0xbb   : > { %9240 = vmatpush.msk.msrb.mxu1 %vm12597_vm2, %v10091_v15  ;;  %9242 = vmatpush.msk.msrb.mxu2 %vm12597_vm2, %v10094_v16 }
  0xbc   : > { %v1407_v27 = vpop.permute.xlu2 %1406 }
  0xbd   : > { %v1411_v43 = vsel %vm12592_vm7, %v1407_v27, %v1403_v22 }
  0xbe   : > { %v1414_v46 = vmul.f32 %v1411_v43, %v10151_v49 }
  0xc1   : > { %9239 = vmatmul.msk.f32.vlgmr.msrb.gmra.mxu0 %vm834_vm3, %v9237_v23  ;;  %9241 = vmatmul.msk.f32.vlgmr.msrb.gmra.mxu1 %vm834_vm3, %v9237_v23 }
  0xc2   : > { %9243 = vmatmul.msk.f32.vlgmr.msrb.gmra.mxu2 %vm834_vm3, %v9237_v23 }
  0xc3   : > { %v1306_v24 = vpop.permute.xlu1 %1305  ;;  %v1304_v25 = vpop.permute.xlu0 %1303 }
  0xc4   : > { %v1311_v15 = vsel %vm12593_vm6, %v1304_v25, %v1306_v24  ;;  %v1502_v45 = vpop.permute.xlu2 %1501 }
  0xc5   : > { %v1313_v16 = vmul.f32 %v1311_v15, %v10183_v0 }
  0xc7   : > { %9245 = vmatpush.msk.msrb.mxu3 %vm12597_vm2, %v1313_v16 }
  0xc8   : > { %9246 = vmatmul.msk.f32.vlgmr.msrb.gmra.mxu3 %vm834_vm3, %v9244_v26 }
  0xcb   : > { %v1308_v28 = vpop.permute.xlu1 %1307  ;;  %v1405_v29 = vpop.permute.xlu0 %1404 }
  0xcc   : > { %v1310_v32 = vsel %vm12593_vm6, %v1306_v24, %v1308_v28  ;;  %v1312_v34 = vsel %vm12593_vm6, %v1308_v28, %v1304_v25  ;;  %v1409_v37 = vsel %vm12592_vm7, %v1405_v29, %v1407_v27  ;;  %v1410_v38 = vsel %vm12592_vm7, %v1403_v22, %v1405_v29  ;;  %v1600_v55 = vpop.permute.xlu2 %1599 }
  0xcd   : > { %v1314_v39 = vmul.f32 %v1310_v32, %v10178_v62  ;;  %v1315_v40 = vmul.f32 %v1312_v34, %v10181_v63  ;;  %v1412_v41 = vmul.f32 %v1410_v38, %v10149_v48  ;;  %v1413_v42 = vmul.f32 %v1409_v37, %v10126_v35 }
  0xcf   : > { %9247 = vmatpush.msk.msra.mxu0 %vm12597_vm2, %v1314_v39  ;;  %9249 = vmatpush.msk.msra.mxu1 %vm12597_vm2, %v1315_v40 }
  0xd0   : > { %9252 = vmatpush.msk.msra.mxu2 %vm12597_vm2, %v1412_v41  ;;  %9254 = vmatpush.msk.msra.mxu3 %vm12597_vm2, %v1413_v42 }
  0xd1   : > { %9248 = vmatmul.msk.f32.vlgmr.msra.gmra.mxu0 %vm834_vm3, %v9244_v26  ;;  %9250 = vmatmul.msk.f32.vlgmr.msra.gmra.mxu1 %vm834_vm3, %v9244_v26 }
  0xd2   : > { %9253 = vmatmul.msk.f32.vlgmr.msra.gmra.mxu2 %vm834_vm3, %v9251_v44  ;;  %9255 = vmatmul.msk.f32.vlgmr.msra.gmra.mxu3 %vm834_vm3, %v9251_v44 }
  0xd3   : > { %9256 = vmatpush.msk.msrb.mxu0 %vm12597_vm2, %v1414_v46  ;;  %v1504_v47 = vpop.permute.xlu0 %1503 }
  0xd4   : > { %v1506_v50 = vpop.permute.xlu1 %1505  ;;  %v1509_v51 = vsel %vm12562_vm8, %v1502_v45, %v1504_v47 }
  0xd5   : > { %v1508_v52 = vsel %vm12562_vm8, %v1504_v47, %v1506_v50  ;;  %v1510_v53 = vsel %vm12562_vm8, %v1506_v50, %v1502_v45  ;;  %9259 = vmatpush.msk.msrb.mxu1 %vm12597_vm2, %v1509_v51 }
  0xd6   : > { %9261 = vmatpush.msk.msrb.mxu2 %vm12597_vm2, %v1508_v52  ;;  %9263 = vmatpush.msk.msrb.mxu3 %vm12597_vm2, %v1510_v53  ;;  %v1696_v52 = vperm.slane %v10119_v31, 2 }
  0xd9   : > { %9257 = vmatmul.msk.f32.vlgmr.msrb.gmra.mxu0 %vm834_vm3, %v9251_v44  ;;  %9260 = vmatmul.msk.f32.vlgmr.msrb.gmra.mxu1 %vm834_vm3, %v9258_v54 }
  0xda   : > { %9262 = vmatmul.msk.f32.vlgmr.msrb.gmra.mxu2 %vm834_vm3, %v9258_v54  ;;  %9264 = vmatmul.msk.f32.vlgmr.msrb.gmra.mxu3 %vm834_vm3, %v9258_v54 }
  0xdb   : > { %v1598_v56 = vpop.permute.xlu0 %1597 }
  0xdc   : > { %v1602_v57 = vpop.permute.xlu1 %1601  ;;  %v1605_v58 = vsel %vm12561_vm9, %v1598_v56, %v1600_v55 }
  0xdd   : > { %v1604_v59 = vsel %vm12561_vm9, %v1600_v55, %v1602_v57  ;;  %v1606_v60 = vsel %vm12561_vm9, %v1602_v57, %v1598_v56  ;;  %v1607_v61 = vmul.f32 %v1605_v58, %v10183_v0  ;;  %v1697_v55 = vperm.slane %v10119_v31, 6 }
  0xde   : > { %v1608_v1 = vmul.f32 %v1604_v59, %v10178_v62  ;;  %v1609_v2 = vmul.f32 %v1606_v60, %v10181_v63  ;;  %v1698_v31 = vperm.slane %v10132_v36, 2 }
  0xdf   : > { %9266 = vmatpush.msk.msra.mxu0 %vm12597_vm2, %v1607_v61 }
  0xe0   : > { %9268 = vmatpush.msk.msra.mxu1 %vm12597_vm2, %v1608_v1  ;;  %9270 = vmatpush.msk.msra.mxu2 %vm12597_vm2, %v1609_v2  ;;  %v10310_v1 = vperm.slane %v1696_v52, 2 }
  0xe1   : > { %9267 = vmatmul.msk.f32.vlgmr.msra.gmra.mxu0 %vm834_vm3, %v9265_v3  ;;  %9269 = vmatmul.msk.f32.vlgmr.msra.gmra.mxu1 %vm834_vm3, %v9265_v3 }
  0xe2   : > { %9271 = vmatmul.msk.f32.vlgmr.msra.gmra.mxu2 %vm834_vm3, %v9265_v3 }
  0xeb   : > { %v793_v18 = vpop.permute.xlu0 %792 }
 0x11d   : > { %v885_v5 = vpop.f32.mrf.mxu1 }
 0x11e   : > { %v909_v22 = vadd.f32 %v885_v5, %v793_v18  ;;  %v10312_v5 = vperm.slane %v1697_v55, 2 }
 0x125   : > { %v865_v4 = vpop.f32.mrf.mxu0 }
 0x126   : > { %v1001_v9 = vpop.f32.mrf.mxu1  ;;  %v908_v14 = vadd.f32 %v865_v4, %v793_v18 }
 0x129   : > { %v961_v7 = vpop.f32.mrf.mxu3 }
 0x12a   : > { %v1004_v23 = vadd.f32 %v961_v7, %v908_v14 }
 0x12b   : > { %v905_v6 = vpop.f32.mrf.mxu2 }
 0x12c   : > { %v910_v28 = vadd.f32 %v905_v6, %v793_v18  ;;  %v10325_v18 = vperm.slane %v1698_v31, 2 }
 0x12d   : > { %v981_v8 = vpop.f32.mrf.mxu0 }
 0x12e   : > { %v1005_v15 = vadd.f32 %v981_v8, %v909_v22  ;;  %v1006_v34 = vadd.f32 %v1001_v9, %v910_v28 }
 0x134   : > { %v1069_v10 = vpop.f32.mrf.mxu2  ;;  %v1089_v11 = vpop.f32.mrf.mxu3 }
 0x135   : > { %v1112_v27 = vadd.f32 %v1069_v10, %v1004_v23  ;;  %v1113_v29 = vadd.f32 %v1089_v11, %v1005_v15 }
 0x136   : > { %v1109_v12 = vpop.f32.mrf.mxu0  ;;  %v1168_v13 = vpop.f32.mrf.mxu1 }
 0x137   : > { %v1211_v32 = vadd.f32 %v1168_v13, %v1112_v27  ;;  %v1114_v44 = vadd.f32 %v1109_v12, %v1006_v34 }
 0x13d   : > { %v1188_v17 = vpop.f32.mrf.mxu2  ;;  %v1208_v19 = vpop.f32.mrf.mxu3 }
 0x13e   : > { %v1248_v20 = vpop.f32.mrf.mxu0  ;;  %v1268_v21 = vpop.f32.mrf.mxu1  ;;  %v1212_v37 = vadd.f32 %v1188_v17, %v1113_v29  ;;  %v1213_v50 = vadd.f32 %v1208_v19, %v1114_v44 }
 0x13f   : > { %v1291_v38 = vadd.f32 %v1248_v20, %v1211_v32 }
 0x140   : > { %v1292_v45 = vadd.f32 %v1268_v21, %v1212_v37  ;;  %v1708_v21 = vld [vmem:[%s12617_s3] sm:$0xf]  ;;  %s12625_s3 = smov 113  }
 0x145   : > { %v1288_v24 = vpop.f32.mrf.mxu2 }
 0x146   : > { %v1293_v56 = vadd.f32 %v1288_v24, %v1213_v50 }
 0x14b   : > { %v1347_v25 = vpop.f32.mrf.mxu3 }
 0x14c   : > { %v1390_v42 = vadd.f32 %v1347_v25, %v1291_v38 }
 0x14e   : > { %v1367_v16 = vpop.f32.mrf.mxu0  ;;  %v1387_v26 = vpop.f32.mrf.mxu1 }
 0x14f   : > { %v1391_v47 = vadd.f32 %v1367_v16, %v1292_v45  ;;  %v1392_v61 = vadd.f32 %v1387_v26, %v1293_v56  ;;  %v1806_v26 = vld [vmem:[%s12618_s30] sm:$0xf] }
 0x155   : > { %v1446_v39 = vpop.f32.mrf.mxu2  ;;  %v1466_v43 = vpop.f32.mrf.mxu3 }
 0x156   : > { %v1486_v40 = vpop.f32.mrf.mxu0  ;;  %v1542_v41 = vpop.f32.mrf.mxu1  ;;  %v1489_v46 = vadd.f32 %v1446_v39, %v1390_v42  ;;  %v1490_v51 = vadd.f32 %v1466_v43, %v1391_v47  ;;  %v9284_v42 = vld [vmem:[%s12618_s30 + $0x4] sm:$0xf] }
 0x157   : > { %v1491_v6 = vadd.f32 %v1486_v40, %v1392_v61 }
 0x158   : > { %v1585_v53 = vadd.f32 %v1542_v41, %v1489_v46 }
 0x15d   : > { %v1562_v54 = vpop.f32.mrf.mxu2  ;;  %v1582_v3 = vpop.f32.mrf.mxu3 }
 0x15e   : > { %v1586_v57 = vadd.f32 %v1562_v54, %v1490_v51  ;;  %v1641_v58 = vpop.f32.mrf.mxu0  ;;  %v1661_v59 = vpop.f32.mrf.mxu1  ;;  %v1587_v9 = vadd.f32 %v1582_v3, %v1491_v6  ;;  %v9305_v3 = vld [vmem:[%s12618_s30 + $0x10] sm:$0xf] }
 0x15f   : > { %v1684_v60 = vadd.f32 %v1641_v58, %v1585_v53  ;;  %v9298_v53 = vld [vmem:[%s12618_s30 + $0xc] sm:$0xf] }
 0x160   : > { %v1685_v2 = vadd.f32 %v1661_v59, %v1586_v57  ;;  %v9291_v59 = vld [vmem:[%s12618_s30 + $0x8] sm:$0xf] }
 0x161   : > { %vm1687_vm10 = vcmp.ge.f32.partialorder %v1684_v60, 0.0  ;;  %v1690_v4 = vmul.f32 0.2, %v1684_v60 }
 0x162   : > { %vm1688_vm11 = vcmp.ge.f32.partialorder %v1685_v2, 0.0  ;;  %v1691_v7 = vmul.f32 0.2, %v1685_v2 }
 0x163   : > { %v1693_v8 = vsel %vm1687_vm10, %v1684_v60, %v1690_v4 }
 0x164   : > { %v10316_v10 = vmul.f32 %v10310_v1, %v1693_v8  ;;  %v1694_v11 = vsel %vm1688_vm11, %v1685_v2, %v1691_v7 }
 0x165   : > { %v10319_v12 = vmul.f32 %v10312_v5, %v1694_v11  ;;  %v1681_v13 = vpop.f32.mrf.mxu2 }
 0x166   : > { %v1686_v17 = vadd.f32 %v1681_v13, %v1587_v9  ;;  %1794 = vrot.lane.b32.xlu1 %v10316_v10, %s12558_s1  ;;  %9272 = vmatpush.msk.msra.mxu3 %vm12597_vm2, %v10316_v10 }
 0x167   : > { %1884 = vrot.lane.b32.xlu0 %v10319_v12, %s12554_s8  ;;  %1796 = vrot.lane.b32.xlu2 %v10319_v12, %s12558_s1 }
 0x168   : > { %vm1689_vm12 = vcmp.ge.f32.partialorder %v1686_v17, 0.0  ;;  %v1692_v36 = vmul.f32 0.2, %v1686_v17  ;;  %9274 = vmatpush.msk.msrb.mxu0 %vm12597_vm2, %v10319_v12  ;;  %9273 = vmatmul.msk.f32.vlgmr.msra.gmra.mxu3 %vm834_vm3, %v1708_v21 }
 0x169   : > { %9275 = vmatmul.msk.f32.vlgmr.msrb.gmra.mxu0 %vm834_vm3, %v1708_v21 }
 0x16a   : > { %v1695_v19 = vsel %vm1689_vm12, %v1686_v17, %v1692_v36 }
 0x16b   : > { %v10334_v20 = vmul.f32 %v10325_v18, %v1695_v19 }
 0x16d   : > { %9276 = vmatpush.msk.msrb.mxu1 %vm12597_vm2, %v10334_v20 }
 0x16e   : > { %1798 = vrot.lane.b32.xlu1 %v10334_v20, %s12558_s1  ;;  %9277 = vmatmul.msk.f32.vlgmr.msrb.gmra.mxu1 %vm834_vm3, %v1708_v21 }
 0x16f   : > { %1970 = vrot.lane.b32.xlu0 %v10319_v12, %s12556_s27  ;;  %1882 = vrot.lane.b32.xlu2 %v10316_v10, %s12554_s8 }
 0x176   : > { %1886 = vrot.lane.b32.xlu1 %v10334_v20, %s12554_s8  ;;  %s12619_s8 = sld [smem:[#allocation38_spill]] }
 0x177   : > { %2061 = vrot.lane.b32.xlu0 %v10334_v20, %s12552_s4  ;;  %1968 = vrot.lane.b32.xlu2 %v10316_v10, %s12556_s27 }
 0x17c   : > { %v1787_v60 = vld [vmem:[%s12619_s8] sm:$0xf]  ;;  %s12622_s8 = smov 16  }
 0x17e   : > { %1972 = vrot.lane.b32.xlu1 %v10334_v20, %s12556_s27 }
 0x17f   : > { %2216 = vrot.lane.b32.xlu0 %v10319_v12, %s12550_s28  ;;  %2057 = vrot.lane.b32.xlu2 %v10316_v10, %s12552_s4 }
 0x186   : > { %2059 = vrot.lane.b32.xlu1 %v10319_v12, %s12552_s4 }
 0x187   : > { %2305 = vrot.lane.b32.xlu0 %v10319_v12, %s12548_s9  ;;  %2214 = vrot.lane.b32.xlu2 %v10316_v10, %s12550_s28 }
 0x18e   : > { %2218 = vrot.lane.b32.xlu1 %v10334_v20, %s12550_s28  ;;  %s12623_s28 = smov 1  }
 0x18f   : > { %2394 = vrot.lane.b32.xlu0 %v10319_v12, %s12546_s5  ;;  %2303 = vrot.lane.b32.xlu2 %v10316_v10, %s12548_s9 }
 0x196   : > { %2307 = vrot.lane.b32.xlu1 %v10334_v20, %s12548_s9  ;;  %s12626_s9 = smov 112  }
 0x197   : > { %2482 = vrot.lane.b32.xlu0 %v10334_v20, %s12616_s6  ;;  %2392 = vrot.lane.b32.xlu2 %v10316_v10, %s12546_s5 }
 0x19e   : > { %2478 = vrot.lane.b32.xlu1 %v10316_v10, %s12616_s6 }
 0x19f   : > { %2480 = vrot.lane.b32.xlu2 %v10319_v12, %s12616_s6 }
 0x1a6   : > { %2396 = vrot.lane.b32.xlu1 %v10334_v20, %s12546_s5  ;;  %s12620_s5 = sld [smem:[#allocation39_spill]] }
 0x1a7   : > { %1790 = vperm.xlu2 %9825, %v1787_v60  }
 0x1c1   : > { %v1797_v14 = vpop.permute.xlu2 %1796 }
 0x1c9   : > { %v1883_v22 = vpop.permute.xlu2 %1882 }
 0x1d1   : > { %v1969_v23 = vpop.permute.xlu2 %1968 }
 0x1d8   : > { %v1795_v24 = vpop.permute.xlu1 %1794 }
 0x1d9   : > { %v1885_v25 = vpop.permute.xlu0 %1884  ;;  %v1801_v15 = vsel %vm815_vm0, %v1795_v24, %v1797_v14  ;;  %v2058_v28 = vpop.permute.xlu2 %2057 }
 0x1da   : > { %v1804_v16 = vmul.f32 %v1801_v15, %v10126_v35  ;;  %v1889_v39 = vsel %vm12596_vm1, %v1883_v22, %v1885_v25 }
 0x1dc   : > { %9280 = vmatpush.msk.msrb.mxu3 %vm12597_vm2, %v1804_v16 }
 0x1dd   : > { %9281 = vmatmul.msk.f32.vlgmr.msrb.gmra.mxu3 %vm834_vm3, %v1806_v26 }
 0x1e0   : > { %v1799_v27 = vpop.permute.xlu1 %1798 }
 0x1e1   : > { %v1971_v29 = vpop.permute.xlu0 %1970  ;;  %v1800_v32 = vsel %vm815_vm0, %v1797_v14, %v1799_v27  ;;  %v1802_v34 = vsel %vm815_vm0, %v1799_v27, %v1795_v24  ;;  %v2215_v50 = vpop.permute.xlu2 %2214 }
 0x1e2   : > { %v1803_v37 = vmul.f32 %v1802_v34, %v10149_v48  ;;  %v1805_v38 = vmul.f32 %v1800_v32, %v10151_v49  ;;  %v1975_v40 = vsel %vm12595_vm4, %v1969_v23, %v1971_v29  ;;  %v9319_v34 = vld [vmem:[%s12618_s30 + $0x18] sm:$0xf] }
 0x1e3   : > { %v1978_v43 = vmul.f32 %v1975_v40, %v10178_v62 }
 0x1e4   : > { %9278 = vmatpush.msk.msrb.mxu2 %vm12597_vm2, %v1803_v37  ;;  %9282 = vmatpush.msk.msra.mxu0 %vm12597_vm2, %v1805_v38  ;;  %v9326_v38 = vld [vmem:[%s12618_s30 + $0x1c] sm:$0xf] }
 0x1e5   : > { %9279 = vmatmul.msk.f32.vlgmr.msrb.gmra.mxu2 %vm834_vm3, %v1806_v26  ;;  %9283 = vmatmul.msk.f32.vlgmr.msra.gmra.mxu0 %vm834_vm3, %v1806_v26 }
 0x1e6   : > { %9287 = vmatpush.msk.msra.mxu2 %vm12597_vm2, %v1889_v39  ;;  %v2617_v39 = vld [vmem:[%s12621_s10] sm:$0xf] }
 0x1e8   : > { %v1887_v41 = vpop.permute.xlu1 %1886 }
 0x1e9   : > { %v2062_v44 = vpop.permute.xlu0 %2061  ;;  %v1888_v45 = vsel %vm12596_vm1, %v1885_v25, %v1887_v41  ;;  %v1890_v46 = vsel %vm12596_vm1, %v1887_v41, %v1883_v22  ;;  %v2304_v61 = vpop.permute.xlu2 %2303 }
 0x1ea   : > { %v2065_v47 = vsel %vm12594_vm5, %v2062_v44, %v2058_v28  ;;  %9285 = vmatpush.msk.msra.mxu1 %vm12597_vm2, %v1890_v46  ;;  %9289 = vmatpush.msk.msra.mxu3 %vm12597_vm2, %v1888_v45 }
 0x1eb   : > { %v2066_v51 = vmul.f32 %v2065_v47, %v10149_v48  ;;  %9290 = vmatmul.msk.f32.vlgmr.msra.gmra.mxu3 %vm834_vm3, %v9284_v42  ;;  %9286 = vmatmul.msk.f32.vlgmr.msra.gmra.mxu1 %vm834_vm3, %v9284_v42 }
 0x1ec   : > { %9294 = vmatpush.msk.msrb.mxu1 %vm12597_vm2, %v1978_v43  ;;  %v9333_v43 = vld [vmem:[%s12618_s30 + $0x20] sm:$0xf] }
 0x1ed   : > { %9299 = vmatpush.msk.msrb.mxu3 %vm12597_vm2, %v2066_v51  ;;  %9288 = vmatmul.msk.f32.vlgmr.msra.gmra.mxu2 %vm834_vm3, %v9284_v42  ;;  %v10545_v51 = vpop.f32.mrf.mxu3 }
 0x1ef   : > { %9308 = vmatpush.msk.msra.mxu3 %vm12597_vm2, %v10319_v12 }
 0x1f0   : > { %v1973_v52 = vpop.permute.xlu1 %1972 }
 0x1f1   : > { %v2217_v54 = vpop.permute.xlu0 %2216  ;;  %v1974_v55 = vsel %vm12595_vm4, %v1971_v29, %v1973_v52  ;;  %v1976_v56 = vsel %vm12595_vm4, %v1973_v52, %v1969_v23  ;;  %v2393_v13 = vpop.permute.xlu2 %2392  ;;  %v2608_v23 = vld [vmem:[%s12620_s5] sm:$0xf]  ;;  %s9802_s5 = smul.u32 24, %s12847_s2 }
 0x1f2   : > { %v1977_v57 = vmul.f32 %v1976_v56, %v10183_v0  ;;  %v1979_v58 = vmul.f32 %v1974_v55, %v10181_v63  ;;  %v2221_v8 = vsel %vm12593_vm6, %v2215_v50, %v2217_v54  ;;  %2611 = vperm.xlu2 %9825, %v2608_v23   ;;  %v10547_v52 = vpop.f32.mrf.mxu0 }
 0x1f3   : > { %9300 = vmatmul.msk.f32.vlgmr.msrb.gmra.mxu3 %vm834_vm3, %v9298_v53  ;;  %9295 = vmatmul.msk.f32.vlgmr.msrb.gmra.mxu1 %vm834_vm3, %v9291_v59  ;;  %v2223_v11 = vmul.f32 %v2221_v8, %v10183_v0 }
 0x1f4   : > { %9292 = vmatpush.msk.msrb.mxu0 %vm12597_vm2, %v1977_v57  ;;  %9296 = vmatpush.msk.msrb.mxu2 %vm12597_vm2, %v1979_v58 }
 0x1f5   : > { %9293 = vmatmul.msk.f32.vlgmr.msrb.gmra.mxu0 %vm834_vm3, %v9291_v59  ;;  %9297 = vmatmul.msk.f32.vlgmr.msrb.gmra.mxu2 %vm834_vm3, %v9291_v59 }
 0x1f6   : > { %9306 = vmatpush.msk.msra.mxu2 %vm12597_vm2, %v10316_v10 }
 0x1f8   : > { %v2060_v2 = vpop.permute.xlu1 %2059 }
 0x1f9   : > { %v2306_v4 = vpop.permute.xlu0 %2305  ;;  %v2063_v6 = vsel %vm12594_vm5, %v2060_v2, %v2062_v44  ;;  %v2064_v7 = vsel %vm12594_vm5, %v2058_v28, %v2060_v2  ;;  %v2481_v15 = vpop.permute.xlu2 %2480 }
 0x1fa   : > { %v2310_v31 = vsel %vm12592_vm7, %v2304_v61, %v2306_v4  ;;  %v2067_v9 = vmul.f32 %v2064_v7, %v10126_v35  ;;  %v2068_v10 = vmul.f32 %v2063_v6, %v10151_v49  ;;  %2620 = vperm.xlu2 %9825, %v2617_v39  }
 0x1fb   : > { %9309 = vmatmul.msk.f32.vlgmr.msra.gmra.mxu3 %vm834_vm3, %v9305_v3  ;;  %v2312_v12 = vmul.f32 %v2310_v31, %v10149_v48 }
 0x1fc   : > { %9301 = vmatpush.msk.msra.mxu0 %vm12597_vm2, %v2067_v9  ;;  %9303 = vmatpush.msk.msra.mxu1 %vm12597_vm2, %v2068_v10 }
 0x1fd   : > { %9302 = vmatmul.msk.f32.vlgmr.msra.gmra.mxu0 %vm834_vm3, %v9298_v53  ;;  %9304 = vmatmul.msk.f32.vlgmr.msra.gmra.mxu1 %vm834_vm3, %v9298_v53  ;;  %v10549_v53 = vpop.f32.mrf.mxu1 }
 0x1fe   : > { %9307 = vmatmul.msk.f32.vlgmr.msra.gmra.mxu2 %vm834_vm3, %v9305_v3  ;;  %9310 = vmatpush.msk.msrb.mxu0 %vm12597_vm2, %v10334_v20  ;;  %v9312_v20 = vld [vmem:[%s12618_s30 + $0x14] sm:$0xf] }
 0x1ff   : > { %9313 = vmatpush.msk.msrb.mxu1 %vm12597_vm2, %v2223_v11 }
 0x200   : > { %9320 = vmatpush.msk.msra.mxu0 %vm12597_vm2, %v2312_v12  ;;  %v2219_v17 = vpop.permute.xlu1 %2218 }
 0x201   : > { %v2395_v36 = vpop.permute.xlu0 %2394  ;;  %v2220_v19 = vsel %vm12593_vm6, %v2217_v54, %v2219_v17  ;;  %v2222_v21 = vsel %vm12593_vm6, %v2219_v17, %v2215_v50  ;;  %v1791_v6 = vpop.permute.xlu2 %1790 }
 0x202   : > { %v2224_v14 = vmul.f32 %v2220_v19, %v10178_v62  ;;  %v2225_v22 = vmul.f32 %v2222_v21, %v10181_v63  ;;  %v2399_v24 = vsel %vm12562_vm8, %v2393_v13, %v2395_v36 }
 0x204   : > { %9315 = vmatpush.msk.msrb.mxu2 %vm12597_vm2, %v2224_v14  ;;  %9317 = vmatpush.msk.msrb.mxu3 %vm12597_vm2, %v2225_v22 }
 0x205   : > { %9311 = vmatmul.msk.f32.vlgmr.msrb.gmra.mxu0 %vm834_vm3, %v9305_v3  ;;  %9314 = vmatmul.msk.f32.vlgmr.msrb.gmra.mxu1 %vm834_vm3, %v9312_v20 }
 0x206   : > { %9316 = vmatmul.msk.f32.vlgmr.msrb.gmra.mxu2 %vm834_vm3, %v9312_v20  ;;  %9318 = vmatmul.msk.f32.vlgmr.msrb.gmra.mxu3 %vm834_vm3, %v9312_v20 }
 0x207   : > { %9327 = vmatpush.msk.msra.mxu3 %vm12597_vm2, %v2399_v24 }
 0x208   : > { %v2308_v25 = vpop.permute.xlu1 %2307 }
 0x209   : > { %v2483_v16 = vpop.permute.xlu0 %2482  ;;  %v2309_v26 = vsel %vm12592_vm7, %v2306_v4, %v2308_v25  ;;  %v2311_v27 = vsel %vm12592_vm7, %v2308_v25, %v2304_v61 }
 0x20a   : > { %v2484_v28 = vsel %vm12561_vm9, %v2481_v15, %v2483_v16  ;;  %v2313_v29 = vmul.f32 %v2309_v26, %v10126_v35  ;;  %v2314_v32 = vmul.f32 %v2311_v27, %v10151_v49 }
 0x20b   : > { %v2488_v37 = vmul.f32 %v2484_v28, %v10178_v62 }
 0x20c   : > { %9322 = vmatpush.msk.msra.mxu1 %vm12597_vm2, %v2313_v29  ;;  %9324 = vmatpush.msk.msra.mxu2 %vm12597_vm2, %v2314_v32 }
 0x20d   : > { %9336 = vmatpush.msk.msrb.mxu3 %vm12597_vm2, %v2488_v37  ;;  %9321 = vmatmul.msk.f32.vlgmr.msra.gmra.mxu0 %vm834_vm3, %v9319_v34 }
 0x20e   : > { %9323 = vmatmul.msk.f32.vlgmr.msra.gmra.mxu1 %vm834_vm3, %v9319_v34  ;;  %9325 = vmatmul.msk.f32.vlgmr.msra.gmra.mxu2 %vm834_vm3, %v9319_v34 }
 0x20f   : > { %9328 = vmatmul.msk.f32.vlgmr.msra.gmra.mxu3 %vm834_vm3, %v9326_v38 }
 0x210   : > { %v2479_v40 = vpop.permute.xlu1 %2478 }
 0x211   : > { %v2485_v41 = vsel %vm12561_vm9, %v2479_v40, %v2481_v15  ;;  %v2486_v44 = vsel %vm12561_vm9, %v2483_v16, %v2479_v40 }
 0x212   : > { %v2487_v42 = vmul.f32 %v2485_v41, %v10183_v0  ;;  %v2489_v50 = vmul.f32 %v2486_v44, %v10181_v63 }
 0x214   : > { %9334 = vmatpush.msk.msrb.mxu2 %vm12597_vm2, %v2487_v42 }
 0x216   : > { %9335 = vmatmul.msk.f32.vlgmr.msrb.gmra.mxu2 %vm834_vm3, %v9333_v43 }
 0x217   : > { %9337 = vmatmul.msk.f32.vlgmr.msrb.gmra.mxu3 %vm834_vm3, %v9333_v43 }
 0x218   : > { %v2397_v45 = vpop.permute.xlu1 %2396 }
 0x219   : > { %v2398_v46 = vsel %vm12562_vm8, %v2395_v36, %v2397_v45  ;;  %v2400_v47 = vsel %vm12562_vm8, %v2397_v45, %v2393_v13 }
 0x21a   : > { %9329 = vmatpush.msk.msrb.mxu0 %vm12597_vm2, %v2398_v46  ;;  %9331 = vmatpush.msk.msrb.mxu1 %vm12597_vm2, %v2400_v47 }
 0x21b   : > { %9330 = vmatmul.msk.f32.vlgmr.msrb.gmra.mxu0 %vm834_vm3, %v9326_v38  ;;  %9332 = vmatmul.msk.f32.vlgmr.msrb.gmra.mxu1 %vm834_vm3, %v9326_v38 }
 0x21c   : > { %9338 = vmatpush.msk.msra.mxu0 %vm12597_vm2, %v2489_v50 }
 0x223   : > { %9339 = vmatmul.msk.f32.vlgmr.msra.gmra.mxu0 %vm834_vm3, %v9333_v43 }
 0x260   : > { %v1856_v54 = vpop.f32.mrf.mxu3 }
 0x261   : > { %v1880_v10 = vadd.f32 %v1856_v54, %v1791_v6 }
 0x262   : > { %v1876_v56 = vpop.f32.mrf.mxu0 }
 0x263   : > { %v1881_v14 = vadd.f32 %v1876_v56, %v1791_v6 }
 0x268   : > { %v1836_v55 = vpop.f32.mrf.mxu2  ;;  %v1922_v57 = vpop.f32.mrf.mxu1 }
 0x269   : > { %v1879_v9 = vadd.f32 %v1836_v55, %v1791_v6 }
 0x26b   : > { %v1965_v12 = vadd.f32 %v1922_v57, %v1879_v9 }
 0x26e   : > { %v1962_v58 = vpop.f32.mrf.mxu3 }
 0x26f   : > { %v1967_v15 = vadd.f32 %v1962_v58, %v1881_v14 }
 0x270   : > { %v1942_v59 = vpop.f32.mrf.mxu2  ;;  %v2031_v61 = vpop.f32.mrf.mxu1 }
 0x271   : > { %v1966_v13 = vadd.f32 %v1942_v59, %v1880_v10 }
 0x272   : > { %v2011_v60 = vpop.f32.mrf.mxu0 }
 0x273   : > { %v2054_v21 = vadd.f32 %v2011_v60, %v1965_v12  ;;  %v2055_v22 = vadd.f32 %v2031_v61, %v1966_v13 }
 0x276   : > { %v2100_v2 = vpop.f32.mrf.mxu3 }
 0x277   : > { %v2143_v20 = vadd.f32 %v2100_v2, %v2054_v21 }
 0x278   : > { %v2051_v3 = vpop.f32.mrf.mxu2 }
 0x279   : > { %v2056_v28 = vadd.f32 %v2051_v3, %v1967_v15 }
 0x27a   : > { %v2120_v4 = vpop.f32.mrf.mxu0  ;;  %v2140_v7 = vpop.f32.mrf.mxu1 }
 0x27b   : > { %v2144_v23 = vadd.f32 %v2120_v4, %v2055_v22  ;;  %v2145_v38 = vadd.f32 %v2140_v7, %v2056_v28 }
 0x27e   : > { %v2188_v8 = vpop.f32.mrf.mxu3 }
 0x27f   : > { %v2212_v16 = vadd.f32 %v2188_v8, %v2144_v23 }
 0x281   : > { %v2168_v31 = vpop.f32.mrf.mxu2 }
 0x282   : > { %v2208_v11 = vpop.f32.mrf.mxu0  ;;  %v2257_v19 = vpop.f32.mrf.mxu1  ;;  %v2211_v24 = vadd.f32 %v2168_v31, %v2143_v20 }
 0x283   : > { %v2213_v42 = vadd.f32 %v2208_v11, %v2145_v38 }
 0x284   : > { %v2300_v32 = vadd.f32 %v2257_v19, %v2211_v24 }
 0x289   : > { %v2277_v17 = vpop.f32.mrf.mxu2  ;;  %v2297_v36 = vpop.f32.mrf.mxu3 }
 0x28a   : > { %v2346_v25 = vpop.f32.mrf.mxu0  ;;  %v2301_v29 = vadd.f32 %v2277_v17, %v2212_v16  ;;  %v2302_v47 = vadd.f32 %v2297_v36, %v2213_v42  ;;  %v2612_v16 = vpop.permute.xlu2 %2611 }
 0x28b   : > { %v2366_v34 = vpop.f32.mrf.mxu1  ;;  %v2389_v37 = vadd.f32 %v2346_v25, %v2300_v32 }
 0x28c   : > { %v2390_v39 = vadd.f32 %v2366_v34, %v2301_v29 }
 0x291   : > { %v2386_v26 = vpop.f32.mrf.mxu2 }
 0x292   : > { %v2432_v27 = vpop.f32.mrf.mxu3  ;;  %v2391_v55 = vadd.f32 %v2386_v26, %v2302_v47 }
 0x293   : > { %v2475_v40 = vadd.f32 %v2432_v27, %v2389_v37  ;;  %v2627_v37 = vshrl.u32 %v813_v30, 7 }
 0x295   : > { %vm2628_vm10 = vcmp.lt.s32.totalorder %v2627_v37, 2 }
 0x298   : > { %v2452_v41 = vpop.f32.mrf.mxu0  ;;  %v2472_v54 = vpop.f32.mrf.mxu1 }
 0x299   : > { %v2476_v43 = vadd.f32 %v2452_v41, %v2390_v39  ;;  %v2521_v44 = vpop.f32.mrf.mxu2  ;;  %v2477_v58 = vadd.f32 %v2472_v54, %v2391_v55 }
 0x29a   : > { %v2564_v45 = vadd.f32 %v2521_v44, %v2475_v40  ;;  %v2541_v46 = vpop.f32.mrf.mxu3 }
 0x29b   : > { %v2565_v50 = vadd.f32 %v2541_v46, %v2476_v43 }
 0x29c   : > { %v2567_v56 = vmul.f32 %v2564_v45, %v10310_v1  ;;  %v2621_v45 = vpop.permute.xlu2 %2620 }
 0x29d   : > { %v2568_v57 = vmul.f32 %v2565_v50, %v10312_v5 }
 0x29e   : > { %v2578_v3 = vmul.f32 %v2567_v56, %v2567_v56  ;;  %v2570_v6 = vsel %vm12597_vm2, %v2567_v56, 0.0 }
 0x29f   : > { %v2579_v59 = vmul.f32 %v2568_v57, %v2568_v57  ;;  %v2571_v2 = vsel %vm12597_vm2, %v2568_v57, 0.0 }
 0x2a0   : > { %v2561_v60 = vpop.f32.mrf.mxu0  ;;  %v2572_v8 = vadd.f32 %v2571_v2, %v2570_v6  ;;  %v2581_v10 = vsel %vm12597_vm2, %v2578_v3, 0.0 }
 0x2a1   : > { %v2566_v61 = vadd.f32 %v2561_v60, %v2477_v58  ;;  %v2582_v7 = vsel %vm12597_vm2, %v2579_v59, 0.0 }
 0x2a2   : > { %v2583_v12 = vadd.f32 %v2582_v7, %v2581_v10 }
 0x2a3   : > { %v2569_v4 = vmul.f32 %v2566_v61, %v10325_v18 }
 0x2a5   : > { %v2573_v31 = vsel %vm12597_vm2, %v2569_v4, 0.0  ;;  %v2580_v9 = vmul.f32 %v2569_v4, %v2569_v4 }
 0x2a6   : > { %v2574_v11 = vadd.f32 %v2573_v31, %v2572_v8 }
 0x2a7   : > { %v2584_v13 = vsel %vm12597_vm2, %v2580_v9, 0.0 }
 0x2a8   : > { %2575 = vadd.xlane.f32.xlu0 %v2574_v11  ;;  %v2585_v17 = vadd.f32 %v2584_v13, %v2583_v12  ;;  %v2663_v11 = vld [vmem:[%s12629_s11] sm:$0xf] }
 0x2aa   : > { %2586 = vadd.xlane.f32.xlu1 %v2585_v17 }
 0x31b   : > { %v2576_v36 = vpop.xlane.xlu0 %2575 }
 0x31c   : > { %v2577_v19 = vmul.f32 0.00390625, %v2576_v36 }
 0x31d   : > { %v2587_v21 = vpop.xlane.xlu1 %2586 }
 0x31e   : > { %v2588_v14 = vmul.f32 0.00390625, %v2587_v21  ;;  %v2589_v22 = vmul.f32 %v2577_v19, %v2577_v19  ;;  %v2591_v29 = vsub.f32 %v2567_v56, %v2577_v19  ;;  %v2592_v32 = vsub.f32 %v2568_v57, %v2577_v19 }
 0x31f   : > { %v2593_v34 = vsub.f32 %v2569_v4, %v2577_v19 }
 0x320   : > { %v2590_v20 = vsub.f32 %v2588_v14, %v2589_v22 }
 0x322   : > { %v2594_v23 = vadd.f32 1e-05, %v2590_v20 }
 0x324   : > { %9847 = vrsqrt.f32 %v2594_v23  ;;  %vm2601_vm14 = vweird.f32 %v2594_v23 }
 0x32a   : > { %v9848_v24 = vpop.eup %9847 }
 0x32b   : > { %v2596_v25 = vmul.f32 %v9848_v24, %v2594_v23  ;;  %vm2602_vm13 = vweird.f32 %v9848_v24 }
 0x32c   : > { %vm2603_vm15 = vmor %vm2601_vm14, %vm2602_vm13 }
 0x32d   : > { %v2597_v15 = vmul.f32 %v9848_v24, %v2596_v25 }
 0x32f   : > { %v2598_v26 = vmul.f32 0.5, %v2597_v15  ;;  %v9346_v15 = vld [vmem:[%s12629_s11 + $0x4] sm:$0xf] }
 0x331   : > { %v2599_v27 = vsub.f32 1.5, %v2598_v26 }
 0x333   : > { %v2600_v28 = vmul.f32 %v9848_v24, %v2599_v27 }
 0x335   : > { %v2604_v38 = vsel %vm2603_vm15, %v9848_v24, %v2600_v28  ;;  %v9353_v24 = vld [vmem:[%s12629_s11 + $0x8] sm:$0xf] }
 0x336   : > { %v2605_v39 = vmul.f32 %v2604_v38, %v2591_v29  ;;  %v2606_v40 = vmul.f32 %v2604_v38, %v2592_v32  ;;  %v2607_v41 = vmul.f32 %v2604_v38, %v2593_v34 }
 0x338   : > { %v2614_v42 = vmul.f32 %v2612_v16, %v2605_v39  ;;  %v2615_v43 = vmul.f32 %v2612_v16, %v2606_v40  ;;  %v2616_v44 = vmul.f32 %v2612_v16, %v2607_v41  ;;  %v9360_v40 = vld [vmem:[%s12629_s11 + $0xc] sm:$0xf] }
 0x33a   : > { %v2623_v46 = vadd.f32 %v2621_v45, %v2614_v42  ;;  %v2624_v47 = vadd.f32 %v2621_v45, %v2615_v43  ;;  %v2625_v50 = vadd.f32 %v2621_v45, %v2616_v44 }
 0x33c   : > { %v2629_v54 = vsel %vm2628_vm10, %v2623_v46, %v2567_v56  ;;  %v2630_v55 = vsel %vm2628_vm10, %v2624_v47, %v2568_v57  ;;  %v2631_v58 = vsel %vm2628_vm10, %v2625_v50, %v2569_v4  ;;  %v2644_v57 = vld [vmem:[%s12628_s12] sm:$0xf]  ;;  %s12633_s12 = sld [smem:[#allocation30_spill]] }
 0x33d   : > { %vm2632_vm11 = vcmp.ge.f32.partialorder %v2629_v54, 0.0  ;;  %vm2633_vm12 = vcmp.ge.f32.partialorder %v2630_v55, 0.0  ;;  %vm2634_vm13 = vcmp.ge.f32.partialorder %v2631_v58, 0.0  ;;  %v2635_v59 = vmul.f32 0.1, %v2629_v54 }
 0x33e   : > { %v2636_v30 = vmul.f32 0.1, %v2630_v55  ;;  %v2637_v60 = vmul.f32 0.1, %v2631_v58 }
 0x33f   : > { %v2638_v61 = vsel %vm2632_vm11, %v2629_v54, %v2635_v59 }
 0x340   : > { %v2639_v2 = vsel %vm2633_vm12, %v2630_v55, %v2636_v30  ;;  %v2640_v3 = vsel %vm2634_vm13, %v2631_v58, %v2637_v60  ;;  %v10562_v6 = vmul.f32 %v2638_v61, %v10310_v1  ;;  %v9367_v60 = vld [vmem:[%s12629_s11 + $0x10] sm:$0xf] }
 0x341   : > { %v10565_v7 = vmul.f32 %v2639_v2, %v10312_v5  ;;  %v10568_v8 = vmul.f32 %v2640_v3, %v10325_v18 }
 0x342   : > { %2651 = vrot.lane.b32.xlu2 %v10562_v6, %s12558_s1 }
 0x343   : > { %2829 = vrot.lane.b32.xlu0 %v10568_v8, %s12556_s27  ;;  %2741 = vrot.lane.b32.xlu1 %v10565_v7, %s12622_s8 }
 0x34a   : > { %2653 = vrot.lane.b32.xlu2 %v10565_v7, %s12558_s1 }
 0x34b   : > { %2918 = vrot.lane.b32.xlu1 %v10568_v8, %s12623_s28  ;;  %2914 = vrot.lane.b32.xlu0 %v10562_v6, %s12623_s28 }
 0x352   : > { %2655 = vrot.lane.b32.xlu2 %v10568_v8, %s12558_s1  ;;  %s12630_s1 = smov 17  }
 0x353   : > { %3084 = vrot.lane.b32.xlu1 %v10568_v8, %s12624_s0  ;;  %2827 = vrot.lane.b32.xlu0 %v10565_v7, %s12556_s27 }
 0x35a   : > { %2825 = vrot.lane.b32.xlu2 %v10562_v6, %s12556_s27  ;;  %s12627_s27 = sld [smem:[#allocation36_spill]] }
 0x35b   : > { %3082 = vrot.lane.b32.xlu1 %v10565_v7, %s12624_s0  ;;  %3169 = vrot.lane.b32.xlu0 %v10562_v6, %s12625_s3 }
 0x360   : > { %v1709_v56 = vld [vmem:[%s12627_s27] sm:$0xf]  ;;  %s12631_s27 = smov 15  }
 0x362   : > { %2743 = vrot.lane.b32.xlu2 %v10568_v8, %s12622_s8 }
 0x363   : > { %3262 = vrot.lane.b32.xlu1 %v10568_v8, %s12626_s9  ;;  %3258 = vrot.lane.b32.xlu0 %v10562_v6, %s12626_s9 }
 0x36a   : > { %2739 = vrot.lane.b32.xlu2 %v10562_v6, %s12622_s8 }
 0x36b   : > { %3346 = vrot.lane.b32.xlu1 %v10565_v7, %s12616_s6  ;;  %3173 = vrot.lane.b32.xlu0 %v10568_v8, %s12625_s3 }
 0x372   : > { %2916 = vrot.lane.b32.xlu2 %v10565_v7, %s12623_s28 }
 0x373   : > { %1712 = vperm.xlu1 %9826, %v1709_v56   ;;  %3348 = vrot.lane.b32.xlu0 %v10568_v8, %s12616_s6 }
 0x37a   : > { %3080 = vrot.lane.b32.xlu2 %v10562_v6, %s12624_s0 }
 0x382   : > { %3171 = vrot.lane.b32.xlu2 %v10565_v7, %s12625_s3 }
 0x38a   : > { %3260 = vrot.lane.b32.xlu2 %v10565_v7, %s12626_s9 }
 0x392   : > { %3344 = vrot.lane.b32.xlu2 %v10562_v6, %s12616_s6 }
 0x39a   : > { %2647 = vperm.xlu2 %9825, %v2644_v57  }
 0x39c   : > { %v2652_v4 = vpop.permute.xlu2 %2651 }
 0x3a4   : > { %v2654_v31 = vpop.permute.xlu2 %2653 }
 0x3a5   : > { %v2658_v9 = vsel %vm815_vm0, %v2652_v4, %v2654_v31 }
 0x3a6   : > { %v2661_v10 = vmul.f32 %v2658_v9, %v10126_v35 }
 0x3a8   : > { %9342 = vmatpush.msk.msra.mxu2 %vm12597_vm2, %v2661_v10 }
 0x3a9   : > { %9343 = vmatmul.msk.f32.vlgmr.msra.gmra.mxu2 %vm834_vm3, %v2663_v11 }
 0x3ac   : > { %v2656_v12 = vpop.permute.xlu2 %2655 }
 0x3ad   : > { %v2657_v13 = vsel %vm815_vm0, %v2654_v31, %v2656_v12  ;;  %v2659_v17 = vsel %vm815_vm0, %v2656_v12, %v2652_v4 }
 0x3ae   : > { %v2660_v36 = vmul.f32 %v2659_v17, %v10149_v48  ;;  %v2662_v19 = vmul.f32 %v2657_v13, %v10151_v49 }
 0x3b0   : > { %9340 = vmatpush.msk.msra.mxu1 %vm12597_vm2, %v2660_v36  ;;  %9344 = vmatpush.msk.msra.mxu3 %vm12597_vm2, %v2662_v19  ;;  %v9381_v36 = vld [vmem:[%s12629_s11 + $0x18] sm:$0xf] }
 0x3b1   : > { %9341 = vmatmul.msk.f32.vlgmr.msra.gmra.mxu1 %vm834_vm3, %v2663_v11  ;;  %9345 = vmatmul.msk.f32.vlgmr.msra.gmra.mxu3 %vm834_vm3, %v2663_v11 }
 0x3b4   : > { %v2826_v21 = vpop.permute.xlu2 %2825 }
 0x3b5   : > { %v2830_v14 = vpop.permute.xlu0 %2829  ;;  %v2742_v22 = vpop.permute.xlu1 %2741 }
 0x3b6   : > { %v2833_v20 = vsel %vm12595_vm4, %v2830_v14, %v2826_v21 }
 0x3b7   : > { %v2834_v23 = vmul.f32 %v2833_v20, %v10183_v0 }
 0x3b9   : > { %9354 = vmatpush.msk.msrb.mxu3 %vm12597_vm2, %v2834_v23 }
 0x3ba   : > { %9355 = vmatmul.msk.f32.vlgmr.msrb.gmra.mxu3 %vm834_vm3, %v9353_v24 }
 0x3bc   : > { %v2744_v25 = vpop.permute.xlu2 %2743 }
 0x3bd   : > { %v2919_v16 = vpop.permute.xlu1 %2918  ;;  %v2915_v26 = vpop.permute.xlu0 %2914  ;;  %v2745_v27 = vsel %vm12596_vm1, %v2742_v22, %v2744_v25 }
 0x3be   : > { %v2922_v28 = vsel %vm12594_vm5, %v2919_v16, %v2915_v26  ;;  %9351 = vmatpush.msk.msrb.mxu2 %vm12597_vm2, %v2745_v27 }
 0x3bf   : > { %v2923_v29 = vmul.f32 %v2922_v28, %v10149_v48  ;;  %9352 = vmatmul.msk.f32.vlgmr.msrb.gmra.mxu2 %vm834_vm3, %v9346_v15  ;;  %v9395_v28 = vld [vmem:[%s12629_s11 + $0x20] sm:$0xf] }
 0x3c1   : > { %9361 = vmatpush.msk.msra.mxu2 %vm12597_vm2, %v2923_v29 }
 0x3c3   : > { %9370 = vmatpush.msk.msrb.mxu2 %vm12597_vm2, %v10565_v7 }
 0x3c4   : > { %v2740_v32 = vpop.permute.xlu2 %2739 }
 0x3c5   : > { %v3085_v34 = vpop.permute.xlu1 %3084  ;;  %v2828_v37 = vpop.permute.xlu0 %2827  ;;  %v2746_v38 = vsel %vm12596_vm1, %v2740_v32, %v2742_v22  ;;  %v2747_v39 = vsel %vm12596_vm1, %v2744_v25, %v2740_v32 }
 0x3c6   : > { %v2831_v41 = vsel %vm12595_vm4, %v2828_v37, %v2830_v14  ;;  %v2832_v42 = vsel %vm12595_vm4, %v2826_v21, %v2828_v37  ;;  %9347 = vmatpush.msk.msrb.mxu0 %vm12597_vm2, %v2747_v39  ;;  %9349 = vmatpush.msk.msrb.mxu1 %vm12597_vm2, %v2746_v38 }
 0x3c7   : > { %v2835_v43 = vmul.f32 %v2832_v42, %v10178_v62  ;;  %v2836_v44 = vmul.f32 %v2831_v41, %v10181_v63  ;;  %9348 = vmatmul.msk.f32.vlgmr.msrb.gmra.mxu0 %vm834_vm3, %v9346_v15  ;;  %9350 = vmatmul.msk.f32.vlgmr.msrb.gmra.mxu1 %vm834_vm3, %v9346_v15 }
 0x3c8   : > { %9362 = vmatmul.msk.f32.vlgmr.msra.gmra.mxu2 %vm834_vm3, %v9360_v40 }
 0x3c9   : > { %9356 = vmatpush.msk.msra.mxu0 %vm12597_vm2, %v2835_v43  ;;  %9358 = vmatpush.msk.msra.mxu1 %vm12597_vm2, %v2836_v44 }
 0x3cb   : > { %9368 = vmatpush.msk.msrb.mxu1 %vm12597_vm2, %v10562_v6 }
 0x3cc   : > { %v2917_v45 = vpop.permute.xlu2 %2916 }
 0x3cd   : > { %v3083_v46 = vpop.permute.xlu1 %3082  ;;  %v3170_v47 = vpop.permute.xlu0 %3169  ;;  %v2920_v50 = vsel %vm12594_vm5, %v2917_v45, %v2919_v16  ;;  %v2921_v54 = vsel %vm12594_vm5, %v2915_v26, %v2917_v45 }
 0x3ce   : > { %v3086_v55 = vsel %vm12593_vm6, %v3083_v46, %v3085_v34  ;;  %v2924_v58 = vmul.f32 %v2921_v54, %v10126_v35  ;;  %v2925_v59 = vmul.f32 %v2920_v50, %v10151_v49 }
 0x3cf   : > { %v3090_v30 = vmul.f32 %v3086_v55, %v10178_v62  ;;  %9357 = vmatmul.msk.f32.vlgmr.msra.gmra.mxu0 %vm834_vm3, %v9353_v24  ;;  %9359 = vmatmul.msk.f32.vlgmr.msra.gmra.mxu1 %vm834_vm3, %v9353_v24  ;;  %v9388_v24 = vld [vmem:[%s12629_s11 + $0x1c] sm:$0xf] }
 0x3d0   : > { %9363 = vmatpush.msk.msra.mxu3 %vm12597_vm2, %v2924_v58  ;;  %9365 = vmatpush.msk.msrb.mxu0 %vm12597_vm2, %v2925_v59 }
 0x3d1   : > { %9377 = vmatpush.msk.msra.mxu1 %vm12597_vm2, %v3090_v30  ;;  %9364 = vmatmul.msk.f32.vlgmr.msra.gmra.mxu3 %vm834_vm3, %v9360_v40 }
 0x3d2   : > { %9372 = vmatpush.msk.msrb.mxu3 %vm12597_vm2, %v10568_v8  ;;  %9371 = vmatmul.msk.f32.vlgmr.msrb.gmra.mxu2 %vm834_vm3, %v9367_v60  ;;  %v9374_v8 = vld [vmem:[%s12629_s11 + $0x14] sm:$0xf]  ;;  %s11836_s11 = scalar_lea.vmem %s12540_s25, %s9802_s5 }
 0x3d4   : > { %v3081_v61 = vpop.permute.xlu2 %3080 }
 0x3d5   : > { %v3259_v2 = vpop.permute.xlu0 %3258  ;;  %v3087_v3 = vsel %vm12593_vm6, %v3081_v61, %v3083_v46  ;;  %v3088_v6 = vsel %vm12593_vm6, %v3085_v34, %v3081_v61  ;;  %v3263_v57 = vpop.permute.xlu1 %3262 }
 0x3d6   : > { %v3089_v7 = vmul.f32 %v3087_v3, %v10183_v0  ;;  %v3091_v56 = vmul.f32 %v3088_v6, %v10181_v63  ;;  %v3266_v19 = vsel %vm12562_vm8, %v3263_v57, %v3259_v2 }
 0x3d7   : > { %9366 = vmatmul.msk.f32.vlgmr.msrb.gmra.mxu0 %vm834_vm3, %v9360_v40  ;;  %9369 = vmatmul.msk.f32.vlgmr.msrb.gmra.mxu1 %vm834_vm3, %v9367_v60 }
 0x3d8   : > { %9375 = vmatpush.msk.msra.mxu0 %vm12597_vm2, %v3089_v7  ;;  %9379 = vmatpush.msk.msra.mxu2 %vm12597_vm2, %v3091_v56 }
 0x3d9   : > { %9373 = vmatmul.msk.f32.vlgmr.msrb.gmra.mxu3 %vm834_vm3, %v9367_v60 }
 0x3da   : > { %9380 = vmatmul.msk.f32.vlgmr.msra.gmra.mxu2 %vm834_vm3, %v9374_v8 }
 0x3dc   : > { %v3172_v4 = vpop.permute.xlu2 %3171 }
 0x3dd   : > { %v3174_v31 = vpop.permute.xlu0 %3173  ;;  %v3176_v9 = vsel %vm12592_vm7, %v3170_v47, %v3172_v4  ;;  %v3347_v14 = vpop.permute.xlu1 %3346 }
 0x3de   : > { %v3177_v10 = vsel %vm12592_vm7, %v3174_v31, %v3170_v47  ;;  %v3175_v11 = vsel %vm12592_vm7, %v3172_v4, %v3174_v31  ;;  %v3178_v12 = vmul.f32 %v3176_v9, %v10149_v48 }
 0x3df   : > { %v3180_v13 = vmul.f32 %v3177_v10, %v10151_v49  ;;  %v3179_v17 = vmul.f32 %v3175_v11, %v10126_v35  ;;  %9376 = vmatmul.msk.f32.vlgmr.msra.gmra.mxu0 %vm834_vm3, %v9374_v8  ;;  %9378 = vmatmul.msk.f32.vlgmr.msra.gmra.mxu1 %vm834_vm3, %v9374_v8 }
 0x3e0   : > { %9382 = vmatpush.msk.msra.mxu3 %vm12597_vm2, %v3178_v12 }
 0x3e1   : > { %9384 = vmatpush.msk.msrb.mxu0 %vm12597_vm2, %v3179_v17  ;;  %9386 = vmatpush.msk.msrb.mxu1 %vm12597_vm2, %v3180_v13 }
 0x3e2   : > { %9383 = vmatmul.msk.f32.vlgmr.msra.gmra.mxu3 %vm834_vm3, %v9381_v36 }
 0x3e3   : > { %9393 = vmatpush.msk.msra.mxu0 %vm12597_vm2, %v3266_v19 }
 0x3e4   : > { %v3261_v21 = vpop.permute.xlu2 %3260 }
 0x3e5   : > { %v3349_v22 = vpop.permute.xlu0 %3348  ;;  %v3264_v20 = vsel %vm12562_vm8, %v3261_v21, %v3263_v57  ;;  %v3265_v23 = vsel %vm12562_vm8, %v3259_v2, %v3261_v21 }
 0x3e6   : > { %v3350_v25 = vsel %vm12561_vm9, %v3347_v14, %v3349_v22  ;;  %9389 = vmatpush.msk.msrb.mxu2 %vm12597_vm2, %v3265_v23  ;;  %9391 = vmatpush.msk.msrb.mxu3 %vm12597_vm2, %v3264_v20 }
 0x3e7   : > { %v3354_v15 = vmul.f32 %v3350_v25, %v10178_v62  ;;  %9385 = vmatmul.msk.f32.vlgmr.msrb.gmra.mxu0 %vm834_vm3, %v9381_v36  ;;  %9387 = vmatmul.msk.f32.vlgmr.msrb.gmra.mxu1 %vm834_vm3, %v9381_v36 }
 0x3e8   : > { %9390 = vmatmul.msk.f32.vlgmr.msrb.gmra.mxu2 %vm834_vm3, %v9388_v24 }
 0x3e9   : > { %9398 = vmatpush.msk.msra.mxu2 %vm12597_vm2, %v3354_v15  ;;  %v1713_v15 = vpop.permute.xlu1 %1712 }
 0x3ea   : > { %9392 = vmatmul.msk.f32.vlgmr.msrb.gmra.mxu3 %vm834_vm3, %v9388_v24 }
 0x3ec   : > { %v3345_v16 = vpop.permute.xlu2 %3344 }
 0x3ed   : > { %v3351_v26 = vsel %vm12561_vm9, %v3345_v16, %v3347_v14  ;;  %v3352_v27 = vsel %vm12561_vm9, %v3349_v22, %v3345_v16 }
 0x3ee   : > { %v3353_v29 = vmul.f32 %v3351_v26, %v10183_v0  ;;  %v3355_v32 = vmul.f32 %v3352_v27, %v10181_v63 }
 0x3ef   : > { %9394 = vmatmul.msk.f32.vlgmr.msra.gmra.mxu0 %vm834_vm3, %v9388_v24 }
 0x3f0   : > { %9399 = vmatmul.msk.f32.vlgmr.msra.gmra.mxu2 %vm834_vm3, %v9395_v28  ;;  %9396 = vmatpush.msk.msra.mxu1 %vm12597_vm2, %v3353_v29 }
 0x3f1   : > { %9400 = vmatpush.msk.msra.mxu3 %vm12597_vm2, %v3355_v32  ;;  %9397 = vmatmul.msk.f32.vlgmr.msra.gmra.mxu1 %vm834_vm3, %v9395_v28  ;;  %v1745_v32 = vadd.f32 %v10545_v51, %v1713_v15  ;;  %v1785_v51 = vadd.f32 %v10549_v53, %v1713_v15 }
 0x3f2   : > { %9401 = vmatmul.msk.f32.vlgmr.msra.gmra.mxu3 %vm834_vm3, %v9395_v28 }
 0x3f4   : > { %v2648_v55 = vpop.permute.xlu2 %2647 }
 0x42c   : > { %v2713_v37 = vpop.f32.mrf.mxu2 }
 0x42d   : > { %v2737_v2 = vadd.f32 %v2713_v37, %v2648_v55 }
 0x42e   : > { %v2693_v34 = vpop.f32.mrf.mxu1 }
 0x42f   : > { %v2736_v59 = vadd.f32 %v2693_v34, %v2648_v55 }
 0x434   : > { %v2733_v38 = vpop.f32.mrf.mxu3 }
 0x435   : > { %v2738_v7 = vadd.f32 %v2733_v38, %v2648_v55 }
 0x43d   : > { %v2868_v42 = vpop.f32.mrf.mxu3 }
 0x442   : > { %v2819_v41 = vpop.f32.mrf.mxu2 }
 0x443   : > { %v2824_v4 = vadd.f32 %v2819_v41, %v2738_v7  ;;  %v9408_v7 = vld [vmem:[%s12528_s13 + $0x4] sm:$0xf] }
 0x444   : > { %v2779_v39 = vpop.f32.mrf.mxu0  ;;  %v2799_v40 = vpop.f32.mrf.mxu1 }
 0x445   : > { %v2822_v61 = vadd.f32 %v2779_v39, %v2736_v59  ;;  %v2823_v56 = vadd.f32 %v2799_v40, %v2737_v2 }
 0x447   : > { %v2911_v3 = vadd.f32 %v2868_v42, %v2822_v61 }
 0x44b   : > { %v2957_v45 = vpop.f32.mrf.mxu2 }
 0x44c   : > { %v2888_v43 = vpop.f32.mrf.mxu0  ;;  %v2908_v44 = vpop.f32.mrf.mxu1  ;;  %v3000_v8 = vadd.f32 %v2957_v45, %v2911_v3 }
 0x44d   : > { %v2912_v31 = vadd.f32 %v2888_v43, %v2823_v56  ;;  %v2913_v12 = vadd.f32 %v2908_v44, %v2824_v4  ;;  %v3467_v4 = vld [vmem:[%s12528_s13] sm:$0xf] }
 0x454   : > { %v2977_v46 = vpop.f32.mrf.mxu3  ;;  %v2997_v47 = vpop.f32.mrf.mxu0 }
 0x455   : > { %v3034_v50 = vpop.f32.mrf.mxu1  ;;  %v3054_v54 = vpop.f32.mrf.mxu2  ;;  %v3001_v13 = vadd.f32 %v2977_v46, %v2912_v31  ;;  %v3002_v36 = vadd.f32 %v2997_v47, %v2913_v12  ;;  %v1765_v47 = vadd.f32 %v10547_v52, %v1713_v15  ;;  %v3448_v52 = vld [vmem:[%s12632_s14] sm:$0xf]  ;;  %s10993_s14 = scalar_lea.vmem %s12633_s12, %s9802_s5 }
 0x456   : > { %v3077_v10 = vadd.f32 %v3034_v50, %v3000_v8 }
 0x457   : > { %v3078_v14 = vadd.f32 %v3054_v54, %v3001_v13 }
 0x45c   : > { %v3074_v58 = vpop.f32.mrf.mxu3  ;;  %v3123_v30 = vpop.f32.mrf.mxu0 }
 0x45d   : > { %v3143_v60 = vpop.f32.mrf.mxu1  ;;  %v3163_v6 = vpop.f32.mrf.mxu2  ;;  %v3166_v17 = vadd.f32 %v3123_v30, %v3077_v10  ;;  %v3079_v22 = vadd.f32 %v3074_v58, %v3002_v36 }
 0x45e   : > { %v3167_v24 = vadd.f32 %v3143_v60, %v3078_v14 }
 0x45f   : > { %v3168_v26 = vadd.f32 %v3163_v6, %v3079_v22 }
 0x464   : > { %v3232_v11 = vpop.f32.mrf.mxu0 }
 0x465   : > { %v3212_v57 = vpop.f32.mrf.mxu3  ;;  %v3252_v9 = vpop.f32.mrf.mxu1  ;;  %v3256_v27 = vadd.f32 %v3232_v11, %v3167_v24 }
 0x466   : > { %v3255_v19 = vadd.f32 %v3212_v57, %v3166_v17  ;;  %v3257_v34 = vadd.f32 %v3252_v9, %v3168_v26 }
 0x46b   : > { %v3298_v21 = vpop.f32.mrf.mxu2 }
 0x46c   : > { %v3341_v20 = vadd.f32 %v3298_v21, %v3255_v19  ;;  %v3338_v28 = vpop.f32.mrf.mxu0  ;;  %v9415_v21 = vld [vmem:[%s12528_s13 + $0x8] sm:$0xf] }
 0x46d   : > { %v3318_v23 = vpop.f32.mrf.mxu3  ;;  %v3343_v40 = vadd.f32 %v3338_v28, %v3257_v34 }
 0x46e   : > { %v3387_v25 = vpop.f32.mrf.mxu1  ;;  %v3342_v37 = vadd.f32 %v3318_v23, %v3256_v27 }
 0x46f   : > { %v3430_v16 = vadd.f32 %v3387_v25, %v3341_v20 }
 0x471   : > { %vm3433_vm14 = vcmp.ge.f32.partialorder %v3430_v16, 0.0  ;;  %v3436_v29 = vmul.f32 0.1, %v3430_v16 }
 0x473   : > { %v3439_v38 = vsel %vm3433_vm14, %v3430_v16, %v3436_v29  ;;  %v3407_v39 = vpop.f32.mrf.mxu2 }
 0x474   : > { %v3442_v41 = vadd.f32 %v3439_v38, %v1745_v32  ;;  %v3431_v42 = vadd.f32 %v3407_v39, %v3342_v37 }
 0x475   : > { %v3427_v43 = vpop.f32.mrf.mxu3 }
 0x476   : > { %v10776_v44 = vmul.f32 %v3442_v41, %v10310_v1  ;;  %vm3434_vm15 = vcmp.ge.f32.partialorder %v3431_v42, 0.0  ;;  %v3437_v45 = vmul.f32 0.1, %v3431_v42  ;;  %v3432_v46 = vadd.f32 %v3427_v43, %v3343_v40  ;;  %v9422_v43 = vld [vmem:[%s12528_s13 + $0xc] sm:$0xf] }
 0x478   : > { %v3440_v50 = vsel %vm3434_vm15, %v3431_v42, %v3437_v45  ;;  %vm3435_vm10 = vcmp.ge.f32.partialorder %v3432_v46, 0.0  ;;  %v3438_v54 = vmul.f32 0.1, %v3432_v46  ;;  %3543 = vrot.lane.b32.xlu0 %v10776_v44, %s12622_s8  ;;  %3455 = vrot.lane.b32.xlu1 %v10776_v44, %s12630_s1 }
 0x479   : > { %v3443_v55 = vadd.f32 %v3440_v50, %v1765_v47 }
 0x47a   : > { %v3441_v58 = vsel %vm3435_vm10, %v3432_v46, %v3438_v54  ;;  %v9429_v46 = vld [vmem:[%s12528_s13 + $0x10] sm:$0xf] }
 0x47b   : > { %v3444_v59 = vadd.f32 %v3441_v58, %v1785_v51  ;;  %v10788_v60 = vmul.f32 %v3443_v55, %v10312_v5  ;;  %v9436_v55 = vld [vmem:[%s12528_s13 + $0x14] sm:$0xf] }
 0x47d   : > { %v10785_v30 = vmul.f32 %v3444_v59, %v10325_v18 }
 0x47f   : > { %3459 = vrot.lane.b32.xlu2 %v10785_v30, %s12630_s1 }
 0x480   : > { %3457 = vrot.lane.b32.xlu0 %v10788_v60, %s12630_s1  ;;  %3629 = vrot.lane.b32.xlu1 %v10776_v44, %s12631_s27 }
 0x487   : > { %3547 = vrot.lane.b32.xlu2 %v10785_v30, %s12622_s8 }
 0x488   : > { %3633 = vrot.lane.b32.xlu0 %v10785_v30, %s12631_s27  ;;  %3545 = vrot.lane.b32.xlu1 %v10788_v60, %s12622_s8 }
 0x48f   : > { %3631 = vrot.lane.b32.xlu2 %v10788_v60, %s12631_s27 }
 0x490   : > { %3718 = vrot.lane.b32.xlu0 %v10776_v44, %s12623_s28  ;;  %3722 = vrot.lane.b32.xlu1 %v10785_v30, %s12623_s28 }
 0x497   : > { %3720 = vrot.lane.b32.xlu2 %v10788_v60, %s12623_s28 }
 0x498   : > { %3884 = vrot.lane.b32.xlu0 %v10776_v44, %s12624_s0  ;;  %3973 = vrot.lane.b32.xlu1 %v10776_v44, %s12625_s3 }
 0x49f   : > { %3886 = vrot.lane.b32.xlu2 %v10788_v60, %s12624_s0 }
 0x4a0   : > { %3975 = vrot.lane.b32.xlu0 %v10788_v60, %s12625_s3  ;;  %3977 = vrot.lane.b32.xlu1 %v10785_v30, %s12625_s3 }
 0x4a7   : > { %3888 = vrot.lane.b32.xlu2 %v10785_v30, %s12624_s0 }
 0x4a8   : > { %4064 = vrot.lane.b32.xlu0 %v10788_v60, %s12626_s9  ;;  %4062 = vrot.lane.b32.xlu1 %v10776_v44, %s12626_s9 }
 0x4af   : > { %4066 = vrot.lane.b32.xlu2 %v10785_v30, %s12626_s9 }
 0x4b0   : > { %4148 = vrot.lane.b32.xlu0 %v10776_v44, %s12616_s6  ;;  %4150 = vrot.lane.b32.xlu1 %v10788_v60, %s12616_s6 }
 0x4b7   : > { %4152 = vrot.lane.b32.xlu2 %v10785_v30, %s12616_s6 }
 0x4b8   : > { %3451 = vperm.xlu0 %9824, %v3448_v52  }
 0x4d9   : > { %v3460_v53 = vpop.permute.xlu2 %3459 }
 0x4e1   : > { %v3548_v61 = vpop.permute.xlu2 %3547 }
 0x4e9   : > { %v3632_v2 = vpop.permute.xlu2 %3631 }
 0x4ea   : > { %v3544_v3 = vpop.permute.xlu0 %3543  ;;  %v3456_v6 = vpop.permute.xlu1 %3455 }
 0x4eb   : > { %v3551_v56 = vsel %vm12596_vm1, %v3548_v61, %v3544_v3  ;;  %v3463_v8 = vsel %vm815_vm0, %v3460_v53, %v3456_v6 }
 0x4ec   : > { %v3464_v57 = vmul.f32 %v3463_v8, %v10149_v48  ;;  %9409 = vmatpush.msk.msrb.mxu3 %vm12597_vm2, %v3551_v56 }
 0x4ed   : > { %9410 = vmatmul.msk.f32.vlgmr.msrb.gmra.mxu3 %vm834_vm3, %v9408_v7 }
 0x4ee   : > { %9402 = vmatpush.msk.msrb.mxu0 %vm12597_vm2, %v3464_v57 }
 0x4ef   : > { %9403 = vmatmul.msk.f32.vlgmr.msrb.gmra.mxu0 %vm834_vm3, %v3467_v4 }
 0x4f1   : > { %v3721_v31 = vpop.permute.xlu2 %3720 }
 0x4f2   : > { %v3458_v9 = vpop.permute.xlu0 %3457  ;;  %v3630_v10 = vpop.permute.xlu1 %3629 }
 0x4f3   : > { %v3461_v11 = vsel %vm815_vm0, %v3458_v9, %v3460_v53  ;;  %v3462_v12 = vsel %vm815_vm0, %v3456_v6, %v3458_v9  ;;  %v3636_v13 = vsel %vm12595_vm4, %v3630_v10, %v3632_v2 }
 0x4f4   : > { %v3465_v17 = vmul.f32 %v3462_v12, %v10126_v35  ;;  %v3466_v36 = vmul.f32 %v3461_v11, %v10151_v49  ;;  %v3639_v19 = vmul.f32 %v3636_v13, %v10178_v62 }
 0x4f6   : > { %9404 = vmatpush.msk.msrb.mxu1 %vm12597_vm2, %v3465_v17  ;;  %9406 = vmatpush.msk.msrb.mxu2 %vm12597_vm2, %v3466_v36 }
 0x4f7   : > { %9418 = vmatpush.msk.msra.mxu3 %vm12597_vm2, %v3639_v19  ;;  %9405 = vmatmul.msk.f32.vlgmr.msrb.gmra.mxu1 %vm834_vm3, %v3467_v4 }
 0x4f8   : > { %9407 = vmatmul.msk.f32.vlgmr.msrb.gmra.mxu2 %vm834_vm3, %v3467_v4  ;;  %9419 = vmatmul.msk.f32.vlgmr.msra.gmra.mxu3 %vm834_vm3, %v9415_v21 }
 0x4f9   : > { %v3887_v14 = vpop.permute.xlu2 %3886 }
 0x4fa   : > { %v3634_v22 = vpop.permute.xlu0 %3633  ;;  %v3546_v20 = vpop.permute.xlu1 %3545 }
 0x4fb   : > { %v3635_v23 = vsel %vm12595_vm4, %v3632_v2, %v3634_v22  ;;  %v3637_v24 = vsel %vm12595_vm4, %v3634_v22, %v3630_v10  ;;  %v3549_v25 = vsel %vm12596_vm1, %v3546_v20, %v3548_v61  ;;  %v3550_v15 = vsel %vm12596_vm1, %v3544_v3, %v3546_v20  ;;  %v9443_v3 = vld [vmem:[%s12528_s13 + $0x18] sm:$0xf]  ;;  %v4299_v22 = vld [vmem:[%s10993_s14 + $0x10] sm:$0xff] }
 0x4fc   : > { %v3638_v16 = vmul.f32 %v3637_v24, %v10183_v0  ;;  %v3640_v26 = vmul.f32 %v3635_v23, %v10181_v63  ;;  %9411 = vmatpush.msk.msra.mxu0 %vm12597_vm2, %v3550_v15  ;;  %9413 = vmatpush.msk.msra.mxu1 %vm12597_vm2, %v3549_v25  ;;  %v10996_v20 = vrot.slane %v4299_v22, 4  ;;  %v4298_v25 = vld [vmem:[%s10993_s14 + $0x8] sm:$0xff] }
 0x4fd   : > { %9412 = vmatmul.msk.f32.vlgmr.msra.gmra.mxu0 %vm834_vm3, %v9408_v7  ;;  %v11001_v15 = vrot.slane %v4298_v25, 4 }
 0x4fe   : > { %9416 = vmatpush.msk.msra.mxu2 %vm12597_vm2, %v3638_v16  ;;  %9420 = vmatpush.msk.msrb.mxu0 %vm12597_vm2, %v3640_v26  ;;  %12634 = vst [vmem:[#allocation2_spill] sm:$0xff] %v10996_v20 }
 0x4ff   : > { %9414 = vmatmul.msk.f32.vlgmr.msra.gmra.mxu1 %vm834_vm3, %v9408_v7  ;;  %4320 = vrot.lane.b32.xlu1 %v10996_v20, %s12630_s1  ;;  %12635 = vst [vmem:[#allocation3_spill] sm:$0xff] %v11001_v15 }
 0x500   : > { %9430 = vmatpush.msk.msra.mxu0 %vm12597_vm2, %v10776_v44  ;;  %9417 = vmatmul.msk.f32.vlgmr.msra.gmra.mxu2 %vm834_vm3, %v9415_v21 }
 0x501   : > { %v3889_v27 = vpop.permute.xlu2 %3888  ;;  %4318 = vrot.lane.b32.xlu0 %v11001_v15, %s12630_s1 }
 0x502   : > { %v3890_v28 = vsel %vm12593_vm6, %v3887_v14, %v3889_v27  ;;  %v3719_v29 = vpop.permute.xlu0 %3718  ;;  %v3723_v32 = vpop.permute.xlu1 %3722 }
 0x503   : > { %v3894_v34 = vmul.f32 %v3890_v28, %v10178_v62  ;;  %v3725_v37 = vsel %vm12594_vm5, %v3719_v29, %v3721_v31  ;;  %v3724_v38 = vsel %vm12594_vm5, %v3721_v31, %v3723_v32  ;;  %v3726_v39 = vsel %vm12594_vm5, %v3723_v32, %v3719_v29  ;;  %v9450_v31 = vld [vmem:[%s12528_s13 + $0x1c] sm:$0xf] }
 0x504   : > { %v3728_v40 = vmul.f32 %v3725_v37, %v10126_v35  ;;  %v3727_v41 = vmul.f32 %v3726_v39, %v10149_v48  ;;  %v3729_v42 = vmul.f32 %v3724_v38, %v10151_v49  ;;  %v4297_v38 = vld [vmem:[%s10993_s14] sm:$0xff] }
 0x505   : > { %9421 = vmatmul.msk.f32.vlgmr.msrb.gmra.mxu0 %vm834_vm3, %v9415_v21  ;;  %v11010_v39 = vrot.slane %v4297_v38, 4 }
 0x506   : > { %9439 = vmatpush.msk.msrb.mxu0 %vm12597_vm2, %v3894_v34  ;;  %9423 = vmatpush.msk.msrb.mxu1 %vm12597_vm2, %v3727_v41 }
 0x507   : > { %9425 = vmatpush.msk.msrb.mxu2 %vm12597_vm2, %v3728_v40  ;;  %9427 = vmatpush.msk.msrb.mxu3 %vm12597_vm2, %v3729_v42  ;;  %12636 = vst [vmem:[#allocation4_spill] sm:$0xff] %v11010_v39 }
 0x508   : > { %9424 = vmatmul.msk.f32.vlgmr.msrb.gmra.mxu1 %vm834_vm3, %v9422_v43  ;;  %9426 = vmatmul.msk.f32.vlgmr.msrb.gmra.mxu2 %vm834_vm3, %v9422_v43 }
 0x509   : > { %9428 = vmatmul.msk.f32.vlgmr.msrb.gmra.mxu3 %vm834_vm3, %v9422_v43  ;;  %9432 = vmatpush.msk.msra.mxu1 %vm12597_vm2, %v10788_v60  ;;  %v4067_v6 = vpop.permute.xlu2 %4066 }
 0x50a   : > { %9434 = vmatpush.msk.msra.mxu2 %vm12597_vm2, %v10785_v30  ;;  %v3885_v44 = vpop.permute.xlu0 %3884  ;;  %v3974_v45 = vpop.permute.xlu1 %3973  ;;  %4494 = vrot.lane.b32.xlu1 %v11001_v15, %s12622_s8 }
 0x50b   : > { %v3891_v47 = vsel %vm12593_vm6, %v3885_v44, %v3887_v14  ;;  %v3892_v50 = vsel %vm12593_vm6, %v3889_v27, %v3885_v44  ;;  %v9457_v14 = vld [vmem:[%s12528_s13 + $0x20] sm:$0xf]  ;;  %4496 = vrot.lane.b32.xlu0 %v10996_v20, %s12622_s8  ;;  %4316 = vrot.lane.b32.xlu2 %v11010_v39, %s12630_s1 }
 0x50c   : > { %v3893_v54 = vmul.f32 %v3891_v47, %v10183_v0  ;;  %v3895_v51 = vmul.f32 %v3892_v50, %v10181_v63 }
 0x50d   : > { %9431 = vmatmul.msk.f32.vlgmr.msra.gmra.mxu0 %vm834_vm3, %v9429_v46 }
 0x50e   : > { %9437 = vmatpush.msk.msra.mxu3 %vm12597_vm2, %v3893_v54  ;;  %9441 = vmatpush.msk.msrb.mxu1 %vm12597_vm2, %v3895_v51 }
 0x510   : > { %9433 = vmatmul.msk.f32.vlgmr.msra.gmra.mxu1 %vm834_vm3, %v9429_v46  ;;  %9435 = vmatmul.msk.f32.vlgmr.msra.gmra.mxu2 %vm834_vm3, %v9429_v46 }
 0x511   : > { %9438 = vmatmul.msk.f32.vlgmr.msra.gmra.mxu3 %vm834_vm3, %v9436_v55  ;;  %v4153_v9 = vpop.permute.xlu2 %4152 }
 0x512   : > { %v3976_v58 = vpop.permute.xlu0 %3975  ;;  %v3978_v59 = vpop.permute.xlu1 %3977 }
 0x513   : > { %v3980_v30 = vsel %vm12592_vm7, %v3974_v45, %v3976_v58  ;;  %v3979_v60 = vsel %vm12592_vm7, %v3976_v58, %v3978_v59  ;;  %v3981_v52 = vsel %vm12592_vm7, %v3978_v59, %v3974_v45  ;;  %4664 = vrot.lane.b32.xlu0 %v11010_v39, %s12631_s27  ;;  %4492 = vrot.lane.b32.xlu2 %v11010_v39, %s12622_s8 }
 0x514   : > { %v3982_v53 = vmul.f32 %v3980_v30, %v10149_v48  ;;  %v3983_v61 = vmul.f32 %v3979_v60, %v10126_v35  ;;  %v3984_v2 = vmul.f32 %v3981_v52, %v10151_v49 }
 0x515   : > { %9440 = vmatmul.msk.f32.vlgmr.msrb.gmra.mxu0 %vm834_vm3, %v9436_v55 }
 0x516   : > { %9444 = vmatpush.msk.msrb.mxu2 %vm12597_vm2, %v3982_v53  ;;  %9446 = vmatpush.msk.msrb.mxu3 %vm12597_vm2, %v3983_v61 }
 0x517   : > { %9448 = vmatpush.msk.msra.mxu0 %vm12597_vm2, %v3984_v2 }
 0x518   : > { %9442 = vmatmul.msk.f32.vlgmr.msrb.gmra.mxu1 %vm834_vm3, %v9436_v55  ;;  %9445 = vmatmul.msk.f32.vlgmr.msrb.gmra.mxu2 %vm834_vm3, %v9443_v3 }
 0x519   : > { %9447 = vmatmul.msk.f32.vlgmr.msrb.gmra.mxu3 %vm834_vm3, %v9443_v3 }
 0x51a   : > { %v4065_v7 = vpop.permute.xlu0 %4064  ;;  %v4063_v56 = vpop.permute.xlu1 %4062 }
 0x51b   : > { %v4068_v8 = vsel %vm12562_vm8, %v4065_v7, %v4067_v6  ;;  %v4069_v57 = vsel %vm12562_vm8, %v4063_v56, %v4065_v7  ;;  %v4070_v4 = vsel %vm12562_vm8, %v4067_v6, %v4063_v56  ;;  %4668 = vrot.lane.b32.xlu2 %v10996_v20, %s12631_s27 }
 0x51c   : > { %9451 = vmatpush.msk.msra.mxu1 %vm12597_vm2, %v4069_v57  ;;  %9453 = vmatpush.msk.msra.mxu2 %vm12597_vm2, %v4068_v8 }
 0x51d   : > { %9455 = vmatpush.msk.msra.mxu3 %vm12597_vm2, %v4070_v4  ;;  %9449 = vmatmul.msk.f32.vlgmr.msra.gmra.mxu0 %vm834_vm3, %v9443_v3 }
 0x520   : > { %9452 = vmatmul.msk.f32.vlgmr.msra.gmra.mxu1 %vm834_vm3, %v9450_v31  ;;  %9454 = vmatmul.msk.f32.vlgmr.msra.gmra.mxu2 %vm834_vm3, %v9450_v31 }
 0x521   : > { %9456 = vmatmul.msk.f32.vlgmr.msra.gmra.mxu3 %vm834_vm3, %v9450_v31 }
 0x522   : > { %v4149_v10 = vpop.permute.xlu0 %4148  ;;  %v4151_v11 = vpop.permute.xlu1 %4150 }
 0x523   : > { %v4156_v12 = vsel %vm12561_vm9, %v4153_v9, %v4149_v10  ;;  %v4154_v13 = vsel %vm12561_vm9, %v4151_v11, %v4153_v9  ;;  %v4155_v17 = vsel %vm12561_vm9, %v4149_v10, %v4151_v11 }
 0x524   : > { %v4159_v36 = vmul.f32 %v4156_v12, %v10181_v63  ;;  %v4157_v19 = vmul.f32 %v4155_v17, %v10183_v0  ;;  %v4158_v21 = vmul.f32 %v4154_v13, %v10178_v62 }
 0x526   : > { %9458 = vmatpush.msk.msrb.mxu0 %vm12597_vm2, %v4157_v19  ;;  %9460 = vmatpush.msk.msrb.mxu1 %vm12597_vm2, %v4158_v21 }
 0x527   : > { %9462 = vmatpush.msk.msrb.mxu2 %vm12597_vm2, %v4159_v36  ;;  %9459 = vmatmul.msk.f32.vlgmr.msrb.gmra.mxu0 %vm834_vm3, %v9457_v14 }
 0x528   : > { %9461 = vmatmul.msk.f32.vlgmr.msrb.gmra.mxu1 %vm834_vm3, %v9457_v14  ;;  %9463 = vmatmul.msk.f32.vlgmr.msrb.gmra.mxu2 %vm834_vm3, %v9457_v14 }
 0x52a   : > { %v3452_v44 = vpop.permute.xlu0 %3451 }
 0x56c   : > { %v3497_v23 = vpop.f32.mrf.mxu0 }
 0x56d   : > { %v3540_v45 = vadd.f32 %v3497_v23, %v3452_v44 }
 0x570   : > { %v3583_v27 = vpop.f32.mrf.mxu3 }
 0x571   : > { %v3626_v50 = vadd.f32 %v3583_v27, %v3540_v45 }
 0x574   : > { %v3517_v24 = vpop.f32.mrf.mxu1 }
 0x575   : > { %v3541_v46 = vadd.f32 %v3517_v24, %v3452_v44 }
 0x57a   : > { %v3603_v16 = vpop.f32.mrf.mxu0 }
 0x57b   : > { %v3537_v26 = vpop.f32.mrf.mxu2  ;;  %v3692_v34 = vpop.f32.mrf.mxu3  ;;  %v3627_v51 = vadd.f32 %v3603_v16, %v3541_v46 }
 0x57c   : > { %v3623_v28 = vpop.f32.mrf.mxu1  ;;  %v3542_v30 = vadd.f32 %v3537_v26, %v3452_v44 }
 0x57d   : > { %v3716_v60 = vadd.f32 %v3692_v34, %v3627_v51 }
 0x57e   : > { %v3628_v3 = vadd.f32 %v3623_v28, %v3542_v30 }
 0x582   : > { %v3712_v29 = vpop.f32.mrf.mxu0 }
 0x583   : > { %v3672_v32 = vpop.f32.mrf.mxu2  ;;  %v3717_v57 = vadd.f32 %v3712_v29, %v3628_v3 }
 0x584   : > { %v3715_v58 = vadd.f32 %v3672_v32, %v3626_v50 }
 0x585   : > { %v3761_v37 = vpop.f32.mrf.mxu1 }
 0x586   : > { %v3804_v52 = vadd.f32 %v3761_v37, %v3715_v58 }
 0x58a   : > { %v3838_v40 = vpop.f32.mrf.mxu0 }
 0x58b   : > { %v3781_v41 = vpop.f32.mrf.mxu2  ;;  %v3881_v61 = vadd.f32 %v3838_v40, %v3804_v52 }
 0x58c   : > { %v3801_v42 = vpop.f32.mrf.mxu3  ;;  %v3805_v53 = vadd.f32 %v3781_v41, %v3716_v60 }
 0x58d   : > { %v3858_v43 = vpop.f32.mrf.mxu1  ;;  %v3806_v9 = vadd.f32 %v3801_v42, %v3717_v57 }
 0x58e   : > { %v3882_v4 = vadd.f32 %v3858_v43, %v3805_v53 }
 0x592   : > { %v3947_v47 = vpop.f32.mrf.mxu0 }
 0x593   : > { %v3878_v54 = vpop.f32.mrf.mxu2  ;;  %v3971_v10 = vadd.f32 %v3947_v47, %v3882_v4 }
 0x594   : > { %v3927_v55 = vpop.f32.mrf.mxu3  ;;  %v3883_v11 = vadd.f32 %v3878_v54, %v3806_v9 }
 0x595   : > { %v3967_v59 = vpop.f32.mrf.mxu1  ;;  %v3970_v7 = vadd.f32 %v3927_v55, %v3881_v61 }
 0x596   : > { %v3972_v22 = vadd.f32 %v3967_v59, %v3883_v11 }
 0x59a   : > { %v4056_v6 = vpop.f32.mrf.mxu0 }
 0x59b   : > { %v4016_v2 = vpop.f32.mrf.mxu2  ;;  %v4061_v16 = vadd.f32 %v4056_v6, %v3972_v22 }
 0x59c   : > { %v4036_v56 = vpop.f32.mrf.mxu3  ;;  %v4059_v31 = vadd.f32 %v4016_v2, %v3970_v7 }
 0x59d   : > { %v4102_v8 = vpop.f32.mrf.mxu1  ;;  %v4060_v12 = vadd.f32 %v4036_v56, %v3971_v10 }
 0x59e   : > { %v4145_v13 = vadd.f32 %v4102_v8, %v4059_v31 }
 0x5a3   : > { %v4122_v17 = vpop.f32.mrf.mxu2 }
 0x5a4   : > { %v4146_v36 = vadd.f32 %v4122_v17, %v4060_v12  ;;  %v4191_v19 = vpop.f32.mrf.mxu0  ;;  %v4142_v24 = vpop.f32.mrf.mxu3 }
 0x5a5   : > { %v4234_v21 = vadd.f32 %v4191_v19, %v4145_v13  ;;  %v4211_v14 = vpop.f32.mrf.mxu1  ;;  %v4147_v28 = vadd.f32 %v4142_v24, %v4061_v16  ;;  %v4317_v24 = vpop.permute.xlu2 %4316 }
 0x5a6   : > { %v4235_v23 = vadd.f32 %v4211_v14, %v4146_v36 }
 0x5a7   : > { %v4237_v25 = vsub.f32 0.0, %v4234_v21 }
 0x5a8   : > { %v4238_v26 = vsub.f32 0.0, %v4235_v23  ;;  %v4321_v23 = vpop.permute.xlu1 %4320 }
 0x5a9   : > { %v4240_v27 = vmul.f32 1.442695, %v4237_v25  ;;  %v4324_v25 = vsel %vm815_vm0, %v4321_v23, %v4317_v24 }
 0x5aa   : > { %v4242_v29 = vmul.f32 1.442695, %v4238_v26  ;;  %v4325_v16 = vmul.f32 %v4324_v25, %v10149_v48  ;;  %v4328_v26 = vld [vmem:[%s12535_s20] sm:$0xff] }
 0x5ab   : > { %9849 = vpow2.f32 %v4240_v27  ;;  %v4231_v32 = vpop.f32.mrf.mxu2  ;;  %v4319_v27 = vpop.permute.xlu0 %4318 }
 0x5ac   : > { %9851 = vpow2.f32 %v4242_v29  ;;  %v4236_v34 = vadd.f32 %v4231_v32, %v4147_v28  ;;  %9464 = vmatpush.msk.msrb.mxu3 %vm12597_vm2, %v4325_v16  ;;  %v4322_v28 = vsel %vm815_vm0, %v4319_v27, %v4321_v23  ;;  %v4323_v29 = vsel %vm815_vm0, %v4317_v24, %v4319_v27 }
 0x5ad   : > { %9465 = vmatmul.msk.f32.vlgmr.msrb.gmra.mxu3 %vm834_vm3, %v4328_v26  ;;  %v4326_v32 = vmul.f32 %v4323_v29, %v10126_v35  ;;  %v9497_v29 = vld [vmem:[%s12536_s21 + $0x10] sm:$0xff] }
 0x5ae   : > { %v4239_v37 = vsub.f32 0.0, %v4236_v34  ;;  %v4327_v34 = vmul.f32 %v4322_v28, %v10151_v49 }
 0x5af   : > { %9466 = vmatpush.msk.msra.mxu0 %vm12597_vm2, %v4326_v32  ;;  %v9504_v32 = vld [vmem:[%s12535_s20 + $0x18] sm:$0xff] }
 0x5b0   : > { %v4244_v38 = vmul.f32 1.442695, %v4239_v37  ;;  %9468 = vmatpush.msk.msra.mxu1 %vm12597_vm2, %v4327_v34  ;;  %9467 = vmatmul.msk.f32.vlgmr.msra.gmra.mxu0 %vm834_vm3, %v4328_v26  ;;  %v4493_v37 = vpop.permute.xlu2 %4492 }
 0x5b1   : > { %v9850_v40 = vpop.eup %9849  ;;  %9469 = vmatmul.msk.f32.vlgmr.msra.gmra.mxu1 %vm834_vm3, %v4328_v26 }
 0x5b2   : > { %v9852_v41 = vpop.eup %9851  ;;  %v4246_v42 = vadd.f32 1.0, %v9850_v40  ;;  %9853 = vpow2.f32 %v4244_v38 }
 0x5b3   : > { %v4247_v43 = vadd.f32 1.0, %v9852_v41  ;;  %v4497_v38 = vpop.permute.xlu0 %4496 }
 0x5b4   : > { %9855 = vrcp.f32 %v4246_v42  ;;  %v4260_v55 = vand.u32 2147483648, %v4246_v42  ;;  %v4258_v30 = vand.u32 2147483647, %v4246_v42  ;;  %vm4254_vm13 = vweird.f32 %v4246_v42 }
 0x5b5   : > { %9857 = vrcp.f32 %v4247_v43  ;;  %v4275_v60 = vand.u32 2147483648, %v4247_v43  ;;  %v4273_v53 = vand.u32 2147483647, %v4247_v43  ;;  %vm4269_vm15 = vweird.f32 %v4247_v43 }
 0x5b6   : > { %v4261_v3 = vor.u32 1.1754944e-38, %v4260_v55  ;;  %vm4259_vm10 = vcmp.eq.f32.partialorder %v4258_v30, 8.507059e+37  ;;  %v4500_v40 = vsel %vm12596_vm1, %v4497_v38, %v4493_v37 }
 0x5b7   : > { %v4276_v8 = vor.u32 1.1754944e-38, %v4275_v60  ;;  %vm4274_vm8 = vcmp.eq.f32.partialorder %v4273_v53, 8.507059e+37  ;;  %9477 = vmatpush.msk.msrb.mxu1 %vm12597_vm2, %v4500_v40 }
 0x5b8   : > { %v9854_v44 = vpop.eup %9853  ;;  %v4669_v41 = vpop.permute.xlu2 %4668 }
 0x5b9   : > { %v4248_v45 = vadd.f32 1.0, %v9854_v44 }
 0x5ba   : > { %v9856_v46 = vpop.eup %9855 }
 0x5bb   : > { %v9858_v47 = vpop.eup %9857  ;;  %v4250_v50 = vmul.f32 %v9856_v46, %v4246_v42  ;;  %9859 = vrcp.f32 %v4248_v45  ;;  %vm4255_vm11 = vweird.f32 %v9856_v46  ;;  %v4290_v11 = vand.u32 2147483648, %v4248_v45 }
 0x5bc   : > { %v4265_v54 = vmul.f32 %v9858_v47, %v4247_v43  ;;  %vm4270_vm12 = vweird.f32 %v9858_v47  ;;  %vm4256_vm14 = vmor %vm4254_vm13, %vm4255_vm11  ;;  %v4288_v17 = vand.u32 2147483647, %v4248_v45  ;;  %v9476_v43 = vld [vmem:[%s12535_s20 + $0x8] sm:$0xff] }
 0x5bd   : > { %v4251_v51 = vsub.f32 1.0, %v4250_v50  ;;  %vm4271_vm9 = vmor %vm4269_vm15, %vm4270_vm12  ;;  %vm4284_vm12 = vweird.f32 %v4248_v45  ;;  %v4291_v19 = vor.u32 1.1754944e-38, %v4290_v11  ;;  %9478 = vmatmul.msk.f32.vlgmr.msrb.gmra.mxu1 %vm834_vm3, %v9476_v43  ;;  %v4665_v50 = vpop.permute.xlu0 %4664 }
 0x5be   : > { %v4266_v58 = vsub.f32 1.0, %v4265_v54  ;;  %vm4289_vm13 = vcmp.eq.f32.partialorder %v4288_v17, 8.507059e+37  ;;  %v4672_v55 = vsel %vm12595_vm4, %v4669_v41, %v4665_v50 }
 0x5bf   : > { %v4252_v59 = vmul.f32 %v9856_v46, %v4251_v51  ;;  %v4673_v60 = vmul.f32 %v4672_v55, %v10183_v0 }
 0x5c0   : > { %v4267_v52 = vmul.f32 %v9858_v47, %v4266_v58 }
 0x5c1   : > { %v9860_v61 = vpop.eup %9859  ;;  %v4253_v2 = vadd.f32 %v9856_v46, %v4252_v59  ;;  %v4416_v59 = vld [vmem:[%s12536_s21] sm:$0xff] }
 0x5c2   : > { %v4268_v6 = vadd.f32 %v9858_v47, %v4267_v52  ;;  %v4280_v7 = vmul.f32 %v9860_v61, %v4248_v45  ;;  %vm4285_vm11 = vweird.f32 %v9860_v61  ;;  %v4300_v45 = vld [vmem:[%s12537_s22] sm:$0xff] }
 0x5c3   : > { %v4257_v56 = vsel %vm4256_vm14, %v9856_v46, %v4253_v2  ;;  %v4495_v46 = vpop.permute.xlu1 %4494 }
 0x5c4   : > { %v4262_v57 = vsel %vm4259_vm10, %v4261_v3, %v4257_v56  ;;  %v4272_v4 = vsel %vm4271_vm9, %v9858_v47, %v4268_v6  ;;  %v4281_v31 = vsub.f32 1.0, %v4280_v7  ;;  %vm4286_vm9 = vmor %vm4284_vm12, %vm4285_vm11  ;;  %v4498_v30 = vsel %vm12596_vm1, %v4495_v46, %v4497_v38 }
 0x5c5   : > { %v11021_v9 = vmul.f32 %v4262_v57, %v10310_v1  ;;  %v4277_v10 = vsel %vm4274_vm8, %v4276_v8, %v4272_v4  ;;  %v9483_v8 = vld [vmem:[%s12536_s21 + $0x8] sm:$0xff]  ;;  %v4499_v57 = vsel %vm12596_vm1, %v4493_v37, %v4495_v46  ;;  %vm12656_vm8 = vcmp.lt.s32.totalorder %v10122_v33, 112 }
 0x5c6   : > { %v11024_v12 = vmul.f32 %v4277_v10, %v10312_v5  ;;  %v4282_v13 = vmul.f32 %v9860_v61, %v4281_v31  ;;  %vm12657_vm14 = vmmov %vm12656_vm8  ;;  %vm12659_vm10 = vcmp.lt.s32.totalorder %v10122_v33, 111 }
 0x5c7   : > { %12637 = vst [vmem:[#allocation5_spill] sm:$0xff] %v11021_v9  ;;  %4404 = vrot.lane.b32.xlu2 %v11021_v9, %s12630_s1  ;;  %vm12658_vm15 = vmmov %vm12656_vm8 }
 0x5c8   : > { %12638 = vst [vmem:[#allocation6_spill] sm:$0xff] %v11024_v12  ;;  %v4283_v36 = vadd.f32 %v9860_v61, %v4282_v13  ;;  %4406 = vrot.lane.b32.xlu1 %v11024_v12, %s12630_s1  ;;  %vm12660_vm11 = vmmov %vm12656_vm8 }
 0x5c9   : > { %vm12662_vm12 = vmmov %vm12659_vm10 }
 0x5ca   : > { %v4287_v21 = vsel %vm4286_vm9, %v9860_v61, %v4283_v36  ;;  %vm12663_vm9 = vmmov %vm12659_vm10 }
 0x5cb   : > { %v4292_v14 = vsel %vm4289_vm13, %v4291_v19, %v4287_v21  ;;  %v9490_v19 = vld [vmem:[%s12535_s20 + $0x10] sm:$0xff]  ;;  %vm12664_vm13 = vmmov %vm12656_vm8 }
 0x5cc   : > { %v11031_v22 = vmul.f32 %v4292_v14, %v10325_v18 }
 0x5ce   : > { %12639 = vst [vmem:[#allocation7_spill] sm:$0xff] %v11031_v22  ;;  %4408 = vrot.lane.b32.xlu0 %v11031_v22, %s12630_s1 }
 0x5cf   : > { %4578 = vrot.lane.b32.xlu2 %v11021_v9, %s12622_s8 }
 0x5d0   : > { %4580 = vrot.lane.b32.xlu1 %v11024_v12, %s12622_s8 }
 0x5d6   : > { %4666 = vrot.lane.b32.xlu0 %v11001_v15, %s12631_s27 }
 0x5d7   : > { %4753 = vrot.lane.b32.xlu2 %v11021_v9, %s12631_s27 }
 0x5d8   : > { %4755 = vrot.lane.b32.xlu1 %v11024_v12, %s12631_s27 }
 0x5de   : > { %4846 = vrot.lane.b32.xlu0 %v10996_v20, %s12623_s28 }
 0x5df   : > { %4842 = vrot.lane.b32.xlu2 %v11010_v39, %s12623_s28 }
 0x5e0   : > { %4582 = vrot.lane.b32.xlu1 %v11031_v22, %s12622_s8 }
 0x5e6   : > { %4757 = vrot.lane.b32.xlu0 %v11031_v22, %s12631_s27 }
 0x5e7   : > { %4931 = vrot.lane.b32.xlu2 %v11021_v9, %s12623_s28 }
 0x5e8   : > { %4844 = vrot.lane.b32.xlu1 %v11001_v15, %s12623_s28 }
 0x5ee   : > { %4933 = vrot.lane.b32.xlu0 %v11024_v12, %s12623_s28 }
 0x5ef   : > { %5171 = vrot.lane.b32.xlu2 %v11010_v39, %s12624_s0 }
 0x5f0   : > { %4935 = vrot.lane.b32.xlu1 %v11031_v22, %s12623_s28 }
 0x5f6   : > { %5175 = vrot.lane.b32.xlu0 %v10996_v20, %s12624_s0 }
 0x5f7   : > { %5260 = vrot.lane.b32.xlu2 %v11021_v9, %s12624_s0 }
 0x5f8   : > { %5173 = vrot.lane.b32.xlu1 %v11001_v15, %s12624_s0 }
 0x5fe   : > { %5353 = vrot.lane.b32.xlu0 %v10996_v20, %s12625_s3 }
 0x5ff   : > { %5349 = vrot.lane.b32.xlu2 %v11010_v39, %s12625_s3 }
 0x600   : > { %5262 = vrot.lane.b32.xlu1 %v11024_v12, %s12624_s0 }
 0x606   : > { %5531 = vrot.lane.b32.xlu0 %v10996_v20, %s12626_s9 }
 0x607   : > { %5438 = vrot.lane.b32.xlu2 %v11021_v9, %s12625_s3 }
 0x608   : > { %5351 = vrot.lane.b32.xlu1 %v11001_v15, %s12625_s3 }
 0x60e   : > { %5264 = vrot.lane.b32.xlu0 %v11031_v22, %s12624_s0 }
 0x60f   : > { %5527 = vrot.lane.b32.xlu2 %v11010_v39, %s12626_s9 }
 0x610   : > { %5440 = vrot.lane.b32.xlu1 %v11024_v12, %s12625_s3 }
 0x616   : > { %5442 = vrot.lane.b32.xlu0 %v11031_v22, %s12625_s3 }
 0x617   : > { %5613 = vrot.lane.b32.xlu2 %v11021_v9, %s12626_s9 }
 0x618   : > { %5529 = vrot.lane.b32.xlu1 %v11001_v15, %s12626_s9 }
 0x61e   : > { %5699 = vrot.lane.b32.xlu0 %v11010_v39, %s12616_s6 }
 0x61f   : > { %5701 = vrot.lane.b32.xlu2 %v11001_v15, %s12616_s6 }
 0x620   : > { %5615 = vrot.lane.b32.xlu1 %v11024_v12, %s12626_s9 }
 0x621   : > { %v4405_v42 = vpop.permute.xlu2 %4404 }
 0x626   : > { %5703 = vrot.lane.b32.xlu0 %v10996_v20, %s12616_s6 }
 0x627   : > { %5788 = vrot.lane.b32.xlu2 %v11021_v9, %s12616_s6 }
 0x628   : > { %5617 = vrot.lane.b32.xlu1 %v11031_v22, %s12626_s9 }
 0x629   : > { %v4579_v44 = vpop.permute.xlu2 %4578 }
 0x62e   : > { %5792 = vrot.lane.b32.xlu0 %v11031_v22, %s12616_s6 }
 0x62f   : > { %4303 = vperm.xlu2 %9825, %v4300_v45  }
 0x630   : > { %5790 = vrot.lane.b32.xlu1 %v11024_v12, %s12616_s6 }
 0x631   : > { %v11137_v47 = vpop.permute.xlu2 %4753 }
 0x639   : > { %v4843_v52 = vpop.permute.xlu2 %4842 }
 0x63a   : > { %v4407_v54 = vpop.permute.xlu1 %4406 }
 0x63b   : > { %v4411_v51 = vsel %vm815_vm0, %v4405_v42, %v4407_v54 }
 0x63c   : > { %v11144_v58 = vmul.f32 %v4411_v51, %v10126_v35 }
 0x63e   : > { %12640 = vst [vmem:[#allocation8_spill] sm:$0xff] %v11144_v58  ;;  %9472 = vmatpush.msk.msra.mxu3 %vm12597_vm2, %v11144_v58 }
 0x63f   : > { %9473 = vmatmul.msk.f32.vlgmr.msra.gmra.mxu3 %vm834_vm3, %v4416_v59 }
 0x640   : > { %9481 = vmatpush.msk.msrb.mxu3 %vm12597_vm2, %v4498_v30  ;;  %v4409_v53 = vpop.permute.xlu0 %4408 }
 0x641   : > { %v4410_v61 = vsel %vm815_vm0, %v4407_v54, %v4409_v53  ;;  %v4412_v2 = vsel %vm815_vm0, %v4409_v53, %v4405_v42  ;;  %v4932_v10 = vpop.permute.xlu2 %4931  ;;  %v9518_v53 = vld [vmem:[%s12535_s20 + $0x20] sm:$0xff] }
 0x642   : > { %9491 = vmatpush.msk.msra.mxu3 %vm12597_vm2, %v4673_v60  ;;  %v11162_v3 = vmul.f32 %v4412_v2, %v10149_v48  ;;  %v11165_v6 = vmul.f32 %v4410_v61, %v10151_v49  ;;  %v4581_v7 = vpop.permute.xlu1 %4580  ;;  %v9511_v61 = vld [vmem:[%s12536_s21 + $0x18] sm:$0xff] }
 0x643   : > { %v11169_v56 = vsel %vm12596_vm1, %v4579_v44, %v4581_v7 }
 0x644   : > { %12641 = vst [vmem:[#allocation9_spill] sm:$0xff] %v11169_v56  ;;  %9470 = vmatpush.msk.msra.mxu2 %vm12597_vm2, %v11162_v3  ;;  %9474 = vmatpush.msk.msrb.mxu0 %vm12597_vm2, %v11165_v6 }
 0x645   : > { %9486 = vmatpush.msk.msra.mxu1 %vm12597_vm2, %v11169_v56  ;;  %9471 = vmatmul.msk.f32.vlgmr.msra.gmra.mxu2 %vm834_vm3, %v4416_v59 }
 0x646   : > { %9475 = vmatmul.msk.f32.vlgmr.msrb.gmra.mxu0 %vm834_vm3, %v4416_v59  ;;  %9479 = vmatpush.msk.msrb.mxu2 %vm12597_vm2, %v4499_v57 }
 0x647   : > { %9482 = vmatmul.msk.f32.vlgmr.msrb.gmra.mxu3 %vm834_vm3, %v9476_v43  ;;  %9487 = vmatmul.msk.f32.vlgmr.msra.gmra.mxu1 %vm834_vm3, %v9483_v8 }
 0x648   : > { %v4667_v4 = vpop.permute.xlu0 %4666 }
 0x649   : > { %v4670_v31 = vsel %vm12595_vm4, %v4667_v4, %v4669_v41  ;;  %v4671_v14 = vsel %vm12595_vm4, %v4665_v50, %v4667_v4  ;;  %v5172_v28 = vpop.permute.xlu2 %5171 }
 0x64a   : > { %v4675_v11 = vmul.f32 %v4670_v31, %v10181_v63  ;;  %v4756_v13 = vpop.permute.xlu1 %4755  ;;  %v4674_v27 = vmul.f32 %v4671_v14, %v10178_v62 }
 0x64b   : > { %v4760_v17 = vsel %vm12595_vm4, %v11137_v47, %v4756_v13 }
 0x64c   : > { %v11194_v36 = vmul.f32 %v4760_v17, %v10178_v62  ;;  %9495 = vmatpush.msk.msrb.mxu1 %vm12597_vm2, %v4675_v11  ;;  %v9525_v17 = vld [vmem:[%s12536_s21 + $0x20] sm:$0xff] }
 0x64d   : > { %9480 = vmatmul.msk.f32.vlgmr.msrb.gmra.mxu2 %vm834_vm3, %v9476_v43 }
 0x64e   : > { %12642 = vst [vmem:[#allocation10_spill] sm:$0xff] %v11194_v36  ;;  %9500 = vmatpush.msk.msrb.mxu3 %vm12597_vm2, %v11194_v36 }
 0x64f   : > { %9492 = vmatmul.msk.f32.vlgmr.msra.gmra.mxu3 %vm834_vm3, %v9490_v19  ;;  %9496 = vmatmul.msk.f32.vlgmr.msrb.gmra.mxu1 %vm834_vm3, %v9490_v19 }
 0x650   : > { %v4847_v21 = vpop.permute.xlu0 %4846 }
 0x651   : > { %v4850_v23 = vsel %vm12594_vm5, %v4847_v21, %v4843_v52 }
 0x652   : > { %v4851_v24 = vmul.f32 %v4850_v23, %v10149_v48  ;;  %v4583_v25 = vpop.permute.xlu1 %4582 }
 0x653   : > { %v11212_v16 = vsel %vm12596_vm1, %v4581_v7, %v4583_v25  ;;  %v11216_v26 = vsel %vm12596_vm1, %v4583_v25, %v4579_v44  ;;  %v9532_v25 = vld [vmem:[%s12535_s20 + $0x28] sm:$0xff] }
 0x654   : > { %12643 = vst [vmem:[#allocation11_spill] sm:$0xff] %v11212_v16  ;;  %9484 = vmatpush.msk.msra.mxu0 %vm12597_vm2, %v11216_v26  ;;  %9488 = vmatpush.msk.msra.mxu2 %vm12597_vm2, %v11212_v16 }
 0x655   : > { %12644 = vst [vmem:[#allocation12_spill] sm:$0xff] %v11216_v26  ;;  %9485 = vmatmul.msk.f32.vlgmr.msra.gmra.mxu0 %vm834_vm3, %v9483_v8  ;;  %9489 = vmatmul.msk.f32.vlgmr.msra.gmra.mxu2 %vm834_vm3, %v9483_v8 }
 0x656   : > { %9493 = vmatpush.msk.msrb.mxu0 %vm12597_vm2, %v4674_v27  ;;  %9505 = vmatpush.msk.msra.mxu1 %vm12597_vm2, %v4851_v24 }
 0x657   : > { %9501 = vmatmul.msk.f32.vlgmr.msrb.gmra.mxu3 %vm834_vm3, %v9497_v29  ;;  %9506 = vmatmul.msk.f32.vlgmr.msra.gmra.mxu1 %vm834_vm3, %v9504_v32 }
 0x658   : > { %v4758_v34 = vpop.permute.xlu0 %4757 }
 0x659   : > { %v4759_v37 = vsel %vm12595_vm4, %v4756_v13, %v4758_v34  ;;  %v4761_v38 = vsel %vm12595_vm4, %v4758_v34, %v11137_v47  ;;  %v11258_v47 = vpop.permute.xlu2 %5260 }
 0x65a   : > { %v11241_v40 = vmul.f32 %v4761_v38, %v10183_v0  ;;  %v11244_v41 = vmul.f32 %v4759_v37, %v10181_v63  ;;  %v4845_v42 = vpop.permute.xlu1 %4844 }
 0x65b   : > { %v4848_v43 = vsel %vm12594_vm5, %v4845_v42, %v4847_v21  ;;  %v4849_v44 = vsel %vm12594_vm5, %v4843_v52, %v4845_v42  ;;  %v9546_v42 = vld [vmem:[%s12535_s20 + $0x30] sm:$0xff] }
 0x65c   : > { %12645 = vst [vmem:[#allocation13_spill] sm:$0xff] %v11241_v40  ;;  %v4852_v45 = vmul.f32 %v4849_v44, %v10126_v35  ;;  %v4853_v46 = vmul.f32 %v4848_v43, %v10151_v49  ;;  %9498 = vmatpush.msk.msrb.mxu2 %vm12597_vm2, %v11241_v40  ;;  %9502 = vmatpush.msk.msra.mxu0 %vm12597_vm2, %v11244_v41 }
 0x65d   : > { %12646 = vst [vmem:[#allocation14_spill] sm:$0xff] %v11244_v41  ;;  %9494 = vmatmul.msk.f32.vlgmr.msrb.gmra.mxu0 %vm834_vm3, %v9490_v19  ;;  %9499 = vmatmul.msk.f32.vlgmr.msrb.gmra.mxu2 %vm834_vm3, %v9497_v29 }
 0x65e   : > { %9507 = vmatpush.msk.msra.mxu2 %vm12597_vm2, %v4852_v45  ;;  %9509 = vmatpush.msk.msra.mxu3 %vm12597_vm2, %v4853_v46 }
 0x65f   : > { %9510 = vmatmul.msk.f32.vlgmr.msra.gmra.mxu3 %vm834_vm3, %v9504_v32 }
 0x660   : > { %9519 = vmatpush.msk.msrb.mxu3 %vm12597_vm2, %v11010_v39  ;;  %v4934_v50 = vpop.permute.xlu0 %4933 }
 0x661   : > { %v4938_v54 = vsel %vm12594_vm5, %v4932_v10, %v4934_v50  ;;  %v5350_v2 = vpop.permute.xlu2 %5349 }
 0x662   : > { %9528 = vmatpush.msk.msra.mxu3 %vm12597_vm2, %v11024_v12  ;;  %v11270_v51 = vmul.f32 %v4938_v54, %v10126_v35  ;;  %v4936_v55 = vpop.permute.xlu1 %4935 }
 0x663   : > { %v4937_v59 = vsel %vm12594_vm5, %v4934_v50, %v4936_v55  ;;  %v4939_v30 = vsel %vm12594_vm5, %v4936_v55, %v4932_v10 }
 0x664   : > { %12647 = vst [vmem:[#allocation15_spill] sm:$0xff] %v11270_v51  ;;  %v11277_v60 = vmul.f32 %v4939_v30, %v10149_v48  ;;  %v11280_v52 = vmul.f32 %v4937_v59, %v10151_v49  ;;  %9514 = vmatpush.msk.msrb.mxu1 %vm12597_vm2, %v11270_v51  ;;  %v9539_v59 = vld [vmem:[%s12536_s21 + $0x28] sm:$0xff] }
 0x665   : > { %9503 = vmatmul.msk.f32.vlgmr.msra.gmra.mxu0 %vm834_vm3, %v9497_v29  ;;  %9508 = vmatmul.msk.f32.vlgmr.msra.gmra.mxu2 %vm834_vm3, %v9504_v32 }
 0x666   : > { %12648 = vst [vmem:[#allocation16_spill] sm:$0xff] %v11277_v60  ;;  %9512 = vmatpush.msk.msrb.mxu0 %vm12597_vm2, %v11277_v60  ;;  %9516 = vmatpush.msk.msrb.mxu2 %vm12597_vm2, %v11280_v52 }
 0x667   : > { %12649 = vst [vmem:[#allocation17_spill] sm:$0xff] %v11280_v52  ;;  %9520 = vmatmul.msk.f32.vlgmr.msrb.gmra.mxu3 %vm834_vm3, %v9518_v53  ;;  %9515 = vmatmul.msk.f32.vlgmr.msrb.gmra.mxu1 %vm834_vm3, %v9511_v61 }
 0x668   : > { %9526 = vmatpush.msk.msra.mxu2 %vm12597_vm2, %v11021_v9  ;;  %9521 = vmatpush.msk.msra.mxu0 %vm12597_vm2, %v11001_v15  ;;  %v5176_v7 = vpop.permute.xlu0 %5175 }
 0x669   : > { %v5179_v8 = vsel %vm12593_vm6, %v5176_v7, %v5172_v28  ;;  %9523 = vmatpush.msk.msra.mxu1 %vm12597_vm2, %v10996_v20  ;;  %v5439_v21 = vpop.permute.xlu2 %5438 }
 0x66a   : > { %v5182_v57 = vmul.f32 %v5179_v8, %v10181_v63  ;;  %v5174_v4 = vpop.permute.xlu1 %5173 }
 0x66b   : > { %v5177_v31 = vsel %vm12593_vm6, %v5174_v4, %v5176_v7  ;;  %v5178_v10 = vsel %vm12593_vm6, %v5172_v28, %v5174_v4 }
 0x66c   : > { %v5180_v11 = vmul.f32 %v5178_v10, %v10183_v0  ;;  %v5181_v13 = vmul.f32 %v5177_v31, %v10178_v62  ;;  %9537 = vmatpush.msk.msrb.mxu3 %vm12597_vm2, %v5182_v57 }
 0x66d   : > { %9513 = vmatmul.msk.f32.vlgmr.msrb.gmra.mxu0 %vm834_vm3, %v9511_v61  ;;  %9517 = vmatmul.msk.f32.vlgmr.msrb.gmra.mxu2 %vm834_vm3, %v9511_v61 }
 0x66e   : > { %9530 = vmatpush.msk.msrb.mxu0 %vm12597_vm2, %v11031_v22  ;;  %9533 = vmatpush.msk.msrb.mxu1 %vm12597_vm2, %v5180_v11 }
 0x66f   : > { %9535 = vmatpush.msk.msrb.mxu2 %vm12597_vm2, %v5181_v13  ;;  %9529 = vmatmul.msk.f32.vlgmr.msra.gmra.mxu3 %vm834_vm3, %v9525_v17  ;;  %v9553_v13 = vld [vmem:[%s12536_s21 + $0x30] sm:$0xff] }
 0x670   : > { %v5354_v19 = vpop.permute.xlu0 %5353  ;;  %9524 = vmatmul.msk.f32.vlgmr.msra.gmra.mxu1 %vm834_vm3, %v9518_v53 }
 0x671   : > { %v5528_v34 = vpop.permute.xlu2 %5527  ;;  %v5357_v44 = vsel %vm12592_vm7, %v5354_v19, %v5350_v2 }
 0x672   : > { %v5263_v14 = vpop.permute.xlu1 %5262 }
 0x673   : > { %v5267_v23 = vsel %vm12593_vm6, %v11258_v47, %v5263_v14 }
 0x674   : > { %v11329_v24 = vmul.f32 %v5267_v23, %v10183_v0 }
 0x675   : > { %9522 = vmatmul.msk.f32.vlgmr.msra.gmra.mxu0 %vm834_vm3, %v9518_v53  ;;  %9527 = vmatmul.msk.f32.vlgmr.msra.gmra.mxu2 %vm834_vm3, %v9525_v17  ;;  %v5360_v53 = vmul.f32 %v5357_v44, %v10151_v49 }
 0x676   : > { %12650 = vst [vmem:[#allocation18_spill] sm:$0xff] %v11329_v24  ;;  %9540 = vmatpush.msk.msra.mxu0 %vm12597_vm2, %v11329_v24 }
 0x677   : > { %9538 = vmatmul.msk.f32.vlgmr.msrb.gmra.mxu3 %vm834_vm3, %v9532_v25 }
 0x678   : > { %v5532_v27 = vpop.permute.xlu0 %5531  ;;  %9534 = vmatmul.msk.f32.vlgmr.msrb.gmra.mxu1 %vm834_vm3, %v9532_v25 }
 0x67a   : > { %v5352_v28 = vpop.permute.xlu1 %5351 }
 0x67b   : > { %v5355_v29 = vsel %vm12592_vm7, %v5352_v28, %v5354_v19  ;;  %v5356_v32 = vsel %vm12592_vm7, %v5350_v2, %v5352_v28 }
 0x67c   : > { %v5358_v37 = vmul.f32 %v5356_v32, %v10149_v48  ;;  %v5359_v38 = vmul.f32 %v5355_v29, %v10126_v35 }
 0x67d   : > { %9531 = vmatmul.msk.f32.vlgmr.msrb.gmra.mxu0 %vm834_vm3, %v9525_v17  ;;  %9536 = vmatmul.msk.f32.vlgmr.msrb.gmra.mxu2 %vm834_vm3, %v9532_v25  ;;  %v5535_v17 = vsel %vm12658_vm15, %v5532_v27, %v5528_v34  ;;  %vm12669_vm15 = vmmov %vm12663_vm9 }
 0x67e   : > { %9547 = vmatpush.msk.msra.mxu3 %vm12597_vm2, %v5358_v37  ;;  %9549 = vmatpush.msk.msrb.mxu0 %vm12597_vm2, %v5359_v38 }
 0x67f   : > { %9548 = vmatmul.msk.f32.vlgmr.msra.gmra.mxu3 %vm834_vm3, %v9546_v42 }
 0x680   : > { %v5265_v43 = vpop.permute.xlu0 %5264 }
 0x681   : > { %v5266_v45 = vsel %vm12593_vm6, %v5263_v14, %v5265_v43  ;;  %v5268_v46 = vsel %vm12593_vm6, %v5265_v43, %v11258_v47  ;;  %v5614_v47 = vpop.permute.xlu2 %5613 }
 0x682   : > { %v11362_v50 = vmul.f32 %v5266_v45, %v10178_v62  ;;  %v11365_v54 = vmul.f32 %v5268_v46, %v10181_v63  ;;  %v5441_v55 = vpop.permute.xlu1 %5440  ;;  %v9567_v45 = vld [vmem:[%s12536_s21 + $0x38] sm:$0xff]  ;;  %v9574_v46 = vld [vmem:[%s12535_s20 + $0x40] sm:$0xff] }
 0x683   : > { %v5445_v30 = vsel %vm12592_vm7, %v5439_v21, %v5441_v55 }
 0x684   : > { %12651 = vst [vmem:[#allocation19_spill] sm:$0xff] %v11362_v50  ;;  %v11374_v61 = vmul.f32 %v5445_v30, %v10149_v48  ;;  %9542 = vmatpush.msk.msra.mxu1 %vm12597_vm2, %v11362_v50  ;;  %9544 = vmatpush.msk.msra.mxu2 %vm12597_vm2, %v11365_v54 }
 0x685   : > { %12652 = vst [vmem:[#allocation20_spill] sm:$0xff] %v11365_v54  ;;  %9541 = vmatmul.msk.f32.vlgmr.msra.gmra.mxu0 %vm834_vm3, %v9539_v59  ;;  %9543 = vmatmul.msk.f32.vlgmr.msra.gmra.mxu1 %vm834_vm3, %v9539_v59 }
 0x686   : > { %12653 = vst [vmem:[#allocation21_spill] sm:$0xff] %v11374_v61  ;;  %9545 = vmatmul.msk.f32.vlgmr.msra.gmra.mxu2 %vm834_vm3, %v9539_v59  ;;  %9551 = vmatpush.msk.msrb.mxu1 %vm12597_vm2, %v5360_v53 }
 0x687   : > { %9554 = vmatpush.msk.msrb.mxu2 %vm12597_vm2, %v11374_v61 }
 0x688   : > { %v5443_v2 = vpop.permute.xlu0 %5442 }
 0x689   : > { %v5444_v7 = vsel %vm12592_vm7, %v5441_v55, %v5443_v2  ;;  %v5446_v8 = vsel %vm12592_vm7, %v5443_v2, %v5439_v21  ;;  %v5702_v19 = vpop.permute.xlu2 %5701 }
 0x68a   : > { %v11391_v57 = vmul.f32 %v5444_v7, %v10126_v35  ;;  %v11394_v4 = vmul.f32 %v5446_v8, %v10151_v49  ;;  %v5530_v31 = vpop.permute.xlu1 %5529 }
 0x68b   : > { %v5533_v10 = vsel %vm12656_vm8, %v5530_v31, %v5532_v27  ;;  %v5534_v11 = vsel %vm12657_vm14, %v5528_v34, %v5530_v31  ;;  %v9560_v27 = vld [vmem:[%s12535_s20 + $0x38] sm:$0xff]  ;;  %vm12667_vm14 = vmmov %vm12663_vm9 }
 0x68c   : > { %12654 = vst [vmem:[#allocation22_spill] sm:$0xff] %v11391_v57  ;;  %9556 = vmatpush.msk.msrb.mxu3 %vm12597_vm2, %v11391_v57  ;;  %9558 = vmatpush.msk.msra.mxu0 %vm12597_vm2, %v11394_v4 }
 0x68d   : > { %12655 = vst [vmem:[#allocation23_spill] sm:$0xff] %v11394_v4  ;;  %9561 = vmatpush.msk.msra.mxu1 %vm12597_vm2, %v5534_v11  ;;  %9563 = vmatpush.msk.msra.mxu2 %vm12597_vm2, %v5533_v10  ;;  %v9581_v10 = vld [vmem:[%s12536_s21 + $0x40] sm:$0xff]  ;;  %v4398_v11 = vpop.f32.mrf.mxu1 }
 0x68e   : > { %9550 = vmatmul.msk.f32.vlgmr.msrb.gmra.mxu0 %vm834_vm3, %v9546_v42  ;;  %9552 = vmatmul.msk.f32.vlgmr.msrb.gmra.mxu1 %vm834_vm3, %v9546_v42 }
 0x68f   : > { %9555 = vmatmul.msk.f32.vlgmr.msrb.gmra.mxu2 %vm834_vm3, %v9553_v13  ;;  %9557 = vmatmul.msk.f32.vlgmr.msrb.gmra.mxu3 %vm834_vm3, %v9553_v13 }
 0x690   : > { %9565 = vmatpush.msk.msra.mxu3 %vm12597_vm2, %v5535_v17  ;;  %v5700_v21 = vpop.permute.xlu0 %5699 }
 0x691   : > { %v5706_v14 = vsel %vm12659_vm10, %v5700_v21, %v5702_v19  ;;  %v5789_v55 = vpop.permute.xlu2 %5788  ;;  %vm12670_vm10 = vmmov %vm12663_vm9 }
 0x692   : > { %v5708_v23 = vmul.f32 %v5706_v14, %v10183_v0  ;;  %v5616_v25 = vpop.permute.xlu1 %5615 }
 0x693   : > { %v11421_v28 = vsel %vm12660_vm11, %v5614_v47, %v5616_v25 }
 0x694   : > { %12661 = vst [vmem:[#allocation24_spill] sm:$0xff] %v11421_v28  ;;  %9568 = vmatpush.msk.msrb.mxu0 %vm12597_vm2, %v11421_v28  ;;  %9575 = vmatpush.msk.msrb.mxu3 %vm12597_vm2, %v5708_v23 }
 0x695   : > { %v4532_v17 = vpop.f32.mrf.mxu1 }
 0x696   : > { %9559 = vmatmul.msk.f32.vlgmr.msra.gmra.mxu0 %vm834_vm3, %v9553_v13  ;;  %9562 = vmatmul.msk.f32.vlgmr.msra.gmra.mxu1 %vm834_vm3, %v9560_v27  ;;  %v4358_v13 = vpop.f32.mrf.mxu3 }
 0x697   : > { %9564 = vmatmul.msk.f32.vlgmr.msra.gmra.mxu2 %vm834_vm3, %v9560_v27  ;;  %9566 = vmatmul.msk.f32.vlgmr.msra.gmra.mxu3 %vm834_vm3, %v9560_v27 }
 0x698   : > { %v5704_v29 = vpop.permute.xlu0 %5703 }
 0x699   : > { %v5705_v32 = vsel %vm12662_vm12, %v5702_v19, %v5704_v29  ;;  %v5707_v34 = vsel %vm12663_vm9, %v5704_v29, %v5700_v21  ;;  %v4378_v19 = vpop.f32.mrf.mxu0 }
 0x69a   : > { %v5709_v37 = vmul.f32 %v5705_v32, %v10178_v62  ;;  %v5710_v38 = vmul.f32 %v5707_v34, %v10181_v63  ;;  %v5618_v42 = vpop.permute.xlu1 %5617 }
 0x69b   : > { %v11441_v43 = vsel %vm12664_vm13, %v5616_v25, %v5618_v42  ;;  %v11445_v44 = vsel %vm12656_vm8, %v5618_v42, %v5614_v47  ;;  %vm12591_vm13 = vcmask 64512  }
 0x69c   : > { %12665 = vst [vmem:[#allocation25_spill] sm:$0xff] %v11441_v43  ;;  %9570 = vmatpush.msk.msrb.mxu1 %vm12597_vm2, %v11441_v43  ;;  %9572 = vmatpush.msk.msrb.mxu2 %vm12597_vm2, %v11445_v44  ;;  %v4304_v43 = vpop.permute.xlu2 %4303 }
 0x69d   : > { %12666 = vst [vmem:[#allocation26_spill] sm:$0xff] %v11445_v44  ;;  %9577 = vmatpush.msk.msra.mxu0 %vm12597_vm2, %v5709_v37  ;;  %v4401_v57 = vadd.f32 %v4358_v13, %v4304_v43  ;;  %v4402_v28 = vadd.f32 %v4378_v19, %v4304_v43  ;;  %v4403_v61 = vadd.f32 %v4398_v11, %v4304_v43 }
 0x69e   : > { %9579 = vmatpush.msk.msra.mxu1 %vm12597_vm2, %v5710_v38  ;;  %9569 = vmatmul.msk.f32.vlgmr.msrb.gmra.mxu0 %vm834_vm3, %v9567_v45 }
 0x69f   : > { %9571 = vmatmul.msk.f32.vlgmr.msrb.gmra.mxu1 %vm834_vm3, %v9567_v45  ;;  %9573 = vmatmul.msk.f32.vlgmr.msrb.gmra.mxu2 %vm834_vm3, %v9567_v45 }
 0x6a0   : > { %9576 = vmatmul.msk.f32.vlgmr.msrb.gmra.mxu3 %vm834_vm3, %v9574_v46  ;;  %v5793_v59 = vpop.permute.xlu0 %5792 }
 0x6a1   : > { %v5796_v30 = vsel %vm12667_vm14, %v5793_v59, %v5789_v55  ;;  %vm12673_vm14 = vmmov %vm12656_vm8 }
 0x6a2   : > { %v11466_v53 = vmul.f32 %v5796_v30, %v10181_v63  ;;  %v5791_v47 = vpop.permute.xlu1 %5790 }
 0x6a3   : > { %v5794_v2 = vsel %vm12669_vm15, %v5791_v47, %v5793_v59  ;;  %v5795_v7 = vsel %vm12670_vm10, %v5789_v55, %v5791_v47  ;;  %vm12674_vm15 = vmmov %vm12670_vm10 }
 0x6a4   : > { %12668 = vst [vmem:[#allocation27_spill] sm:$0xff] %v11466_v53  ;;  %v11473_v8 = vmul.f32 %v5795_v7, %v10183_v0  ;;  %v11476_v31 = vmul.f32 %v5794_v2, %v10178_v62  ;;  %9586 = vmatpush.msk.msrb.mxu0 %vm12597_vm2, %v11466_v53  ;;  %vm12675_vm10 = vmmov %vm12656_vm8 }
 0x6a6   : > { %12671 = vst [vmem:[#allocation28_spill] sm:$0xff] %v11473_v8  ;;  %9578 = vmatmul.msk.f32.vlgmr.msra.gmra.mxu0 %vm834_vm3, %v9574_v46  ;;  %9582 = vmatpush.msk.msra.mxu2 %vm12597_vm2, %v11473_v8 }
 0x6a7   : > { %12672 = vst [vmem:[#allocation29_spill] sm:$0xff] %v11476_v31  ;;  %9580 = vmatmul.msk.f32.vlgmr.msra.gmra.mxu1 %vm834_vm3, %v9574_v46  ;;  %9584 = vmatpush.msk.msra.mxu3 %vm12597_vm2, %v11476_v31 }
 0x6a8   : > { %9583 = vmatmul.msk.f32.vlgmr.msra.gmra.mxu2 %vm834_vm3, %v9581_v10  ;;  %9585 = vmatmul.msk.f32.vlgmr.msra.gmra.mxu3 %vm834_vm3, %v9581_v10 }
 0x6ae   : > { %9587 = vmatmul.msk.f32.vlgmr.msrb.gmra.mxu0 %vm834_vm3, %v9581_v10 }
 0x6c2   : > { %v4466_v21 = vpop.f32.mrf.mxu3 }
 0x6c3   : > { %v4486_v25 = vpop.f32.mrf.mxu0  ;;  %v4490_v50 = vadd.f32 %v4466_v21, %v4402_v28 }
 0x6c4   : > { %v4638_v14 = vpop.f32.mrf.mxu1  ;;  %v4491_v24 = vadd.f32 %v4486_v25, %v4403_v61 }
 0x6c8   : > { %v4446_v23 = vpop.f32.mrf.mxu2 }
 0x6c9   : > { %v4489_v4 = vadd.f32 %v4446_v23, %v4401_v57 }
 0x6ca   : > { %v4572_v27 = vpop.f32.mrf.mxu3 }
 0x6cb   : > { %v4575_v22 = vadd.f32 %v4532_v17, %v4489_v4  ;;  %v4577_v36 = vadd.f32 %v4572_v27, %v4491_v24 }
 0x6cc   : > { %v4747_v32 = vpop.f32.mrf.mxu1 }
 0x6d0   : > { %v4552_v29 = vpop.f32.mrf.mxu2 }
 0x6d1   : > { %v4576_v9 = vadd.f32 %v4552_v29, %v4490_v50 }
 0x6d2   : > { %v4618_v34 = vpop.f32.mrf.mxu0  ;;  %v4707_v37 = vpop.f32.mrf.mxu3 }
 0x6d3   : > { %v4661_v60 = vadd.f32 %v4618_v34, %v4575_v22  ;;  %v4662_v40 = vadd.f32 %v4638_v14, %v4576_v9 }
 0x6d4   : > { %v4885_v46 = vpop.f32.mrf.mxu1 }
 0x6d5   : > { %v4750_v16 = vadd.f32 %v4707_v37, %v4661_v60 }
 0x6d8   : > { %v4658_v38 = vpop.f32.mrf.mxu2 }
 0x6d9   : > { %v4663_v41 = vadd.f32 %v4658_v38, %v4577_v36 }
 0x6da   : > { %v4727_v42 = vpop.f32.mrf.mxu0  ;;  %v4816_v45 = vpop.f32.mrf.mxu3 }
 0x6db   : > { %v4751_v56 = vadd.f32 %v4727_v42, %v4662_v40  ;;  %v4752_v58 = vadd.f32 %v4747_v32, %v4663_v41 }
 0x6dd   : > { %v4840_v11 = vadd.f32 %v4816_v45, %v4751_v56 }
 0x6e0   : > { %v4796_v55 = vpop.f32.mrf.mxu2 }
 0x6e1   : > { %v4839_v13 = vadd.f32 %v4796_v55, %v4750_v16 }
 0x6e2   : > { %v4836_v59 = vpop.f32.mrf.mxu0  ;;  %v4925_v30 = vpop.f32.mrf.mxu3 }
 0x6e3   : > { %v4841_v57 = vadd.f32 %v4836_v59, %v4752_v58  ;;  %v4928_v21 = vadd.f32 %v4885_v46, %v4839_v13 }
 0x6e4   : > { %v4994_v47 = vpop.f32.mrf.mxu1 }
 0x6e5   : > { %v4930_v4 = vadd.f32 %v4925_v30, %v4841_v57 }
 0x6e8   : > { %v4905_v2 = vpop.f32.mrf.mxu2 }
 0x6e9   : > { %v4929_v61 = vadd.f32 %v4905_v2, %v4840_v11 }
 0x6ea   : > { %v4974_v7 = vpop.f32.mrf.mxu0  ;;  %v5048_v10 = vpop.f32.mrf.mxu3 }
 0x6eb   : > { %v5017_v50 = vadd.f32 %v4974_v7, %v4928_v21  ;;  %v5018_v23 = vadd.f32 %v4994_v47, %v4929_v61 }
 0x6ed   : > { %v5088_v15 = vpop.f32.mrf.mxu1  ;;  %v5091_v9 = vadd.f32 %v5048_v10, %v5017_v50 }
 0x6f0   : > { %v5014_v20 = vpop.f32.mrf.mxu2 }
 0x6f1   : > { %v5019_v17 = vadd.f32 %v5014_v20, %v4930_v4 }
 0x6f2   : > { %v5068_v39 = vpop.f32.mrf.mxu0  ;;  %v5145_v31 = vpop.f32.mrf.mxu3 }
 0x6f3   : > { %v5092_v60 = vadd.f32 %v5068_v39, %v5018_v23  ;;  %v5093_v41 = vadd.f32 %v5088_v15, %v5019_v17 }
 0x6f5   : > { %v5214_v8 = vpop.f32.mrf.mxu1  ;;  %v5169_v25 = vadd.f32 %v5145_v31, %v5092_v60  ;;  %v5889_v60 = vld [vmem:[%s12539_s24] sm:$0xff] }
 0x6f8   : > { %v5125_v53 = vpop.f32.mrf.mxu2 }
 0x6f9   : > { %v5168_v14 = vadd.f32 %v5125_v53, %v5091_v9 }
 0x6fa   : > { %v5165_v44 = vpop.f32.mrf.mxu0  ;;  %v5254_v54 = vpop.f32.mrf.mxu3 }
 0x6fb   : > { %v5170_v16 = vadd.f32 %v5165_v44, %v5093_v41  ;;  %v5257_v58 = vadd.f32 %v5214_v8, %v5168_v14 }
 0x6fd   : > { %v5259_v32 = vadd.f32 %v5254_v54, %v5170_v16 }
 0x700   : > { %v5234_v12 = vpop.f32.mrf.mxu2 }
 0x701   : > { %v5258_v27 = vadd.f32 %v5234_v12, %v5169_v25 }
 0x702   : > { %v5303_v51 = vpop.f32.mrf.mxu0  ;;  %v5323_v52 = vpop.f32.mrf.mxu1 }
 0x703   : > { %v5392_v19 = vpop.f32.mrf.mxu3  ;;  %v5346_v37 = vadd.f32 %v5303_v51, %v5257_v58  ;;  %v5347_v20 = vadd.f32 %v5323_v52, %v5258_v27 }
 0x705   : > { %v5435_v45 = vadd.f32 %v5392_v19, %v5346_v37 }
 0x709   : > { %v5343_v26 = vpop.f32.mrf.mxu2 }
 0x70a   : > { %v5348_v38 = vadd.f32 %v5343_v26, %v5259_v32 }
 0x70b   : > { %v5412_v43 = vpop.f32.mrf.mxu0  ;;  %v5432_v28 = vpop.f32.mrf.mxu1 }
 0x70c   : > { %v5436_v46 = vadd.f32 %v5412_v43, %v5347_v20  ;;  %v5437_v55 = vadd.f32 %v5432_v28, %v5348_v38  ;;  %v5908_v38 = vld [vmem:[%s12538_s23] sm:$0xff] }
 0x712   : > { %v5481_v24 = vpop.f32.mrf.mxu2  ;;  %v5501_v22 = vpop.f32.mrf.mxu3 }
 0x713   : > { %v5521_v36 = vpop.f32.mrf.mxu0  ;;  %v5567_v40 = vpop.f32.mrf.mxu1  ;;  %v5524_v59 = vadd.f32 %v5481_v24, %v5435_v45  ;;  %v5525_v39 = vadd.f32 %v5501_v22, %v5436_v46 }
 0x714   : > { %v5526_v15 = vadd.f32 %v5521_v36, %v5437_v55 }
 0x715   : > { %v5610_v12 = vadd.f32 %v5567_v40, %v5524_v59 }
 0x71a   : > { %v5587_v29 = vpop.f32.mrf.mxu2  ;;  %v5607_v56 = vpop.f32.mrf.mxu3 }
 0x71b   : > { %v5653_v34 = vpop.f32.mrf.mxu0  ;;  %v5611_v31 = vadd.f32 %v5587_v29, %v5525_v39  ;;  %v5612_v8 = vadd.f32 %v5607_v56, %v5526_v15  ;;  %v9591_v39 = vld [vmem:[%s12538_s23 + $0x8] sm:$0xff] }
 0x71c   : > { %v5673_v42 = vpop.f32.mrf.mxu1  ;;  %v5696_v2 = vadd.f32 %v5653_v34, %v5610_v12 }
 0x71d   : > { %v5697_v54 = vadd.f32 %v5673_v42, %v5611_v31 }
 0x722   : > { %v5693_v30 = vpop.f32.mrf.mxu2 }
 0x723   : > { %v5742_v53 = vpop.f32.mrf.mxu3  ;;  %v5762_v44 = vpop.f32.mrf.mxu0  ;;  %v5698_v47 = vadd.f32 %v5693_v30, %v5612_v8  ;;  %v9595_v30 = vld [vmem:[%s12538_s23 + $0x10] sm:$0xff] }
 0x724   : > { %v5782_v7 = vpop.f32.mrf.mxu1  ;;  %v5785_v51 = vadd.f32 %v5742_v53, %v5696_v2  ;;  %v5786_v26 = vadd.f32 %v5762_v44, %v5697_v54  ;;  %v9599_v2 = vld [vmem:[%s12538_s23 + $0x18] sm:$0xff] }
 0x725   : > { %v5787_v52 = vadd.f32 %v5782_v7, %v5698_v47 }
 0x72b   : > { %v5831_v10 = vpop.f32.mrf.mxu2  ;;  %v5851_v13 = vpop.f32.mrf.mxu3 }
 0x72c   : > { %v5874_v19 = vadd.f32 %v5831_v10, %v5785_v51  ;;  %v5875_v57 = vadd.f32 %v5851_v13, %v5786_v26  ;;  %v5871_v43 = vpop.f32.mrf.mxu0 }
 0x72d   : > { %v5876_v28 = vadd.f32 %v5871_v43, %v5787_v52 }
 0x72e   : > { %vm5877_vm11 = vcmp.ge.f32.partialorder %v5874_v19, 0.0  ;;  %v5880_v11 = vmul.f32 0.1, %v5874_v19  ;;  %vm5878_vm12 = vcmp.ge.f32.partialorder %v5875_v57, 0.0  ;;  %v5881_v21 = vmul.f32 0.1, %v5875_v57 }
 0x72f   : > { %vm5879_vm9 = vcmp.ge.f32.partialorder %v5876_v28, 0.0  ;;  %v5882_v61 = vmul.f32 0.1, %v5876_v28 }
 0x730   : > { %v5883_v4 = vsel %vm5877_vm11, %v5874_v19, %v5880_v11  ;;  %v5884_v50 = vsel %vm5878_vm12, %v5875_v57, %v5881_v21  ;;  %v9603_v11 = vld [vmem:[%s12538_s23 + $0x20] sm:$0xff]  ;;  %vm12676_vm11 = vmmov %vm12674_vm15 }
 0x731   : > { %v11493_v17 = vmul.f32 %v5883_v4, %v10310_v1  ;;  %v11496_v23 = vmul.f32 %v5884_v50, %v10312_v5  ;;  %v5885_v24 = vsel %vm5879_vm9, %v5876_v28, %v5882_v61  ;;  %vm12677_vm12 = vmmov %vm12676_vm11 }
 0x732   : > { %v11499_v22 = vmul.f32 %v5885_v24, %v10325_v18 }
 0x733   : > { %5898 = vrot.lane.b32.xlu0 %v11496_v23, %s12630_s1  ;;  %5896 = vrot.lane.b32.xlu1 %v11493_v17, %s12630_s1  ;;  %v9832_v9 = vpack.i.bf16 %v11496_v23, %v11493_v17 }
 0x734   : > { %5900 = vrot.lane.b32.xlu2 %v11499_v22, %s12630_s1  ;;  %v9827_v36 = vpack.i.bf16 %v11499_v22, %v11496_v23 }
 0x73b   : > { %6057 = vrot.lane.b32.xlu0 %v11499_v22, %s12631_s27  ;;  %6053 = vrot.lane.b32.xlu1 %v11493_v17, %s12631_s27 }
 0x73c   : > { %9828 = vrot.lane.b32.xlu2 %v9827_v36, %s12622_s8 }
 0x743   : > { %6133 = vrot.lane.b32.xlu0 %v11493_v17, %s12623_s28  ;;  %5976 = vrot.lane.b32.xlu1 %v11493_v17, %s12622_s8 }
 0x744   : > { %6135 = vrot.lane.b32.xlu2 %v11496_v23, %s12623_s28 }
 0x74b   : > { %6055 = vrot.lane.b32.xlu0 %v11496_v23, %s12631_s27  ;;  %6137 = vrot.lane.b32.xlu1 %v11499_v22, %s12623_s28 }
 0x74c   : > { %6363 = vrot.lane.b32.xlu2 %v11496_v23, %s12625_s3 }
 0x753   : > { %6361 = vrot.lane.b32.xlu0 %v11493_v17, %s12625_s3  ;;  %6285 = vrot.lane.b32.xlu1 %v11499_v22, %s12624_s0 }
 0x754   : > { %6281 = vrot.lane.b32.xlu2 %v11493_v17, %s12624_s0 }
 0x75b   : > { %9833 = vrot.lane.b32.xlu0 %v9832_v9, %s12626_s9  ;;  %6283 = vrot.lane.b32.xlu1 %v11496_v23, %s12624_s0 }
 0x75c   : > { %6445 = vrot.lane.b32.xlu2 %v11499_v22, %s12626_s9 }
 0x763   : > { %6518 = vrot.lane.b32.xlu0 %v11493_v17, %s12616_s6  ;;  %6365 = vrot.lane.b32.xlu1 %v11499_v22, %s12625_s3 }
 0x764   : > { %6520 = vrot.lane.b32.xlu2 %v11496_v23, %s12616_s6 }
 0x76b   : > { %5892 = vperm.xlu0 %9824, %v5889_v60   ;;  %6522 = vrot.lane.b32.xlu1 %v11499_v22, %s12616_s6 }
 0x78e   : > { %v5901_v40 = vpop.permute.xlu2 %5900 }
 0x796   : > { %v9829_v41 = vpop.permute.xlu2 %9828 }
 0x797   : > { %v9831_v25 = vunpack.i.h.bf16 %v9829_v41  ;;  %v9830_v56 = vunpack.i.l.bf16 %v9829_v41 }
 0x799   : > { %v5982_v20 = vsel %vm12596_vm1, %v9830_v56, %v9831_v25 }
 0x79e   : > { %v6136_v42 = vpop.permute.xlu2 %6135 }
 0x7a5   : > { %v5899_v14 = vpop.permute.xlu0 %5898  ;;  %v5897_v16 = vpop.permute.xlu1 %5896 }
 0x7a6   : > { %v5902_v58 = vsel %vm815_vm0, %v5899_v14, %v5901_v40  ;;  %v5903_v27 = vsel %vm815_vm0, %v5897_v16, %v5899_v14  ;;  %v5904_v29 = vsel %vm815_vm0, %v5901_v40, %v5897_v16  ;;  %v11578_v44 = vpop.permute.xlu2 %6363 }
 0x7a7   : > { %v5907_v32 = vmul.f32 %v5902_v58, %v10151_v49  ;;  %v5905_v34 = vmul.f32 %v5904_v29, %v10149_v48  ;;  %v5906_v37 = vmul.f32 %v5903_v27, %v10126_v35  ;;  %v9607_v29 = vld [vmem:[%s12538_s23 + $0x28] sm:$0xff] }
 0x7a9   : > { %5928 = vmatpush.msrb.mxu1 %v5905_v34  ;;  %5948 = vmatpush.msrb.mxu2 %v5906_v37 }
 0x7aa   : > { %5968 = vmatpush.msrb.mxu3 %v5907_v32  ;;  %9588 = vmatmul.msk.f32.vlgmr.msrb.gmra.mxu1 %vm12591_vm13, %v5908_v38 }
 0x7ab   : > { %9589 = vmatmul.msk.f32.vlgmr.msrb.gmra.mxu2 %vm12591_vm13, %v5908_v38  ;;  %9590 = vmatmul.msk.f32.vlgmr.msrb.gmra.mxu3 %vm12591_vm13, %v5908_v38 }
 0x7ac   : > { %6045 = vmatpush.msra.mxu2 %v5982_v20 }
 0x7ad   : > { %v6058_v45 = vpop.permute.xlu0 %6057  ;;  %v6054_v46 = vpop.permute.xlu1 %6053 }
 0x7ae   : > { %v6061_v55 = vsel %vm12595_vm4, %v6058_v45, %v6054_v46  ;;  %v6282_v43 = vpop.permute.xlu2 %6281 }
 0x7af   : > { %v6062_v59 = vmul.f32 %v6061_v55, %v10183_v0 }
 0x7b1   : > { %6085 = vmatpush.msra.mxu3 %v6062_v59 }
 0x7b3   : > { %9594 = vmatmul.msk.f32.vlgmr.msra.gmra.mxu2 %vm12591_vm13, %v9591_v39  ;;  %9596 = vmatmul.msk.f32.vlgmr.msra.gmra.mxu3 %vm12591_vm13, %v9595_v30 }
 0x7b5   : > { %v6134_v15 = vpop.permute.xlu0 %6133  ;;  %v5977_v53 = vpop.permute.xlu1 %5976 }
 0x7b6   : > { %v6140_v31 = vsel %vm12594_vm5, %v6134_v15, %v6136_v42  ;;  %v5983_v8 = vsel %vm12596_vm1, %v5977_v53, %v9830_v56  ;;  %v5984_v12 = vsel %vm12596_vm1, %v9831_v25, %v5977_v53  ;;  %v9615_v56 = vld [vmem:[%s12538_s23 + $0x38] sm:$0xff]  ;;  %vm9917_vm1 = vmmov 1  }
 0x7b7   : > { %v6143_v47 = vmul.f32 %v6140_v31, %v10126_v35  ;;  %6005 = vmatpush.msra.mxu0 %v5984_v12  ;;  %6025 = vmatpush.msra.mxu1 %v5983_v8  ;;  %v9619_v31 = vld [vmem:[%s12538_s23 + $0x40] sm:$0xff] }
 0x7b8   : > { %9592 = vmatmul.msk.f32.vlgmr.msra.gmra.mxu0 %vm12591_vm13, %v9591_v39  ;;  %9593 = vmatmul.msk.f32.vlgmr.msra.gmra.mxu1 %vm12591_vm13, %v9591_v39 }
 0x7b9   : > { %6185 = vmatpush.msrb.mxu3 %v6143_v47 }
 0x7bb   : > { %6273 = vmatpush.msra.mxu3 %v11499_v22 }
 0x7bc   : > { %9601 = vmatmul.msk.f32.vlgmr.msrb.gmra.mxu3 %vm12591_vm13, %v9599_v2 }
 0x7bd   : > { %v6056_v54 = vpop.permute.xlu0 %6055  ;;  %v6138_v7 = vpop.permute.xlu1 %6137 }
 0x7be   : > { %v6059_v51 = vsel %vm12595_vm4, %v6056_v54, %v6058_v45  ;;  %v6060_v26 = vsel %vm12595_vm4, %v6054_v46, %v6056_v54  ;;  %v6139_v52 = vsel %vm12594_vm5, %v6136_v42, %v6138_v7  ;;  %v6141_v10 = vsel %vm12594_vm5, %v6138_v7, %v6134_v15 }
 0x7bf   : > { %v6063_v13 = vmul.f32 %v6060_v26, %v10178_v62  ;;  %v6064_v19 = vmul.f32 %v6059_v51, %v10181_v63  ;;  %v6142_v57 = vmul.f32 %v6141_v10, %v10149_v48  ;;  %v6144_v28 = vmul.f32 %v6139_v52, %v10151_v49 }
 0x7c1   : > { %6105 = vmatpush.msrb.mxu0 %v6063_v13  ;;  %6125 = vmatpush.msrb.mxu1 %v6064_v19 }
 0x7c2   : > { %6165 = vmatpush.msrb.mxu2 %v6142_v57  ;;  %9597 = vmatmul.msk.f32.vlgmr.msrb.gmra.mxu0 %vm12591_vm13, %v9595_v30 }
 0x7c3   : > { %9598 = vmatmul.msk.f32.vlgmr.msrb.gmra.mxu1 %vm12591_vm13, %v9595_v30  ;;  %9600 = vmatmul.msk.f32.vlgmr.msrb.gmra.mxu2 %vm12591_vm13, %v9599_v2 }
 0x7c4   : > { %6205 = vmatpush.msra.mxu0 %v6144_v28  ;;  %6233 = vmatpush.msra.mxu1 %v11493_v17  ;;  %v6446_v17 = vpop.permute.xlu2 %6445 }
 0x7c5   : > { %6253 = vmatpush.msra.mxu2 %v11496_v23  ;;  %v6362_v21 = vpop.permute.xlu0 %6361  ;;  %v6286_v61 = vpop.permute.xlu1 %6285  ;;  %9606 = vmatmul.msk.f32.vlgmr.msra.gmra.mxu3 %vm12591_vm13, %v9603_v11  ;;  %v9611_v23 = vld [vmem:[%s12538_s23 + $0x30] sm:$0xff] }
 0x7c6   : > { %v6368_v4 = vsel %vm12592_vm7, %v6362_v21, %v11578_v44  ;;  %v6289_v50 = vsel %vm12593_vm6, %v6286_v61, %v6282_v43 }
 0x7c7   : > { %v6370_v24 = vmul.f32 %v6368_v4, %v10149_v48  ;;  %v6292_v22 = vmul.f32 %v6289_v50, %v10181_v63 }
 0x7c9   : > { %6353 = vmatpush.msrb.mxu2 %v6292_v22  ;;  %6393 = vmatpush.msrb.mxu3 %v6370_v24 }
 0x7ca   : > { %9602 = vmatmul.msk.f32.vlgmr.msra.gmra.mxu0 %vm12591_vm13, %v9599_v2 }
 0x7cb   : > { %9604 = vmatmul.msk.f32.vlgmr.msra.gmra.mxu1 %vm12591_vm13, %v9603_v11  ;;  %9605 = vmatmul.msk.f32.vlgmr.msra.gmra.mxu2 %vm12591_vm13, %v9603_v11 }
 0x7cc   : > { %v6521_v32 = vpop.permute.xlu2 %6520 }
 0x7cd   : > { %v9834_v36 = vpop.permute.xlu0 %9833  ;;  %v6284_v9 = vpop.permute.xlu1 %6283  ;;  %9612 = vmatmul.msk.f32.vlgmr.msrb.gmra.mxu3 %vm12591_vm13, %v9611_v23 }
 0x7ce   : > { %v9836_v60 = vunpack.i.h.bf16 %v9834_v36  ;;  %v9835_v40 = vunpack.i.l.bf16 %v9834_v36  ;;  %v6287_v41 = vsel %vm12593_vm6, %v6284_v9, %v6286_v61  ;;  %v6288_v14 = vsel %vm12593_vm6, %v6282_v43, %v6284_v9 }
 0x7cf   : > { %v6290_v16 = vmul.f32 %v6288_v14, %v10183_v0  ;;  %v6291_v25 = vmul.f32 %v6287_v41, %v10178_v62 }
 0x7d0   : > { %v6448_v58 = vsel %vm12656_vm8, %v9835_v40, %v9836_v60  ;;  %v6447_v27 = vsel %vm12673_vm14, %v9836_v60, %v6446_v17  ;;  %v6449_v59 = vsel %vm12675_vm10, %v6446_v17, %v9835_v40 }
 0x7d1   : > { %6313 = vmatpush.msrb.mxu0 %v6290_v16  ;;  %6333 = vmatpush.msrb.mxu1 %v6291_v25 }
 0x7d2   : > { %6470 = vmatpush.msra.mxu2 %v6448_v58  ;;  %6490 = vmatpush.msra.mxu3 %v6447_v27 }
 0x7d3   : > { %9608 = vmatmul.msk.f32.vlgmr.msrb.gmra.mxu0 %vm12591_vm13, %v9607_v29  ;;  %9609 = vmatmul.msk.f32.vlgmr.msrb.gmra.mxu1 %vm12591_vm13, %v9607_v29 }
 0x7d4   : > { %9610 = vmatmul.msk.f32.vlgmr.msrb.gmra.mxu2 %vm12591_vm13, %v9607_v29 }
 0x7d5   : > { %v6519_v34 = vpop.permute.xlu0 %6518  ;;  %v6366_v37 = vpop.permute.xlu1 %6365  ;;  %9617 = vmatmul.msk.f32.vlgmr.msra.gmra.mxu3 %vm12591_vm13, %v9615_v56 }
 0x7d6   : > { %v6525_v38 = vsel %vm12674_vm15, %v6519_v34, %v6521_v32  ;;  %v6367_v20 = vsel %vm12592_vm7, %v11578_v44, %v6366_v37  ;;  %v6369_v42 = vsel %vm12592_vm7, %v6366_v37, %v6362_v21 }
 0x7d7   : > { %v6527_v45 = vmul.f32 %v6525_v38, %v10183_v0  ;;  %v6371_v46 = vmul.f32 %v6367_v20, %v10126_v35  ;;  %v6372_v55 = vmul.f32 %v6369_v42, %v10151_v49 }
 0x7d9   : > { %6413 = vmatpush.msra.mxu0 %v6371_v46  ;;  %6433 = vmatpush.msra.mxu1 %v6372_v55 }
 0x7db   : > { %6510 = vmatpush.msrb.mxu0 %v6449_v59  ;;  %6550 = vmatpush.msrb.mxu1 %v6527_v45 }
 0x7dc   : > { %9613 = vmatmul.msk.f32.vlgmr.msra.gmra.mxu0 %vm12591_vm13, %v9611_v23  ;;  %9614 = vmatmul.msk.f32.vlgmr.msra.gmra.mxu1 %vm12591_vm13, %v9611_v23 }
 0x7dd   : > { %9616 = vmatmul.msk.f32.vlgmr.msra.gmra.mxu2 %vm12591_vm13, %v9615_v56  ;;  %v6523_v39 = vpop.permute.xlu1 %6522  ;;  %v5893_v43 = vpop.permute.xlu0 %5892 }
 0x7de   : > { %v6524_v30 = vsel %vm12676_vm11, %v6521_v32, %v6523_v39  ;;  %v6526_v15 = vsel %vm12677_vm12, %v6523_v39, %v6519_v34 }
 0x7df   : > { %v6528_v53 = vmul.f32 %v6524_v30, %v10178_v62  ;;  %v6529_v44 = vmul.f32 %v6526_v15, %v10181_v63 }
 0x7e1   : > { %6570 = vmatpush.msrb.mxu2 %v6528_v53  ;;  %6590 = vmatpush.msrb.mxu3 %v6529_v44 }
 0x7e2   : > { %9622 = vmatmul.msk.f32.vlgmr.msrb.gmra.mxu3 %vm12591_vm13, %v9619_v31 }
 0x7e3   : > { %9638 = vmatpush.msk.msra.mxu3 %vm12597_vm2, %v11162_v3 }
 0x7e4   : > { %9618 = vmatmul.msk.f32.vlgmr.msrb.gmra.mxu0 %vm12591_vm13, %v9615_v56  ;;  %9620 = vmatmul.msk.f32.vlgmr.msrb.gmra.mxu1 %vm12591_vm13, %v9619_v31 }
 0x7e5   : > { %9621 = vmatmul.msk.f32.vlgmr.msrb.gmra.mxu2 %vm12591_vm13, %v9619_v31 }
 0x827   : > { %v5930_v8 = vpop.f32.mrf.mxu1 }
 0x828   : > { %v5973_v28 = vadd.f32 %v5930_v8, %v5893_v43 }
 0x82e   : > { %v5970_v12 = vpop.f32.mrf.mxu3  ;;  %v5950_v47 = vpop.f32.mrf.mxu2 }
 0x82f   : > { %v5974_v24 = vadd.f32 %v5950_v47, %v5893_v43  ;;  %v5975_v36 = vadd.f32 %v5970_v12, %v5893_v43 }
 0x835   : > { %v6007_v2 = vpop.f32.mrf.mxu0  ;;  %v6027_v54 = vpop.f32.mrf.mxu1 }
 0x836   : > { %v6087_v7 = vpop.f32.mrf.mxu3  ;;  %v6047_v51 = vpop.f32.mrf.mxu2  ;;  %v6050_v21 = vadd.f32 %v6007_v2, %v5973_v28  ;;  %v6051_v17 = vadd.f32 %v6027_v54, %v5974_v24 }
 0x837   : > { %v6052_v14 = vadd.f32 %v6047_v51, %v5975_v36 }
 0x838   : > { %v6130_v3 = vadd.f32 %v6087_v7, %v6050_v21 }
 0x83f   : > { %v6107_v26 = vpop.f32.mrf.mxu0  ;;  %v6187_v10 = vpop.f32.mrf.mxu3 }
 0x840   : > { %v6127_v52 = vpop.f32.mrf.mxu1  ;;  %v6131_v9 = vadd.f32 %v6107_v26, %v6051_v17 }
 0x841   : > { %v6132_v25 = vadd.f32 %v6127_v52, %v6052_v14 }
 0x842   : > { %v6211_v58 = vadd.f32 %v6187_v10, %v6131_v9 }
 0x846   : > { %v6167_v13 = vpop.f32.mrf.mxu2 }
 0x847   : > { %v6207_v19 = vpop.f32.mrf.mxu0  ;;  %v6210_v22 = vadd.f32 %v6167_v13, %v6130_v3 }
 0x848   : > { %v6235_v57 = vpop.f32.mrf.mxu1  ;;  %v6275_v11 = vpop.f32.mrf.mxu3  ;;  %v6212_v29 = vadd.f32 %v6207_v19, %v6132_v25 }
 0x849   : > { %v6278_v40 = vadd.f32 %v6235_v57, %v6210_v22 }
 0x84a   : > { %v6280_v42 = vadd.f32 %v6275_v11, %v6212_v29 }
 0x84e   : > { %v6255_v61 = vpop.f32.mrf.mxu2 }
 0x84f   : > { %v6279_v56 = vadd.f32 %v6255_v61, %v6211_v58 }
 0x850   : > { %v6335_v4 = vpop.f32.mrf.mxu1  ;;  %v6315_v50 = vpop.f32.mrf.mxu0 }
 0x851   : > { %v6395_v23 = vpop.f32.mrf.mxu3  ;;  %v6358_v16 = vadd.f32 %v6315_v50, %v6278_v40  ;;  %v6359_v45 = vadd.f32 %v6335_v4, %v6279_v56 }
 0x853   : > { %v6438_v32 = vadd.f32 %v6395_v23, %v6358_v16 }
 0x857   : > { %v6355_v60 = vpop.f32.mrf.mxu2 }
 0x858   : > { %v6360_v55 = vadd.f32 %v6355_v60, %v6280_v42 }
 0x859   : > { %v6435_v41 = vpop.f32.mrf.mxu1  ;;  %v6415_v27 = vpop.f32.mrf.mxu0 }
 0x85a   : > { %v6492_v37 = vpop.f32.mrf.mxu3  ;;  %v6439_v59 = vadd.f32 %v6415_v27, %v6359_v45  ;;  %v6440_v53 = vadd.f32 %v6435_v41, %v6360_v55 }
 0x85c   : > { %v6516_v44 = vadd.f32 %v6492_v37, %v6439_v59 }
 0x860   : > { %v6472_v34 = vpop.f32.mrf.mxu2 }
 0x861   : > { %v6515_v38 = vadd.f32 %v6472_v34, %v6438_v32  ;;  %v6552_v20 = vpop.f32.mrf.mxu1  ;;  %v6512_v30 = vpop.f32.mrf.mxu0 }
 0x862   : > { %v6517_v12 = vadd.f32 %v6512_v30, %v6440_v53 }
 0x863   : > { %v11679_v46 = vadd.f32 %v6552_v20, %v6515_v38 }
 0x865   : > { %v11682_v39 = vmul.f32 0.2, %v11679_v46  ;;  %v6592_v8 = vpop.f32.mrf.mxu3 }
 0x866   : > { %v11692_v7 = vadd.f32 %v6592_v8, %v6517_v12 }
 0x867   : > { %v11685_v15 = vand.u32 2147483647, %v11682_v39 }
 0x868   : > { %v6572_v31 = vpop.f32.mrf.mxu2  ;;  %v11701_v52 = vmul.f32 0.2, %v11692_v7 }
 0x869   : > { %vm6622_vm9 = vcmp.gt.f32.partialorder %v11685_v15, 0.0  ;;  %v6676_v2 = vadd.f32 1.0, %v11685_v15  ;;  %v11690_v54 = vadd.f32 %v6572_v31, %v6516_v44  ;;  %vm6610_vm14 = vcmp.gt.f32.partialorder %v11685_v15, 2.4142137 }
 0x86a   : > { %v6625_v47 = vsel %vm6622_vm9, %v11685_v15, 1.0  ;;  %v11713_v3 = vand.u32 2147483647, %v11701_v52  ;;  %vm6613_vm15 = vcmp.gt.f32.partialorder %v11685_v15, 0.41421357  ;;  %v9623_v17 = vadd.f32 -1.0, %v11685_v15 }
 0x86b   : > { %9861 = vrcp.f32 %v6625_v47  ;;  %v11695_v51 = vmul.f32 0.2, %v11690_v54  ;;  %v6637_v28 = vand.u32 2147483647, %v6625_v47  ;;  %v6639_v11 = vand.u32 2147483648, %v6625_v47 }
 0x86c   : > { %9863 = vrcp.f32 %v6676_v2  ;;  %v6688_v4 = vand.u32 2147483647, %v6676_v2  ;;  %v6690_v24 = vand.u32 2147483648, %v6676_v2  ;;  %vm6633_vm10 = vweird.f32 %v6625_v47 }
 0x86d   : > { %v11698_v26 = vand.u32 2147483647, %v11695_v51  ;;  %vm11718_vm12 = vcmp.eq.f32.partialorder %v6637_v28, 8.507059e+37  ;;  %vm6684_vm9 = vweird.f32 %v6676_v2  ;;  %v6640_v60 = vor.u32 1.1754944e-38, %v6639_v11 }
 0x86e   : > { %vm11722_vm13 = vcmp.eq.f32.partialorder %v6688_v4, 8.507059e+37  ;;  %vm6624_vm7 = vcmp.gt.f32.partialorder %v11713_v3, 0.0  ;;  %v6691_v16 = vor.u32 1.1754944e-38, %v6690_v24  ;;  %v11734_v56 = vadd.f32 1.0, %v11713_v3 }
 0x86f   : > { %vm6623_vm8 = vcmp.gt.f32.partialorder %v11698_v26, 0.0  ;;  %v11708_v43 = vadd.f32 1.0, %v11698_v26  ;;  %vm6611_vm5 = vcmp.gt.f32.partialorder %v11698_v26, 2.4142137  ;;  %v11729_v25 = vsel %vm6624_vm7, %v11713_v3, 1.0 }
 0x870   : > { %v11705_v57 = vsel %vm6623_vm8, %v11698_v26, 1.0  ;;  %vm6614_vm7 = vcmp.gt.f32.partialorder %v11698_v26, 0.41421357  ;;  %vm6617_vm2 = vmxor %vm6611_vm5, %vm9917_vm1 }
 0x871   : > { %v9862_v10 = vpop.eup %9861  ;;  %9865 = vrcp.f32 %v11705_v57  ;;  %v6652_v45 = vand.u32 2147483647, %v11705_v57  ;;  %v6654_v59 = vand.u32 2147483648, %v11705_v57  ;;  %v6703_v53 = vand.u32 2147483647, %v11708_v43 }
 0x872   : > { %v9864_v13 = vpop.eup %9863  ;;  %v6629_v19 = vmul.f32 %v9862_v10, %v6625_v47  ;;  %9867 = vrcp.f32 %v11708_v43  ;;  %vm6634_vm11 = vweird.f32 %v9862_v10  ;;  %v6705_v8 = vand.u32 2147483648, %v11708_v43 }
 0x873   : > { %v6680_v21 = vmul.f32 %v9864_v13, %v6676_v2  ;;  %vm6685_vm8 = vweird.f32 %v9864_v13  ;;  %vm6635_vm6 = vmor %vm6633_vm10, %vm6634_vm11  ;;  %9869 = vrcp.f32 %v11729_v25  ;;  %v9624_v47 = vadd.f32 -1.0, %v11698_v26 }
 0x874   : > { %v6630_v61 = vsub.f32 1.0, %v6629_v19  ;;  %vm6686_vm4 = vmor %vm6684_vm9, %vm6685_vm8  ;;  %9871 = vrcp.f32 %v11734_v56  ;;  %vm6699_vm11 = vweird.f32 %v11708_v43  ;;  %v6655_v11 = vor.u32 1.1754944e-38, %v6654_v59 }
 0x875   : > { %v6681_v50 = vsub.f32 1.0, %v6680_v21  ;;  %vm6616_vm10 = vmxor %vm6610_vm14, %vm9917_vm1  ;;  %vm6653_vm9 = vcmp.eq.f32.partialorder %v6652_v45, 8.507059e+37 }
 0x876   : > { %v6631_v22 = vmul.f32 %v9862_v10, %v6630_v61 }
 0x877   : > { %v6682_v36 = vmul.f32 %v9864_v13, %v6681_v50  ;;  %v9866_v41 = vpop.eup %9865  ;;  %v6706_v50 = vor.u32 1.1754944e-38, %v6705_v8 }
 0x878   : > { %v6632_v9 = vadd.f32 %v9862_v10, %v6631_v22  ;;  %v9868_v58 = vpop.eup %9867  ;;  %v6644_v29 = vmul.f32 %v9866_v41, %v11705_v57 }
 0x879   : > { %v6683_v14 = vadd.f32 %v9864_v13, %v6682_v36  ;;  %v6695_v37 = vmul.f32 %v9868_v58, %v11708_v43 }
 0x87a   : > { %v6636_v27 = vsel %vm6635_vm6, %v9862_v10, %v6632_v9  ;;  %v6645_v42 = vsub.f32 1.0, %v6644_v29  ;;  %vm6649_vm6 = vweird.f32 %v9866_v41  ;;  %v9870_v10 = vpop.eup %9869  ;;  %v6669_v9 = vand.u32 2147483648, %v11729_v25 }
 0x87b   : > { %v6641_v32 = vsel %vm11718_vm12, %v6640_v60, %v6636_v27  ;;  %v6687_v34 = vsel %vm6686_vm4, %v9864_v13, %v6683_v14  ;;  %v6696_v30 = vsub.f32 1.0, %v6695_v37  ;;  %vm11750_vm4 = vmand %vm6613_vm15, %vm6616_vm10  ;;  %vm6648_vm15 = vweird.f32 %v11705_v57 }
 0x87c   : > { %v6642_v38 = vmul.f32 -1.0, %v6641_v32  ;;  %v6692_v20 = vsel %vm11722_vm13, %v6691_v16, %v6687_v34  ;;  %v6646_v31 = vmul.f32 %v9866_v41, %v6645_v42  ;;  %vm6700_vm13 = vweird.f32 %v9868_v58  ;;  %vm6650_vm12 = vmor %vm6648_vm15, %vm6649_vm6 }
 0x87d   : > { %v6693_v55 = vmul.f32 %v9623_v17, %v6692_v20  ;;  %v6697_v2 = vmul.f32 %v9868_v58, %v6696_v30  ;;  %v6659_v61 = vmul.f32 %v9870_v10, %v11729_v25  ;;  %vm6701_vm8 = vmor %vm6699_vm11, %vm6700_vm13  ;;  %vm6704_vm10 = vcmp.eq.f32.partialorder %v6703_v53, 8.507059e+37  ;;  %v9872_v17 = vpop.eup %9871 }
 0x87e   : > { %v6647_v19 = vadd.f32 %v9866_v41, %v6646_v31  ;;  %vm6664_vm6 = vweird.f32 %v9870_v10  ;;  %v6710_v14 = vmul.f32 %v9872_v17, %v11734_v56  ;;  %vm11776_vm13 = vmand %vm6614_vm7, %vm6617_vm2  ;;  %vm6663_vm15 = vweird.f32 %v11729_v25 }
 0x87f   : > { %v6724_v12 = vsel %vm11750_vm4, %v6693_v55, %v11685_v15  ;;  %v6698_v21 = vadd.f32 %v9868_v58, %v6697_v2  ;;  %v6660_v22 = vsub.f32 1.0, %v6659_v61  ;;  %v6718_v27 = vand.u32 2147483647, %v11734_v56  ;;  %vm6665_vm2 = vmor %vm6663_vm15, %vm6664_vm6 }
 0x880   : > { %v11762_v13 = vsel %vm6610_vm14, %v6642_v38, %v6724_v12  ;;  %v6651_v4 = vsel %vm6650_vm12, %v9866_v41, %v6647_v19  ;;  %v6711_v37 = vsub.f32 1.0, %v6710_v14  ;;  %v6670_v20 = vor.u32 1.1754944e-38, %v6669_v9 }
 0x881   : > { %v6736_v28 = vmul.f32 %v11762_v13, %v11762_v13  ;;  %v6656_v57 = vsel %vm6653_vm9, %v6655_v11, %v6651_v4  ;;  %v6702_v43 = vsel %vm6701_vm8, %v9868_v58, %v6698_v21  ;;  %v6661_v41 = vmul.f32 %v9870_v10, %v6660_v22 }
 0x882   : > { %v6657_v23 = vmul.f32 -1.0, %v6656_v57  ;;  %v6707_v36 = vsel %vm6704_vm10, %v6706_v50, %v6702_v43  ;;  %v6667_v58 = vand.u32 2147483647, %v11729_v25  ;;  %vm6715_vm7 = vweird.f32 %v9872_v17 }
 0x883   : > { %v6739_v24 = vmul.f32 0.080537446, %v6736_v28  ;;  %v6708_v40 = vmul.f32 %v9624_v47, %v6707_v36  ;;  %v6662_v34 = vadd.f32 %v9870_v10, %v6661_v41  ;;  %v6720_v42 = vand.u32 2147483648, %v11734_v56 }
 0x884   : > { %v6712_v59 = vmul.f32 %v9872_v17, %v6711_v37  ;;  %vm6612_vm11 = vcmp.gt.f32.partialorder %v11713_v3, 2.4142137  ;;  %vm6668_vm12 = vcmp.eq.f32.partialorder %v6667_v58, 8.507059e+37  ;;  %vm6714_vm9 = vweird.f32 %v11734_v56 }
 0x885   : > { %v9626_v60 = vadd.f32 -0.13877685, %v6739_v24  ;;  %v6725_v32 = vsel %vm11776_vm13, %v6708_v40, %v11698_v26  ;;  %v6666_v55 = vsel %vm6665_vm2, %v9870_v10, %v6662_v34  ;;  %vm6615_vm8 = vcmp.gt.f32.partialorder %v11713_v3, 0.41421357  ;;  %vm6716_vm10 = vmor %vm6714_vm9, %vm6715_vm7 }
 0x886   : > { %v6728_v38 = vsel %vm6611_vm5, %v6657_v23, %v6725_v32  ;;  %v6671_v31 = vsel %vm6668_vm12, %v6670_v20, %v6666_v55  ;;  %v6713_v8 = vadd.f32 %v9872_v17, %v6712_v59  ;;  %v9625_v12 = vadd.f32 -1.0, %v11713_v3  ;;  %vm6618_vm6 = vmxor %vm6612_vm11, %vm9917_vm1 }
 0x887   : > { %v6745_v29 = vmul.f32 %v9626_v60, %v6736_v28  ;;  %v6737_v25 = vmul.f32 %v6728_v38, %v6728_v38  ;;  %v6721_v47 = vor.u32 1.1754944e-38, %v6720_v42  ;;  %vm6719_vm15 = vcmp.eq.f32.partialorder %v6718_v27, 8.507059e+37  ;;  %vm11798_vm2 = vmand %vm6615_vm8, %vm6618_vm6 }
 0x888   : > { %v6717_v10 = vsel %vm6716_vm10, %v9872_v17, %v6713_v8  ;;  %v6672_v56 = vmul.f32 -1.0, %v6671_v31  ;;  %v9918_v24 = vmov 0.0   ;;  %vm6601_vm7 = vcmp.lt.f32.partialorder %v11682_v39, 0.0 }
 0x889   : > { %v6748_v45 = vadd.f32 0.19977711, %v6745_v29  ;;  %v6740_v53 = vmul.f32 0.080537446, %v6737_v25  ;;  %v6722_v11 = vsel %vm6719_vm15, %v6721_v47, %v6717_v10  ;;  %v6730_v57 = vsel %vm11750_vm4, 0.7853982, %v9918_v24 }
 0x88a   : > { %v6723_v4 = vmul.f32 %v9625_v12, %v6722_v11  ;;  %v6733_v44 = vsel %vm6610_vm14, 1.5707964, %v6730_v57  ;;  %v9919_v14 = vmov 1.0   ;;  %v6731_v39 = vsel %vm11776_vm13, 0.7853982, %v9918_v24  ;;  %v9897_v47 = vld [vmem:[%s10993_s14] sm:$0xff] }
 0x88b   : > { %v6751_v30 = vmul.f32 %v6748_v45, %v6736_v28  ;;  %v9627_v19 = vadd.f32 -0.13877685, %v6740_v53  ;;  %v6604_v58 = vsel %vm6601_vm7, -1.0, %v9919_v14  ;;  %vm6602_vm4 = vcmp.lt.f32.partialorder %v11695_v51, 0.0 }
 0x88c   : > { %v6726_v17 = vsel %vm11798_vm2, %v6723_v4, %v11713_v3  ;;  %v6734_v45 = vsel %vm6611_vm5, 1.5707964, %v6731_v39  ;;  %v6605_v59 = vsel %vm6602_vm4, -1.0, %v9919_v14  ;;  %v6732_v51 = vsel %vm11798_vm2, 0.7853982, %v9918_v24  ;;  %v9898_v4 = vld [vmem:[%s10993_s14 + $0x8] sm:$0xff] }
 0x88d   : > { %v9629_v2 = vadd.f32 -0.3333295, %v6751_v30  ;;  %v6746_v61 = vmul.f32 %v9627_v19, %v6737_v25  ;;  %vm6603_vm5 = vcmp.lt.f32.partialorder %v11701_v52, 0.0  ;;  %v6788_v57 = vrot.slane %v11690_v54, 4 }
 0x88e   : > { %v6789_v54 = vrot.slane %v11692_v7, 4  ;;  %v6799_v7 = vld [vmem:[%s12532_s17] sm:$0xff]  ;;  %vm12688_vm14 = vcmask 1043456   ;;  %vm12692_vm12 = vcmp.lt.s32.totalorder %v10122_v33, 16  ;;  %vm12702_vm4 = vcmp.lt.s32.totalorder %v10122_v33, 15 }
 0x88f   : > { %v6757_v21 = vmul.f32 %v9629_v2, %v6736_v28  ;;  %v6749_v22 = vadd.f32 0.19977711, %v6746_v61  ;;  %v6729_v28 = vsel %vm6612_vm11, %v6672_v56, %v6726_v17  ;;  %v6787_v2 = vrot.slane %v11679_v46, 4  ;;  %vm12689_vm13 = vmmov %vm12688_vm14 }
 0x890   : > { %v6738_v9 = vmul.f32 %v6729_v28, %v6729_v28  ;;  %v6735_v56 = vsel %vm6612_vm11, 1.5707964, %v6732_v51  ;;  %v6606_v46 = vsel %vm6603_vm5, -1.0, %v9919_v14  ;;  %vm12691_vm11 = vmmov %vm12689_vm13  ;;  %v9651_v51 = vld [vmem:[%s12531_s16 + $0x8] sm:$0xff] }
 0x891   : > { %v6760_v43 = vmul.f32 %v6757_v21, %v11762_v13  ;;  %v6752_v36 = vmul.f32 %v6749_v22, %v6737_v25  ;;  %vm12693_vm9 = vmmov %vm12691_vm11 }
 0x892   : > { %v6741_v41 = vmul.f32 0.080537446, %v6738_v9  ;;  %vm12694_vm8 = vmmov %vm12693_vm9 }
 0x893   : > { %v6763_v23 = vadd.f32 %v6760_v43, %v11762_v13  ;;  %v9630_v40 = vadd.f32 -0.3333295, %v6752_v36  ;;  %vm12696_vm10 = vmmov %vm12694_vm8 }
 0x894   : > { %v9628_v32 = vadd.f32 -0.13877685, %v6741_v41  ;;  %vm12697_vm6 = vmmov %vm12694_vm8 }
 0x895   : > { %v6766_v60 = vadd.f32 %v6763_v23, %v6733_v44  ;;  %v6758_v29 = vmul.f32 %v9630_v40, %v6737_v25  ;;  %v9899_v23 = vld [vmem:[%s10993_s14 + $0x10] sm:$0xff]  ;;  %vm12699_vm15 = vmmov %vm12697_vm6 }
 0x896   : > { %v6747_v37 = vmul.f32 %v9628_v32, %v6738_v9  ;;  %vm12700_vm2 = vmmov %vm12692_vm12 }
 0x897   : > { %v6769_v27 = vmul.f32 %v6766_v60, %v6604_v58  ;;  %v6761_v13 = vmul.f32 %v6758_v29, %v6728_v38  ;;  %v6894_v60 = vld [vmem:[%s12531_s16] sm:$0xff]  ;;  %vm12701_vm7 = vmmov %vm12700_vm2 }
 0x898   : > { %v6750_v42 = vadd.f32 0.19977711, %v6747_v37  ;;  %9639 = vmatmul.msk.f32.vlgmr.msra.gmra.mxu3 %vm834_vm3, %v6894_v60  ;;  %v6818_v29 = vld [vmem:[%s12530_s15] sm:$0xff]  ;;  %vm12703_vm5 = vmmov %vm12697_vm6 }
 0x899   : > { %v6772_v34 = vmul.f32 3.18, %v6769_v27  ;;  %v6764_v15 = vadd.f32 %v6761_v13, %v6728_v38 }
 0x89a   : > { %v6753_v25 = vmul.f32 %v6750_v42, %v6738_v9 }
 0x89b   : > { %v6775_v20 = vmul.f32 1.442695, %v6772_v34  ;;  %v6767_v55 = vadd.f32 %v6764_v15, %v6734_v45  ;;  %v12690_v34 = vld [vmem:[#allocation12_spill] sm:$0xff] }
 0x89c   : > { %v9631_v53 = vadd.f32 -0.3333295, %v6753_v25  ;;  %v12698_v25 = vld [vmem:[#allocation9_spill] sm:$0xff] }
 0x89d   : > { %9873 = vpow2.f32 %v6775_v20  ;;  %v6770_v30 = vmul.f32 %v6767_v55, %v6605_v59  ;;  %v12695_v55 = vld [vmem:[#allocation8_spill] sm:$0xff] }
 0x89e   : > { %v6759_v31 = vmul.f32 %v9631_v53, %v6738_v9 }
 0x89f   : > { %v6773_v16 = vmul.f32 3.18, %v6770_v30  ;;  %v9644_v30 = vld [vmem:[%s12530_s15 + $0x8] sm:$0xff] }
 0x8a0   : > { %v6762_v38 = vmul.f32 %v6759_v31, %v6729_v28 }
 0x8a1   : > { %v6777_v12 = vmul.f32 1.442695, %v6773_v16 }
 0x8a2   : > { %v6765_v19 = vadd.f32 %v6762_v38, %v6729_v28  ;;  %v12705_v38 = vld [vmem:[#allocation11_spill] sm:$0xff] }
 0x8a3   : > { %v9874_v8 = vpop.eup %9873  ;;  %9875 = vpow2.f32 %v6777_v12 }
 0x8a4   : > { %v6781_v26 = vmul.f32 %v9897_v47, %v9874_v8  ;;  %v6768_v11 = vadd.f32 %v6765_v19, %v6735_v56  ;;  %v12708_v47 = vld [vmem:[#allocation13_spill] sm:$0xff]  ;;  %v9658_v56 = vld [vmem:[%s12530_s15 + $0x10] sm:$0xff] }
 0x8a6   : > { %v6793_v10 = vadd.f32 %v6787_v2, %v6781_v26  ;;  %v6771_v52 = vmul.f32 %v6768_v11, %v6606_v46  ;;  %v12710_v26 = vld [vmem:[#allocation14_spill] sm:$0xff] }
 0x8a8   : > { %v11839_v21 = vmul.f32 %v6793_v10, %v10310_v1  ;;  %v6774_v61 = vmul.f32 3.18, %v6771_v52 }
 0x8a9   : > { %v9876_v3 = vpop.eup %9875 }
 0x8aa   : > { %6806 = vrot.lane.b32.xlu2 %v11839_v21, %s12630_s1  ;;  %9120 = vst [vmem:[%s11836_s11] sm:$0xf] %v11839_v21  ;;  %v6782_v50 = vmul.f32 %v9898_v4, %v9876_v3  ;;  %v6779_v43 = vmul.f32 1.442695, %v6774_v61 }
 0x8ac   : > { %v6794_v22 = vadd.f32 %v6788_v57, %v6782_v50  ;;  %9877 = vpow2.f32 %v6779_v43  ;;  %v12717_v50 = vld [vmem:[#allocation16_spill] sm:$0xff]  ;;  %v12719_v57 = vld [vmem:[#allocation10_spill] sm:$0xff] }
 0x8ae   : > { %v11849_v17 = vmul.f32 %v6794_v22, %v10312_v5  ;;  %v9665_v22 = vld [vmem:[%s12531_s16 + $0x10] sm:$0xff] }
 0x8b0   : > { %6808 = vrot.lane.b32.xlu1 %v11849_v17, %s12630_s1  ;;  %9121 = vst [vmem:[%s11836_s11 + $0x8] sm:$0xf] %v11849_v17 }
 0x8b2   : > { %6961 = vrot.lane.b32.xlu2 %v11839_v21, %s12622_s8  ;;  %v9878_v28 = vpop.eup %9877 }
 0x8b3   : > { %v6783_v36 = vmul.f32 %v9899_v23, %v9878_v28 }
 0x8b5   : > { %v6795_v9 = vadd.f32 %v6789_v54, %v6783_v36 }
 0x8b7   : > { %v11860_v44 = vmul.f32 %v6795_v9, %v10325_v18  ;;  %v12726_v9 = vld [vmem:[#allocation17_spill] sm:$0xff] }
 0x8b9   : > { %6810 = vrot.lane.b32.xlu0 %v11860_v44, %s12630_s1  ;;  %6965 = vrot.lane.b32.xlu1 %v11860_v44, %s12622_s8  ;;  %9122 = vst [vmem:[%s11836_s11 + $0x10] sm:$0xf] %v11860_v44 }
 0x8ba   : > { %7115 = vrot.lane.b32.xlu2 %v11839_v21, %s12631_s27 }
 0x8c1   : > { %6963 = vrot.lane.b32.xlu0 %v11849_v17, %s12622_s8  ;;  %7117 = vrot.lane.b32.xlu1 %v11849_v17, %s12631_s27 }
 0x8c2   : > { %7272 = vrot.lane.b32.xlu2 %v11839_v21, %s12623_s28 }
 0x8c9   : > { %7119 = vrot.lane.b32.xlu0 %v11860_v44, %s12631_s27  ;;  %7276 = vrot.lane.b32.xlu1 %v11860_v44, %s12623_s28 }
 0x8ca   : > { %7574 = vrot.lane.b32.xlu2 %v11839_v21, %s12624_s0 }
 0x8d1   : > { %7274 = vrot.lane.b32.xlu0 %v11849_v17, %s12623_s28  ;;  %7576 = vrot.lane.b32.xlu1 %v11849_v17, %s12624_s0 }
 0x8d2   : > { %7731 = vrot.lane.b32.xlu2 %v11839_v21, %s12625_s3 }
 0x8d9   : > { %7578 = vrot.lane.b32.xlu0 %v11860_v44, %s12624_s0  ;;  %7733 = vrot.lane.b32.xlu1 %v11849_v17, %s12625_s3 }
 0x8da   : > { %7888 = vrot.lane.b32.xlu2 %v11839_v21, %s12626_s9 }
 0x8e1   : > { %7735 = vrot.lane.b32.xlu0 %v11860_v44, %s12625_s3  ;;  %7890 = vrot.lane.b32.xlu1 %v11849_v17, %s12626_s9 }
 0x8e2   : > { %8042 = vrot.lane.b32.xlu2 %v11839_v21, %s12616_s6 }
 0x8e9   : > { %7892 = vrot.lane.b32.xlu0 %v11860_v44, %s12626_s9  ;;  %8044 = vrot.lane.b32.xlu1 %v11849_v17, %s12616_s6 }
 0x8ea   : > { %6802 = vperm.xlu2 %9825, %v6799_v7   ;;  %v12729_v7 = vld [vmem:[#allocation15_spill] sm:$0xff] }
 0x8f1   : > { %8046 = vrot.lane.b32.xlu0 %v11860_v44, %s12616_s6 }
 0x904   : > { %v6807_v40 = vpop.permute.xlu2 %6806 }
 0x90c   : > { %v6962_v32 = vpop.permute.xlu2 %6961 }
 0x922   : > { %v6809_v41 = vpop.permute.xlu1 %6808 }
 0x923   : > { %v6813_v58 = vsel %vm815_vm0, %v6807_v40, %v6809_v41 }
 0x924   : > { %v6816_v27 = vmul.f32 %v6813_v58, %v10126_v35  ;;  %v12731_v58 = vld [vmem:[#allocation5_spill] sm:$0xff] }
 0x926   : > { %9634 = vmatpush.msk.msra.mxu1 %vm12688_vm14, %v6816_v27  ;;  %vm12704_vm14 = vmmov %vm12703_vm5  ;;  %v12733_v27 = vld [vmem:[#allocation7_spill] sm:$0xff] }
 0x927   : > { %9635 = vmatmul.msk.f32.vlgmr.msra.gmra.mxu1 %vm834_vm3, %v6818_v29 }
 0x928   : > { %9642 = vmatpush.msk.msrb.mxu1 %vm12689_vm13, %v11165_v6  ;;  %v7116_v6 = vpop.permute.xlu2 %7115  ;;  %vm12706_vm13 = vmmov %vm12703_vm5 }
 0x92a   : > { %9652 = vmatpush.msk.msra.mxu1 %vm12691_vm11, %v12690_v34  ;;  %vm12707_vm11 = vmmov %vm12703_vm5 }
 0x92b   : > { %v6811_v39 = vpop.permute.xlu0 %6810  ;;  %v6966_v13 = vpop.permute.xlu1 %6965 }
 0x92c   : > { %v6814_v37 = vsel %vm815_vm0, %v6811_v39, %v6807_v40  ;;  %v6812_v20 = vsel %vm815_vm0, %v6809_v41, %v6811_v39  ;;  %v6969_v45 = vsel %vm12692_vm12, %v6966_v13, %v6962_v32  ;;  %vm12709_vm12 = vmmov %vm12703_vm5 }
 0x92d   : > { %v6815_v15 = vmul.f32 %v6814_v37, %v10149_v48  ;;  %v6817_v42 = vmul.f32 %v6812_v20, %v10151_v49  ;;  %v12739_v20 = vld [vmem:[#allocation18_spill] sm:$0xff] }
 0x92f   : > { %9643 = vmatmul.msk.f32.vlgmr.msrb.gmra.mxu1 %vm834_vm3, %v6894_v60  ;;  %9632 = vmatpush.msk.msra.mxu0 %vm12693_vm9, %v6815_v15  ;;  %vm12711_vm9 = vmmov %vm12703_vm5  ;;  %v12741_v15 = vld [vmem:[#allocation6_spill] sm:$0xff] }
 0x930   : > { %9636 = vmatpush.msk.msra.mxu2 %vm12694_vm8, %v6817_v42  ;;  %9633 = vmatmul.msk.f32.vlgmr.msra.gmra.mxu0 %vm834_vm3, %v6818_v29  ;;  %v7273_v2 = vpop.permute.xlu2 %7272  ;;  %vm12712_vm8 = vmmov %vm12702_vm4 }
 0x931   : > { %9637 = vmatmul.msk.f32.vlgmr.msra.gmra.mxu2 %vm834_vm3, %v6818_v29  ;;  %9640 = vmatpush.msk.msrb.mxu0 %vm12696_vm10, %v12695_v55  ;;  %vm12713_vm10 = vmmov %vm12702_vm4 }
 0x932   : > { %9645 = vmatpush.msk.msrb.mxu2 %vm12697_vm6, %v6969_v45  ;;  %vm12714_vm6 = vcmp.lt.s32.totalorder %v10122_v33, 1  ;;  %v9693_v45 = vld [vmem:[%s12531_s16 + $0x20] sm:$0xff] }
 0x933   : > { %v6964_v59 = vpop.permute.xlu0 %6963  ;;  %v7118_v53 = vpop.permute.xlu1 %7117 }
 0x934   : > { %9654 = vmatpush.msk.msra.mxu2 %vm12699_vm15, %v12698_v25  ;;  %v6968_v16 = vsel %vm12700_vm2, %v6962_v32, %v6964_v59  ;;  %v6967_v31 = vsel %vm12701_vm7, %v6964_v59, %v6966_v13  ;;  %v7122_v8 = vsel %vm12702_vm4, %v7116_v6, %v7118_v53  ;;  %vm12715_vm15 = vmmov %vm12703_vm5  ;;  %v9686_v32 = vld [vmem:[%s12530_s15 + $0x20] sm:$0xff]  ;;  %v12746_v59 = vld [vmem:[#allocation20_spill] sm:$0xff] }
 0x935   : > { %9647 = vmatpush.msk.msrb.mxu3 %vm12703_vm5, %v6968_v16  ;;  %9649 = vmatpush.msk.msra.mxu0 %vm12704_vm14, %v6967_v31  ;;  %v7125_v12 = vmul.f32 %v7122_v8, %v10178_v62  ;;  %vm12716_vm2 = vmmov %vm12703_vm5  ;;  %v9700_v16 = vld [vmem:[%s12530_s15 + $0x28] sm:$0xff] }
 0x936   : > { %9648 = vmatmul.msk.f32.vlgmr.msrb.gmra.mxu3 %vm834_vm3, %v9644_v30  ;;  %vm12718_vm7 = vmmov %vm12716_vm2 }
 0x937   : > { %9653 = vmatmul.msk.f32.vlgmr.msra.gmra.mxu1 %vm834_vm3, %v9651_v51  ;;  %9656 = vmatpush.msk.msra.mxu3 %vm12706_vm13, %v12705_v38  ;;  %vm12720_vm4 = vmmov %vm12716_vm2  ;;  %v9707_v38 = vld [vmem:[%s12531_s16 + $0x28] sm:$0xff] }
 0x938   : > { %9661 = vmatpush.msk.msrb.mxu1 %vm12707_vm11, %v7125_v12  ;;  %9641 = vmatmul.msk.f32.vlgmr.msrb.gmra.mxu0 %vm834_vm3, %v6894_v60  ;;  %vm12721_vm5 = vmmov %vm12716_vm2  ;;  %v9672_v60 = vld [vmem:[%s12530_s15 + $0x18] sm:$0xff]  ;;  %v7575_v34 = vpop.permute.xlu2 %7574 }
 0x939   : > { %9666 = vmatpush.msk.msrb.mxu3 %vm12709_vm12, %v12708_v47  ;;  %9646 = vmatmul.msk.f32.vlgmr.msrb.gmra.mxu2 %vm834_vm3, %v9644_v30  ;;  %vm12722_vm14 = vmmov %vm12714_vm6 }
 0x93a   : > { %9670 = vmatpush.msk.msra.mxu1 %vm12711_vm9, %v12710_v26  ;;  %vm12723_vm13 = vmmov %vm12714_vm6  ;;  %v12753_v26 = vld [vmem:[#allocation21_spill] sm:$0xff] }
 0x93b   : > { %v7120_v19 = vpop.permute.xlu0 %7119  ;;  %v7277_v10 = vpop.permute.xlu1 %7276  ;;  %vm12724_vm11 = vmmov %vm12716_vm2 }
 0x93c   : > { %v7123_v11 = vsel %vm12712_vm8, %v7120_v19, %v7116_v6  ;;  %v7121_v46 = vsel %vm12713_vm10, %v7118_v53, %v7120_v19  ;;  %v7280_v52 = vsel %vm12714_vm6, %v7277_v10, %v7273_v2  ;;  %vm12725_vm12 = vmmov %vm12716_vm2 }
 0x93d   : > { %v7124_v3 = vmul.f32 %v7123_v11, %v10183_v0  ;;  %v7126_v61 = vmul.f32 %v7121_v46, %v10181_v63  ;;  %v7281_v4 = vmul.f32 %v7280_v52, %v10149_v48  ;;  %vm12727_vm9 = vmmov %vm12716_vm2  ;;  %v12761_v52 = vld [vmem:[#allocation24_spill] sm:$0xff] }
 0x93e   : > { %9657 = vmatmul.msk.f32.vlgmr.msra.gmra.mxu3 %vm834_vm3, %v9651_v51  ;;  %vm12728_vm8 = vmmov %vm12716_vm2 }
 0x93f   : > { %9662 = vmatmul.msk.f32.vlgmr.msrb.gmra.mxu1 %vm834_vm3, %v9658_v56  ;;  %9659 = vmatpush.msk.msrb.mxu0 %vm12715_vm15, %v7124_v3  ;;  %vm12730_vm10 = vmmov %vm12716_vm2 }
 0x940   : > { %9663 = vmatpush.msk.msrb.mxu2 %vm12716_vm2, %v7126_v61  ;;  %9650 = vmatmul.msk.f32.vlgmr.msra.gmra.mxu0 %vm834_vm3, %v9644_v30  ;;  %vm12732_vm6 = vmmov %vm12716_vm2  ;;  %v12750_v30 = vld [vmem:[#allocation19_spill] sm:$0xff]  ;;  %v7732_v53 = vpop.permute.xlu2 %7731 }
 0x941   : > { %9680 = vmatpush.msk.msrb.mxu1 %vm12718_vm7, %v12717_v50  ;;  %9655 = vmatmul.msk.f32.vlgmr.msra.gmra.mxu2 %vm834_vm3, %v9651_v51  ;;  %vm12734_vm15 = vmmov %vm12716_vm2  ;;  %vm12735_vm7 = vcmp.lt.s32.totalorder %v10122_v33, 127 }
 0x942   : > { %9668 = vmatpush.msk.msra.mxu0 %vm12720_vm4, %v12719_v57  ;;  %9673 = vmatpush.msk.msra.mxu2 %vm12721_vm5, %v7281_v4  ;;  %vm12736_vm4 = vmmov %vm12716_vm2  ;;  %v12764_v4 = vld [vmem:[#allocation22_spill] sm:$0xff]  ;;  %v9721_v57 = vld [vmem:[%s12531_s16 + $0x30] sm:$0xff] }
 0x943   : > { %v7275_v43 = vpop.permute.xlu0 %7274  ;;  %v7577_v41 = vpop.permute.xlu1 %7576  ;;  %vm12737_vm5 = vmmov %vm12735_vm7 }
 0x944   : > { %v7279_v28 = vsel %vm12722_vm14, %v7273_v2, %v7275_v43  ;;  %v7278_v23 = vsel %vm12723_vm13, %v7275_v43, %v7277_v10  ;;  %v7581_v39 = vsel %vm12737_vm5, %v7575_v34, %v7577_v41  ;;  %vm12738_vm14 = vmmov %vm12716_vm2  ;;  %v12755_v2 = vld [vmem:[#allocation23_spill] sm:$0xff] }
 0x945   : > { %v7282_v36 = vmul.f32 %v7279_v28, %v10126_v35  ;;  %v7283_v54 = vmul.f32 %v7278_v23, %v10151_v49  ;;  %vm12740_vm13 = vmmov %vm12716_vm2  ;;  %v9714_v10 = vld [vmem:[%s12530_s15 + $0x30] sm:$0xff]  ;;  %v12772_v23 = vld [vmem:[#allocation25_spill] sm:$0xff] }
 0x946   : > { %9667 = vmatmul.msk.f32.vlgmr.msrb.gmra.mxu3 %vm834_vm3, %v9665_v22 }
 0x947   : > { %9671 = vmatmul.msk.f32.vlgmr.msra.gmra.mxu1 %vm834_vm3, %v9665_v22  ;;  %9675 = vmatpush.msk.msra.mxu3 %vm12724_vm11, %v7282_v36  ;;  %vm12742_vm11 = vmmov %vm12716_vm2 }
 0x948   : > { %9689 = vmatpush.msk.msra.mxu1 %vm12725_vm12, %v11849_v17  ;;  %9660 = vmatmul.msk.f32.vlgmr.msrb.gmra.mxu0 %vm834_vm3, %v9658_v56  ;;  %v9679_v17 = vld [vmem:[%s12531_s16 + $0x18] sm:$0xff]  ;;  %vm12743_vm12 = vcmp.lt.s32.totalorder %v10122_v33, 113  ;;  %v7889_v3 = vpop.permute.xlu2 %7888 }
 0x949   : > { %9684 = vmatpush.msk.msrb.mxu3 %vm12727_vm9, %v12726_v9  ;;  %9664 = vmatmul.msk.f32.vlgmr.msrb.gmra.mxu2 %vm834_vm3, %v9658_v56  ;;  %vm12744_vm9 = vmmov %vm12716_vm2 }
 0x94a   : > { %9677 = vmatpush.msk.msrb.mxu0 %vm12728_vm8, %v7283_v54  ;;  %9682 = vmatpush.msk.msrb.mxu2 %vm12730_vm10, %v12729_v7  ;;  %vm12745_vm8 = vmmov %vm12737_vm5  ;;  %v9728_v54 = vld [vmem:[%s12530_s15 + $0x38] sm:$0xff] }
 0x94b   : > { %v7579_v40 = vpop.permute.xlu0 %7578  ;;  %v7734_v37 = vpop.permute.xlu1 %7733  ;;  %vm12747_vm10 = vmmov %vm12716_vm2 }
 0x94c   : > { %v7580_v29 = vsel %vm12735_vm7, %v7577_v41, %v7579_v40  ;;  %v7582_v6 = vsel %vm12745_vm8, %v7579_v40, %v7575_v34  ;;  %vm12751_vm7 = vmmov %vm12743_vm12  ;;  %v12776_v41 = vld [vmem:[#allocation28_spill] sm:$0xff] }
 0x94d   : > { %v7584_v13 = vmul.f32 %v7580_v29, %v10178_v62  ;;  %v7585_v25 = vmul.f32 %v7582_v6, %v10181_v63  ;;  %v7738_v31 = vsel %vm12751_vm7, %v7732_v53, %v7734_v37  ;;  %vm12754_vm5 = vmmov %vm12716_vm2  ;;  %v12782_v29 = vld [vmem:[#allocation29_spill] sm:$0xff] }
 0x94e   : > { %9676 = vmatmul.msk.f32.vlgmr.msra.gmra.mxu3 %vm834_vm3, %v9672_v60  ;;  %v7740_v47 = vmul.f32 %v7738_v31, %v10149_v48  ;;  %vm12762_vm8 = vmmov %vm12716_vm2 }
 0x94f   : > { %9681 = vmatmul.msk.f32.vlgmr.msrb.gmra.mxu1 %vm834_vm3, %v9679_v17  ;;  %9694 = vmatpush.msk.msra.mxu3 %vm12732_vm6, %v12731_v58  ;;  %vm12748_vm6 = vmmov %vm12716_vm2 }
 0x950   : > { %9698 = vmatpush.msk.msrb.mxu1 %vm12734_vm15, %v12733_v27  ;;  %9669 = vmatmul.msk.f32.vlgmr.msra.gmra.mxu0 %vm834_vm3, %v9665_v22  ;;  %vm12749_vm15 = vmmov %vm12716_vm2  ;;  %v12767_v22 = vld [vmem:[#allocation26_spill] sm:$0xff]  ;;  %v8043_v36 = vpop.permute.xlu2 %8042  ;;  %v9742_v27 = vld [vmem:[%s12530_s15 + $0x40] sm:$0xff] }
 0x951   : > { %9674 = vmatmul.msk.f32.vlgmr.msra.gmra.mxu2 %vm834_vm3, %v9672_v60  ;;  %9687 = vmatpush.msk.msra.mxu0 %vm12716_vm2, %v11839_v21 }
 0x952   : > { %9691 = vmatpush.msk.msra.mxu2 %vm12736_vm4, %v11860_v44  ;;  %v7583_v44 = vmul.f32 %v7581_v39, %v10183_v0  ;;  %vm12752_vm4 = vmmov %vm12751_vm7 }
 0x953   : > { %v7736_v21 = vpop.permute.xlu0 %7735  ;;  %v7891_v51 = vpop.permute.xlu1 %7890  ;;  %vm12768_vm7 = vmmov %vm12716_vm2 }
 0x954   : > { %v7737_v42 = vsel %vm12743_vm12, %v7734_v37, %v7736_v21  ;;  %v7739_v8 = vsel %vm12752_vm4, %v7736_v21, %v7732_v53  ;;  %vm12759_vm12 = vcmp.lt.s32.totalorder %v10122_v33, 112  ;;  %vm12769_vm4 = vmmov %vm12716_vm2  ;;  %v6915_v37 = vpop.f32.mrf.mxu3 }
 0x955   : > { %v7741_v55 = vmul.f32 %v7737_v42, %v10126_v35  ;;  %v7742_v19 = vmul.f32 %v7739_v8, %v10151_v49 }
 0x956   : > { %9685 = vmatmul.msk.f32.vlgmr.msrb.gmra.mxu3 %vm834_vm3, %v9679_v17 }
 0x957   : > { %9690 = vmatmul.msk.f32.vlgmr.msra.gmra.mxu1 %vm834_vm3, %v9686_v32  ;;  %9703 = vmatpush.msk.msrb.mxu3 %vm12738_vm14, %v7584_v13  ;;  %vm12756_vm14 = vmmov %vm12716_vm2 }
 0x958   : > { %9708 = vmatpush.msk.msra.mxu1 %vm12740_vm13, %v12739_v20  ;;  %9678 = vmatmul.msk.f32.vlgmr.msrb.gmra.mxu0 %vm834_vm3, %v9672_v60  ;;  %vm12757_vm13 = vmmov %vm12716_vm2  ;;  %v9735_v60 = vld [vmem:[%s12531_s16 + $0x38] sm:$0xff]  ;;  %v6803_v13 = vpop.permute.xlu2 %6802 }
 0x959   : > { %9683 = vmatmul.msk.f32.vlgmr.msrb.gmra.mxu2 %vm834_vm3, %v9679_v17  ;;  %9696 = vmatpush.msk.msrb.mxu0 %vm12742_vm11, %v12741_v15  ;;  %vm12758_vm11 = vmmov %vm12716_vm2  ;;  %v12778_v17 = vld [vmem:[#allocation27_spill] sm:$0xff] }
 0x95a   : > { %9701 = vmatpush.msk.msrb.mxu2 %vm12744_vm9, %v7583_v44  ;;  %vm12760_vm9 = vmmov %vm12716_vm2 }
 0x95b   : > { %v7893_v12 = vpop.permute.xlu0 %7892  ;;  %v8045_v46 = vpop.permute.xlu1 %8044 }
 0x95c   : > { %v7894_v56 = vsel %vm12759_vm12, %v7891_v51, %v7893_v12 }
 0x95e   : > { %9695 = vmatmul.msk.f32.vlgmr.msra.gmra.mxu3 %vm834_vm3, %v9693_v45 }
 0x95f   : > { %9699 = vmatmul.msk.f32.vlgmr.msrb.gmra.mxu1 %vm834_vm3, %v9693_v45  ;;  %9712 = vmatpush.msk.msra.mxu3 %vm12747_vm10, %v12746_v59  ;;  %vm12763_vm10 = vmmov %vm12759_vm12 }
 0x960   : > { %9717 = vmatpush.msk.msrb.mxu1 %vm12748_vm6, %v7741_v55  ;;  %9688 = vmatmul.msk.f32.vlgmr.msra.gmra.mxu0 %vm834_vm3, %v9686_v32  ;;  %v7895_v61 = vsel %vm12763_vm10, %v7889_v3, %v7891_v51  ;;  %vm12765_vm6 = vmmov %vm12716_vm2 }
 0x961   : > { %9692 = vmatmul.msk.f32.vlgmr.msra.gmra.mxu2 %vm834_vm3, %v9686_v32  ;;  %9705 = vmatpush.msk.msra.mxu0 %vm12749_vm15, %v7585_v25  ;;  %vm12766_vm15 = vcmp.lt.s32.totalorder %v10122_v33, 111  ;;  %v9749_v32 = vld [vmem:[%s12531_s16 + $0x40] sm:$0xff] }
 0x962   : > { %9710 = vmatpush.msk.msra.mxu2 %vm12716_vm2, %v12750_v30 }
 0x963   : > { %v8047_v11 = vpop.permute.xlu0 %8046 }
 0x964   : > { %v8048_v50 = vsel %vm12766_vm15, %v8045_v46, %v8047_v11 }
 0x965   : > { %v8052_v43 = vmul.f32 %v8048_v50, %v10178_v62 }
 0x966   : > { %9704 = vmatmul.msk.f32.vlgmr.msrb.gmra.mxu3 %vm834_vm3, %v9700_v16 }
 0x967   : > { %9709 = vmatmul.msk.f32.vlgmr.msra.gmra.mxu1 %vm834_vm3, %v9707_v38  ;;  %9722 = vmatpush.msk.msrb.mxu3 %vm12754_vm5, %v12753_v26  ;;  %vm12770_vm5 = vmmov %vm12763_vm10 }
 0x968   : > { %9726 = vmatpush.msk.msra.mxu1 %vm12756_vm14, %v12755_v2  ;;  %9697 = vmatmul.msk.f32.vlgmr.msrb.gmra.mxu0 %vm834_vm3, %v9693_v45  ;;  %v7896_v28 = vsel %vm12770_vm5, %v7893_v12, %v7889_v3  ;;  %vm12771_vm14 = vmmov %vm12716_vm2 }
 0x969   : > { %9702 = vmatmul.msk.f32.vlgmr.msrb.gmra.mxu2 %vm834_vm3, %v9700_v16  ;;  %9715 = vmatpush.msk.msrb.mxu0 %vm12757_vm13, %v7740_v47  ;;  %vm12773_vm13 = vmmov %vm12716_vm2 }
 0x96a   : > { %9719 = vmatpush.msk.msrb.mxu2 %vm12758_vm11, %v7742_v19  ;;  %vm12774_vm11 = vmmov %vm12766_vm15 }
 0x96b   : > { %v8049_v9 = vsel %vm12774_vm11, %v8043_v36, %v8045_v46  ;;  %vm12775_vm12 = vmmov %vm12774_vm11 }
 0x96c   : > { %v8050_v7 = vsel %vm12775_vm12, %v8047_v11, %v8043_v36  ;;  %v8051_v40 = vmul.f32 %v8049_v9, %v10183_v0  ;;  %vm12780_vm10 = vmmov %vm12716_vm2 }
 0x96d   : > { %v8053_v58 = vmul.f32 %v8050_v7, %v10181_v63  ;;  %vm12783_vm15 = vmmov %vm12716_vm2 }
 0x96e   : > { %9713 = vmatmul.msk.f32.vlgmr.msra.gmra.mxu3 %vm834_vm3, %v9707_v38 }
 0x96f   : > { %9718 = vmatmul.msk.f32.vlgmr.msrb.gmra.mxu1 %vm834_vm3, %v9714_v10  ;;  %9731 = vmatpush.msk.msra.mxu3 %vm12760_vm9, %v7894_v56  ;;  %vm12777_vm9 = vmmov %vm12716_vm2 }
 0x970   : > { %9736 = vmatpush.msk.msrb.mxu1 %vm12762_vm8, %v12761_v52  ;;  %9706 = vmatmul.msk.f32.vlgmr.msra.gmra.mxu0 %vm834_vm3, %v9700_v16  ;;  %vm12779_vm8 = vmmov %vm12716_vm2 }
 0x971   : > { %9711 = vmatmul.msk.f32.vlgmr.msra.gmra.mxu2 %vm834_vm3, %v9707_v38  ;;  %9724 = vmatpush.msk.msra.mxu0 %vm12765_vm6, %v12764_v4  ;;  %vm12781_vm6 = vmmov %vm12716_vm2 }
 0x972   : > { %9729 = vmatpush.msk.msra.mxu2 %vm12716_vm2, %v7895_v61 }
 0x976   : > { %9723 = vmatmul.msk.f32.vlgmr.msrb.gmra.mxu3 %vm834_vm3, %v9721_v57 }
 0x977   : > { %9727 = vmatmul.msk.f32.vlgmr.msra.gmra.mxu1 %vm834_vm3, %v9721_v57  ;;  %9740 = vmatpush.msk.msrb.mxu3 %vm12768_vm7, %v12767_v22 }
 0x978   : > { %9745 = vmatpush.msk.msra.mxu1 %vm12769_vm4, %v8052_v43  ;;  %9716 = vmatmul.msk.f32.vlgmr.msrb.gmra.mxu0 %vm834_vm3, %v9714_v10  ;;  %vm12784_vm4 = vcmask 64512  }
 0x979   : > { %9720 = vmatmul.msk.f32.vlgmr.msrb.gmra.mxu2 %vm834_vm3, %v9714_v10  ;;  %9733 = vmatpush.msk.msrb.mxu0 %vm12771_vm14, %v7896_v28  ;;  %vm12785_vm5 = vmmov %vm12784_vm4 }
 0x97a   : > { %9738 = vmatpush.msk.msrb.mxu2 %vm12773_vm13, %v12772_v23  ;;  %vm12786_vm14 = vmmov %vm12784_vm4 }
 0x97b   : > { %vm12790_vm12 = vmmov %vm12784_vm4 }
 0x97e   : > { %9732 = vmatmul.msk.f32.vlgmr.msra.gmra.mxu3 %vm834_vm3, %v9728_v54 }
 0x97f   : > { %9737 = vmatmul.msk.f32.vlgmr.msrb.gmra.mxu1 %vm834_vm3, %v9735_v60  ;;  %9750 = vmatpush.msk.msra.mxu3 %vm12777_vm9, %v12776_v41  ;;  %vm12791_vm9 = vmmov %vm12784_vm4 }
 0x980   : > { %9754 = vmatpush.msk.msrb.mxu1 %vm12779_vm8, %v12778_v17  ;;  %9725 = vmatmul.msk.f32.vlgmr.msra.gmra.mxu0 %vm834_vm3, %v9721_v57  ;;  %vm12792_vm8 = vcmp.lt.s32.totalorder %v10122_v33, 15 }
 0x981   : > { %9730 = vmatmul.msk.f32.vlgmr.msra.gmra.mxu2 %vm834_vm3, %v9728_v54  ;;  %9743 = vmatpush.msk.msra.mxu0 %vm12780_vm10, %v8051_v40  ;;  %vm12793_vm10 = vmmov %vm12784_vm4 }
 0x982   : > { %9747 = vmatpush.msk.msra.mxu2 %vm12781_vm6, %v8053_v58  ;;  %vm12794_vm6 = vmmov %vm12792_vm8 }
 0x986   : > { %9741 = vmatmul.msk.f32.vlgmr.msrb.gmra.mxu3 %vm834_vm3, %v9735_v60 }
 0x987   : > { %9746 = vmatmul.msk.f32.vlgmr.msra.gmra.mxu1 %vm834_vm3, %v9742_v27 }
 0x988   : > { %9734 = vmatmul.msk.f32.vlgmr.msrb.gmra.mxu0 %vm834_vm3, %v9728_v54 }
 0x989   : > { %9739 = vmatmul.msk.f32.vlgmr.msrb.gmra.mxu2 %vm834_vm3, %v9735_v60  ;;  %9752 = vmatpush.msk.msrb.mxu0 %vm12783_vm15, %v12782_v29  ;;  %vm12795_vm15 = vmmov %vm12794_vm6 }
 0x98e   : > { %9751 = vmatmul.msk.f32.vlgmr.msra.gmra.mxu3 %vm834_vm3, %v9749_v32 }
 0x98f   : > { %9755 = vmatmul.msk.f32.vlgmr.msrb.gmra.mxu1 %vm834_vm3, %v9749_v32 }
 0x990   : > { %9744 = vmatmul.msk.f32.vlgmr.msra.gmra.mxu0 %vm834_vm3, %v9742_v27 }
 0x991   : > { %9748 = vmatmul.msk.f32.vlgmr.msra.gmra.mxu2 %vm834_vm3, %v9742_v27 }
 0x998   : > { %9753 = vmatmul.msk.f32.vlgmr.msrb.gmra.mxu0 %vm834_vm3, %v9749_v32 }
 0x9a4   : > { %v6868_v34 = vpop.f32.mrf.mxu1 }
 0x9a5   : > { %v6892_v45 = vadd.f32 %v6868_v34, %v6803_v13 }
 0x9ac   : > { %v6955_v39 = vpop.f32.mrf.mxu1 }
 0x9ad   : > { %v6848_v21 = vpop.f32.mrf.mxu0 }
 0x9ae   : > { %v6891_v20 = vadd.f32 %v6848_v21, %v6803_v13 }
 0x9b0   : > { %v6958_v44 = vadd.f32 %v6915_v37, %v6891_v20 }
 0x9b4   : > { %v6888_v15 = vpop.f32.mrf.mxu2  ;;  %v7069_v42 = vpop.f32.mrf.mxu1 }
 0x9b5   : > { %v6893_v6 = vadd.f32 %v6888_v15, %v6803_v13  ;;  %v6935_v55 = vpop.f32.mrf.mxu0 }
 0x9b6   : > { %v6959_v25 = vadd.f32 %v6935_v55, %v6892_v45 }
 0x9b7   : > { %v6960_v59 = vadd.f32 %v6955_v39, %v6893_v6 }
 0x9b9   : > { %v7021_v30 = vpop.f32.mrf.mxu3 }
 0x9ba   : > { %v7045_v7 = vadd.f32 %v7021_v30, %v6959_v25 }
 0x9bc   : > { %v7178_v53 = vpop.f32.mrf.mxu1  ;;  %v7001_v16 = vpop.f32.mrf.mxu2 }
 0x9bd   : > { %v7041_v31 = vpop.f32.mrf.mxu0  ;;  %v7044_v23 = vadd.f32 %v7001_v16, %v6958_v44 }
 0x9be   : > { %v7046_v58 = vadd.f32 %v7041_v31, %v6960_v59 }
 0x9bf   : > { %v7112_v60 = vadd.f32 %v7069_v42, %v7044_v23 }
 0x9c1   : > { %v7109_v8 = vpop.f32.mrf.mxu3 }
 0x9c2   : > { %v7114_v32 = vadd.f32 %v7109_v8, %v7046_v58 }
 0x9c4   : > { %v7266_v12 = vpop.f32.mrf.mxu1  ;;  %v7089_v51 = vpop.f32.mrf.mxu2 }
 0x9c5   : > { %v7158_v38 = vpop.f32.mrf.mxu0  ;;  %v7113_v41 = vadd.f32 %v7089_v51, %v7045_v7 }
 0x9c6   : > { %v7201_v17 = vadd.f32 %v7158_v38, %v7112_v60 }
 0x9c7   : > { %v7202_v39 = vadd.f32 %v7178_v53, %v7113_v41 }
 0x9c9   : > { %v7226_v47 = vpop.f32.mrf.mxu3 }
 0x9ca   : > { %v7269_v27 = vadd.f32 %v7226_v47, %v7201_v17 }
 0x9cc   : > { %v7383_v26 = vpop.f32.mrf.mxu1  ;;  %v7198_v2 = vpop.f32.mrf.mxu2 }
 0x9cd   : > { %v7246_v19 = vpop.f32.mrf.mxu0  ;;  %v7203_v37 = vadd.f32 %v7198_v2, %v7114_v32 }
 0x9ce   : > { %v7270_v20 = vadd.f32 %v7246_v19, %v7202_v39 }
 0x9cf   : > { %v7271_v6 = vadd.f32 %v7266_v12, %v7203_v37 }
 0x9d1   : > { %v7335_v10 = vpop.f32.mrf.mxu3 }
 0x9d2   : > { %v7359_v44 = vadd.f32 %v7335_v10, %v7270_v20 }
 0x9d4   : > { %v7480_v56 = vpop.f32.mrf.mxu1  ;;  %v7315_v11 = vpop.f32.mrf.mxu2 }
 0x9d5   : > { %v7355_v46 = vpop.f32.mrf.mxu0  ;;  %v7358_v13 = vadd.f32 %v7315_v11, %v7269_v27 }
 0x9d6   : > { %v7360_v30 = vadd.f32 %v7355_v46, %v7271_v6 }
 0x9d7   : > { %v7426_v45 = vadd.f32 %v7383_v26, %v7358_v13 }
 0x9d9   : > { %v7423_v52 = vpop.f32.mrf.mxu3 }
 0x9da   : > { %v7428_v59 = vadd.f32 %v7423_v52, %v7360_v30 }
 0x9dc   : > { %v7568_v3 = vpop.f32.mrf.mxu1  ;;  %v7403_v61 = vpop.f32.mrf.mxu2 }
 0x9dd   : > { %v7460_v4 = vpop.f32.mrf.mxu0  ;;  %v7427_v55 = vadd.f32 %v7403_v61, %v7359_v44 }
 0x9de   : > { %v7503_v25 = vadd.f32 %v7460_v4, %v7426_v45 }
 0x9df   : > { %v7504_v31 = vadd.f32 %v7480_v56, %v7427_v55 }
 0x9e1   : > { %v7528_v50 = vpop.f32.mrf.mxu3 }
 0x9e2   : > { %v7571_v51 = vadd.f32 %v7528_v50, %v7503_v25 }
 0x9e4   : > { %v7685_v57 = vpop.f32.mrf.mxu1  ;;  %v7500_v43 = vpop.f32.mrf.mxu2 }
 0x9e5   : > { %v7548_v22 = vpop.f32.mrf.mxu0  ;;  %v7505_v47 = vadd.f32 %v7500_v43, %v7428_v59 }
 0x9e6   : > { %v7572_v11 = vadd.f32 %v7548_v22, %v7504_v31 }
 0x9e7   : > { %v7573_v7 = vadd.f32 %v7568_v3, %v7505_v47 }
 0x9e9   : > { %v7637_v28 = vpop.f32.mrf.mxu3 }
 0x9ea   : > { %v7661_v23 = vadd.f32 %v7637_v28, %v7572_v11 }
 0x9ec   : > { %v7617_v36 = vpop.f32.mrf.mxu2  ;;  %v7794_v54 = vpop.f32.mrf.mxu1 }
 0x9ed   : > { %v7657_v9 = vpop.f32.mrf.mxu0  ;;  %v7660_v38 = vadd.f32 %v7617_v36, %v7571_v51  ;;  %v8211_v51 = vld [vmem:[%s12534_s19] sm:$0xff] }
 0x9ee   : > { %v7662_v61 = vadd.f32 %v7657_v9, %v7573_v7 }
 0x9ef   : > { %v7728_v2 = vadd.f32 %v7685_v57, %v7660_v38 }
 0x9f1   : > { %v7725_v40 = vpop.f32.mrf.mxu3 }
 0x9f2   : > { %v7730_v60 = vadd.f32 %v7725_v40, %v7662_v61 }
 0x9f4   : > { %v7705_v29 = vpop.f32.mrf.mxu2  ;;  %v7882_v21 = vpop.f32.mrf.mxu1 }
 0x9f5   : > { %v7774_v34 = vpop.f32.mrf.mxu0  ;;  %v7729_v26 = vadd.f32 %v7705_v29, %v7661_v23 }
 0x9f6   : > { %v7817_v12 = vadd.f32 %v7774_v34, %v7728_v2 }
 0x9f7   : > { %v7818_v41 = vadd.f32 %v7794_v54, %v7729_v26 }
 0x9f9   : > { %v7842_v15 = vpop.f32.mrf.mxu3 }
 0x9fa   : > { %v7885_v4 = vadd.f32 %v7842_v15, %v7817_v12 }
 0x9fc   : > { %v7814_v42 = vpop.f32.mrf.mxu2  ;;  %v7996_v8 = vpop.f32.mrf.mxu1 }
 0x9fd   : > { %v7862_v16 = vpop.f32.mrf.mxu0  ;;  %v7819_v56 = vadd.f32 %v7814_v42, %v7730_v60 }
 0x9fe   : > { %v7886_v36 = vadd.f32 %v7862_v16, %v7818_v41 }
 0x9ff   : > { %v7887_v28 = vadd.f32 %v7882_v21, %v7819_v56 }
 0xa01   : > { %v7948_v53 = vpop.f32.mrf.mxu3 }
 0xa02   : > { %v7972_v58 = vadd.f32 %v7948_v53, %v7886_v36  ;;  %v8230_v53 = vld [vmem:[%s12533_s18] sm:$0xff] }
 0xa04   : > { %v7928_v19 = vpop.f32.mrf.mxu2  ;;  %v8105_v52 = vpop.f32.mrf.mxu1 }
 0xa05   : > { %v7968_v10 = vpop.f32.mrf.mxu0  ;;  %v7971_v50 = vadd.f32 %v7928_v19, %v7885_v4  ;;  %v9759_v4 = vld [vmem:[%s12533_s18 + $0x8] sm:$0xff] }
 0xa06   : > { %v7973_v3 = vadd.f32 %v7968_v10, %v7887_v28 }
 0xa07   : > { %v8039_v22 = vadd.f32 %v7996_v8, %v7971_v50 }
 0xa09   : > { %v8036_v46 = vpop.f32.mrf.mxu3 }
 0xa0a   : > { %v8041_v34 = vadd.f32 %v8036_v46, %v7973_v3 }
 0xa0c   : > { %v8016_v17 = vpop.f32.mrf.mxu2  ;;  %v8193_v54 = vpop.f32.mrf.mxu1 }
 0xa0d   : > { %v8085_v43 = vpop.f32.mrf.mxu0  ;;  %v8040_v57 = vadd.f32 %v8016_v17, %v7972_v58 }
 0xa0e   : > { %v8128_v27 = vadd.f32 %v8085_v43, %v8039_v22  ;;  %v9763_v43 = vld [vmem:[%s12533_s18 + $0x10] sm:$0xff] }
 0xa0f   : > { %v8129_v9 = vadd.f32 %v8105_v52, %v8040_v57 }
 0xa11   : > { %v8153_v32 = vpop.f32.mrf.mxu3 }
 0xa12   : > { %v8196_v29 = vadd.f32 %v8153_v32, %v8128_v27 }
 0xa14   : > { %vm8199_vm3 = vcmp.ge.f32.partialorder %v8196_v29, 0.0  ;;  %v8202_v40 = vmul.f32 0.1, %v8196_v29  ;;  %v8125_v39 = vpop.f32.mrf.mxu2 }
 0xa15   : > { %v8130_v13 = vadd.f32 %v8125_v39, %v8041_v34  ;;  %v8173_v37 = vpop.f32.mrf.mxu0 }
 0xa16   : > { %v8205_v20 = vsel %vm8199_vm3, %v8196_v29, %v8202_v40  ;;  %v8197_v15 = vadd.f32 %v8173_v37, %v8129_v9  ;;  %vm12796_vm3 = vmmov %vm12784_vm4  ;;  %v9767_v9 = vld [vmem:[%s12533_s18 + $0x18] sm:$0xff] }
 0xa17   : > { %v12166_v44 = vmul.f32 %v8205_v20, %v10310_v1  ;;  %v8198_v45 = vadd.f32 %v8193_v54, %v8130_v13  ;;  %v9771_v20 = vld [vmem:[%s12533_s18 + $0x20] sm:$0xff] }
 0xa18   : > { %vm8200_vm2 = vcmp.ge.f32.partialorder %v8197_v15, 0.0  ;;  %v8203_v21 = vmul.f32 0.1, %v8197_v15 }
 0xa19   : > { %vm8201_vm7 = vcmp.ge.f32.partialorder %v8198_v45, 0.0  ;;  %v8204_v6 = vmul.f32 0.1, %v8198_v45  ;;  %8218 = vrot.lane.b32.xlu1 %v12166_v44, %s12630_s1 }
 0xa1a   : > { %v8206_v55 = vsel %vm8200_vm2, %v8197_v15, %v8203_v21  ;;  %vm12797_vm2 = vcmp.lt.s32.totalorder %v10122_v33, 1 }
 0xa1b   : > { %v12171_v25 = vmul.f32 %v8206_v55, %v10312_v5  ;;  %v8207_v42 = vsel %vm8201_vm7, %v8198_v45, %v8204_v6  ;;  %vm12798_vm7 = vmmov %vm12796_vm3 }
 0xa1c   : > { %v12174_v30 = vmul.f32 %v8207_v42, %v10325_v18 }
 0xa1d   : > { %8220 = vrot.lane.b32.xlu0 %v12171_v25, %s12630_s1  ;;  %v9837_v16 = vpack.i.bf16 %v12171_v25, %v12166_v44 }
 0xa1e   : > { %8222 = vrot.lane.b32.xlu2 %v12174_v30, %s12630_s1 }
 0xa21   : > { %9838 = vrot.lane.b32.xlu1 %v9837_v16, %s12622_s8 }
 0xa25   : > { %8301 = vrot.lane.b32.xlu0 %v12174_v30, %s12622_s8 }
 0xa26   : > { %8374 = vrot.lane.b32.xlu2 %v12166_v44, %s12631_s27 }
 0xa29   : > { %8378 = vrot.lane.b32.xlu1 %v12174_v30, %s12631_s27 }
 0xa2d   : > { %8376 = vrot.lane.b32.xlu0 %v12171_v25, %s12631_s27 }
 0xa2e   : > { %8454 = vrot.lane.b32.xlu2 %v12166_v44, %s12623_s28 }
 0xa31   : > { %8458 = vrot.lane.b32.xlu1 %v12174_v30, %s12623_s28 }
 0xa35   : > { %8456 = vrot.lane.b32.xlu0 %v12171_v25, %s12623_s28 }
 0xa36   : > { %8602 = vrot.lane.b32.xlu2 %v12166_v44, %s12624_s0 }
 0xa39   : > { %8604 = vrot.lane.b32.xlu1 %v12171_v25, %s12624_s0 }
 0xa3d   : > { %8606 = vrot.lane.b32.xlu0 %v12174_v30, %s12624_s0 }
 0xa3e   : > { %8682 = vrot.lane.b32.xlu2 %v12166_v44, %s12625_s3 }
 0xa41   : > { %8684 = vrot.lane.b32.xlu1 %v12171_v25, %s12625_s3 }
 0xa45   : > { %8686 = vrot.lane.b32.xlu0 %v12174_v30, %s12625_s3 }
 0xa46   : > { %9843 = vrot.lane.b32.xlu2 %v9837_v16, %s12626_s9 }
 0xa49   : > { %8766 = vrot.lane.b32.xlu1 %v12174_v30, %s12626_s9 }
 0xa4d   : > { %8839 = vrot.lane.b32.xlu0 %v12166_v44, %s12616_s6 }
 0xa4e   : > { %8841 = vrot.lane.b32.xlu2 %v12171_v25, %s12616_s6 }
 0xa51   : > { %8843 = vrot.lane.b32.xlu1 %v12174_v30, %s12616_s6 }
 0xa55   : > { %8214 = vperm.xlu0 %9824, %v8211_v51  }
 0xa78   : > { %v8223_v59 = vpop.permute.xlu2 %8222 }
 0xa80   : > { %v8375_v31 = vpop.permute.xlu2 %8374 }
 0xa88   : > { %v8455_v11 = vpop.permute.xlu2 %8454 }
 0xa8b   : > { %v8219_v38 = vpop.permute.xlu1 %8218 }
 0xa8c   : > { %v8226_v8 = vsel %vm815_vm0, %v8223_v59, %v8219_v38 }
 0xa8d   : > { %v8227_v47 = vmul.f32 %v8226_v8, %v10149_v48 }
 0xa8f   : > { %8249 = vmatpush.msrb.mxu2 %v8227_v47  ;;  %v8221_v23 = vpop.permute.xlu0 %8220 }
 0xa90   : > { %v8224_v2 = vsel %vm815_vm0, %v8221_v23, %v8223_v59  ;;  %v8225_v19 = vsel %vm815_vm0, %v8219_v38, %v8221_v23  ;;  %9756 = vmatmul.msk.f32.vlgmr.msrb.gmra.mxu2 %vm12784_vm4, %v8230_v53  ;;  %vm12787_vm0 = vcmp.lt.s32.totalorder %v10122_v33, 16  ;;  %v8603_v52 = vpop.permute.xlu2 %8602  ;;  %vm12799_vm4 = vmmov %vm12796_vm3 }
 0xa91   : > { %v8228_v7 = vmul.f32 %v8225_v19, %v10126_v35  ;;  %v8229_v10 = vmul.f32 %v8224_v2, %v10151_v49  ;;  %vm12788_vm13 = vmmov %vm12787_vm0 }
 0xa92   : > { %vm12789_vm11 = vmmov %vm12787_vm0 }
 0xa93   : > { %v9839_v26 = vpop.permute.xlu1 %9838  ;;  %8269 = vmatpush.msrb.mxu3 %v8228_v7  ;;  %8289 = vmatpush.msra.mxu0 %v8229_v10 }
 0xa94   : > { %v9841_v12 = vunpack.i.h.bf16 %v9839_v26  ;;  %v9840_v61 = vunpack.i.l.bf16 %v9839_v26  ;;  %9757 = vmatmul.msk.f32.vlgmr.msrb.gmra.mxu3 %vm12785_vm5, %v8230_v53  ;;  %9758 = vmatmul.msk.f32.vlgmr.msra.gmra.mxu0 %vm12786_vm14, %v8230_v53  ;;  %vm12800_vm5 = vmmov %vm12797_vm2 }
 0xa95   : > { %vm12801_vm14 = vmmov %vm12797_vm2 }
 0xa96   : > { %v8304_v60 = vsel %vm12787_vm0, %v9840_v61, %v9841_v12  ;;  %vm12802_vm0 = vmmov %vm12796_vm3 }
 0xa97   : > { %8346 = vmatpush.msra.mxu2 %v8304_v60  ;;  %v8302_v46 = vpop.permute.xlu0 %8301  ;;  %v9787_v60 = vld [vmem:[%s12533_s18 + $0x40] sm:$0xff] }
 0xa98   : > { %v8303_v41 = vsel %vm12788_vm13, %v9841_v12, %v8302_v46  ;;  %v8305_v50 = vsel %vm12789_vm11, %v8302_v46, %v9840_v61  ;;  %9761 = vmatmul.msk.f32.vlgmr.msra.gmra.mxu2 %vm12790_vm12, %v9759_v4  ;;  %v8683_v3 = vpop.permute.xlu2 %8682  ;;  %vm12803_vm13 = vcmp.lt.s32.totalorder %v10122_v33, 127  ;;  %vm12804_vm11 = vmmov %vm12802_vm0 }
 0xa99   : > { %8326 = vmatpush.msra.mxu1 %v8305_v50  ;;  %8366 = vmatpush.msra.mxu3 %v8303_v41  ;;  %vm12805_vm12 = vmmov %vm12802_vm0 }
 0xa9a   : > { %9760 = vmatmul.msk.f32.vlgmr.msra.gmra.mxu1 %vm12791_vm9, %v9759_v4  ;;  %vm12806_vm9 = vmmov %vm12802_vm0 }
 0xa9b   : > { %v8379_v56 = vpop.permute.xlu1 %8378 }
 0xa9c   : > { %v8382_v36 = vsel %vm12792_vm8, %v8379_v56, %v8375_v31  ;;  %9762 = vmatmul.msk.f32.vlgmr.msra.gmra.mxu3 %vm12793_vm10, %v9759_v4  ;;  %vm12807_vm8 = vmmov %vm12803_vm13 }
 0xa9d   : > { %v8383_v17 = vmul.f32 %v8382_v36, %v10183_v0  ;;  %vm12808_vm10 = vmmov %vm12807_vm8 }
 0xa9f   : > { %8406 = vmatpush.msrb.mxu0 %v8383_v17  ;;  %v8377_v58 = vpop.permute.xlu0 %8376 }
 0xaa0   : > { %v8380_v22 = vsel %vm12794_vm6, %v8377_v58, %v8379_v56  ;;  %v8381_v28 = vsel %vm12795_vm15, %v8375_v31, %v8377_v58  ;;  %9764 = vmatmul.msk.f32.vlgmr.msrb.gmra.mxu0 %vm12796_vm3, %v9763_v43  ;;  %v9844_v45 = vpop.permute.xlu2 %9843  ;;  %vm12809_vm6 = vmmov %vm12802_vm0  ;;  %vm12810_vm15 = vcmp.lt.s32.totalorder %v10122_v33, 113 }
 0xaa1   : > { %v8384_v57 = vmul.f32 %v8381_v28, %v10178_v62  ;;  %v8385_v27 = vmul.f32 %v8380_v22, %v10181_v63  ;;  %v9846_v55 = vunpack.i.h.bf16 %v9844_v45  ;;  %vm12811_vm3 = vmmov %vm12802_vm0 }
 0xaa3   : > { %v8459_v32 = vpop.permute.xlu1 %8458  ;;  %8426 = vmatpush.msrb.mxu1 %v8384_v57  ;;  %8446 = vmatpush.msrb.mxu2 %v8385_v27 }
 0xaa4   : > { %v8462_v29 = vsel %vm12797_vm2, %v8459_v32, %v8455_v11  ;;  %9765 = vmatmul.msk.f32.vlgmr.msrb.gmra.mxu1 %vm12798_vm7, %v9763_v43  ;;  %9766 = vmatmul.msk.f32.vlgmr.msrb.gmra.mxu2 %vm12799_vm4, %v9763_v43  ;;  %vm12812_vm2 = vmmov %vm12802_vm0  ;;  %vm12813_vm7 = vcmp.lt.s32.totalorder %v10122_v33, 112 }
 0xaa5   : > { %v8463_v34 = vmul.f32 %v8462_v29, %v10149_v48  ;;  %8554 = vmatpush.msra.mxu2 %v12166_v44  ;;  %vm12814_vm4 = vmmov %vm12802_vm0 }
 0xaa7   : > { %8486 = vmatpush.msrb.mxu3 %v8463_v34  ;;  %v8457_v40 = vpop.permute.xlu0 %8456 }
 0xaa8   : > { %v8460_v39 = vsel %vm12800_vm5, %v8457_v40, %v8459_v32  ;;  %v8461_v54 = vsel %vm12801_vm14, %v8455_v11, %v8457_v40  ;;  %9768 = vmatmul.msk.f32.vlgmr.msrb.gmra.mxu3 %vm12802_vm0, %v9767_v9  ;;  %vm12815_vm5 = vmmov %vm12810_vm15 }
 0xaa9   : > { %v8464_v13 = vmul.f32 %v8461_v54, %v10126_v35  ;;  %v8465_v37 = vmul.f32 %v8460_v39, %v10151_v49  ;;  %8574 = vmatpush.msra.mxu3 %v12171_v25  ;;  %v9845_v25 = vunpack.i.l.bf16 %v9844_v45  ;;  %vm12816_vm14 = vmmov %vm12815_vm5 }
 0xaab   : > { %v8605_v15 = vpop.permute.xlu1 %8604  ;;  %8506 = vmatpush.msra.mxu0 %v8464_v13  ;;  %8526 = vmatpush.msra.mxu1 %v8465_v37  ;;  %v8769_v8 = vsel %vm12813_vm7, %v9845_v25, %v9846_v55 }
 0xaac   : > { %v8609_v44 = vsel %vm12803_vm13, %v8603_v52, %v8605_v15  ;;  %9769 = vmatmul.msk.f32.vlgmr.msra.gmra.mxu0 %vm12804_vm11, %v9767_v9  ;;  %9770 = vmatmul.msk.f32.vlgmr.msra.gmra.mxu1 %vm12805_vm12, %v9767_v9  ;;  %vm12817_vm13 = vmmov %vm12813_vm7 }
 0xaad   : > { %v8611_v21 = vmul.f32 %v8609_v44, %v10183_v0  ;;  %9772 = vmatmul.msk.f32.vlgmr.msra.gmra.mxu2 %vm12806_vm9, %v9771_v20  ;;  %8594 = vmatpush.msrb.mxu0 %v12174_v30  ;;  %v9775_v30 = vld [vmem:[%s12533_s18 + $0x28] sm:$0xff]  ;;  %vm12818_vm11 = vmmov %vm12813_vm7 }
 0xaae   : > { %vm12819_vm12 = vmmov %vm12802_vm0 }
 0xaaf   : > { %8634 = vmatpush.msrb.mxu1 %v8611_v21  ;;  %v8607_v6 = vpop.permute.xlu0 %8606  ;;  %vm12820_vm9 = vmmov %vm12802_vm0 }
 0xab0   : > { %v8608_v42 = vsel %vm12807_vm8, %v8605_v15, %v8607_v6  ;;  %v8610_v16 = vsel %vm12808_vm10, %v8607_v6, %v8603_v52  ;;  %9773 = vmatmul.msk.f32.vlgmr.msra.gmra.mxu3 %vm12809_vm6, %v9771_v20  ;;  %vm12821_vm8 = vmmov %vm12802_vm0  ;;  %vm12822_vm10 = vcmp.lt.s32.totalorder %v10122_v33, 111 }
 0xab1   : > { %v8612_v51 = vmul.f32 %v8608_v42, %v10178_v62  ;;  %v8613_v59 = vmul.f32 %v8610_v16, %v10181_v63  ;;  %vm12823_vm6 = vmmov %vm12802_vm0 }
 0xab2   : > { %vm12827_vm7 = vmmov %vm12802_vm0 }
 0xab3   : > { %v8685_v31 = vpop.permute.xlu1 %8684  ;;  %8654 = vmatpush.msrb.mxu2 %v8612_v51  ;;  %8674 = vmatpush.msrb.mxu3 %v8613_v59 }
 0xab4   : > { %v8689_v38 = vsel %vm12810_vm15, %v8683_v3, %v8685_v31  ;;  %9774 = vmatmul.msk.f32.vlgmr.msrb.gmra.mxu0 %vm12811_vm3, %v9771_v20  ;;  %9776 = vmatmul.msk.f32.vlgmr.msrb.gmra.mxu1 %vm12812_vm2, %v9775_v30  ;;  %vm12824_vm15 = vmmov %vm12822_vm10 }
 0xab5   : > { %v8691_v47 = vmul.f32 %v8689_v38, %v10149_v48  ;;  %9777 = vmatmul.msk.f32.vlgmr.msrb.gmra.mxu2 %vm12814_vm4, %v9775_v30  ;;  %8791 = vmatpush.msra.mxu3 %v8769_v8  ;;  %v9779_v48 = vld [vmem:[%s12533_s18 + $0x30] sm:$0xff]  ;;  %vm12825_vm3 = vmmov %vm12822_vm10 }
 0xab6   : > { %vm12826_vm2 = vmmov %vm12802_vm0 }
 0xab7   : > { %8714 = vmatpush.msra.mxu0 %v8691_v47  ;;  %v8687_v53 = vpop.permute.xlu0 %8686  ;;  %vm12828_vm4 = vmmov %vm12802_vm0 }
 0xab8   : > { %v8688_v11 = vsel %vm12815_vm5, %v8685_v31, %v8687_v53  ;;  %v8690_v23 = vsel %vm12816_vm14, %v8687_v53, %v8683_v3  ;;  %9778 = vmatmul.msk.f32.vlgmr.msrb.gmra.mxu3 %vm12802_vm0, %v9775_v30  ;;  %vm12829_vm5 = vmmov %vm12802_vm0 }
 0xab9   : > { %v8692_v2 = vmul.f32 %v8688_v11, %v10126_v35  ;;  %v8693_v19 = vmul.f32 %v8690_v23, %v10151_v49  ;;  %v9783_v35 = vld [vmem:[%s12533_s18 + $0x38] sm:$0xff]  ;;  %v8842_v49 = vpop.permute.xlu2 %8841  ;;  %vm12830_vm14 = vmmov %vm12802_vm0 }
 0xabb   : > { %v8767_v7 = vpop.permute.xlu1 %8766  ;;  %8734 = vmatpush.msra.mxu1 %v8692_v2  ;;  %8754 = vmatpush.msra.mxu2 %v8693_v19 }
 0xabc   : > { %v8768_v10 = vsel %vm12817_vm13, %v9846_v55, %v8767_v7  ;;  %v8770_v26 = vsel %vm12818_vm11, %v8767_v7, %v9845_v25  ;;  %9780 = vmatmul.msk.f32.vlgmr.msra.gmra.mxu0 %vm12819_vm12, %v9779_v48  ;;  %9781 = vmatmul.msk.f32.vlgmr.msra.gmra.mxu1 %vm12820_vm9, %v9779_v48 }
 0xabd   : > { %9782 = vmatmul.msk.f32.vlgmr.msra.gmra.mxu2 %vm12821_vm8, %v9779_v48  ;;  %8811 = vmatpush.msrb.mxu0 %v8768_v10 }
 0xabe   : > { %8831 = vmatpush.msrb.mxu1 %v8770_v26 }
 0xabf   : > { %v8840_v12 = vpop.permute.xlu0 %8839 }
 0xac0   : > { %v8846_v61 = vsel %vm12822_vm10, %v8840_v12, %v8842_v49  ;;  %9784 = vmatmul.msk.f32.vlgmr.msra.gmra.mxu3 %vm12823_vm6, %v9783_v35 }
 0xac1   : > { %v8848_v4 = vmul.f32 %v8846_v61, %v10183_v0 }
 0xac3   : > { %v8844_v46 = vpop.permute.xlu1 %8843  ;;  %8871 = vmatpush.msrb.mxu2 %v8848_v4 }
 0xac4   : > { %v8845_v41 = vsel %vm12824_vm15, %v8842_v49, %v8844_v46  ;;  %v8847_v50 = vsel %vm12825_vm3, %v8844_v46, %v8840_v12  ;;  %9785 = vmatmul.msk.f32.vlgmr.msrb.gmra.mxu0 %vm12826_vm2, %v9783_v35  ;;  %9786 = vmatmul.msk.f32.vlgmr.msrb.gmra.mxu1 %vm12827_vm7, %v9783_v35 }
 0xac5   : > { %v8849_v52 = vmul.f32 %v8845_v41, %v10178_v62  ;;  %v8850_v0 = vmul.f32 %v8847_v50, %v10181_v63  ;;  %9788 = vmatmul.msk.f32.vlgmr.msrb.gmra.mxu2 %vm12828_vm4, %v9787_v60 }
 0xac7   : > { %8891 = vmatpush.msrb.mxu3 %v8849_v52  ;;  %8911 = vmatpush.msra.mxu0 %v8850_v0  ;;  %v8215_v9 = vpop.permute.xlu0 %8214 }
 0xac8   : > { %9789 = vmatmul.msk.f32.vlgmr.msrb.gmra.mxu3 %vm12829_vm5, %v9787_v60 }
 0xacc   : > { %9790 = vmatmul.msk.f32.vlgmr.msra.gmra.mxu0 %vm12830_vm14, %v9787_v60 }
 0xb11   : > { %v8291_v36 = vpop.f32.mrf.mxu0 }
 0xb12   : > { %v8296_v40 = vadd.f32 %v8291_v36, %v8215_v9 }
 0xb13   : > { %v8251_v56 = vpop.f32.mrf.mxu2 }
 0xb14   : > { %v8294_v39 = vadd.f32 %v8251_v56, %v8215_v9 }
 0xb17   : > { %v8271_v33 = vpop.f32.mrf.mxu3  ;;  %v8328_v17 = vpop.f32.mrf.mxu1 }
 0xb18   : > { %v8371_v37 = vadd.f32 %v8328_v17, %v8294_v39  ;;  %v8295_v42 = vadd.f32 %v8271_v33, %v8215_v9 }
 0xb1b   : > { %v8348_v43 = vpop.f32.mrf.mxu2 }
 0xb1c   : > { %v8372_v30 = vadd.f32 %v8348_v43, %v8295_v42 }
 0xb1d   : > { %v8408_v58 = vpop.f32.mrf.mxu0 }
 0xb1e   : > { %v8451_v44 = vadd.f32 %v8408_v58, %v8371_v37 }
 0xb1f   : > { %v8368_v28 = vpop.f32.mrf.mxu3 }
 0xb20   : > { %v8373_v54 = vadd.f32 %v8368_v28, %v8296_v40 }
 0xb21   : > { %v8428_v22 = vpop.f32.mrf.mxu1 }
 0xb22   : > { %v8452_v8 = vadd.f32 %v8428_v22, %v8372_v30 }
 0xb27   : > { %v8448_v57 = vpop.f32.mrf.mxu2 }
 0xb28   : > { %v8453_v15 = vadd.f32 %v8448_v57, %v8373_v54 }
 0xb29   : > { %v8508_v62 = vpop.f32.mrf.mxu0  ;;  %v8528_v27 = vpop.f32.mrf.mxu1 }
 0xb2a   : > { %v8533_v55 = vadd.f32 %v8528_v27, %v8453_v15  ;;  %v8532_v2 = vadd.f32 %v8508_v62, %v8452_v8 }
 0xb2b   : > { %v8488_v63 = vpop.f32.mrf.mxu3 }
 0xb2c   : > { %v8531_v6 = vadd.f32 %v8488_v63, %v8451_v44 }
 0xb30   : > { %v8556_v3 = vpop.f32.mrf.mxu2 }
 0xb31   : > { %v8596_v32 = vpop.f32.mrf.mxu0  ;;  %v8636_v29 = vpop.f32.mrf.mxu1  ;;  %v8599_v25 = vadd.f32 %v8556_v3, %v8531_v6 }
 0xb32   : > { %v8601_v16 = vadd.f32 %v8596_v32, %v8533_v55 }
 0xb33   : > { %v8576_v34 = vpop.f32.mrf.mxu3  ;;  %v8679_v38 = vadd.f32 %v8636_v29, %v8599_v25 }
 0xb34   : > { %v8600_v48 = vadd.f32 %v8576_v34, %v8532_v2 }
 0xb38   : > { %v8656_v13 = vpop.f32.mrf.mxu2 }
 0xb39   : > { %v8716_v20 = vpop.f32.mrf.mxu0  ;;  %v8736_v45 = vpop.f32.mrf.mxu1  ;;  %v8680_v49 = vadd.f32 %v8656_v13, %v8600_v48 }
 0xb3a   : > { %v8759_v11 = vadd.f32 %v8716_v20, %v8679_v38 }
 0xb3b   : > { %v8676_v21 = vpop.f32.mrf.mxu3  ;;  %v8760_v46 = vadd.f32 %v8736_v45, %v8680_v49 }
 0xb3c   : > { %v8681_v31 = vadd.f32 %v8676_v21, %v8601_v16 }
 0xb40   : > { %v8756_v51 = vpop.f32.mrf.mxu2 }
 0xb41   : > { %v8813_v59 = vpop.f32.mrf.mxu0  ;;  %v8761_v47 = vadd.f32 %v8756_v51, %v8681_v31  ;;  %v8833_v23 = vpop.f32.mrf.mxu1 }
 0xb42   : > { %v8837_v50 = vadd.f32 %v8813_v59, %v8760_v46 }
 0xb43   : > { %v8793_v53 = vpop.f32.mrf.mxu3  ;;  %v8838_v7 = vadd.f32 %v8833_v23, %v8761_v47 }
 0xb44   : > { %v8836_v19 = vadd.f32 %v8793_v53, %v8759_v11 }
 0xb48   : > { %v8873_v10 = vpop.f32.mrf.mxu2 }
 0xb49   : > { %v12344_v26 = vadd.f32 %v8873_v10, %v8836_v19  ;;  %v8913_v35 = vpop.f32.mrf.mxu0 }
 0xb4a   : > { %v12346_v12 = vadd.f32 %v8913_v35, %v8838_v7 }
 0xb4b   : > { %v12349_v61 = vmul.f32 0.2, %v12344_v26  ;;  %v8893_v41 = vpop.f32.mrf.mxu3 }
 0xb4c   : > { %v12352_v4 = vmul.f32 0.2, %v12346_v12  ;;  %v12363_v36 = vadd.f32 %v8893_v41, %v8837_v50 }
 0xb4d   : > { %v12355_v60 = vand.u32 2147483647, %v12349_v61 }
 0xb4e   : > { %v12361_v56 = vand.u32 2147483647, %v12352_v4  ;;  %v12374_v58 = vmul.f32 0.2, %v12363_v36 }
 0xb4f   : > { %vm8943_vm0 = vcmp.gt.f32.partialorder %v12355_v60, 0.0  ;;  %v8997_v0 = vadd.f32 1.0, %v12355_v60  ;;  %vm8931_vm11 = vcmp.gt.f32.partialorder %v12355_v60, 2.4142137  ;;  %vm8934_vm12 = vcmp.gt.f32.partialorder %v12355_v60, 0.41421357 }
 0xb50   : > { %v8946_v52 = vsel %vm8943_vm0, %v12355_v60, 1.0  ;;  %vm8945_vm13 = vcmp.gt.f32.partialorder %v12361_v56, 0.0  ;;  %v12370_v17 = vadd.f32 1.0, %v12361_v56  ;;  %v9791_v3 = vadd.f32 -1.0, %v12355_v60  ;;  %vm12401_vm4 = vmxor %vm8931_vm11, %vm9917_vm1 }
 0xb51   : > { %9879 = vrcp.f32 %v8946_v52  ;;  %v12367_v33 = vsel %vm8945_vm13, %v12361_v56, 1.0  ;;  %v8958_v43 = vand.u32 2147483647, %v8946_v52  ;;  %v8960_v28 = vand.u32 2147483648, %v8946_v52 }
 0xb52   : > { %9881 = vrcp.f32 %v8997_v0  ;;  %v9009_v57 = vand.u32 2147483647, %v8997_v0  ;;  %v9011_v62 = vand.u32 2147483648, %v8997_v0  ;;  %vm8954_vm9 = vweird.f32 %v8946_v52 }
 0xb53   : > { %9883 = vrcp.f32 %v12367_v33  ;;  %vm12380_vm8 = vcmp.eq.f32.partialorder %v8958_v43, 8.507059e+37  ;;  %vm9005_vm10 = vweird.f32 %v8997_v0  ;;  %v12385_v9 = vand.u32 2147483647, %v12374_v58 }
 0xb54   : > { %9885 = vrcp.f32 %v12370_v17  ;;  %v8961_v40 = vor.u32 1.1754944e-38, %v8960_v28  ;;  %vm12387_vm6 = vcmp.eq.f32.partialorder %v9009_v57, 8.507059e+37  ;;  %v9012_v13 = vor.u32 1.1754944e-38, %v9011_v62 }
 0xb55   : > { %vm8933_vm15 = vcmp.gt.f32.partialorder %v12361_v56, 2.4142137  ;;  %v9793_v15 = vadd.f32 -1.0, %v12361_v56  ;;  %vm8944_vm2 = vcmp.gt.f32.partialorder %v12385_v9, 0.0  ;;  %vm8936_vm5 = vcmp.gt.f32.partialorder %v12361_v56, 0.41421357 }
 0xb56   : > { %v12396_v6 = vsel %vm8944_vm2, %v12385_v9, 1.0  ;;  %vm8984_vm14 = vweird.f32 %v12367_v33  ;;  %v8988_v59 = vand.u32 2147483647, %v12367_v33  ;;  %v8990_v30 = vand.u32 2147483648, %v12367_v33 }
 0xb57   : > { %v9880_v22 = vpop.eup %9879  ;;  %9887 = vrcp.f32 %v12396_v6  ;;  %v9039_v8 = vand.u32 2147483647, %v12370_v17  ;;  %v9041_v47 = vand.u32 2147483648, %v12370_v17  ;;  %v12430_v49 = vadd.f32 1.0, %v12385_v9 }
 0xb58   : > { %v9882_v27 = vpop.eup %9881  ;;  %v8950_v63 = vmul.f32 %v9880_v22, %v8946_v52  ;;  %vm8955_vm3 = vweird.f32 %v9880_v22  ;;  %vm8989_vm2 = vcmp.eq.f32.partialorder %v8988_v59, 8.507059e+37  ;;  %v8991_v41 = vor.u32 1.1754944e-38, %v8990_v30 }
 0xb59   : > { %v9001_v32 = vmul.f32 %v9882_v27, %v8997_v0  ;;  %v9884_v37 = vpop.eup %9883  ;;  %vm9006_vm7 = vweird.f32 %v9882_v27  ;;  %vm8956_vm0 = vmor %vm8954_vm9, %vm8955_vm3  ;;  %v9042_v43 = vor.u32 1.1754944e-38, %v9041_v47  ;;  %9889 = vrcp.f32 %v12430_v49 }
 0xb5a   : > { %v8951_v29 = vsub.f32 1.0, %v8950_v63  ;;  %v9886_v44 = vpop.eup %9885  ;;  %v8980_v21 = vmul.f32 %v9884_v37, %v12367_v33  ;;  %vm9007_vm13 = vmor %vm9005_vm10, %vm9006_vm7  ;;  %vm8985_vm9 = vweird.f32 %v9884_v37  ;;  %vm9040_vm7 = vcmp.eq.f32.partialorder %v9039_v8, 8.507059e+37 }
 0xb5b   : > { %v9002_v39 = vsub.f32 1.0, %v9001_v32  ;;  %v9031_v42 = vmul.f32 %v9886_v44, %v12370_v17  ;;  %vm9036_vm3 = vweird.f32 %v9886_v44  ;;  %vm12424_vm10 = vmand %vm8934_vm12, %vm12401_vm4  ;;  %v8973_v55 = vand.u32 2147483647, %v12396_v6 }
 0xb5c   : > { %v8952_v20 = vmul.f32 %v9880_v22, %v8951_v29  ;;  %v8981_v51 = vsub.f32 1.0, %v8980_v21  ;;  %vm8939_vm4 = vmxor %vm8933_vm15, %vm9917_vm1  ;;  %v9026_v30 = vand.u32 2147483648, %v12430_v49  ;;  %v9024_v8 = vand.u32 2147483647, %v12430_v49 }
 0xb5d   : > { %v9003_v45 = vmul.f32 %v9882_v27, %v9002_v39  ;;  %v9032_v38 = vsub.f32 1.0, %v9031_v42  ;;  %v9888_v46 = vpop.eup %9887 }
 0xb5e   : > { %v8953_v25 = vadd.f32 %v9880_v22, %v8952_v20  ;;  %v8982_v23 = vmul.f32 %v9884_v37, %v8981_v51 }
 0xb5f   : > { %v9004_v16 = vadd.f32 %v9882_v27, %v9003_v45  ;;  %v9033_v48 = vmul.f32 %v9886_v44, %v9032_v38 }
 0xb60   : > { %v8957_v31 = vsel %vm8956_vm0, %v9880_v22, %v8953_v25  ;;  %v8983_v35 = vadd.f32 %v9884_v37, %v8982_v23  ;;  %vm8970_vm0 = vweird.f32 %v9888_v46 }
 0xb61   : > { %v8962_v53 = vsel %vm12380_vm8, %v8961_v40, %v8957_v31  ;;  %v9008_v11 = vsel %vm9007_vm13, %v9882_v27, %v9004_v16  ;;  %vm9035_vm8 = vweird.f32 %v12370_v17  ;;  %v9034_v50 = vadd.f32 %v9886_v44, %v9033_v48 }
 0xb62   : > { %v8963_v2 = vmul.f32 -1.0, %v8962_v53  ;;  %v9013_v19 = vsel %vm12387_vm6, %v9012_v13, %v9008_v11  ;;  %vm8986_vm6 = vmor %vm8984_vm14, %vm8985_vm9  ;;  %v8965_v17 = vmul.f32 %v9888_v46, %v12396_v6  ;;  %v9890_v13 = vpop.eup %9889  ;;  %v9792_v48 = vadd.f32 -1.0, %v12385_v9 }
 0xb63   : > { %v9014_v10 = vmul.f32 %v9791_v3, %v9013_v19  ;;  %v8987_v0 = vsel %vm8986_vm6, %v9884_v37, %v8983_v35  ;;  %vm9037_vm12 = vmor %vm9035_vm8, %vm9036_vm3  ;;  %v9016_v45 = vmul.f32 %v9890_v13, %v12430_v49  ;;  %vm9021_vm9 = vweird.f32 %v9890_v13 }
 0xb64   : > { %v8992_v33 = vsel %vm8989_vm2, %v8991_v41, %v8987_v0  ;;  %v9038_v28 = vsel %vm9037_vm12, %v9886_v44, %v9034_v50  ;;  %v8966_v63 = vsub.f32 1.0, %v8965_v17  ;;  %vm12446_vm14 = vmand %vm8936_vm5, %vm8939_vm4  ;;  %vm8969_vm5 = vweird.f32 %v12396_v6 }
 0xb65   : > { %v9045_v52 = vsel %vm12424_vm10, %v9014_v10, %v12355_v60  ;;  %v8993_v62 = vmul.f32 -1.0, %v8992_v33  ;;  %v9043_v27 = vsel %vm9040_vm7, %v9042_v43, %v9038_v28  ;;  %vm8971_vm13 = vmor %vm8969_vm5, %vm8970_vm0  ;;  %v9017_v42 = vsub.f32 1.0, %v9016_v45 }
 0xb66   : > { %v9048_v22 = vsel %vm8931_vm11, %v8963_v2, %v9045_v52  ;;  %v9044_v3 = vmul.f32 %v9793_v15, %v9043_v27  ;;  %v8967_v34 = vmul.f32 %v9888_v46, %v8966_v63  ;;  %v8975_v15 = vand.u32 2147483648, %v12396_v6 }
 0xb67   : > { %v9057_v57 = vmul.f32 %v9048_v22, %v9048_v22  ;;  %v9018_v38 = vmul.f32 %v9890_v13, %v9017_v42  ;;  %vm8932_vm3 = vcmp.gt.f32.partialorder %v12385_v9, 2.4142137  ;;  %vm8974_vm8 = vcmp.eq.f32.partialorder %v8973_v55, 8.507059e+37  ;;  %v12843_v42 = vld [vmem:[#allocation4_spill] sm:$0xff] }
 0xb68   : > { %v9047_v40 = vsel %vm12446_vm14, %v9044_v3, %v12361_v56  ;;  %v8968_v20 = vadd.f32 %v9888_v46, %v8967_v34  ;;  %v8976_v59 = vor.u32 1.1754944e-38, %v8975_v15  ;;  %vm9020_vm6 = vweird.f32 %v12430_v49  ;;  %vm8938_vm12 = vmxor %vm8932_vm3, %vm9917_vm1 }
 0xb69   : > { %v9060_v32 = vmul.f32 0.080537446, %v9057_v57  ;;  %v9050_v54 = vsel %vm8933_vm15, %v8993_v62, %v9047_v40  ;;  %v9019_v6 = vadd.f32 %v9890_v13, %v9018_v38  ;;  %vm8935_vm2 = vcmp.gt.f32.partialorder %v12385_v9, 0.41421357  ;;  %vm9022_vm7 = vmor %vm9020_vm6, %vm9021_vm9 }
 0xb6a   : > { %v9059_v37 = vmul.f32 %v9050_v54, %v9050_v54  ;;  %v8972_v51 = vsel %vm8971_vm13, %v9888_v46, %v8968_v20  ;;  %v9027_v2 = vor.u32 1.1754944e-38, %v9026_v30  ;;  %vm9025_vm4 = vcmp.eq.f32.partialorder %v9024_v8, 8.507059e+37  ;;  %vm12473_vm0 = vmand %vm8935_vm2, %vm8938_vm12 }
 0xb6b   : > { %v9794_v39 = vadd.f32 -0.13877685, %v9060_v32  ;;  %v8977_v11 = vsel %vm8974_vm8, %v8976_v59, %v8972_v51  ;;  %v9023_v10 = vsel %vm9022_vm7, %v9890_v13, %v9019_v6  ;;  %v9051_v49 = vsel %vm12424_vm10, 0.7853982, %v9918_v24 }
 0xb6c   : > { %v9062_v21 = vmul.f32 0.080537446, %v9059_v37  ;;  %v8978_v46 = vmul.f32 -1.0, %v8977_v11  ;;  %v9028_v41 = vsel %vm9025_vm4, %v9027_v2, %v9023_v10  ;;  %vm8922_vm1 = vcmp.lt.f32.partialorder %v12349_v61, 0.0 }
 0xb6d   : > { %v9066_v44 = vmul.f32 %v9794_v39, %v9057_v57  ;;  %v9029_v52 = vmul.f32 %v9792_v48, %v9028_v41  ;;  %v9054_v7 = vsel %vm8931_vm11, 1.5707964, %v9051_v49  ;;  %v8925_v63 = vsel %vm8922_vm1, -1.0, %v9919_v14 }
 0xb6e   : > { %v9796_v16 = vadd.f32 -0.13877685, %v9062_v21  ;;  %v9053_v61 = vsel %vm12446_vm14, 0.7853982, %v9918_v24  ;;  %vm8924_vm10 = vcmp.lt.f32.partialorder %v12352_v4, 0.0  ;;  %v9108_v56 = vrot.slane %v12344_v26, 4 }
 0xb6f   : > { %v9069_v25 = vadd.f32 0.19977711, %v9066_v44  ;;  %v9046_v33 = vsel %vm12473_vm0, %v9029_v52, %v12385_v9  ;;  %v9056_v40 = vsel %vm8933_vm15, 1.5707964, %v9053_v61  ;;  %v8927_v20 = vsel %vm8924_vm10, -1.0, %v9919_v14 }
 0xb70   : > { %v9068_v47 = vmul.f32 %v9796_v16, %v9059_v37  ;;  %v9052_v51 = vsel %vm12473_vm0, 0.7853982, %v9918_v24  ;;  %vm8923_vm11 = vcmp.lt.f32.partialorder %v12374_v58, 0.0  ;;  %v9110_v26 = vrot.slane %v12346_v12, 4 }
 0xb71   : > { %v9072_v31 = vmul.f32 %v9069_v25, %v9057_v57  ;;  %v8926_v24 = vsel %vm8923_vm11, -1.0, %v9919_v14  ;;  %v9109_v12 = vrot.slane %v12363_v36, 4 }
 0xb72   : > { %v9071_v23 = vadd.f32 0.19977711, %v9068_v47  ;;  %v9055_v47 = vsel %vm8932_vm3, 1.5707964, %v9052_v51 }
 0xb73   : > { %v9797_v53 = vadd.f32 -0.3333295, %v9072_v31 }
 0xb74   : > { %v9074_v35 = vmul.f32 %v9071_v23, %v9059_v37 }
 0xb75   : > { %v9078_v19 = vmul.f32 %v9797_v53, %v9057_v57  ;;  %v9049_v57 = vsel %vm8932_vm3, %v8978_v46, %v9046_v33  ;;  %v12844_v53 = vld [vmem:[#allocation2_spill] sm:$0xff] }
 0xb76   : > { %v9799_v0 = vadd.f32 -0.3333295, %v9074_v35  ;;  %v9058_v27 = vmul.f32 %v9049_v57, %v9049_v57  ;;  %v12845_v35 = vld [vmem:[#allocation3_spill] sm:$0xff] }
 0xb77   : > { %v9081_v50 = vmul.f32 %v9078_v19, %v9048_v22 }
 0xb78   : > { %v9080_v28 = vmul.f32 %v9799_v0, %v9059_v37  ;;  %v9061_v32 = vmul.f32 0.080537446, %v9058_v27 }
 0xb79   : > { %v9084_v17 = vadd.f32 %v9081_v50, %v9048_v22 }
 0xb7a   : > { %v9083_v22 = vmul.f32 %v9080_v28, %v9050_v54  ;;  %v9795_v39 = vadd.f32 -0.13877685, %v9061_v32 }
 0xb7b   : > { %v9087_v62 = vadd.f32 %v9084_v17, %v9054_v7 }
 0xb7c   : > { %v9086_v34 = vadd.f32 %v9083_v22, %v9050_v54  ;;  %v9067_v15 = vmul.f32 %v9795_v39, %v9058_v27 }
 0xb7d   : > { %v9090_v3 = vmul.f32 %v9087_v62, %v8925_v63 }
 0xb7e   : > { %v9089_v13 = vadd.f32 %v9086_v34, %v9056_v40  ;;  %v9070_v29 = vadd.f32 0.19977711, %v9067_v15 }
 0xb7f   : > { %v9093_v60 = vmul.f32 3.18, %v9090_v3 }
 0xb80   : > { %v9092_v44 = vmul.f32 %v9089_v13, %v8927_v20  ;;  %v9073_v21 = vmul.f32 %v9070_v29, %v9058_v27 }
 0xb81   : > { %v9096_v37 = vmul.f32 1.442695, %v9093_v60 }
 0xb82   : > { %v9095_v45 = vmul.f32 3.18, %v9092_v44  ;;  %v9798_v25 = vadd.f32 -0.3333295, %v9073_v21 }
 0xb83   : > { %9891 = vpow2.f32 %v9096_v37 }
 0xb84   : > { %v9100_v55 = vmul.f32 1.442695, %v9095_v45  ;;  %v9079_v54 = vmul.f32 %v9798_v25, %v9058_v27 }
 0xb86   : > { %9893 = vpow2.f32 %v9100_v55  ;;  %v9082_v59 = vmul.f32 %v9079_v54, %v9049_v57 }
 0xb88   : > { %v9085_v31 = vadd.f32 %v9082_v59, %v9049_v57 }
 0xb89   : > { %v9892_v4 = vpop.eup %9891 }
 0xb8a   : > { %v9102_v16 = vmul.f32 %v9892_v4, %v12843_v42  ;;  %v9088_v6 = vadd.f32 %v9085_v31, %v9055_v47 }
 0xb8c   : > { %v9114_v30 = vadd.f32 %v9108_v56, %v9102_v16  ;;  %v9894_v38 = vpop.eup %9893  ;;  %v9091_v19 = vmul.f32 %v9088_v6, %v8926_v24 }
 0xb8d   : > { %v9104_v11 = vmul.f32 %v9894_v38, %v12844_v53 }
 0xb8e   : > { %v9117_v8 = vmul.f32 %v9114_v30, %v10310_v1  ;;  %v9094_v48 = vmul.f32 3.18, %v9091_v19 }
 0xb8f   : > { %v9116_v2 = vadd.f32 %v9110_v26, %v9104_v11 }
 0xb90   : > { %v9126_v23 = vrot.slane %v9117_v8, 4  ;;  %v9098_v1 = vmul.f32 1.442695, %v9094_v48 }
 0xb91   : > { %v9119_v58 = vmul.f32 %v9116_v2, %v10325_v18 }
 0xb92   : > { %9132 = vst [vmem:[%s11836_s11] sm:$0xf0] %v9126_v23  ;;  %9895 = vpow2.f32 %v9098_v1 }
 0xb93   : > { %v9128_v10 = vrot.slane %v9119_v58, 4 }
 0xb95   : > { %9134 = vst [vmem:[%s11836_s11 + $0x10] sm:$0xf0] %v9128_v10 }
 0xb98   : > { %v9896_v9 = vpop.eup %9895 }
 0xb99   : > { %v9103_v46 = vmul.f32 %v9896_v9, %v12845_v35 }
 0xb9b   : > { %v9115_v41 = vadd.f32 %v9109_v12, %v9103_v46 }
 0xb9d   : > { %v9118_v49 = vmul.f32 %v9115_v41, %v10312_v5 }
 0xb9f   : > { %v9127_v14 = vrot.slane %v9118_v49, 4 }
 0xba1   : > { %9133 = vst [vmem:[%s11836_s11 + $0x8] sm:$0xf0] %v9127_v14 }
 0xba2 PF: > { %s35_s29 = sadd.s32 1, %s9906_s29  }
 0xba3   : > { %p32_p4 = scmp.ge.s32.totalorder %s35_s29, 4  }
 0xba5   :  { %34 = sbr.rel (!%p32_p4) target bundleno = 15 (0xf), region = 242 }

</bundles_post_ra>
